<compile_context>
chip_gen: v7x
topology: tpu7x:2x2x1
jax: 0.10.0
libtpu: 0.0.40
codegen_flags: <defaults>
</compile_context>

<pallas_src>
import math
import jax
import jax.numpy as jnp
from jax.experimental import pallas as pl
from jax.experimental.pallas import tpu as pltpu


SKEL_NHEAD = 4
IMU_NHEAD = 4
SKEL_LAYERS = 2
IMU_LAYERS = 3


# ---------------------------------------------------------------------------
# In-kernel building blocks (traced inside the single fused kernel)
# ---------------------------------------------------------------------------

def _layer_norm(x, g, b):
    """LayerNorm over the last dim, eps=1e-5 (matches torch)."""
    mean = jnp.mean(x, axis=-1, keepdims=True)
    cen = x - mean
    var = jnp.mean(cen * cen, axis=-1, keepdims=True)
    return cen * jax.lax.rsqrt(var + 1e-5) * g + b


def _encoder_layer(x, lrefs, nhead, B, S, D):
    """Pre-LN transformer encoder layer on a (B*S, D) f32 activation VALUE.

    Matmul inputs are bf16 (MXU native); accumulation, LayerNorm, softmax and residual
    adds are f32.  Returns the new (B*S, D) activation and the list of per-head attention
    probabilities, each of shape (B, S, S) (f32, exact softmax).
    """
    (wqkv, bqkv, wo, bo, w1, b1, w2, b2, ln1g, ln1b, ln2g, ln2b) = lrefs
    hd = D // nhead

    # ---- self-attention block (1/sqrt(hd) scale is pre-folded into the Q weights) ----
    h = _layer_norm(x, ln1g[...], ln1b[...])
    qkv = jnp.dot(h.astype(jnp.bfloat16), wqkv[...],
                  preferred_element_type=jnp.float32) + bqkv[...]          # (B*S, 3D) f32

    head_outs = []
    head_attns = []
    for hh in range(nhead):
        q = qkv[:, hh * hd:(hh + 1) * hd].reshape(B, S, hd)
        k = qkv[:, D + hh * hd:D + (hh + 1) * hd].reshape(B, S, hd)
        v = qkv[:, 2 * D + hh * hd:2 * D + (hh + 1) * hd].reshape(B, S, hd)

        s = jnp.einsum("bqd,bkd->bqk", q.astype(jnp.bfloat16), k.astype(jnp.bfloat16),
                       preferred_element_type=jnp.float32)
        s = s - jnp.max(s, axis=-1, keepdims=True)
        e = jnp.exp(s)
        a = e / jnp.sum(e, axis=-1, keepdims=True)     # exact softmax (maps are outputs)
        o = jnp.einsum("bqk,bkd->bqd", a.astype(jnp.bfloat16), v.astype(jnp.bfloat16),
                       preferred_element_type=jnp.float32)

        head_outs.append(o.reshape(B * S, hd))
        head_attns.append(a)

    attn_cat = jnp.concatenate(head_outs, axis=-1)                         # (B*S, D)
    attn_out = jnp.dot(attn_cat.astype(jnp.bfloat16), wo[...],
                       preferred_element_type=jnp.float32) + bo[...]
    x = x + attn_out                                                       # dropout1 identity

    # ---- feed-forward block (relu) ----
    h2 = _layer_norm(x, ln2g[...], ln2b[...])
    ff = jnp.maximum(jnp.dot(h2.astype(jnp.bfloat16), w1[...],
                             preferred_element_type=jnp.float32) + b1[...], 0.0)
    ff = jnp.dot(ff.astype(jnp.bfloat16), w2[...],
                 preferred_element_type=jnp.float32) + b2[...]
    x = x + ff                                                             # dropout2 identity
    return x, head_attns


def _make_model_kernel(B, S, D):
    """Build the single fused forward kernel."""

    def kernel(
        # ---- inputs ----
        skel_ref, imu_ref, pe_ref,
        skel_in_w, skel_in_b, imu_in_w, imu_in_b,
        s_wqkv, s_bqkv, s_wo, s_bo, s_w1, s_b1, s_w2, s_b2,
        s_ln1g, s_ln1b, s_ln2g, s_ln2b,
        i_wqkv, i_bqkv, i_wo, i_bo, i_w1, i_b1, i_w2, i_b2,
        i_ln1g, i_ln1b, i_ln2g, i_ln2b,
        fuse_w_s, fuse_w_i, fuse_b, out_w, out_b,
        # ---- outputs ----
        slab_ref, skel_inter_ref, imu_inter_ref, skel_attn_ref, imu_attn_ref,
    ):
        pe = pe_ref[...]                                  # (B*S, D), pre-tiled in wrapper

        # ---------------- skeleton branch (standard MHA, head-averaged maps) ----------------
        x = jnp.dot(skel_ref[...], skel_in_w[...],
                    preferred_element_type=jnp.float32) + skel_in_b[...]
        x = x + pe                                         # (B*S, D) f32

        s_lrefs = (s_wqkv, s_bqkv, s_wo, s_bo, s_w1, s_b1, s_w2, s_b2,
                   s_ln1g, s_ln1b, s_ln2g, s_ln2b)
        s_inters = []
        for layer in range(SKEL_LAYERS):
            x, attns = _encoder_layer(x, s_lrefs, SKEL_NHEAD, B, S, D)
            s_inters.append(x)
            a_sum = attns[0]
            for a in attns[1:]:
                a_sum = a_sum + a
            skel_attn_ref[layer] = a_sum * (1.0 / SKEL_NHEAD)
        skel_inter_ref[...] = jnp.concatenate(s_inters, axis=-1)   # (B*S, 2D) lane-dense
        s_feat = jnp.mean(x.reshape(B, S, D), axis=1)              # (B, D)

        # ---------------- IMU branch (quaternion attention == SDP attention, per-head maps) --
        x = jnp.dot(imu_ref[...], imu_in_w[...],
                    preferred_element_type=jnp.float32) + imu_in_b[...]
        x = x + pe

        i_lrefs = (i_wqkv, i_bqkv, i_wo, i_bo, i_w1, i_b1, i_w2, i_b2,
                   i_ln1g, i_ln1b, i_ln2g, i_ln2b)
        i_inters = []
        for layer in range(IMU_LAYERS):
            x, attns = _encoder_layer(x, i_lrefs, IMU_NHEAD, B, S, D)
            i_inters.append(x)
            for hh in range(IMU_NHEAD):
                imu_attn_ref[layer * IMU_NHEAD + hh] = attns[hh]
        imu_inter_ref[...] = jnp.concatenate(i_inters, axis=-1)    # (B*S, 3D)
        i_feat = jnp.mean(x.reshape(B, S, D), axis=1)              # (B, D)

        # ---------------- fusion head (concat folded into two matmuls; packed output) --------
        fused = (
            jnp.dot(s_feat.astype(jnp.bfloat16), fuse_w_s[...],
                    preferred_element_type=jnp.float32)
            + jnp.dot(i_feat.astype(jnp.bfloat16), fuse_w_i[...],
                      preferred_element_type=jnp.float32)
            + fuse_b[...]
        )
        fused = jnp.maximum(fused, 0.0)                   # relu; drop identity in eval
        logits_pad = jnp.dot(fused.astype(jnp.bfloat16), out_w[...],
                             preferred_element_type=jnp.float32) + out_b[...]   # (B, D), zero-padded cols
        # single lane-dense (B, 4D) store: [skel_feat | imu_feat | fused_feat | logits(pad)]
        slab_ref[...] = jnp.concatenate([s_feat, i_feat, fused, logits_pad], axis=-1)

    return kernel


# ---------------------------------------------------------------------------
# Wrapper (single pallas_call, jitted)
# ---------------------------------------------------------------------------

def _full_spec(shape):
    nd = len(shape)
    return pl.BlockSpec(tuple(shape), lambda i, _nd=nd: (0,) * _nd)


@jax.jit
def quat_teacher_forward(params, skel_seq, imu_seq):
    """Forward pass of QuatTeacherEnhanced (skel_mask=None, imu_mask=None, eval mode)."""
    B, S, _ = skel_seq.shape
    D = params["skel_in_w"].shape[1]
    n_classes = params["out_w"].shape[1]
    assert n_classes <= D

    bf16 = jnp.bfloat16
    f32 = jnp.float32

    def r2(v):
        return v.astype(f32).reshape(1, -1)

    def prep_layer(p, nhead):
        hd = D // nhead
        scale = 1.0 / math.sqrt(hd)
        # fold the attention scale into the Q projection (weights + bias)
        wqkv = jnp.concatenate([p["wqkv"][:, :D] * scale, p["wqkv"][:, D:]], axis=1)
        bqkv = jnp.concatenate([p["bqkv"][:D] * scale, p["bqkv"][D:]], axis=0)
        return [
            wqkv.astype(bf16), r2(bqkv),
            p["wo"].astype(bf16), r2(p["bo"]),
            p["w1"].astype(bf16), r2(p["b1"]),
            p["w2"].astype(bf16), r2(p["b2"]),
            r2(p["ln1_g"]), r2(p["ln1_b"]), r2(p["ln2_g"]), r2(p["ln2_b"]),
        ]

    pe_tiled = jnp.tile(params["pe"][:S], (B, 1)).astype(f32)          # (B*S, D)
    skel_flat = skel_seq.reshape(B * S, -1).astype(bf16)
    imu_flat = imu_seq.reshape(B * S, -1).astype(bf16)

    # pad the tiny classifier to a lane-dense (D, D) matmul (extra columns are zeros)
    out_w_pad = jnp.zeros((D, D), f32).at[:, :n_classes].set(params["out_w"]).astype(bf16)
    out_b_pad = jnp.zeros((D,), f32).at[:n_classes].set(params["out_b"]).reshape(1, -1)

    inputs = [
        skel_flat, imu_flat, pe_tiled,
        params["skel_in_w"].astype(bf16), r2(params["skel_in_b"]),
        params["imu_in_w"].astype(bf16), r2(params["imu_in_b"]),
    ]
    inputs += prep_layer(params["skel_layer"], SKEL_NHEAD)
    inputs += prep_layer(params["imu_layer"], IMU_NHEAD)
    inputs += [
        params["fuse_w"][:D].astype(bf16), params["fuse_w"][D:].astype(bf16),
        r2(params["fuse_b"]),
        out_w_pad, out_b_pad,
    ]

    out_shapes = (
        jax.ShapeDtypeStruct((B, 4 * D), f32),                          # feat/logits slab
        jax.ShapeDtypeStruct((B * S, SKEL_LAYERS * D), f32),            # skel intermediates
        jax.ShapeDtypeStruct((B * S, IMU_LAYERS * D), f32),             # imu intermediates
        jax.ShapeDtypeStruct((SKEL_LAYERS, B, S, S), f32),              # skel attn (head-avg)
        jax.ShapeDtypeStruct((IMU_LAYERS * IMU_NHEAD, B, S, S), f32),   # imu attn (per-head)
    )

    outs = pl.pallas_call(
        _make_model_kernel(B, S, D),
        out_shape=out_shapes,
        grid=(1,),
        in_specs=[_full_spec(x.shape) for x in inputs],
        out_specs=tuple(_full_spec(s.shape) for s in out_shapes),
        compiler_params=pltpu.CompilerParams(dimension_semantics=("arbitrary",)),
    )(*inputs)

    slab, s_inter, i_inter, s_attn, i_attn = outs

    s_feat = slab[:, :D]
    i_feat = slab[:, D:2 * D]
    fused = slab[:, 2 * D:3 * D]
    logits = slab[:, 3 * D:3 * D + n_classes]

    s_inter = s_inter.reshape(B, S, SKEL_LAYERS * D)
    i_inter = i_inter.reshape(B, S, IMU_LAYERS * D)
    i_attn = i_attn.reshape(IMU_LAYERS, IMU_NHEAD, B, S, S)

    return {
        "logits": logits,
        "skel_feat": s_feat,
        "imu_feat": i_feat,
        "fused_feat": fused,
        "skel_intermediates": [s_inter[:, :, l * D:(l + 1) * D] for l in range(SKEL_LAYERS)],
        "imu_intermediates": [i_inter[:, :, l * D:(l + 1) * D] for l in range(IMU_LAYERS)],
        "skel_attentions": [s_attn[l] for l in range(SKEL_LAYERS)],
        "imu_attentions": [jnp.transpose(i_attn[l], (1, 0, 2, 3)) for l in range(IMU_LAYERS)],
    }


# ---------------------------------------------------------------------------
# Deterministic parameter initialization (nn.Linear-like shapes; weights stored
# as (in, out) so y = x @ W + b; QKV is stored pre-fused as (D, 3D))
# ---------------------------------------------------------------------------

def positional_encoding(max_len, d_model):
    position = jnp.arange(max_len, dtype=jnp.float32)[:, None]
    div_term = jnp.exp(
        jnp.arange(0, d_model, 2, dtype=jnp.float32) * (-math.log(10000.0) / d_model)
    )
    pe = jnp.zeros((max_len, d_model), dtype=jnp.float32)
    pe = pe.at[:, 0::2].set(jnp.sin(position * div_term))
    pe = pe.at[:, 1::2].set(jnp.cos(position * div_term))
    return pe


def _init_linear(key, fan_in, fan_out):
    kw, kb = jax.random.split(key)
    bound = 1.0 / math.sqrt(fan_in)
    w = jax.random.uniform(kw, (fan_in, fan_out), jnp.float32, -bound, bound)
    b = jax.random.uniform(kb, (fan_out,), jnp.float32, -bound, bound)
    return w, b


def _init_encoder_layer(key, d_model, dim_ff):
    keys = jax.random.split(key, 6)
    p = {}
    wq, bq = _init_linear(keys[0], d_model, d_model)
    wk, bk = _init_linear(keys[1], d_model, d_model)
    wv, bv = _init_linear(keys[2], d_model, d_model)
    p["wqkv"] = jnp.concatenate([wq, wk, wv], axis=1)   # (D, 3D)
    p["bqkv"] = jnp.concatenate([bq, bk, bv], axis=0)   # (3D,)
    p["wo"], p["bo"] = _init_linear(keys[3], d_model, d_model)
    p["w1"], p["b1"] = _init_linear(keys[4], d_model, dim_ff)
    p["w2"], p["b2"] = _init_linear(keys[5], dim_ff, d_model)
    p["ln1_g"] = jnp.ones((d_model,), jnp.float32)
    p["ln1_b"] = jnp.zeros((d_model,), jnp.float32)
    p["ln2_g"] = jnp.ones((d_model,), jnp.float32)
    p["ln2_b"] = jnp.zeros((d_model,), jnp.float32)
    return p


def init_params(key, feat_dim=16, d_model=64, dim_ff=128, num_classes=2, max_len=64):
    keys = jax.random.split(key, 6)
    params = {}
    params["skel_in_w"], params["skel_in_b"] = _init_linear(keys[0], 96, d_model)
    params["imu_in_w"], params["imu_in_b"] = _init_linear(keys[1], feat_dim, d_model)
    params["skel_layer"] = _init_encoder_layer(keys[2], d_model, dim_ff)
    params["imu_layer"] = _init_encoder_layer(keys[3], d_model, dim_ff)
    params["fuse_w"], params["fuse_b"] = _init_linear(keys[4], 2 * d_model, d_model)
    params["out_w"], params["out_b"] = _init_linear(keys[5], d_model, num_classes)
    params["pe"] = positional_encoding(max_len, d_model)
    return params


# ---------------------------------------------------------------------------
# Main
# ---------------------------------------------------------------------------

if __name__ == "__main__":
    B, S = 2, 8
    feat_dim, d_model, num_classes = 16, 64, 2

    root = jax.random.PRNGKey(0)
    k_params, k_skel, k_imu = jax.random.split(root, 3)

    params = init_params(k_params, feat_dim=feat_dim, d_model=d_model,
                         dim_ff=128, num_classes=num_classes, max_len=64)

    skel_seq = jax.random.normal(k_skel, (B, S, 96), dtype=jnp.float32)
    imu_seq = jax.random.normal(k_imu, (B, S, feat_dim), dtype=jnp.float32)

    out = quat_teacher_forward(params, skel_seq, imu_seq)

    jax.block_until_ready(out["logits"])
    jax.block_until_ready(out["fused_feat"])

    # basic shape sanity checks
    assert out["logits"].shape == (B, num_classes)
    assert out["skel_feat"].shape == (B, d_model)
    assert out["imu_feat"].shape == (B, d_model)
    assert out["fused_feat"].shape == (B, d_model)
    assert len(out["skel_intermediates"]) == 2 and len(out["imu_intermediates"]) == 3
    assert out["skel_intermediates"][0].shape == (B, S, d_model)
    assert out["imu_intermediates"][0].shape == (B, S, d_model)
    assert out["skel_attentions"][0].shape == (B, S, S)       # head-averaged (nn.MHA)
    assert out["imu_attentions"][0].shape == (B, 4, S, S)     # per-head (QuaternionAttention)
    assert all(bool(jnp.isfinite(v).all()) for v in
               (out["logits"], out["fused_feat"], out["skel_feat"], out["imu_feat"]))
    # attention rows sum to 1 (exact softmax, distillation targets)
    assert bool(jnp.allclose(jnp.sum(out["imu_attentions"][0], axis=-1), 1.0, atol=1e-5))

    print("KERNEL_OK")
</pallas_src>

<mosaic_0001>
module attributes {stable_mosaic.version = 11 : i64} {
  func.func @kernel(%arg0: i32, %arg1: memref<16x96xbf16, #tpu.memory_space<vmem>>, %arg2: memref<16x16xbf16, #tpu.memory_space<vmem>>, %arg3: memref<16x64xf32, #tpu.memory_space<vmem>>, %arg4: memref<96x64xbf16, #tpu.memory_space<vmem>>, %arg5: memref<1x64xf32, #tpu.memory_space<vmem>>, %arg6: memref<16x64xbf16, #tpu.memory_space<vmem>>, %arg7: memref<1x64xf32, #tpu.memory_space<vmem>>, %arg8: memref<64x192xbf16, #tpu.memory_space<vmem>>, %arg9: memref<1x192xf32, #tpu.memory_space<vmem>>, %arg10: memref<64x64xbf16, #tpu.memory_space<vmem>>, %arg11: memref<1x64xf32, #tpu.memory_space<vmem>>, %arg12: memref<64x128xbf16, #tpu.memory_space<vmem>>, %arg13: memref<1x128xf32, #tpu.memory_space<vmem>>, %arg14: memref<128x64xbf16, #tpu.memory_space<vmem>>, %arg15: memref<1x64xf32, #tpu.memory_space<vmem>>, %arg16: memref<1x64xf32, #tpu.memory_space<vmem>>, %arg17: memref<1x64xf32, #tpu.memory_space<vmem>>, %arg18: memref<1x64xf32, #tpu.memory_space<vmem>>, %arg19: memref<1x64xf32, #tpu.memory_space<vmem>>, %arg20: memref<64x192xbf16, #tpu.memory_space<vmem>>, %arg21: memref<1x192xf32, #tpu.memory_space<vmem>>, %arg22: memref<64x64xbf16, #tpu.memory_space<vmem>>, %arg23: memref<1x64xf32, #tpu.memory_space<vmem>>, %arg24: memref<64x128xbf16, #tpu.memory_space<vmem>>, %arg25: memref<1x128xf32, #tpu.memory_space<vmem>>, %arg26: memref<128x64xbf16, #tpu.memory_space<vmem>>, %arg27: memref<1x64xf32, #tpu.memory_space<vmem>>, %arg28: memref<1x64xf32, #tpu.memory_space<vmem>>, %arg29: memref<1x64xf32, #tpu.memory_space<vmem>>, %arg30: memref<1x64xf32, #tpu.memory_space<vmem>>, %arg31: memref<1x64xf32, #tpu.memory_space<vmem>>, %arg32: memref<64x64xbf16, #tpu.memory_space<vmem>>, %arg33: memref<64x64xbf16, #tpu.memory_space<vmem>>, %arg34: memref<1x64xf32, #tpu.memory_space<vmem>>, %arg35: memref<64x64xbf16, #tpu.memory_space<vmem>>, %arg36: memref<1x64xf32, #tpu.memory_space<vmem>>, %arg37: memref<2x256xf32, #tpu.memory_space<vmem>>, %arg38: memref<16x128xf32, #tpu.memory_space<vmem>>, %arg39: memref<16x192xf32, #tpu.memory_space<vmem>>, %arg40: memref<2x2x8x8xf32, #tpu.memory_space<vmem>>, %arg41: memref<12x2x8x8xf32, #tpu.memory_space<vmem>>) attributes {dimension_semantics = [#tpu.dimension_semantics<arbitrary>], iteration_bounds = array<i64: 1>, scalar_prefetch = 0 : i64, scratch_operands = 0 : i64, tpu.core_type = #tpu.core_type<tc>, window_params = [{pipeline_mode = #tpu.pipeline_mode<synchronous>, transform_indices = @transform_0, window_bounds = array<i64: 16, 96>}, {pipeline_mode = #tpu.pipeline_mode<synchronous>, transform_indices = @transform_1, window_bounds = array<i64: 16, 16>}, {pipeline_mode = #tpu.pipeline_mode<synchronous>, transform_indices = @transform_2, window_bounds = array<i64: 16, 64>}, {pipeline_mode = #tpu.pipeline_mode<synchronous>, transform_indices = @transform_3, window_bounds = array<i64: 96, 64>}, {pipeline_mode = #tpu.pipeline_mode<synchronous>, transform_indices = @transform_4, window_bounds = array<i64: 1, 64>}, {pipeline_mode = #tpu.pipeline_mode<synchronous>, transform_indices = @transform_5, window_bounds = array<i64: 16, 64>}, {pipeline_mode = #tpu.pipeline_mode<synchronous>, transform_indices = @transform_6, window_bounds = array<i64: 1, 64>}, {pipeline_mode = #tpu.pipeline_mode<synchronous>, transform_indices = @transform_7, window_bounds = array<i64: 64, 192>}, {pipeline_mode = #tpu.pipeline_mode<synchronous>, transform_indices = @transform_8, window_bounds = array<i64: 1, 192>}, {pipeline_mode = #tpu.pipeline_mode<synchronous>, transform_indices = @transform_9, window_bounds = array<i64: 64, 64>}, {pipeline_mode = #tpu.pipeline_mode<synchronous>, transform_indices = @transform_10, window_bounds = array<i64: 1, 64>}, {pipeline_mode = #tpu.pipeline_mode<synchronous>, transform_indices = @transform_11, window_bounds = array<i64: 64, 128>}, {pipeline_mode = #tpu.pipeline_mode<synchronous>, transform_indices = @transform_12, window_bounds = array<i64: 1, 128>}, {pipeline_mode = #tpu.pipeline_mode<synchronous>, transform_indices = @transform_13, window_bounds = array<i64: 128, 64>}, {pipeline_mode = #tpu.pipeline_mode<synchronous>, transform_indices = @transform_14, window_bounds = array<i64: 1, 64>}, {pipeline_mode = #tpu.pipeline_mode<synchronous>, transform_indices = @transform_15, window_bounds = array<i64: 1, 64>}, {pipeline_mode = #tpu.pipeline_mode<synchronous>, transform_indices = @transform_16, window_bounds = array<i64: 1, 64>}, {pipeline_mode = #tpu.pipeline_mode<synchronous>, transform_indices = @transform_17, window_bounds = array<i64: 1, 64>}, {pipeline_mode = #tpu.pipeline_mode<synchronous>, transform_indices = @transform_18, window_bounds = array<i64: 1, 64>}, {pipeline_mode = #tpu.pipeline_mode<synchronous>, transform_indices = @transform_19, window_bounds = array<i64: 64, 192>}, {pipeline_mode = #tpu.pipeline_mode<synchronous>, transform_indices = @transform_20, window_bounds = array<i64: 1, 192>}, {pipeline_mode = #tpu.pipeline_mode<synchronous>, transform_indices = @transform_21, window_bounds = array<i64: 64, 64>}, {pipeline_mode = #tpu.pipeline_mode<synchronous>, transform_indices = @transform_22, window_bounds = array<i64: 1, 64>}, {pipeline_mode = #tpu.pipeline_mode<synchronous>, transform_indices = @transform_23, window_bounds = array<i64: 64, 128>}, {pipeline_mode = #tpu.pipeline_mode<synchronous>, transform_indices = @transform_24, window_bounds = array<i64: 1, 128>}, {pipeline_mode = #tpu.pipeline_mode<synchronous>, transform_indices = @transform_25, window_bounds = array<i64: 128, 64>}, {pipeline_mode = #tpu.pipeline_mode<synchronous>, transform_indices = @transform_26, window_bounds = array<i64: 1, 64>}, {pipeline_mode = #tpu.pipeline_mode<synchronous>, transform_indices = @transform_27, window_bounds = array<i64: 1, 64>}, {pipeline_mode = #tpu.pipeline_mode<synchronous>, transform_indices = @transform_28, window_bounds = array<i64: 1, 64>}, {pipeline_mode = #tpu.pipeline_mode<synchronous>, transform_indices = @transform_29, window_bounds = array<i64: 1, 64>}, {pipeline_mode = #tpu.pipeline_mode<synchronous>, transform_indices = @transform_30, window_bounds = array<i64: 1, 64>}, {pipeline_mode = #tpu.pipeline_mode<synchronous>, transform_indices = @transform_31, window_bounds = array<i64: 64, 64>}, {pipeline_mode = #tpu.pipeline_mode<synchronous>, transform_indices = @transform_32, window_bounds = array<i64: 64, 64>}, {pipeline_mode = #tpu.pipeline_mode<synchronous>, transform_indices = @transform_33, window_bounds = array<i64: 1, 64>}, {pipeline_mode = #tpu.pipeline_mode<synchronous>, transform_indices = @transform_34, window_bounds = array<i64: 64, 64>}, {pipeline_mode = #tpu.pipeline_mode<synchronous>, transform_indices = @transform_35, window_bounds = array<i64: 1, 64>}, {pipeline_mode = #tpu.pipeline_mode<synchronous>, transform_indices = @transform_36, window_bounds = array<i64: 2, 256>}, {pipeline_mode = #tpu.pipeline_mode<synchronous>, transform_indices = @transform_37, window_bounds = array<i64: 16, 128>}, {pipeline_mode = #tpu.pipeline_mode<synchronous>, transform_indices = @transform_38, window_bounds = array<i64: 16, 192>}, {pipeline_mode = #tpu.pipeline_mode<synchronous>, transform_indices = @transform_39, window_bounds = array<i64: 2, 2, 8, 8>}, {pipeline_mode = #tpu.pipeline_mode<synchronous>, transform_indices = @transform_40, window_bounds = array<i64: 12, 2, 8, 8>}]} {
    %c0 = arith.constant 0 : index
    %c0_0 = arith.constant 0 : index
    %0 = vector.load %arg3[%c0, %c0_0] : memref<16x64xf32, #tpu.memory_space<vmem>>, vector<16x64xf32>
    %c0_1 = arith.constant 0 : index
    %c0_2 = arith.constant 0 : index
    %1 = vector.load %arg1[%c0_1, %c0_2] : memref<16x96xbf16, #tpu.memory_space<vmem>>, vector<16x96xbf16>
    %c0_3 = arith.constant 0 : index
    %c0_4 = arith.constant 0 : index
    %2 = vector.load %arg4[%c0_3, %c0_4] : memref<96x64xbf16, #tpu.memory_space<vmem>>, vector<96x64xbf16>
    %cst = arith.constant dense<0.000000e+00> : vector<16x64xf32>
    %3 = tpu.matmul %1, %2, %cst {dimension_numbers = #tpu.dot_dimension_numbers<[1], [0], [0], [1], [0, 0, 1, 1], [], []>} : vector<16x96xbf16>, vector<96x64xbf16>, vector<16x64xf32> -> vector<16x64xf32>
    %c0_5 = arith.constant 0 : index
    %c0_6 = arith.constant 0 : index
    %4 = vector.load %arg5[%c0_5, %c0_6] : memref<1x64xf32, #tpu.memory_space<vmem>>, vector<1x64xf32>
    %5 = vector.broadcast %4 : vector<1x64xf32> to vector<16x64xf32>
    %6 = arith.addf %3, %5 : vector<16x64xf32>
    %7 = arith.addf %6, %0 : vector<16x64xf32>
    %c0_7 = arith.constant 0 : index
    %c0_8 = arith.constant 0 : index
    %8 = vector.load %arg16[%c0_7, %c0_8] : memref<1x64xf32, #tpu.memory_space<vmem>>, vector<1x64xf32>
    %c0_9 = arith.constant 0 : index
    %c0_10 = arith.constant 0 : index
    %9 = vector.load %arg17[%c0_9, %c0_10] : memref<1x64xf32, #tpu.memory_space<vmem>>, vector<1x64xf32>
    %cst_11 = arith.constant dense<0.000000e+00> : vector<16xf32>
    %10 = vector.multi_reduction <add>, %7, %cst_11 [1] : vector<16x64xf32> to vector<16xf32>
    %11 = vector.shape_cast %10 : vector<16xf32> to vector<16x1xf32>
    %cst_12 = arith.constant 6.400000e+01 : f32
    %12 = vector.broadcast %cst_12 : f32 to vector<16x1xf32>
    %13 = arith.divf %11, %12 : vector<16x1xf32>
    %14 = vector.broadcast %13 : vector<16x1xf32> to vector<16x64xf32>
    %15 = arith.subf %7, %14 : vector<16x64xf32>
    %16 = arith.mulf %15, %15 : vector<16x64xf32>
    %cst_13 = arith.constant dense<0.000000e+00> : vector<16xf32>
    %17 = vector.multi_reduction <add>, %16, %cst_13 [1] : vector<16x64xf32> to vector<16xf32>
    %18 = vector.shape_cast %17 : vector<16xf32> to vector<16x1xf32>
    %cst_14 = arith.constant 6.400000e+01 : f32
    %19 = vector.broadcast %cst_14 : f32 to vector<16x1xf32>
    %20 = arith.divf %18, %19 : vector<16x1xf32>
    %cst_15 = arith.constant 9.99999974E-6 : f32
    %21 = vector.broadcast %cst_15 : f32 to vector<16x1xf32>
    %22 = arith.addf %20, %21 : vector<16x1xf32>
    %23 = math.rsqrt %22 : vector<16x1xf32>
    %24 = vector.broadcast %23 : vector<16x1xf32> to vector<16x64xf32>
    %25 = arith.mulf %15, %24 : vector<16x64xf32>
    %26 = vector.broadcast %8 : vector<1x64xf32> to vector<16x64xf32>
    %27 = arith.mulf %25, %26 : vector<16x64xf32>
    %28 = vector.broadcast %9 : vector<1x64xf32> to vector<16x64xf32>
    %29 = arith.addf %27, %28 : vector<16x64xf32>
    %30 = arith.truncf %29 : vector<16x64xf32> to vector<16x64xbf16>
    %c0_16 = arith.constant 0 : index
    %c0_17 = arith.constant 0 : index
    %31 = vector.load %arg8[%c0_16, %c0_17] : memref<64x192xbf16, #tpu.memory_space<vmem>>, vector<64x192xbf16>
    %cst_18 = arith.constant dense<0.000000e+00> : vector<16x192xf32>
    %32 = tpu.matmul %30, %31, %cst_18 {dimension_numbers = #tpu.dot_dimension_numbers<[1], [0], [0], [1], [0, 0, 1, 1], [], []>} : vector<16x64xbf16>, vector<64x192xbf16>, vector<16x192xf32> -> vector<16x192xf32>
    %c0_19 = arith.constant 0 : index
    %c0_20 = arith.constant 0 : index
    %33 = vector.load %arg9[%c0_19, %c0_20] : memref<1x192xf32, #tpu.memory_space<vmem>>, vector<1x192xf32>
    %34 = vector.broadcast %33 : vector<1x192xf32> to vector<16x192xf32>
    %35 = arith.addf %32, %34 : vector<16x192xf32>
    %36 = vector.extract_strided_slice %35 {offsets = [0, 0], sizes = [16, 16], strides = [1, 1]} : vector<16x192xf32> to vector<16x16xf32>
    %37 = vector.shape_cast %36 : vector<16x16xf32> to vector<2x8x16xf32>
    %38 = vector.extract_strided_slice %35 {offsets = [0, 64], sizes = [16, 16], strides = [1, 1]} : vector<16x192xf32> to vector<16x16xf32>
    %39 = vector.shape_cast %38 : vector<16x16xf32> to vector<2x8x16xf32>
    %40 = vector.extract_strided_slice %35 {offsets = [0, 128], sizes = [16, 16], strides = [1, 1]} : vector<16x192xf32> to vector<16x16xf32>
    %41 = vector.shape_cast %40 : vector<16x16xf32> to vector<2x8x16xf32>
    %42 = arith.truncf %37 : vector<2x8x16xf32> to vector<2x8x16xbf16>
    %43 = arith.truncf %39 : vector<2x8x16xf32> to vector<2x8x16xbf16>
    "tpu.trace_start"() <{level = 10 : i32, message = "bqd,bkd->bqk"}> : () -> ()
    %cst_21 = arith.constant dense<0.000000e+00> : vector<2x8x8xf32>
    %44 = tpu.matmul %42, %43, %cst_21 {dimension_numbers = #tpu.dot_dimension_numbers<[2], [2], [1], [1], [0, 0, 0, 1, 1, 1], [0], [0]>} : vector<2x8x16xbf16>, vector<2x8x16xbf16>, vector<2x8x8xf32> -> vector<2x8x8xf32>
    "tpu.trace_stop"() : () -> ()
    %cst_22 = arith.constant dense<0xFF800000> : vector<2x8xf32>
    %45 = vector.multi_reduction <maximumf>, %44, %cst_22 [2] : vector<2x8x8xf32> to vector<2x8xf32>
    %46 = vector.shape_cast %45 : vector<2x8xf32> to vector<2x8x1xf32>
    %47 = vector.broadcast %46 : vector<2x8x1xf32> to vector<2x8x8xf32>
    %48 = arith.subf %44, %47 : vector<2x8x8xf32>
    %49 = math.exp %48 : vector<2x8x8xf32>
    %cst_23 = arith.constant dense<0.000000e+00> : vector<2x8xf32>
    %50 = vector.multi_reduction <add>, %49, %cst_23 [2] : vector<2x8x8xf32> to vector<2x8xf32>
    %51 = vector.shape_cast %50 : vector<2x8xf32> to vector<2x8x1xf32>
    %52 = vector.broadcast %51 : vector<2x8x1xf32> to vector<2x8x8xf32>
    %53 = arith.divf %49, %52 : vector<2x8x8xf32>
    %54 = arith.truncf %53 : vector<2x8x8xf32> to vector<2x8x8xbf16>
    %55 = arith.truncf %41 : vector<2x8x16xf32> to vector<2x8x16xbf16>
    "tpu.trace_start"() <{level = 10 : i32, message = "bqk,bkd->bqd"}> : () -> ()
    %cst_24 = arith.constant dense<0.000000e+00> : vector<2x8x16xf32>
    %56 = tpu.matmul %54, %55, %cst_24 {dimension_numbers = #tpu.dot_dimension_numbers<[2], [1], [1], [2], [0, 0, 0, 1, 1, 2], [0], [0]>} : vector<2x8x8xbf16>, vector<2x8x16xbf16>, vector<2x8x16xf32> -> vector<2x8x16xf32>
    "tpu.trace_stop"() : () -> ()
    %57 = vector.shape_cast %56 : vector<2x8x16xf32> to vector<16x16xf32>
    %58 = vector.extract_strided_slice %35 {offsets = [0, 16], sizes = [16, 16], strides = [1, 1]} : vector<16x192xf32> to vector<16x16xf32>
    %59 = vector.shape_cast %58 : vector<16x16xf32> to vector<2x8x16xf32>
    %60 = vector.extract_strided_slice %35 {offsets = [0, 80], sizes = [16, 16], strides = [1, 1]} : vector<16x192xf32> to vector<16x16xf32>
    %61 = vector.shape_cast %60 : vector<16x16xf32> to vector<2x8x16xf32>
    %62 = vector.extract_strided_slice %35 {offsets = [0, 144], sizes = [16, 16], strides = [1, 1]} : vector<16x192xf32> to vector<16x16xf32>
    %63 = vector.shape_cast %62 : vector<16x16xf32> to vector<2x8x16xf32>
    %64 = arith.truncf %59 : vector<2x8x16xf32> to vector<2x8x16xbf16>
    %65 = arith.truncf %61 : vector<2x8x16xf32> to vector<2x8x16xbf16>
    "tpu.trace_start"() <{level = 10 : i32, message = "bqd,bkd->bqk"}> : () -> ()
    %cst_25 = arith.constant dense<0.000000e+00> : vector<2x8x8xf32>
    %66 = tpu.matmul %64, %65, %cst_25 {dimension_numbers = #tpu.dot_dimension_numbers<[2], [2], [1], [1], [0, 0, 0, 1, 1, 1], [0], [0]>} : vector<2x8x16xbf16>, vector<2x8x16xbf16>, vector<2x8x8xf32> -> vector<2x8x8xf32>
    "tpu.trace_stop"() : () -> ()
    %cst_26 = arith.constant dense<0xFF800000> : vector<2x8xf32>
    %67 = vector.multi_reduction <maximumf>, %66, %cst_26 [2] : vector<2x8x8xf32> to vector<2x8xf32>
    %68 = vector.shape_cast %67 : vector<2x8xf32> to vector<2x8x1xf32>
    %69 = vector.broadcast %68 : vector<2x8x1xf32> to vector<2x8x8xf32>
    %70 = arith.subf %66, %69 : vector<2x8x8xf32>
    %71 = math.exp %70 : vector<2x8x8xf32>
    %cst_27 = arith.constant dense<0.000000e+00> : vector<2x8xf32>
    %72 = vector.multi_reduction <add>, %71, %cst_27 [2] : vector<2x8x8xf32> to vector<2x8xf32>
    %73 = vector.shape_cast %72 : vector<2x8xf32> to vector<2x8x1xf32>
    %74 = vector.broadcast %73 : vector<2x8x1xf32> to vector<2x8x8xf32>
    %75 = arith.divf %71, %74 : vector<2x8x8xf32>
    %76 = arith.truncf %75 : vector<2x8x8xf32> to vector<2x8x8xbf16>
    %77 = arith.truncf %63 : vector<2x8x16xf32> to vector<2x8x16xbf16>
    "tpu.trace_start"() <{level = 10 : i32, message = "bqk,bkd->bqd"}> : () -> ()
    %cst_28 = arith.constant dense<0.000000e+00> : vector<2x8x16xf32>
    %78 = tpu.matmul %76, %77, %cst_28 {dimension_numbers = #tpu.dot_dimension_numbers<[2], [1], [1], [2], [0, 0, 0, 1, 1, 2], [0], [0]>} : vector<2x8x8xbf16>, vector<2x8x16xbf16>, vector<2x8x16xf32> -> vector<2x8x16xf32>
    "tpu.trace_stop"() : () -> ()
    %79 = vector.shape_cast %78 : vector<2x8x16xf32> to vector<16x16xf32>
    %80 = vector.extract_strided_slice %35 {offsets = [0, 32], sizes = [16, 16], strides = [1, 1]} : vector<16x192xf32> to vector<16x16xf32>
    %81 = vector.shape_cast %80 : vector<16x16xf32> to vector<2x8x16xf32>
    %82 = vector.extract_strided_slice %35 {offsets = [0, 96], sizes = [16, 16], strides = [1, 1]} : vector<16x192xf32> to vector<16x16xf32>
    %83 = vector.shape_cast %82 : vector<16x16xf32> to vector<2x8x16xf32>
    %84 = vector.extract_strided_slice %35 {offsets = [0, 160], sizes = [16, 16], strides = [1, 1]} : vector<16x192xf32> to vector<16x16xf32>
    %85 = vector.shape_cast %84 : vector<16x16xf32> to vector<2x8x16xf32>
    %86 = arith.truncf %81 : vector<2x8x16xf32> to vector<2x8x16xbf16>
    %87 = arith.truncf %83 : vector<2x8x16xf32> to vector<2x8x16xbf16>
    "tpu.trace_start"() <{level = 10 : i32, message = "bqd,bkd->bqk"}> : () -> ()
    %cst_29 = arith.constant dense<0.000000e+00> : vector<2x8x8xf32>
    %88 = tpu.matmul %86, %87, %cst_29 {dimension_numbers = #tpu.dot_dimension_numbers<[2], [2], [1], [1], [0, 0, 0, 1, 1, 1], [0], [0]>} : vector<2x8x16xbf16>, vector<2x8x16xbf16>, vector<2x8x8xf32> -> vector<2x8x8xf32>
    "tpu.trace_stop"() : () -> ()
    %cst_30 = arith.constant dense<0xFF800000> : vector<2x8xf32>
    %89 = vector.multi_reduction <maximumf>, %88, %cst_30 [2] : vector<2x8x8xf32> to vector<2x8xf32>
    %90 = vector.shape_cast %89 : vector<2x8xf32> to vector<2x8x1xf32>
    %91 = vector.broadcast %90 : vector<2x8x1xf32> to vector<2x8x8xf32>
    %92 = arith.subf %88, %91 : vector<2x8x8xf32>
    %93 = math.exp %92 : vector<2x8x8xf32>
    %cst_31 = arith.constant dense<0.000000e+00> : vector<2x8xf32>
    %94 = vector.multi_reduction <add>, %93, %cst_31 [2] : vector<2x8x8xf32> to vector<2x8xf32>
    %95 = vector.shape_cast %94 : vector<2x8xf32> to vector<2x8x1xf32>
    %96 = vector.broadcast %95 : vector<2x8x1xf32> to vector<2x8x8xf32>
    %97 = arith.divf %93, %96 : vector<2x8x8xf32>
    %98 = arith.truncf %97 : vector<2x8x8xf32> to vector<2x8x8xbf16>
    %99 = arith.truncf %85 : vector<2x8x16xf32> to vector<2x8x16xbf16>
    "tpu.trace_start"() <{level = 10 : i32, message = "bqk,bkd->bqd"}> : () -> ()
    %cst_32 = arith.constant dense<0.000000e+00> : vector<2x8x16xf32>
    %100 = tpu.matmul %98, %99, %cst_32 {dimension_numbers = #tpu.dot_dimension_numbers<[2], [1], [1], [2], [0, 0, 0, 1, 1, 2], [0], [0]>} : vector<2x8x8xbf16>, vector<2x8x16xbf16>, vector<2x8x16xf32> -> vector<2x8x16xf32>
    "tpu.trace_stop"() : () -> ()
    %101 = vector.shape_cast %100 : vector<2x8x16xf32> to vector<16x16xf32>
    %102 = vector.extract_strided_slice %35 {offsets = [0, 48], sizes = [16, 16], strides = [1, 1]} : vector<16x192xf32> to vector<16x16xf32>
    %103 = vector.shape_cast %102 : vector<16x16xf32> to vector<2x8x16xf32>
    %104 = vector.extract_strided_slice %35 {offsets = [0, 112], sizes = [16, 16], strides = [1, 1]} : vector<16x192xf32> to vector<16x16xf32>
    %105 = vector.shape_cast %104 : vector<16x16xf32> to vector<2x8x16xf32>
    %106 = vector.extract_strided_slice %35 {offsets = [0, 176], sizes = [16, 16], strides = [1, 1]} : vector<16x192xf32> to vector<16x16xf32>
    %107 = vector.shape_cast %106 : vector<16x16xf32> to vector<2x8x16xf32>
    %108 = arith.truncf %103 : vector<2x8x16xf32> to vector<2x8x16xbf16>
    %109 = arith.truncf %105 : vector<2x8x16xf32> to vector<2x8x16xbf16>
    "tpu.trace_start"() <{level = 10 : i32, message = "bqd,bkd->bqk"}> : () -> ()
    %cst_33 = arith.constant dense<0.000000e+00> : vector<2x8x8xf32>
    %110 = tpu.matmul %108, %109, %cst_33 {dimension_numbers = #tpu.dot_dimension_numbers<[2], [2], [1], [1], [0, 0, 0, 1, 1, 1], [0], [0]>} : vector<2x8x16xbf16>, vector<2x8x16xbf16>, vector<2x8x8xf32> -> vector<2x8x8xf32>
    "tpu.trace_stop"() : () -> ()
    %cst_34 = arith.constant dense<0xFF800000> : vector<2x8xf32>
    %111 = vector.multi_reduction <maximumf>, %110, %cst_34 [2] : vector<2x8x8xf32> to vector<2x8xf32>
    %112 = vector.shape_cast %111 : vector<2x8xf32> to vector<2x8x1xf32>
    %113 = vector.broadcast %112 : vector<2x8x1xf32> to vector<2x8x8xf32>
    %114 = arith.subf %110, %113 : vector<2x8x8xf32>
    %115 = math.exp %114 : vector<2x8x8xf32>
    %cst_35 = arith.constant dense<0.000000e+00> : vector<2x8xf32>
    %116 = vector.multi_reduction <add>, %115, %cst_35 [2] : vector<2x8x8xf32> to vector<2x8xf32>
    %117 = vector.shape_cast %116 : vector<2x8xf32> to vector<2x8x1xf32>
    %118 = vector.broadcast %117 : vector<2x8x1xf32> to vector<2x8x8xf32>
    %119 = arith.divf %115, %118 : vector<2x8x8xf32>
    %120 = arith.truncf %119 : vector<2x8x8xf32> to vector<2x8x8xbf16>
    %121 = arith.truncf %107 : vector<2x8x16xf32> to vector<2x8x16xbf16>
    "tpu.trace_start"() <{level = 10 : i32, message = "bqk,bkd->bqd"}> : () -> ()
    %cst_36 = arith.constant dense<0.000000e+00> : vector<2x8x16xf32>
    %122 = tpu.matmul %120, %121, %cst_36 {dimension_numbers = #tpu.dot_dimension_numbers<[2], [1], [1], [2], [0, 0, 0, 1, 1, 2], [0], [0]>} : vector<2x8x8xbf16>, vector<2x8x16xbf16>, vector<2x8x16xf32> -> vector<2x8x16xf32>
    "tpu.trace_stop"() : () -> ()
    %123 = vector.shape_cast %122 : vector<2x8x16xf32> to vector<16x16xf32>
    %124 = tpu.concatenate %57, %79, %101, %123 in 1 : vector<16x16xf32>, vector<16x16xf32>, vector<16x16xf32>, vector<16x16xf32> -> vector<16x64xf32>
    %125 = arith.truncf %124 : vector<16x64xf32> to vector<16x64xbf16>
    %c0_37 = arith.constant 0 : index
    %c0_38 = arith.constant 0 : index
    %126 = vector.load %arg10[%c0_37, %c0_38] : memref<64x64xbf16, #tpu.memory_space<vmem>>, vector<64x64xbf16>
    %cst_39 = arith.constant dense<0.000000e+00> : vector<16x64xf32>
    %127 = tpu.matmul %125, %126, %cst_39 {dimension_numbers = #tpu.dot_dimension_numbers<[1], [0], [0], [1], [0, 0, 1, 1], [], []>} : vector<16x64xbf16>, vector<64x64xbf16>, vector<16x64xf32> -> vector<16x64xf32>
    %c0_40 = arith.constant 0 : index
    %c0_41 = arith.constant 0 : index
    %128 = vector.load %arg11[%c0_40, %c0_41] : memref<1x64xf32, #tpu.memory_space<vmem>>, vector<1x64xf32>
    %129 = vector.broadcast %128 : vector<1x64xf32> to vector<16x64xf32>
    %130 = arith.addf %127, %129 : vector<16x64xf32>
    %131 = arith.addf %7, %130 : vector<16x64xf32>
    %c0_42 = arith.constant 0 : index
    %c0_43 = arith.constant 0 : index
    %132 = vector.load %arg18[%c0_42, %c0_43] : memref<1x64xf32, #tpu.memory_space<vmem>>, vector<1x64xf32>
    %c0_44 = arith.constant 0 : index
    %c0_45 = arith.constant 0 : index
    %133 = vector.load %arg19[%c0_44, %c0_45] : memref<1x64xf32, #tpu.memory_space<vmem>>, vector<1x64xf32>
    %cst_46 = arith.constant dense<0.000000e+00> : vector<16xf32>
    %134 = vector.multi_reduction <add>, %131, %cst_46 [1] : vector<16x64xf32> to vector<16xf32>
    %135 = vector.shape_cast %134 : vector<16xf32> to vector<16x1xf32>
    %cst_47 = arith.constant 6.400000e+01 : f32
    %136 = vector.broadcast %cst_47 : f32 to vector<16x1xf32>
    %137 = arith.divf %135, %136 : vector<16x1xf32>
    %138 = vector.broadcast %137 : vector<16x1xf32> to vector<16x64xf32>
    %139 = arith.subf %131, %138 : vector<16x64xf32>
    %140 = arith.mulf %139, %139 : vector<16x64xf32>
    %cst_48 = arith.constant dense<0.000000e+00> : vector<16xf32>
    %141 = vector.multi_reduction <add>, %140, %cst_48 [1] : vector<16x64xf32> to vector<16xf32>
    %142 = vector.shape_cast %141 : vector<16xf32> to vector<16x1xf32>
    %cst_49 = arith.constant 6.400000e+01 : f32
    %143 = vector.broadcast %cst_49 : f32 to vector<16x1xf32>
    %144 = arith.divf %142, %143 : vector<16x1xf32>
    %cst_50 = arith.constant 9.99999974E-6 : f32
    %145 = vector.broadcast %cst_50 : f32 to vector<16x1xf32>
    %146 = arith.addf %144, %145 : vector<16x1xf32>
    %147 = math.rsqrt %146 : vector<16x1xf32>
    %148 = vector.broadcast %147 : vector<16x1xf32> to vector<16x64xf32>
    %149 = arith.mulf %139, %148 : vector<16x64xf32>
    %150 = vector.broadcast %132 : vector<1x64xf32> to vector<16x64xf32>
    %151 = arith.mulf %149, %150 : vector<16x64xf32>
    %152 = vector.broadcast %133 : vector<1x64xf32> to vector<16x64xf32>
    %153 = arith.addf %151, %152 : vector<16x64xf32>
    %154 = arith.truncf %153 : vector<16x64xf32> to vector<16x64xbf16>
    %c0_51 = arith.constant 0 : index
    %c0_52 = arith.constant 0 : index
    %155 = vector.load %arg12[%c0_51, %c0_52] : memref<64x128xbf16, #tpu.memory_space<vmem>>, vector<64x128xbf16>
    %cst_53 = arith.constant dense<0.000000e+00> : vector<16x128xf32>
    %156 = tpu.matmul %154, %155, %cst_53 {dimension_numbers = #tpu.dot_dimension_numbers<[1], [0], [0], [1], [0, 0, 1, 1], [], []>} : vector<16x64xbf16>, vector<64x128xbf16>, vector<16x128xf32> -> vector<16x128xf32>
    %c0_54 = arith.constant 0 : index
    %c0_55 = arith.constant 0 : index
    %157 = vector.load %arg13[%c0_54, %c0_55] : memref<1x128xf32, #tpu.memory_space<vmem>>, vector<1x128xf32>
    %158 = vector.broadcast %157 : vector<1x128xf32> to vector<16x128xf32>
    %159 = arith.addf %156, %158 : vector<16x128xf32>
    %cst_56 = arith.constant 0.000000e+00 : f32
    %160 = vector.broadcast %cst_56 : f32 to vector<16x128xf32>
    %161 = arith.maximumf %159, %160 : vector<16x128xf32>
    %162 = arith.truncf %161 : vector<16x128xf32> to vector<16x128xbf16>
    %c0_57 = arith.constant 0 : index
    %c0_58 = arith.constant 0 : index
    %163 = vector.load %arg14[%c0_57, %c0_58] : memref<128x64xbf16, #tpu.memory_space<vmem>>, vector<128x64xbf16>
    %cst_59 = arith.constant dense<0.000000e+00> : vector<16x64xf32>
    %164 = tpu.matmul %162, %163, %cst_59 {dimension_numbers = #tpu.dot_dimension_numbers<[1], [0], [0], [1], [0, 0, 1, 1], [], []>} : vector<16x128xbf16>, vector<128x64xbf16>, vector<16x64xf32> -> vector<16x64xf32>
    %c0_60 = arith.constant 0 : index
    %c0_61 = arith.constant 0 : index
    %165 = vector.load %arg15[%c0_60, %c0_61] : memref<1x64xf32, #tpu.memory_space<vmem>>, vector<1x64xf32>
    %166 = vector.broadcast %165 : vector<1x64xf32> to vector<16x64xf32>
    %167 = arith.addf %164, %166 : vector<16x64xf32>
    %168 = arith.addf %131, %167 : vector<16x64xf32>
    %169 = arith.addf %53, %75 : vector<2x8x8xf32>
    %170 = arith.addf %169, %97 : vector<2x8x8xf32>
    %171 = arith.addf %170, %119 : vector<2x8x8xf32>
    %cst_62 = arith.constant 2.500000e-01 : f32
    %172 = vector.broadcast %cst_62 : f32 to vector<2x8x8xf32>
    %173 = arith.mulf %171, %172 : vector<2x8x8xf32>
    %c0_63 = arith.constant 0 : index
    %c0_64 = arith.constant 0 : index
    %c0_65 = arith.constant 0 : index
    %c0_66 = arith.constant 0 : index
    %174 = vector.load %arg40[%c0_63, %c0_64, %c0_65, %c0_66] : memref<2x2x8x8xf32, #tpu.memory_space<vmem>>, vector<1x2x8x8xf32>
    %175 = vector.shape_cast %174 : vector<1x2x8x8xf32> to vector<2x8x8xf32>
    %176 = vector.shape_cast %173 : vector<2x8x8xf32> to vector<1x2x8x8xf32>
    tpu.vector_store %arg40[%c0_63, %c0_64, %c0_65, %c0_66], %176 {strides = array<i32>} : memref<2x2x8x8xf32, #tpu.memory_space<vmem>>, vector<1x2x8x8xf32>,
    %c0_67 = arith.constant 0 : index
    %c0_68 = arith.constant 0 : index
    %177 = vector.load %arg16[%c0_67, %c0_68] : memref<1x64xf32, #tpu.memory_space<vmem>>, vector<1x64xf32>
    %c0_69 = arith.constant 0 : index
    %c0_70 = arith.constant 0 : index
    %178 = vector.load %arg17[%c0_69, %c0_70] : memref<1x64xf32, #tpu.memory_space<vmem>>, vector<1x64xf32>
    %cst_71 = arith.constant dense<0.000000e+00> : vector<16xf32>
    %179 = vector.multi_reduction <add>, %168, %cst_71 [1] : vector<16x64xf32> to vector<16xf32>
    %180 = vector.shape_cast %179 : vector<16xf32> to vector<16x1xf32>
    %cst_72 = arith.constant 6.400000e+01 : f32
    %181 = vector.broadcast %cst_72 : f32 to vector<16x1xf32>
    %182 = arith.divf %180, %181 : vector<16x1xf32>
    %183 = vector.broadcast %182 : vector<16x1xf32> to vector<16x64xf32>
    %184 = arith.subf %168, %183 : vector<16x64xf32>
    %185 = arith.mulf %184, %184 : vector<16x64xf32>
    %cst_73 = arith.constant dense<0.000000e+00> : vector<16xf32>
    %186 = vector.multi_reduction <add>, %185, %cst_73 [1] : vector<16x64xf32> to vector<16xf32>
    %187 = vector.shape_cast %186 : vector<16xf32> to vector<16x1xf32>
    %cst_74 = arith.constant 6.400000e+01 : f32
    %188 = vector.broadcast %cst_74 : f32 to vector<16x1xf32>
    %189 = arith.divf %187, %188 : vector<16x1xf32>
    %cst_75 = arith.constant 9.99999974E-6 : f32
    %190 = vector.broadcast %cst_75 : f32 to vector<16x1xf32>
    %191 = arith.addf %189, %190 : vector<16x1xf32>
    %192 = math.rsqrt %191 : vector<16x1xf32>
    %193 = vector.broadcast %192 : vector<16x1xf32> to vector<16x64xf32>
    %194 = arith.mulf %184, %193 : vector<16x64xf32>
    %195 = vector.broadcast %177 : vector<1x64xf32> to vector<16x64xf32>
    %196 = arith.mulf %194, %195 : vector<16x64xf32>
    %197 = vector.broadcast %178 : vector<1x64xf32> to vector<16x64xf32>
    %198 = arith.addf %196, %197 : vector<16x64xf32>
    %199 = arith.truncf %198 : vector<16x64xf32> to vector<16x64xbf16>
    %c0_76 = arith.constant 0 : index
    %c0_77 = arith.constant 0 : index
    %200 = vector.load %arg8[%c0_76, %c0_77] : memref<64x192xbf16, #tpu.memory_space<vmem>>, vector<64x192xbf16>
    %cst_78 = arith.constant dense<0.000000e+00> : vector<16x192xf32>
    %201 = tpu.matmul %199, %200, %cst_78 {dimension_numbers = #tpu.dot_dimension_numbers<[1], [0], [0], [1], [0, 0, 1, 1], [], []>} : vector<16x64xbf16>, vector<64x192xbf16>, vector<16x192xf32> -> vector<16x192xf32>
    %c0_79 = arith.constant 0 : index
    %c0_80 = arith.constant 0 : index
    %202 = vector.load %arg9[%c0_79, %c0_80] : memref<1x192xf32, #tpu.memory_space<vmem>>, vector<1x192xf32>
    %203 = vector.broadcast %202 : vector<1x192xf32> to vector<16x192xf32>
    %204 = arith.addf %201, %203 : vector<16x192xf32>
    %205 = vector.extract_strided_slice %204 {offsets = [0, 0], sizes = [16, 16], strides = [1, 1]} : vector<16x192xf32> to vector<16x16xf32>
    %206 = vector.shape_cast %205 : vector<16x16xf32> to vector<2x8x16xf32>
    %207 = vector.extract_strided_slice %204 {offsets = [0, 64], sizes = [16, 16], strides = [1, 1]} : vector<16x192xf32> to vector<16x16xf32>
    %208 = vector.shape_cast %207 : vector<16x16xf32> to vector<2x8x16xf32>
    %209 = vector.extract_strided_slice %204 {offsets = [0, 128], sizes = [16, 16], strides = [1, 1]} : vector<16x192xf32> to vector<16x16xf32>
    %210 = vector.shape_cast %209 : vector<16x16xf32> to vector<2x8x16xf32>
    %211 = arith.truncf %206 : vector<2x8x16xf32> to vector<2x8x16xbf16>
    %212 = arith.truncf %208 : vector<2x8x16xf32> to vector<2x8x16xbf16>
    "tpu.trace_start"() <{level = 10 : i32, message = "bqd,bkd->bqk"}> : () -> ()
    %cst_81 = arith.constant dense<0.000000e+00> : vector<2x8x8xf32>
    %213 = tpu.matmul %211, %212, %cst_81 {dimension_numbers = #tpu.dot_dimension_numbers<[2], [2], [1], [1], [0, 0, 0, 1, 1, 1], [0], [0]>} : vector<2x8x16xbf16>, vector<2x8x16xbf16>, vector<2x8x8xf32> -> vector<2x8x8xf32>
    "tpu.trace_stop"() : () -> ()
    %cst_82 = arith.constant dense<0xFF800000> : vector<2x8xf32>
    %214 = vector.multi_reduction <maximumf>, %213, %cst_82 [2] : vector<2x8x8xf32> to vector<2x8xf32>
    %215 = vector.shape_cast %214 : vector<2x8xf32> to vector<2x8x1xf32>
    %216 = vector.broadcast %215 : vector<2x8x1xf32> to vector<2x8x8xf32>
    %217 = arith.subf %213, %216 : vector<2x8x8xf32>
    %218 = math.exp %217 : vector<2x8x8xf32>
    %cst_83 = arith.constant dense<0.000000e+00> : vector<2x8xf32>
    %219 = vector.multi_reduction <add>, %218, %cst_83 [2] : vector<2x8x8xf32> to vector<2x8xf32>
    %220 = vector.shape_cast %219 : vector<2x8xf32> to vector<2x8x1xf32>
    %221 = vector.broadcast %220 : vector<2x8x1xf32> to vector<2x8x8xf32>
    %222 = arith.divf %218, %221 : vector<2x8x8xf32>
    %223 = arith.truncf %222 : vector<2x8x8xf32> to vector<2x8x8xbf16>
    %224 = arith.truncf %210 : vector<2x8x16xf32> to vector<2x8x16xbf16>
    "tpu.trace_start"() <{level = 10 : i32, message = "bqk,bkd->bqd"}> : () -> ()
    %cst_84 = arith.constant dense<0.000000e+00> : vector<2x8x16xf32>
    %225 = tpu.matmul %223, %224, %cst_84 {dimension_numbers = #tpu.dot_dimension_numbers<[2], [1], [1], [2], [0, 0, 0, 1, 1, 2], [0], [0]>} : vector<2x8x8xbf16>, vector<2x8x16xbf16>, vector<2x8x16xf32> -> vector<2x8x16xf32>
    "tpu.trace_stop"() : () -> ()
    %226 = vector.shape_cast %225 : vector<2x8x16xf32> to vector<16x16xf32>
    %227 = vector.extract_strided_slice %204 {offsets = [0, 16], sizes = [16, 16], strides = [1, 1]} : vector<16x192xf32> to vector<16x16xf32>
    %228 = vector.shape_cast %227 : vector<16x16xf32> to vector<2x8x16xf32>
    %229 = vector.extract_strided_slice %204 {offsets = [0, 80], sizes = [16, 16], strides = [1, 1]} : vector<16x192xf32> to vector<16x16xf32>
    %230 = vector.shape_cast %229 : vector<16x16xf32> to vector<2x8x16xf32>
    %231 = vector.extract_strided_slice %204 {offsets = [0, 144], sizes = [16, 16], strides = [1, 1]} : vector<16x192xf32> to vector<16x16xf32>
    %232 = vector.shape_cast %231 : vector<16x16xf32> to vector<2x8x16xf32>
    %233 = arith.truncf %228 : vector<2x8x16xf32> to vector<2x8x16xbf16>
    %234 = arith.truncf %230 : vector<2x8x16xf32> to vector<2x8x16xbf16>
    "tpu.trace_start"() <{level = 10 : i32, message = "bqd,bkd->bqk"}> : () -> ()
    %cst_85 = arith.constant dense<0.000000e+00> : vector<2x8x8xf32>
    %235 = tpu.matmul %233, %234, %cst_85 {dimension_numbers = #tpu.dot_dimension_numbers<[2], [2], [1], [1], [0, 0, 0, 1, 1, 1], [0], [0]>} : vector<2x8x16xbf16>, vector<2x8x16xbf16>, vector<2x8x8xf32> -> vector<2x8x8xf32>
    "tpu.trace_stop"() : () -> ()
    %cst_86 = arith.constant dense<0xFF800000> : vector<2x8xf32>
    %236 = vector.multi_reduction <maximumf>, %235, %cst_86 [2] : vector<2x8x8xf32> to vector<2x8xf32>
    %237 = vector.shape_cast %236 : vector<2x8xf32> to vector<2x8x1xf32>
    %238 = vector.broadcast %237 : vector<2x8x1xf32> to vector<2x8x8xf32>
    %239 = arith.subf %235, %238 : vector<2x8x8xf32>
    %240 = math.exp %239 : vector<2x8x8xf32>
    %cst_87 = arith.constant dense<0.000000e+00> : vector<2x8xf32>
    %241 = vector.multi_reduction <add>, %240, %cst_87 [2] : vector<2x8x8xf32> to vector<2x8xf32>
    %242 = vector.shape_cast %241 : vector<2x8xf32> to vector<2x8x1xf32>
    %243 = vector.broadcast %242 : vector<2x8x1xf32> to vector<2x8x8xf32>
    %244 = arith.divf %240, %243 : vector<2x8x8xf32>
    %245 = arith.truncf %244 : vector<2x8x8xf32> to vector<2x8x8xbf16>
    %246 = arith.truncf %232 : vector<2x8x16xf32> to vector<2x8x16xbf16>
    "tpu.trace_start"() <{level = 10 : i32, message = "bqk,bkd->bqd"}> : () -> ()
    %cst_88 = arith.constant dense<0.000000e+00> : vector<2x8x16xf32>
    %247 = tpu.matmul %245, %246, %cst_88 {dimension_numbers = #tpu.dot_dimension_numbers<[2], [1], [1], [2], [0, 0, 0, 1, 1, 2], [0], [0]>} : vector<2x8x8xbf16>, vector<2x8x16xbf16>, vector<2x8x16xf32> -> vector<2x8x16xf32>
    "tpu.trace_stop"() : () -> ()
    %248 = vector.shape_cast %247 : vector<2x8x16xf32> to vector<16x16xf32>
    %249 = vector.extract_strided_slice %204 {offsets = [0, 32], sizes = [16, 16], strides = [1, 1]} : vector<16x192xf32> to vector<16x16xf32>
    %250 = vector.shape_cast %249 : vector<16x16xf32> to vector<2x8x16xf32>
    %251 = vector.extract_strided_slice %204 {offsets = [0, 96], sizes = [16, 16], strides = [1, 1]} : vector<16x192xf32> to vector<16x16xf32>
    %252 = vector.shape_cast %251 : vector<16x16xf32> to vector<2x8x16xf32>
    %253 = vector.extract_strided_slice %204 {offsets = [0, 160], sizes = [16, 16], strides = [1, 1]} : vector<16x192xf32> to vector<16x16xf32>
    %254 = vector.shape_cast %253 : vector<16x16xf32> to vector<2x8x16xf32>
    %255 = arith.truncf %250 : vector<2x8x16xf32> to vector<2x8x16xbf16>
    %256 = arith.truncf %252 : vector<2x8x16xf32> to vector<2x8x16xbf16>
    "tpu.trace_start"() <{level = 10 : i32, message = "bqd,bkd->bqk"}> : () -> ()
    %cst_89 = arith.constant dense<0.000000e+00> : vector<2x8x8xf32>
    %257 = tpu.matmul %255, %256, %cst_89 {dimension_numbers = #tpu.dot_dimension_numbers<[2], [2], [1], [1], [0, 0, 0, 1, 1, 1], [0], [0]>} : vector<2x8x16xbf16>, vector<2x8x16xbf16>, vector<2x8x8xf32> -> vector<2x8x8xf32>
    "tpu.trace_stop"() : () -> ()
    %cst_90 = arith.constant dense<0xFF800000> : vector<2x8xf32>
    %258 = vector.multi_reduction <maximumf>, %257, %cst_90 [2] : vector<2x8x8xf32> to vector<2x8xf32>
    %259 = vector.shape_cast %258 : vector<2x8xf32> to vector<2x8x1xf32>
    %260 = vector.broadcast %259 : vector<2x8x1xf32> to vector<2x8x8xf32>
    %261 = arith.subf %257, %260 : vector<2x8x8xf32>
    %262 = math.exp %261 : vector<2x8x8xf32>
    %cst_91 = arith.constant dense<0.000000e+00> : vector<2x8xf32>
    %263 = vector.multi_reduction <add>, %262, %cst_91 [2] : vector<2x8x8xf32> to vector<2x8xf32>
    %264 = vector.shape_cast %263 : vector<2x8xf32> to vector<2x8x1xf32>
    %265 = vector.broadcast %264 : vector<2x8x1xf32> to vector<2x8x8xf32>
    %266 = arith.divf %262, %265 : vector<2x8x8xf32>
    %267 = arith.truncf %266 : vector<2x8x8xf32> to vector<2x8x8xbf16>
    %268 = arith.truncf %254 : vector<2x8x16xf32> to vector<2x8x16xbf16>
    "tpu.trace_start"() <{level = 10 : i32, message = "bqk,bkd->bqd"}> : () -> ()
    %cst_92 = arith.constant dense<0.000000e+00> : vector<2x8x16xf32>
    %269 = tpu.matmul %267, %268, %cst_92 {dimension_numbers = #tpu.dot_dimension_numbers<[2], [1], [1], [2], [0, 0, 0, 1, 1, 2], [0], [0]>} : vector<2x8x8xbf16>, vector<2x8x16xbf16>, vector<2x8x16xf32> -> vector<2x8x16xf32>
    "tpu.trace_stop"() : () -> ()
    %270 = vector.shape_cast %269 : vector<2x8x16xf32> to vector<16x16xf32>
    %271 = vector.extract_strided_slice %204 {offsets = [0, 48], sizes = [16, 16], strides = [1, 1]} : vector<16x192xf32> to vector<16x16xf32>
    %272 = vector.shape_cast %271 : vector<16x16xf32> to vector<2x8x16xf32>
    %273 = vector.extract_strided_slice %204 {offsets = [0, 112], sizes = [16, 16], strides = [1, 1]} : vector<16x192xf32> to vector<16x16xf32>
    %274 = vector.shape_cast %273 : vector<16x16xf32> to vector<2x8x16xf32>
    %275 = vector.extract_strided_slice %204 {offsets = [0, 176], sizes = [16, 16], strides = [1, 1]} : vector<16x192xf32> to vector<16x16xf32>
    %276 = vector.shape_cast %275 : vector<16x16xf32> to vector<2x8x16xf32>
    %277 = arith.truncf %272 : vector<2x8x16xf32> to vector<2x8x16xbf16>
    %278 = arith.truncf %274 : vector<2x8x16xf32> to vector<2x8x16xbf16>
    "tpu.trace_start"() <{level = 10 : i32, message = "bqd,bkd->bqk"}> : () -> ()
    %cst_93 = arith.constant dense<0.000000e+00> : vector<2x8x8xf32>
    %279 = tpu.matmul %277, %278, %cst_93 {dimension_numbers = #tpu.dot_dimension_numbers<[2], [2], [1], [1], [0, 0, 0, 1, 1, 1], [0], [0]>} : vector<2x8x16xbf16>, vector<2x8x16xbf16>, vector<2x8x8xf32> -> vector<2x8x8xf32>
    "tpu.trace_stop"() : () -> ()
    %cst_94 = arith.constant dense<0xFF800000> : vector<2x8xf32>
    %280 = vector.multi_reduction <maximumf>, %279, %cst_94 [2] : vector<2x8x8xf32> to vector<2x8xf32>
    %281 = vector.shape_cast %280 : vector<2x8xf32> to vector<2x8x1xf32>
    %282 = vector.broadcast %281 : vector<2x8x1xf32> to vector<2x8x8xf32>
    %283 = arith.subf %279, %282 : vector<2x8x8xf32>
    %284 = math.exp %283 : vector<2x8x8xf32>
    %cst_95 = arith.constant dense<0.000000e+00> : vector<2x8xf32>
    %285 = vector.multi_reduction <add>, %284, %cst_95 [2] : vector<2x8x8xf32> to vector<2x8xf32>
    %286 = vector.shape_cast %285 : vector<2x8xf32> to vector<2x8x1xf32>
    %287 = vector.broadcast %286 : vector<2x8x1xf32> to vector<2x8x8xf32>
    %288 = arith.divf %284, %287 : vector<2x8x8xf32>
    %289 = arith.truncf %288 : vector<2x8x8xf32> to vector<2x8x8xbf16>
    %290 = arith.truncf %276 : vector<2x8x16xf32> to vector<2x8x16xbf16>
    "tpu.trace_start"() <{level = 10 : i32, message = "bqk,bkd->bqd"}> : () -> ()
    %cst_96 = arith.constant dense<0.000000e+00> : vector<2x8x16xf32>
    %291 = tpu.matmul %289, %290, %cst_96 {dimension_numbers = #tpu.dot_dimension_numbers<[2], [1], [1], [2], [0, 0, 0, 1, 1, 2], [0], [0]>} : vector<2x8x8xbf16>, vector<2x8x16xbf16>, vector<2x8x16xf32> -> vector<2x8x16xf32>
    "tpu.trace_stop"() : () -> ()
    %292 = vector.shape_cast %291 : vector<2x8x16xf32> to vector<16x16xf32>
    %293 = tpu.concatenate %226, %248, %270, %292 in 1 : vector<16x16xf32>, vector<16x16xf32>, vector<16x16xf32>, vector<16x16xf32> -> vector<16x64xf32>
    %294 = arith.truncf %293 : vector<16x64xf32> to vector<16x64xbf16>
    %c0_97 = arith.constant 0 : index
    %c0_98 = arith.constant 0 : index
    %295 = vector.load %arg10[%c0_97, %c0_98] : memref<64x64xbf16, #tpu.memory_space<vmem>>, vector<64x64xbf16>
    %cst_99 = arith.constant dense<0.000000e+00> : vector<16x64xf32>
    %296 = tpu.matmul %294, %295, %cst_99 {dimension_numbers = #tpu.dot_dimension_numbers<[1], [0], [0], [1], [0, 0, 1, 1], [], []>} : vector<16x64xbf16>, vector<64x64xbf16>, vector<16x64xf32> -> vector<16x64xf32>
    %c0_100 = arith.constant 0 : index
    %c0_101 = arith.constant 0 : index
    %297 = vector.load %arg11[%c0_100, %c0_101] : memref<1x64xf32, #tpu.memory_space<vmem>>, vector<1x64xf32>
    %298 = vector.broadcast %297 : vector<1x64xf32> to vector<16x64xf32>
    %299 = arith.addf %296, %298 : vector<16x64xf32>
    %300 = arith.addf %168, %299 : vector<16x64xf32>
    %c0_102 = arith.constant 0 : index
    %c0_103 = arith.constant 0 : index
    %301 = vector.load %arg18[%c0_102, %c0_103] : memref<1x64xf32, #tpu.memory_space<vmem>>, vector<1x64xf32>
    %c0_104 = arith.constant 0 : index
    %c0_105 = arith.constant 0 : index
    %302 = vector.load %arg19[%c0_104, %c0_105] : memref<1x64xf32, #tpu.memory_space<vmem>>, vector<1x64xf32>
    %cst_106 = arith.constant dense<0.000000e+00> : vector<16xf32>
    %303 = vector.multi_reduction <add>, %300, %cst_106 [1] : vector<16x64xf32> to vector<16xf32>
    %304 = vector.shape_cast %303 : vector<16xf32> to vector<16x1xf32>
    %cst_107 = arith.constant 6.400000e+01 : f32
    %305 = vector.broadcast %cst_107 : f32 to vector<16x1xf32>
    %306 = arith.divf %304, %305 : vector<16x1xf32>
    %307 = vector.broadcast %306 : vector<16x1xf32> to vector<16x64xf32>
    %308 = arith.subf %300, %307 : vector<16x64xf32>
    %309 = arith.mulf %308, %308 : vector<16x64xf32>
    %cst_108 = arith.constant dense<0.000000e+00> : vector<16xf32>
    %310 = vector.multi_reduction <add>, %309, %cst_108 [1] : vector<16x64xf32> to vector<16xf32>
    %311 = vector.shape_cast %310 : vector<16xf32> to vector<16x1xf32>
    %cst_109 = arith.constant 6.400000e+01 : f32
    %312 = vector.broadcast %cst_109 : f32 to vector<16x1xf32>
    %313 = arith.divf %311, %312 : vector<16x1xf32>
    %cst_110 = arith.constant 9.99999974E-6 : f32
    %314 = vector.broadcast %cst_110 : f32 to vector<16x1xf32>
    %315 = arith.addf %313, %314 : vector<16x1xf32>
    %316 = math.rsqrt %315 : vector<16x1xf32>
    %317 = vector.broadcast %316 : vector<16x1xf32> to vector<16x64xf32>
    %318 = arith.mulf %308, %317 : vector<16x64xf32>
    %319 = vector.broadcast %301 : vector<1x64xf32> to vector<16x64xf32>
    %320 = arith.mulf %318, %319 : vector<16x64xf32>
    %321 = vector.broadcast %302 : vector<1x64xf32> to vector<16x64xf32>
    %322 = arith.addf %320, %321 : vector<16x64xf32>
    %323 = arith.truncf %322 : vector<16x64xf32> to vector<16x64xbf16>
    %c0_111 = arith.constant 0 : index
    %c0_112 = arith.constant 0 : index
    %324 = vector.load %arg12[%c0_111, %c0_112] : memref<64x128xbf16, #tpu.memory_space<vmem>>, vector<64x128xbf16>
    %cst_113 = arith.constant dense<0.000000e+00> : vector<16x128xf32>
    %325 = tpu.matmul %323, %324, %cst_113 {dimension_numbers = #tpu.dot_dimension_numbers<[1], [0], [0], [1], [0, 0, 1, 1], [], []>} : vector<16x64xbf16>, vector<64x128xbf16>, vector<16x128xf32> -> vector<16x128xf32>
    %c0_114 = arith.constant 0 : index
    %c0_115 = arith.constant 0 : index
    %326 = vector.load %arg13[%c0_114, %c0_115] : memref<1x128xf32, #tpu.memory_space<vmem>>, vector<1x128xf32>
    %327 = vector.broadcast %326 : vector<1x128xf32> to vector<16x128xf32>
    %328 = arith.addf %325, %327 : vector<16x128xf32>
    %cst_116 = arith.constant 0.000000e+00 : f32
    %329 = vector.broadcast %cst_116 : f32 to vector<16x128xf32>
    %330 = arith.maximumf %328, %329 : vector<16x128xf32>
    %331 = arith.truncf %330 : vector<16x128xf32> to vector<16x128xbf16>
    %c0_117 = arith.constant 0 : index
    %c0_118 = arith.constant 0 : index
    %332 = vector.load %arg14[%c0_117, %c0_118] : memref<128x64xbf16, #tpu.memory_space<vmem>>, vector<128x64xbf16>
    %cst_119 = arith.constant dense<0.000000e+00> : vector<16x64xf32>
    %333 = tpu.matmul %331, %332, %cst_119 {dimension_numbers = #tpu.dot_dimension_numbers<[1], [0], [0], [1], [0, 0, 1, 1], [], []>} : vector<16x128xbf16>, vector<128x64xbf16>, vector<16x64xf32> -> vector<16x64xf32>
    %c0_120 = arith.constant 0 : index
    %c0_121 = arith.constant 0 : index
    %334 = vector.load %arg15[%c0_120, %c0_121] : memref<1x64xf32, #tpu.memory_space<vmem>>, vector<1x64xf32>
    %335 = vector.broadcast %334 : vector<1x64xf32> to vector<16x64xf32>
    %336 = arith.addf %333, %335 : vector<16x64xf32>
    %337 = arith.addf %300, %336 : vector<16x64xf32>
    %338 = arith.addf %222, %244 : vector<2x8x8xf32>
    %339 = arith.addf %338, %266 : vector<2x8x8xf32>
    %340 = arith.addf %339, %288 : vector<2x8x8xf32>
    %cst_122 = arith.constant 2.500000e-01 : f32
    %341 = vector.broadcast %cst_122 : f32 to vector<2x8x8xf32>
    %342 = arith.mulf %340, %341 : vector<2x8x8xf32>
    %c1 = arith.constant 1 : index
    %c0_123 = arith.constant 0 : index
    %c0_124 = arith.constant 0 : index
    %c0_125 = arith.constant 0 : index
    %343 = vector.load %arg40[%c1, %c0_123, %c0_124, %c0_125] : memref<2x2x8x8xf32, #tpu.memory_space<vmem>>, vector<1x2x8x8xf32>
    %344 = vector.shape_cast %343 : vector<1x2x8x8xf32> to vector<2x8x8xf32>
    %345 = vector.shape_cast %342 : vector<2x8x8xf32> to vector<1x2x8x8xf32>
    tpu.vector_store %arg40[%c1, %c0_123, %c0_124, %c0_125], %345 {strides = array<i32>} : memref<2x2x8x8xf32, #tpu.memory_space<vmem>>, vector<1x2x8x8xf32>,
    %346 = tpu.concatenate %168, %337 in 1 : vector<16x64xf32>, vector<16x64xf32> -> vector<16x128xf32>
    %c0_126 = arith.constant 0 : index
    %c0_127 = arith.constant 0 : index
    %347 = vector.load %arg38[%c0_126, %c0_127] : memref<16x128xf32, #tpu.memory_space<vmem>>, vector<16x128xf32>
    tpu.vector_store %arg38[%c0_126, %c0_127], %346 {strides = array<i32>} : memref<16x128xf32, #tpu.memory_space<vmem>>, vector<16x128xf32>,
    %348 = vector.shape_cast %337 : vector<16x64xf32> to vector<2x8x64xf32>
    %cst_128 = arith.constant dense<0.000000e+00> : vector<2x64xf32>
    %349 = vector.multi_reduction <add>, %348, %cst_128 [1] : vector<2x8x64xf32> to vector<2x64xf32>
    %cst_129 = arith.constant 8.000000e+00 : f32
    %350 = vector.broadcast %cst_129 : f32 to vector<2x64xf32>
    %351 = arith.divf %349, %350 : vector<2x64xf32>
    %c0_130 = arith.constant 0 : index
    %c0_131 = arith.constant 0 : index
    %352 = vector.load %arg2[%c0_130, %c0_131] : memref<16x16xbf16, #tpu.memory_space<vmem>>, vector<16x16xbf16>
    %c0_132 = arith.constant 0 : index
    %c0_133 = arith.constant 0 : index
    %353 = vector.load %arg6[%c0_132, %c0_133] : memref<16x64xbf16, #tpu.memory_space<vmem>>, vector<16x64xbf16>
    %cst_134 = arith.constant dense<0.000000e+00> : vector<16x64xf32>
    %354 = tpu.matmul %352, %353, %cst_134 {dimension_numbers = #tpu.dot_dimension_numbers<[1], [0], [0], [1], [0, 0, 1, 1], [], []>} : vector<16x16xbf16>, vector<16x64xbf16>, vector<16x64xf32> -> vector<16x64xf32>
    %c0_135 = arith.constant 0 : index
    %c0_136 = arith.constant 0 : index
    %355 = vector.load %arg7[%c0_135, %c0_136] : memref<1x64xf32, #tpu.memory_space<vmem>>, vector<1x64xf32>
    %356 = vector.broadcast %355 : vector<1x64xf32> to vector<16x64xf32>
    %357 = arith.addf %354, %356 : vector<16x64xf32>
    %358 = arith.addf %357, %0 : vector<16x64xf32>
    %c0_137 = arith.constant 0 : index
    %c0_138 = arith.constant 0 : index
    %359 = vector.load %arg28[%c0_137, %c0_138] : memref<1x64xf32, #tpu.memory_space<vmem>>, vector<1x64xf32>
    %c0_139 = arith.constant 0 : index
    %c0_140 = arith.constant 0 : index
    %360 = vector.load %arg29[%c0_139, %c0_140] : memref<1x64xf32, #tpu.memory_space<vmem>>, vector<1x64xf32>
    %cst_141 = arith.constant dense<0.000000e+00> : vector<16xf32>
    %361 = vector.multi_reduction <add>, %358, %cst_141 [1] : vector<16x64xf32> to vector<16xf32>
    %362 = vector.shape_cast %361 : vector<16xf32> to vector<16x1xf32>
    %cst_142 = arith.constant 6.400000e+01 : f32
    %363 = vector.broadcast %cst_142 : f32 to vector<16x1xf32>
    %364 = arith.divf %362, %363 : vector<16x1xf32>
    %365 = vector.broadcast %364 : vector<16x1xf32> to vector<16x64xf32>
    %366 = arith.subf %358, %365 : vector<16x64xf32>
    %367 = arith.mulf %366, %366 : vector<16x64xf32>
    %cst_143 = arith.constant dense<0.000000e+00> : vector<16xf32>
    %368 = vector.multi_reduction <add>, %367, %cst_143 [1] : vector<16x64xf32> to vector<16xf32>
    %369 = vector.shape_cast %368 : vector<16xf32> to vector<16x1xf32>
    %cst_144 = arith.constant 6.400000e+01 : f32
    %370 = vector.broadcast %cst_144 : f32 to vector<16x1xf32>
    %371 = arith.divf %369, %370 : vector<16x1xf32>
    %cst_145 = arith.constant 9.99999974E-6 : f32
    %372 = vector.broadcast %cst_145 : f32 to vector<16x1xf32>
    %373 = arith.addf %371, %372 : vector<16x1xf32>
    %374 = math.rsqrt %373 : vector<16x1xf32>
    %375 = vector.broadcast %374 : vector<16x1xf32> to vector<16x64xf32>
    %376 = arith.mulf %366, %375 : vector<16x64xf32>
    %377 = vector.broadcast %359 : vector<1x64xf32> to vector<16x64xf32>
    %378 = arith.mulf %376, %377 : vector<16x64xf32>
    %379 = vector.broadcast %360 : vector<1x64xf32> to vector<16x64xf32>
    %380 = arith.addf %378, %379 : vector<16x64xf32>
    %381 = arith.truncf %380 : vector<16x64xf32> to vector<16x64xbf16>
    %c0_146 = arith.constant 0 : index
    %c0_147 = arith.constant 0 : index
    %382 = vector.load %arg20[%c0_146, %c0_147] : memref<64x192xbf16, #tpu.memory_space<vmem>>, vector<64x192xbf16>
    %cst_148 = arith.constant dense<0.000000e+00> : vector<16x192xf32>
    %383 = tpu.matmul %381, %382, %cst_148 {dimension_numbers = #tpu.dot_dimension_numbers<[1], [0], [0], [1], [0, 0, 1, 1], [], []>} : vector<16x64xbf16>, vector<64x192xbf16>, vector<16x192xf32> -> vector<16x192xf32>
    %c0_149 = arith.constant 0 : index
    %c0_150 = arith.constant 0 : index
    %384 = vector.load %arg21[%c0_149, %c0_150] : memref<1x192xf32, #tpu.memory_space<vmem>>, vector<1x192xf32>
    %385 = vector.broadcast %384 : vector<1x192xf32> to vector<16x192xf32>
    %386 = arith.addf %383, %385 : vector<16x192xf32>
    %387 = vector.extract_strided_slice %386 {offsets = [0, 0], sizes = [16, 16], strides = [1, 1]} : vector<16x192xf32> to vector<16x16xf32>
    %388 = vector.shape_cast %387 : vector<16x16xf32> to vector<2x8x16xf32>
    %389 = vector.extract_strided_slice %386 {offsets = [0, 64], sizes = [16, 16], strides = [1, 1]} : vector<16x192xf32> to vector<16x16xf32>
    %390 = vector.shape_cast %389 : vector<16x16xf32> to vector<2x8x16xf32>
    %391 = vector.extract_strided_slice %386 {offsets = [0, 128], sizes = [16, 16], strides = [1, 1]} : vector<16x192xf32> to vector<16x16xf32>
    %392 = vector.shape_cast %391 : vector<16x16xf32> to vector<2x8x16xf32>
    %393 = arith.truncf %388 : vector<2x8x16xf32> to vector<2x8x16xbf16>
    %394 = arith.truncf %390 : vector<2x8x16xf32> to vector<2x8x16xbf16>
    "tpu.trace_start"() <{level = 10 : i32, message = "bqd,bkd->bqk"}> : () -> ()
    %cst_151 = arith.constant dense<0.000000e+00> : vector<2x8x8xf32>
    %395 = tpu.matmul %393, %394, %cst_151 {dimension_numbers = #tpu.dot_dimension_numbers<[2], [2], [1], [1], [0, 0, 0, 1, 1, 1], [0], [0]>} : vector<2x8x16xbf16>, vector<2x8x16xbf16>, vector<2x8x8xf32> -> vector<2x8x8xf32>
    "tpu.trace_stop"() : () -> ()
    %cst_152 = arith.constant dense<0xFF800000> : vector<2x8xf32>
    %396 = vector.multi_reduction <maximumf>, %395, %cst_152 [2] : vector<2x8x8xf32> to vector<2x8xf32>
    %397 = vector.shape_cast %396 : vector<2x8xf32> to vector<2x8x1xf32>
    %398 = vector.broadcast %397 : vector<2x8x1xf32> to vector<2x8x8xf32>
    %399 = arith.subf %395, %398 : vector<2x8x8xf32>
    %400 = math.exp %399 : vector<2x8x8xf32>
    %cst_153 = arith.constant dense<0.000000e+00> : vector<2x8xf32>
    %401 = vector.multi_reduction <add>, %400, %cst_153 [2] : vector<2x8x8xf32> to vector<2x8xf32>
    %402 = vector.shape_cast %401 : vector<2x8xf32> to vector<2x8x1xf32>
    %403 = vector.broadcast %402 : vector<2x8x1xf32> to vector<2x8x8xf32>
    %404 = arith.divf %400, %403 : vector<2x8x8xf32>
    %405 = arith.truncf %404 : vector<2x8x8xf32> to vector<2x8x8xbf16>
    %406 = arith.truncf %392 : vector<2x8x16xf32> to vector<2x8x16xbf16>
    "tpu.trace_start"() <{level = 10 : i32, message = "bqk,bkd->bqd"}> : () -> ()
    %cst_154 = arith.constant dense<0.000000e+00> : vector<2x8x16xf32>
    %407 = tpu.matmul %405, %406, %cst_154 {dimension_numbers = #tpu.dot_dimension_numbers<[2], [1], [1], [2], [0, 0, 0, 1, 1, 2], [0], [0]>} : vector<2x8x8xbf16>, vector<2x8x16xbf16>, vector<2x8x16xf32> -> vector<2x8x16xf32>
    "tpu.trace_stop"() : () -> ()
    %408 = vector.shape_cast %407 : vector<2x8x16xf32> to vector<16x16xf32>
    %409 = vector.extract_strided_slice %386 {offsets = [0, 16], sizes = [16, 16], strides = [1, 1]} : vector<16x192xf32> to vector<16x16xf32>
    %410 = vector.shape_cast %409 : vector<16x16xf32> to vector<2x8x16xf32>
    %411 = vector.extract_strided_slice %386 {offsets = [0, 80], sizes = [16, 16], strides = [1, 1]} : vector<16x192xf32> to vector<16x16xf32>
    %412 = vector.shape_cast %411 : vector<16x16xf32> to vector<2x8x16xf32>
    %413 = vector.extract_strided_slice %386 {offsets = [0, 144], sizes = [16, 16], strides = [1, 1]} : vector<16x192xf32> to vector<16x16xf32>
    %414 = vector.shape_cast %413 : vector<16x16xf32> to vector<2x8x16xf32>
    %415 = arith.truncf %410 : vector<2x8x16xf32> to vector<2x8x16xbf16>
    %416 = arith.truncf %412 : vector<2x8x16xf32> to vector<2x8x16xbf16>
    "tpu.trace_start"() <{level = 10 : i32, message = "bqd,bkd->bqk"}> : () -> ()
    %cst_155 = arith.constant dense<0.000000e+00> : vector<2x8x8xf32>
    %417 = tpu.matmul %415, %416, %cst_155 {dimension_numbers = #tpu.dot_dimension_numbers<[2], [2], [1], [1], [0, 0, 0, 1, 1, 1], [0], [0]>} : vector<2x8x16xbf16>, vector<2x8x16xbf16>, vector<2x8x8xf32> -> vector<2x8x8xf32>
    "tpu.trace_stop"() : () -> ()
    %cst_156 = arith.constant dense<0xFF800000> : vector<2x8xf32>
    %418 = vector.multi_reduction <maximumf>, %417, %cst_156 [2] : vector<2x8x8xf32> to vector<2x8xf32>
    %419 = vector.shape_cast %418 : vector<2x8xf32> to vector<2x8x1xf32>
    %420 = vector.broadcast %419 : vector<2x8x1xf32> to vector<2x8x8xf32>
    %421 = arith.subf %417, %420 : vector<2x8x8xf32>
    %422 = math.exp %421 : vector<2x8x8xf32>
    %cst_157 = arith.constant dense<0.000000e+00> : vector<2x8xf32>
    %423 = vector.multi_reduction <add>, %422, %cst_157 [2] : vector<2x8x8xf32> to vector<2x8xf32>
    %424 = vector.shape_cast %423 : vector<2x8xf32> to vector<2x8x1xf32>
    %425 = vector.broadcast %424 : vector<2x8x1xf32> to vector<2x8x8xf32>
    %426 = arith.divf %422, %425 : vector<2x8x8xf32>
    %427 = arith.truncf %426 : vector<2x8x8xf32> to vector<2x8x8xbf16>
    %428 = arith.truncf %414 : vector<2x8x16xf32> to vector<2x8x16xbf16>
    "tpu.trace_start"() <{level = 10 : i32, message = "bqk,bkd->bqd"}> : () -> ()
    %cst_158 = arith.constant dense<0.000000e+00> : vector<2x8x16xf32>
    %429 = tpu.matmul %427, %428, %cst_158 {dimension_numbers = #tpu.dot_dimension_numbers<[2], [1], [1], [2], [0, 0, 0, 1, 1, 2], [0], [0]>} : vector<2x8x8xbf16>, vector<2x8x16xbf16>, vector<2x8x16xf32> -> vector<2x8x16xf32>
    "tpu.trace_stop"() : () -> ()
    %430 = vector.shape_cast %429 : vector<2x8x16xf32> to vector<16x16xf32>
    %431 = vector.extract_strided_slice %386 {offsets = [0, 32], sizes = [16, 16], strides = [1, 1]} : vector<16x192xf32> to vector<16x16xf32>
    %432 = vector.shape_cast %431 : vector<16x16xf32> to vector<2x8x16xf32>
    %433 = vector.extract_strided_slice %386 {offsets = [0, 96], sizes = [16, 16], strides = [1, 1]} : vector<16x192xf32> to vector<16x16xf32>
    %434 = vector.shape_cast %433 : vector<16x16xf32> to vector<2x8x16xf32>
    %435 = vector.extract_strided_slice %386 {offsets = [0, 160], sizes = [16, 16], strides = [1, 1]} : vector<16x192xf32> to vector<16x16xf32>
    %436 = vector.shape_cast %435 : vector<16x16xf32> to vector<2x8x16xf32>
    %437 = arith.truncf %432 : vector<2x8x16xf32> to vector<2x8x16xbf16>
    %438 = arith.truncf %434 : vector<2x8x16xf32> to vector<2x8x16xbf16>
    "tpu.trace_start"() <{level = 10 : i32, message = "bqd,bkd->bqk"}> : () -> ()
    %cst_159 = arith.constant dense<0.000000e+00> : vector<2x8x8xf32>
    %439 = tpu.matmul %437, %438, %cst_159 {dimension_numbers = #tpu.dot_dimension_numbers<[2], [2], [1], [1], [0, 0, 0, 1, 1, 1], [0], [0]>} : vector<2x8x16xbf16>, vector<2x8x16xbf16>, vector<2x8x8xf32> -> vector<2x8x8xf32>
    "tpu.trace_stop"() : () -> ()
    %cst_160 = arith.constant dense<0xFF800000> : vector<2x8xf32>
    %440 = vector.multi_reduction <maximumf>, %439, %cst_160 [2] : vector<2x8x8xf32> to vector<2x8xf32>
    %441 = vector.shape_cast %440 : vector<2x8xf32> to vector<2x8x1xf32>
    %442 = vector.broadcast %441 : vector<2x8x1xf32> to vector<2x8x8xf32>
    %443 = arith.subf %439, %442 : vector<2x8x8xf32>
    %444 = math.exp %443 : vector<2x8x8xf32>
    %cst_161 = arith.constant dense<0.000000e+00> : vector<2x8xf32>
    %445 = vector.multi_reduction <add>, %444, %cst_161 [2] : vector<2x8x8xf32> to vector<2x8xf32>
    %446 = vector.shape_cast %445 : vector<2x8xf32> to vector<2x8x1xf32>
    %447 = vector.broadcast %446 : vector<2x8x1xf32> to vector<2x8x8xf32>
    %448 = arith.divf %444, %447 : vector<2x8x8xf32>
    %449 = arith.truncf %448 : vector<2x8x8xf32> to vector<2x8x8xbf16>
    %450 = arith.truncf %436 : vector<2x8x16xf32> to vector<2x8x16xbf16>
    "tpu.trace_start"() <{level = 10 : i32, message = "bqk,bkd->bqd"}> : () -> ()
    %cst_162 = arith.constant dense<0.000000e+00> : vector<2x8x16xf32>
    %451 = tpu.matmul %449, %450, %cst_162 {dimension_numbers = #tpu.dot_dimension_numbers<[2], [1], [1], [2], [0, 0, 0, 1, 1, 2], [0], [0]>} : vector<2x8x8xbf16>, vector<2x8x16xbf16>, vector<2x8x16xf32> -> vector<2x8x16xf32>
    "tpu.trace_stop"() : () -> ()
    %452 = vector.shape_cast %451 : vector<2x8x16xf32> to vector<16x16xf32>
    %453 = vector.extract_strided_slice %386 {offsets = [0, 48], sizes = [16, 16], strides = [1, 1]} : vector<16x192xf32> to vector<16x16xf32>
    %454 = vector.shape_cast %453 : vector<16x16xf32> to vector<2x8x16xf32>
    %455 = vector.extract_strided_slice %386 {offsets = [0, 112], sizes = [16, 16], strides = [1, 1]} : vector<16x192xf32> to vector<16x16xf32>
    %456 = vector.shape_cast %455 : vector<16x16xf32> to vector<2x8x16xf32>
    %457 = vector.extract_strided_slice %386 {offsets = [0, 176], sizes = [16, 16], strides = [1, 1]} : vector<16x192xf32> to vector<16x16xf32>
    %458 = vector.shape_cast %457 : vector<16x16xf32> to vector<2x8x16xf32>
    %459 = arith.truncf %454 : vector<2x8x16xf32> to vector<2x8x16xbf16>
    %460 = arith.truncf %456 : vector<2x8x16xf32> to vector<2x8x16xbf16>
    "tpu.trace_start"() <{level = 10 : i32, message = "bqd,bkd->bqk"}> : () -> ()
    %cst_163 = arith.constant dense<0.000000e+00> : vector<2x8x8xf32>
    %461 = tpu.matmul %459, %460, %cst_163 {dimension_numbers = #tpu.dot_dimension_numbers<[2], [2], [1], [1], [0, 0, 0, 1, 1, 1], [0], [0]>} : vector<2x8x16xbf16>, vector<2x8x16xbf16>, vector<2x8x8xf32> -> vector<2x8x8xf32>
    "tpu.trace_stop"() : () -> ()
    %cst_164 = arith.constant dense<0xFF800000> : vector<2x8xf32>
    %462 = vector.multi_reduction <maximumf>, %461, %cst_164 [2] : vector<2x8x8xf32> to vector<2x8xf32>
    %463 = vector.shape_cast %462 : vector<2x8xf32> to vector<2x8x1xf32>
    %464 = vector.broadcast %463 : vector<2x8x1xf32> to vector<2x8x8xf32>
    %465 = arith.subf %461, %464 : vector<2x8x8xf32>
    %466 = math.exp %465 : vector<2x8x8xf32>
    %cst_165 = arith.constant dense<0.000000e+00> : vector<2x8xf32>
    %467 = vector.multi_reduction <add>, %466, %cst_165 [2] : vector<2x8x8xf32> to vector<2x8xf32>
    %468 = vector.shape_cast %467 : vector<2x8xf32> to vector<2x8x1xf32>
    %469 = vector.broadcast %468 : vector<2x8x1xf32> to vector<2x8x8xf32>
    %470 = arith.divf %466, %469 : vector<2x8x8xf32>
    %471 = arith.truncf %470 : vector<2x8x8xf32> to vector<2x8x8xbf16>
    %472 = arith.truncf %458 : vector<2x8x16xf32> to vector<2x8x16xbf16>
    "tpu.trace_start"() <{level = 10 : i32, message = "bqk,bkd->bqd"}> : () -> ()
    %cst_166 = arith.constant dense<0.000000e+00> : vector<2x8x16xf32>
    %473 = tpu.matmul %471, %472, %cst_166 {dimension_numbers = #tpu.dot_dimension_numbers<[2], [1], [1], [2], [0, 0, 0, 1, 1, 2], [0], [0]>} : vector<2x8x8xbf16>, vector<2x8x16xbf16>, vector<2x8x16xf32> -> vector<2x8x16xf32>
    "tpu.trace_stop"() : () -> ()
    %474 = vector.shape_cast %473 : vector<2x8x16xf32> to vector<16x16xf32>
    %475 = tpu.concatenate %408, %430, %452, %474 in 1 : vector<16x16xf32>, vector<16x16xf32>, vector<16x16xf32>, vector<16x16xf32> -> vector<16x64xf32>
    %476 = arith.truncf %475 : vector<16x64xf32> to vector<16x64xbf16>
    %c0_167 = arith.constant 0 : index
    %c0_168 = arith.constant 0 : index
    %477 = vector.load %arg22[%c0_167, %c0_168] : memref<64x64xbf16, #tpu.memory_space<vmem>>, vector<64x64xbf16>
    %cst_169 = arith.constant dense<0.000000e+00> : vector<16x64xf32>
    %478 = tpu.matmul %476, %477, %cst_169 {dimension_numbers = #tpu.dot_dimension_numbers<[1], [0], [0], [1], [0, 0, 1, 1], [], []>} : vector<16x64xbf16>, vector<64x64xbf16>, vector<16x64xf32> -> vector<16x64xf32>
    %c0_170 = arith.constant 0 : index
    %c0_171 = arith.constant 0 : index
    %479 = vector.load %arg23[%c0_170, %c0_171] : memref<1x64xf32, #tpu.memory_space<vmem>>, vector<1x64xf32>
    %480 = vector.broadcast %479 : vector<1x64xf32> to vector<16x64xf32>
    %481 = arith.addf %478, %480 : vector<16x64xf32>
    %482 = arith.addf %358, %481 : vector<16x64xf32>
    %c0_172 = arith.constant 0 : index
    %c0_173 = arith.constant 0 : index
    %483 = vector.load %arg30[%c0_172, %c0_173] : memref<1x64xf32, #tpu.memory_space<vmem>>, vector<1x64xf32>
    %c0_174 = arith.constant 0 : index
    %c0_175 = arith.constant 0 : index
    %484 = vector.load %arg31[%c0_174, %c0_175] : memref<1x64xf32, #tpu.memory_space<vmem>>, vector<1x64xf32>
    %cst_176 = arith.constant dense<0.000000e+00> : vector<16xf32>
    %485 = vector.multi_reduction <add>, %482, %cst_176 [1] : vector<16x64xf32> to vector<16xf32>
    %486 = vector.shape_cast %485 : vector<16xf32> to vector<16x1xf32>
    %cst_177 = arith.constant 6.400000e+01 : f32
    %487 = vector.broadcast %cst_177 : f32 to vector<16x1xf32>
    %488 = arith.divf %486, %487 : vector<16x1xf32>
    %489 = vector.broadcast %488 : vector<16x1xf32> to vector<16x64xf32>
    %490 = arith.subf %482, %489 : vector<16x64xf32>
    %491 = arith.mulf %490, %490 : vector<16x64xf32>
    %cst_178 = arith.constant dense<0.000000e+00> : vector<16xf32>
    %492 = vector.multi_reduction <add>, %491, %cst_178 [1] : vector<16x64xf32> to vector<16xf32>
    %493 = vector.shape_cast %492 : vector<16xf32> to vector<16x1xf32>
    %cst_179 = arith.constant 6.400000e+01 : f32
    %494 = vector.broadcast %cst_179 : f32 to vector<16x1xf32>
    %495 = arith.divf %493, %494 : vector<16x1xf32>
    %cst_180 = arith.constant 9.99999974E-6 : f32
    %496 = vector.broadcast %cst_180 : f32 to vector<16x1xf32>
    %497 = arith.addf %495, %496 : vector<16x1xf32>
    %498 = math.rsqrt %497 : vector<16x1xf32>
    %499 = vector.broadcast %498 : vector<16x1xf32> to vector<16x64xf32>
    %500 = arith.mulf %490, %499 : vector<16x64xf32>
    %501 = vector.broadcast %483 : vector<1x64xf32> to vector<16x64xf32>
    %502 = arith.mulf %500, %501 : vector<16x64xf32>
    %503 = vector.broadcast %484 : vector<1x64xf32> to vector<16x64xf32>
    %504 = arith.addf %502, %503 : vector<16x64xf32>
    %505 = arith.truncf %504 : vector<16x64xf32> to vector<16x64xbf16>
    %c0_181 = arith.constant 0 : index
    %c0_182 = arith.constant 0 : index
    %506 = vector.load %arg24[%c0_181, %c0_182] : memref<64x128xbf16, #tpu.memory_space<vmem>>, vector<64x128xbf16>
    %cst_183 = arith.constant dense<0.000000e+00> : vector<16x128xf32>
    %507 = tpu.matmul %505, %506, %cst_183 {dimension_numbers = #tpu.dot_dimension_numbers<[1], [0], [0], [1], [0, 0, 1, 1], [], []>} : vector<16x64xbf16>, vector<64x128xbf16>, vector<16x128xf32> -> vector<16x128xf32>
    %c0_184 = arith.constant 0 : index
    %c0_185 = arith.constant 0 : index
    %508 = vector.load %arg25[%c0_184, %c0_185] : memref<1x128xf32, #tpu.memory_space<vmem>>, vector<1x128xf32>
    %509 = vector.broadcast %508 : vector<1x128xf32> to vector<16x128xf32>
    %510 = arith.addf %507, %509 : vector<16x128xf32>
    %cst_186 = arith.constant 0.000000e+00 : f32
    %511 = vector.broadcast %cst_186 : f32 to vector<16x128xf32>
    %512 = arith.maximumf %510, %511 : vector<16x128xf32>
    %513 = arith.truncf %512 : vector<16x128xf32> to vector<16x128xbf16>
    %c0_187 = arith.constant 0 : index
    %c0_188 = arith.constant 0 : index
    %514 = vector.load %arg26[%c0_187, %c0_188] : memref<128x64xbf16, #tpu.memory_space<vmem>>, vector<128x64xbf16>
    %cst_189 = arith.constant dense<0.000000e+00> : vector<16x64xf32>
    %515 = tpu.matmul %513, %514, %cst_189 {dimension_numbers = #tpu.dot_dimension_numbers<[1], [0], [0], [1], [0, 0, 1, 1], [], []>} : vector<16x128xbf16>, vector<128x64xbf16>, vector<16x64xf32> -> vector<16x64xf32>
    %c0_190 = arith.constant 0 : index
    %c0_191 = arith.constant 0 : index
    %516 = vector.load %arg27[%c0_190, %c0_191] : memref<1x64xf32, #tpu.memory_space<vmem>>, vector<1x64xf32>
    %517 = vector.broadcast %516 : vector<1x64xf32> to vector<16x64xf32>
    %518 = arith.addf %515, %517 : vector<16x64xf32>
    %519 = arith.addf %482, %518 : vector<16x64xf32>
    %c0_192 = arith.constant 0 : index
    %c0_193 = arith.constant 0 : index
    %c0_194 = arith.constant 0 : index
    %c0_195 = arith.constant 0 : index
    %520 = vector.load %arg41[%c0_192, %c0_193, %c0_194, %c0_195] : memref<12x2x8x8xf32, #tpu.memory_space<vmem>>, vector<1x2x8x8xf32>
    %521 = vector.shape_cast %520 : vector<1x2x8x8xf32> to vector<2x8x8xf32>
    %522 = vector.shape_cast %404 : vector<2x8x8xf32> to vector<1x2x8x8xf32>
    tpu.vector_store %arg41[%c0_192, %c0_193, %c0_194, %c0_195], %522 {strides = array<i32>} : memref<12x2x8x8xf32, #tpu.memory_space<vmem>>, vector<1x2x8x8xf32>,
    %c1_196 = arith.constant 1 : index
    %c0_197 = arith.constant 0 : index
    %c0_198 = arith.constant 0 : index
    %c0_199 = arith.constant 0 : index
    %523 = vector.load %arg41[%c1_196, %c0_197, %c0_198, %c0_199] : memref<12x2x8x8xf32, #tpu.memory_space<vmem>>, vector<1x2x8x8xf32>
    %524 = vector.shape_cast %523 : vector<1x2x8x8xf32> to vector<2x8x8xf32>
    %525 = vector.shape_cast %426 : vector<2x8x8xf32> to vector<1x2x8x8xf32>
    tpu.vector_store %arg41[%c1_196, %c0_197, %c0_198, %c0_199], %525 {strides = array<i32>} : memref<12x2x8x8xf32, #tpu.memory_space<vmem>>, vector<1x2x8x8xf32>,
    %c2 = arith.constant 2 : index
    %c0_200 = arith.constant 0 : index
    %c0_201 = arith.constant 0 : index
    %c0_202 = arith.constant 0 : index
    %526 = vector.load %arg41[%c2, %c0_200, %c0_201, %c0_202] : memref<12x2x8x8xf32, #tpu.memory_space<vmem>>, vector<1x2x8x8xf32>
    %527 = vector.shape_cast %526 : vector<1x2x8x8xf32> to vector<2x8x8xf32>
    %528 = vector.shape_cast %448 : vector<2x8x8xf32> to vector<1x2x8x8xf32>
    tpu.vector_store %arg41[%c2, %c0_200, %c0_201, %c0_202], %528 {strides = array<i32>} : memref<12x2x8x8xf32, #tpu.memory_space<vmem>>, vector<1x2x8x8xf32>,
    %c3 = arith.constant 3 : index
    %c0_203 = arith.constant 0 : index
    %c0_204 = arith.constant 0 : index
    %c0_205 = arith.constant 0 : index
    %529 = vector.load %arg41[%c3, %c0_203, %c0_204, %c0_205] : memref<12x2x8x8xf32, #tpu.memory_space<vmem>>, vector<1x2x8x8xf32>
    %530 = vector.shape_cast %529 : vector<1x2x8x8xf32> to vector<2x8x8xf32>
    %531 = vector.shape_cast %470 : vector<2x8x8xf32> to vector<1x2x8x8xf32>
    tpu.vector_store %arg41[%c3, %c0_203, %c0_204, %c0_205], %531 {strides = array<i32>} : memref<12x2x8x8xf32, #tpu.memory_space<vmem>>, vector<1x2x8x8xf32>,
    %c0_206 = arith.constant 0 : index
    %c0_207 = arith.constant 0 : index
    %532 = vector.load %arg28[%c0_206, %c0_207] : memref<1x64xf32, #tpu.memory_space<vmem>>, vector<1x64xf32>
    %c0_208 = arith.constant 0 : index
    %c0_209 = arith.constant 0 : index
    %533 = vector.load %arg29[%c0_208, %c0_209] : memref<1x64xf32, #tpu.memory_space<vmem>>, vector<1x64xf32>
    %cst_210 = arith.constant dense<0.000000e+00> : vector<16xf32>
    %534 = vector.multi_reduction <add>, %519, %cst_210 [1] : vector<16x64xf32> to vector<16xf32>
    %535 = vector.shape_cast %534 : vector<16xf32> to vector<16x1xf32>
    %cst_211 = arith.constant 6.400000e+01 : f32
    %536 = vector.broadcast %cst_211 : f32 to vector<16x1xf32>
    %537 = arith.divf %535, %536 : vector<16x1xf32>
    %538 = vector.broadcast %537 : vector<16x1xf32> to vector<16x64xf32>
    %539 = arith.subf %519, %538 : vector<16x64xf32>
    %540 = arith.mulf %539, %539 : vector<16x64xf32>
    %cst_212 = arith.constant dense<0.000000e+00> : vector<16xf32>
    %541 = vector.multi_reduction <add>, %540, %cst_212 [1] : vector<16x64xf32> to vector<16xf32>
    %542 = vector.shape_cast %541 : vector<16xf32> to vector<16x1xf32>
    %cst_213 = arith.constant 6.400000e+01 : f32
    %543 = vector.broadcast %cst_213 : f32 to vector<16x1xf32>
    %544 = arith.divf %542, %543 : vector<16x1xf32>
    %cst_214 = arith.constant 9.99999974E-6 : f32
    %545 = vector.broadcast %cst_214 : f32 to vector<16x1xf32>
    %546 = arith.addf %544, %545 : vector<16x1xf32>
    %547 = math.rsqrt %546 : vector<16x1xf32>
    %548 = vector.broadcast %547 : vector<16x1xf32> to vector<16x64xf32>
    %549 = arith.mulf %539, %548 : vector<16x64xf32>
    %550 = vector.broadcast %532 : vector<1x64xf32> to vector<16x64xf32>
    %551 = arith.mulf %549, %550 : vector<16x64xf32>
    %552 = vector.broadcast %533 : vector<1x64xf32> to vector<16x64xf32>
    %553 = arith.addf %551, %552 : vector<16x64xf32>
    %554 = arith.truncf %553 : vector<16x64xf32> to vector<16x64xbf16>
    %c0_215 = arith.constant 0 : index
    %c0_216 = arith.constant 0 : index
    %555 = vector.load %arg20[%c0_215, %c0_216] : memref<64x192xbf16, #tpu.memory_space<vmem>>, vector<64x192xbf16>
    %cst_217 = arith.constant dense<0.000000e+00> : vector<16x192xf32>
    %556 = tpu.matmul %554, %555, %cst_217 {dimension_numbers = #tpu.dot_dimension_numbers<[1], [0], [0], [1], [0, 0, 1, 1], [], []>} : vector<16x64xbf16>, vector<64x192xbf16>, vector<16x192xf32> -> vector<16x192xf32>
    %c0_218 = arith.constant 0 : index
    %c0_219 = arith.constant 0 : index
    %557 = vector.load %arg21[%c0_218, %c0_219] : memref<1x192xf32, #tpu.memory_space<vmem>>, vector<1x192xf32>
    %558 = vector.broadcast %557 : vector<1x192xf32> to vector<16x192xf32>
    %559 = arith.addf %556, %558 : vector<16x192xf32>
    %560 = vector.extract_strided_slice %559 {offsets = [0, 0], sizes = [16, 16], strides = [1, 1]} : vector<16x192xf32> to vector<16x16xf32>
    %561 = vector.shape_cast %560 : vector<16x16xf32> to vector<2x8x16xf32>
    %562 = vector.extract_strided_slice %559 {offsets = [0, 64], sizes = [16, 16], strides = [1, 1]} : vector<16x192xf32> to vector<16x16xf32>
    %563 = vector.shape_cast %562 : vector<16x16xf32> to vector<2x8x16xf32>
    %564 = vector.extract_strided_slice %559 {offsets = [0, 128], sizes = [16, 16], strides = [1, 1]} : vector<16x192xf32> to vector<16x16xf32>
    %565 = vector.shape_cast %564 : vector<16x16xf32> to vector<2x8x16xf32>
    %566 = arith.truncf %561 : vector<2x8x16xf32> to vector<2x8x16xbf16>
    %567 = arith.truncf %563 : vector<2x8x16xf32> to vector<2x8x16xbf16>
    "tpu.trace_start"() <{level = 10 : i32, message = "bqd,bkd->bqk"}> : () -> ()
    %cst_220 = arith.constant dense<0.000000e+00> : vector<2x8x8xf32>
    %568 = tpu.matmul %566, %567, %cst_220 {dimension_numbers = #tpu.dot_dimension_numbers<[2], [2], [1], [1], [0, 0, 0, 1, 1, 1], [0], [0]>} : vector<2x8x16xbf16>, vector<2x8x16xbf16>, vector<2x8x8xf32> -> vector<2x8x8xf32>
    "tpu.trace_stop"() : () -> ()
    %cst_221 = arith.constant dense<0xFF800000> : vector<2x8xf32>
    %569 = vector.multi_reduction <maximumf>, %568, %cst_221 [2] : vector<2x8x8xf32> to vector<2x8xf32>
    %570 = vector.shape_cast %569 : vector<2x8xf32> to vector<2x8x1xf32>
    %571 = vector.broadcast %570 : vector<2x8x1xf32> to vector<2x8x8xf32>
    %572 = arith.subf %568, %571 : vector<2x8x8xf32>
    %573 = math.exp %572 : vector<2x8x8xf32>
    %cst_222 = arith.constant dense<0.000000e+00> : vector<2x8xf32>
    %574 = vector.multi_reduction <add>, %573, %cst_222 [2] : vector<2x8x8xf32> to vector<2x8xf32>
    %575 = vector.shape_cast %574 : vector<2x8xf32> to vector<2x8x1xf32>
    %576 = vector.broadcast %575 : vector<2x8x1xf32> to vector<2x8x8xf32>
    %577 = arith.divf %573, %576 : vector<2x8x8xf32>
    %578 = arith.truncf %577 : vector<2x8x8xf32> to vector<2x8x8xbf16>
    %579 = arith.truncf %565 : vector<2x8x16xf32> to vector<2x8x16xbf16>
    "tpu.trace_start"() <{level = 10 : i32, message = "bqk,bkd->bqd"}> : () -> ()
    %cst_223 = arith.constant dense<0.000000e+00> : vector<2x8x16xf32>
    %580 = tpu.matmul %578, %579, %cst_223 {dimension_numbers = #tpu.dot_dimension_numbers<[2], [1], [1], [2], [0, 0, 0, 1, 1, 2], [0], [0]>} : vector<2x8x8xbf16>, vector<2x8x16xbf16>, vector<2x8x16xf32> -> vector<2x8x16xf32>
    "tpu.trace_stop"() : () -> ()
    %581 = vector.shape_cast %580 : vector<2x8x16xf32> to vector<16x16xf32>
    %582 = vector.extract_strided_slice %559 {offsets = [0, 16], sizes = [16, 16], strides = [1, 1]} : vector<16x192xf32> to vector<16x16xf32>
    %583 = vector.shape_cast %582 : vector<16x16xf32> to vector<2x8x16xf32>
    %584 = vector.extract_strided_slice %559 {offsets = [0, 80], sizes = [16, 16], strides = [1, 1]} : vector<16x192xf32> to vector<16x16xf32>
    %585 = vector.shape_cast %584 : vector<16x16xf32> to vector<2x8x16xf32>
    %586 = vector.extract_strided_slice %559 {offsets = [0, 144], sizes = [16, 16], strides = [1, 1]} : vector<16x192xf32> to vector<16x16xf32>
    %587 = vector.shape_cast %586 : vector<16x16xf32> to vector<2x8x16xf32>
    %588 = arith.truncf %583 : vector<2x8x16xf32> to vector<2x8x16xbf16>
    %589 = arith.truncf %585 : vector<2x8x16xf32> to vector<2x8x16xbf16>
    "tpu.trace_start"() <{level = 10 : i32, message = "bqd,bkd->bqk"}> : () -> ()
    %cst_224 = arith.constant dense<0.000000e+00> : vector<2x8x8xf32>
    %590 = tpu.matmul %588, %589, %cst_224 {dimension_numbers = #tpu.dot_dimension_numbers<[2], [2], [1], [1], [0, 0, 0, 1, 1, 1], [0], [0]>} : vector<2x8x16xbf16>, vector<2x8x16xbf16>, vector<2x8x8xf32> -> vector<2x8x8xf32>
    "tpu.trace_stop"() : () -> ()
    %cst_225 = arith.constant dense<0xFF800000> : vector<2x8xf32>
    %591 = vector.multi_reduction <maximumf>, %590, %cst_225 [2] : vector<2x8x8xf32> to vector<2x8xf32>
    %592 = vector.shape_cast %591 : vector<2x8xf32> to vector<2x8x1xf32>
    %593 = vector.broadcast %592 : vector<2x8x1xf32> to vector<2x8x8xf32>
    %594 = arith.subf %590, %593 : vector<2x8x8xf32>
    %595 = math.exp %594 : vector<2x8x8xf32>
    %cst_226 = arith.constant dense<0.000000e+00> : vector<2x8xf32>
    %596 = vector.multi_reduction <add>, %595, %cst_226 [2] : vector<2x8x8xf32> to vector<2x8xf32>
    %597 = vector.shape_cast %596 : vector<2x8xf32> to vector<2x8x1xf32>
    %598 = vector.broadcast %597 : vector<2x8x1xf32> to vector<2x8x8xf32>
    %599 = arith.divf %595, %598 : vector<2x8x8xf32>
    %600 = arith.truncf %599 : vector<2x8x8xf32> to vector<2x8x8xbf16>
    %601 = arith.truncf %587 : vector<2x8x16xf32> to vector<2x8x16xbf16>
    "tpu.trace_start"() <{level = 10 : i32, message = "bqk,bkd->bqd"}> : () -> ()
    %cst_227 = arith.constant dense<0.000000e+00> : vector<2x8x16xf32>
    %602 = tpu.matmul %600, %601, %cst_227 {dimension_numbers = #tpu.dot_dimension_numbers<[2], [1], [1], [2], [0, 0, 0, 1, 1, 2], [0], [0]>} : vector<2x8x8xbf16>, vector<2x8x16xbf16>, vector<2x8x16xf32> -> vector<2x8x16xf32>
    "tpu.trace_stop"() : () -> ()
    %603 = vector.shape_cast %602 : vector<2x8x16xf32> to vector<16x16xf32>
    %604 = vector.extract_strided_slice %559 {offsets = [0, 32], sizes = [16, 16], strides = [1, 1]} : vector<16x192xf32> to vector<16x16xf32>
    %605 = vector.shape_cast %604 : vector<16x16xf32> to vector<2x8x16xf32>
    %606 = vector.extract_strided_slice %559 {offsets = [0, 96], sizes = [16, 16], strides = [1, 1]} : vector<16x192xf32> to vector<16x16xf32>
    %607 = vector.shape_cast %606 : vector<16x16xf32> to vector<2x8x16xf32>
    %608 = vector.extract_strided_slice %559 {offsets = [0, 160], sizes = [16, 16], strides = [1, 1]} : vector<16x192xf32> to vector<16x16xf32>
    %609 = vector.shape_cast %608 : vector<16x16xf32> to vector<2x8x16xf32>
    %610 = arith.truncf %605 : vector<2x8x16xf32> to vector<2x8x16xbf16>
    %611 = arith.truncf %607 : vector<2x8x16xf32> to vector<2x8x16xbf16>
    "tpu.trace_start"() <{level = 10 : i32, message = "bqd,bkd->bqk"}> : () -> ()
    %cst_228 = arith.constant dense<0.000000e+00> : vector<2x8x8xf32>
    %612 = tpu.matmul %610, %611, %cst_228 {dimension_numbers = #tpu.dot_dimension_numbers<[2], [2], [1], [1], [0, 0, 0, 1, 1, 1], [0], [0]>} : vector<2x8x16xbf16>, vector<2x8x16xbf16>, vector<2x8x8xf32> -> vector<2x8x8xf32>
    "tpu.trace_stop"() : () -> ()
    %cst_229 = arith.constant dense<0xFF800000> : vector<2x8xf32>
    %613 = vector.multi_reduction <maximumf>, %612, %cst_229 [2] : vector<2x8x8xf32> to vector<2x8xf32>
    %614 = vector.shape_cast %613 : vector<2x8xf32> to vector<2x8x1xf32>
    %615 = vector.broadcast %614 : vector<2x8x1xf32> to vector<2x8x8xf32>
    %616 = arith.subf %612, %615 : vector<2x8x8xf32>
    %617 = math.exp %616 : vector<2x8x8xf32>
    %cst_230 = arith.constant dense<0.000000e+00> : vector<2x8xf32>
    %618 = vector.multi_reduction <add>, %617, %cst_230 [2] : vector<2x8x8xf32> to vector<2x8xf32>
    %619 = vector.shape_cast %618 : vector<2x8xf32> to vector<2x8x1xf32>
    %620 = vector.broadcast %619 : vector<2x8x1xf32> to vector<2x8x8xf32>
    %621 = arith.divf %617, %620 : vector<2x8x8xf32>
    %622 = arith.truncf %621 : vector<2x8x8xf32> to vector<2x8x8xbf16>
    %623 = arith.truncf %609 : vector<2x8x16xf32> to vector<2x8x16xbf16>
    "tpu.trace_start"() <{level = 10 : i32, message = "bqk,bkd->bqd"}> : () -> ()
    %cst_231 = arith.constant dense<0.000000e+00> : vector<2x8x16xf32>
    %624 = tpu.matmul %622, %623, %cst_231 {dimension_numbers = #tpu.dot_dimension_numbers<[2], [1], [1], [2], [0, 0, 0, 1, 1, 2], [0], [0]>} : vector<2x8x8xbf16>, vector<2x8x16xbf16>, vector<2x8x16xf32> -> vector<2x8x16xf32>
    "tpu.trace_stop"() : () -> ()
    %625 = vector.shape_cast %624 : vector<2x8x16xf32> to vector<16x16xf32>
    %626 = vector.extract_strided_slice %559 {offsets = [0, 48], sizes = [16, 16], strides = [1, 1]} : vector<16x192xf32> to vector<16x16xf32>
    %627 = vector.shape_cast %626 : vector<16x16xf32> to vector<2x8x16xf32>
    %628 = vector.extract_strided_slice %559 {offsets = [0, 112], sizes = [16, 16], strides = [1, 1]} : vector<16x192xf32> to vector<16x16xf32>
    %629 = vector.shape_cast %628 : vector<16x16xf32> to vector<2x8x16xf32>
    %630 = vector.extract_strided_slice %559 {offsets = [0, 176], sizes = [16, 16], strides = [1, 1]} : vector<16x192xf32> to vector<16x16xf32>
    %631 = vector.shape_cast %630 : vector<16x16xf32> to vector<2x8x16xf32>
    %632 = arith.truncf %627 : vector<2x8x16xf32> to vector<2x8x16xbf16>
    %633 = arith.truncf %629 : vector<2x8x16xf32> to vector<2x8x16xbf16>
    "tpu.trace_start"() <{level = 10 : i32, message = "bqd,bkd->bqk"}> : () -> ()
    %cst_232 = arith.constant dense<0.000000e+00> : vector<2x8x8xf32>
    %634 = tpu.matmul %632, %633, %cst_232 {dimension_numbers = #tpu.dot_dimension_numbers<[2], [2], [1], [1], [0, 0, 0, 1, 1, 1], [0], [0]>} : vector<2x8x16xbf16>, vector<2x8x16xbf16>, vector<2x8x8xf32> -> vector<2x8x8xf32>
    "tpu.trace_stop"() : () -> ()
    %cst_233 = arith.constant dense<0xFF800000> : vector<2x8xf32>
    %635 = vector.multi_reduction <maximumf>, %634, %cst_233 [2] : vector<2x8x8xf32> to vector<2x8xf32>
    %636 = vector.shape_cast %635 : vector<2x8xf32> to vector<2x8x1xf32>
    %637 = vector.broadcast %636 : vector<2x8x1xf32> to vector<2x8x8xf32>
    %638 = arith.subf %634, %637 : vector<2x8x8xf32>
    %639 = math.exp %638 : vector<2x8x8xf32>
    %cst_234 = arith.constant dense<0.000000e+00> : vector<2x8xf32>
    %640 = vector.multi_reduction <add>, %639, %cst_234 [2] : vector<2x8x8xf32> to vector<2x8xf32>
    %641 = vector.shape_cast %640 : vector<2x8xf32> to vector<2x8x1xf32>
    %642 = vector.broadcast %641 : vector<2x8x1xf32> to vector<2x8x8xf32>
    %643 = arith.divf %639, %642 : vector<2x8x8xf32>
    %644 = arith.truncf %643 : vector<2x8x8xf32> to vector<2x8x8xbf16>
    %645 = arith.truncf %631 : vector<2x8x16xf32> to vector<2x8x16xbf16>
    "tpu.trace_start"() <{level = 10 : i32, message = "bqk,bkd->bqd"}> : () -> ()
    %cst_235 = arith.constant dense<0.000000e+00> : vector<2x8x16xf32>
    %646 = tpu.matmul %644, %645, %cst_235 {dimension_numbers = #tpu.dot_dimension_numbers<[2], [1], [1], [2], [0, 0, 0, 1, 1, 2], [0], [0]>} : vector<2x8x8xbf16>, vector<2x8x16xbf16>, vector<2x8x16xf32> -> vector<2x8x16xf32>
    "tpu.trace_stop"() : () -> ()
    %647 = vector.shape_cast %646 : vector<2x8x16xf32> to vector<16x16xf32>
    %648 = tpu.concatenate %581, %603, %625, %647 in 1 : vector<16x16xf32>, vector<16x16xf32>, vector<16x16xf32>, vector<16x16xf32> -> vector<16x64xf32>
    %649 = arith.truncf %648 : vector<16x64xf32> to vector<16x64xbf16>
    %c0_236 = arith.constant 0 : index
    %c0_237 = arith.constant 0 : index
    %650 = vector.load %arg22[%c0_236, %c0_237] : memref<64x64xbf16, #tpu.memory_space<vmem>>, vector<64x64xbf16>
    %cst_238 = arith.constant dense<0.000000e+00> : vector<16x64xf32>
    %651 = tpu.matmul %649, %650, %cst_238 {dimension_numbers = #tpu.dot_dimension_numbers<[1], [0], [0], [1], [0, 0, 1, 1], [], []>} : vector<16x64xbf16>, vector<64x64xbf16>, vector<16x64xf32> -> vector<16x64xf32>
    %c0_239 = arith.constant 0 : index
    %c0_240 = arith.constant 0 : index
    %652 = vector.load %arg23[%c0_239, %c0_240] : memref<1x64xf32, #tpu.memory_space<vmem>>, vector<1x64xf32>
    %653 = vector.broadcast %652 : vector<1x64xf32> to vector<16x64xf32>
    %654 = arith.addf %651, %653 : vector<16x64xf32>
    %655 = arith.addf %519, %654 : vector<16x64xf32>
    %c0_241 = arith.constant 0 : index
    %c0_242 = arith.constant 0 : index
    %656 = vector.load %arg30[%c0_241, %c0_242] : memref<1x64xf32, #tpu.memory_space<vmem>>, vector<1x64xf32>
    %c0_243 = arith.constant 0 : index
    %c0_244 = arith.constant 0 : index
    %657 = vector.load %arg31[%c0_243, %c0_244] : memref<1x64xf32, #tpu.memory_space<vmem>>, vector<1x64xf32>
    %cst_245 = arith.constant dense<0.000000e+00> : vector<16xf32>
    %658 = vector.multi_reduction <add>, %655, %cst_245 [1] : vector<16x64xf32> to vector<16xf32>
    %659 = vector.shape_cast %658 : vector<16xf32> to vector<16x1xf32>
    %cst_246 = arith.constant 6.400000e+01 : f32
    %660 = vector.broadcast %cst_246 : f32 to vector<16x1xf32>
    %661 = arith.divf %659, %660 : vector<16x1xf32>
    %662 = vector.broadcast %661 : vector<16x1xf32> to vector<16x64xf32>
    %663 = arith.subf %655, %662 : vector<16x64xf32>
    %664 = arith.mulf %663, %663 : vector<16x64xf32>
    %cst_247 = arith.constant dense<0.000000e+00> : vector<16xf32>
    %665 = vector.multi_reduction <add>, %664, %cst_247 [1] : vector<16x64xf32> to vector<16xf32>
    %666 = vector.shape_cast %665 : vector<16xf32> to vector<16x1xf32>
    %cst_248 = arith.constant 6.400000e+01 : f32
    %667 = vector.broadcast %cst_248 : f32 to vector<16x1xf32>
    %668 = arith.divf %666, %667 : vector<16x1xf32>
    %cst_249 = arith.constant 9.99999974E-6 : f32
    %669 = vector.broadcast %cst_249 : f32 to vector<16x1xf32>
    %670 = arith.addf %668, %669 : vector<16x1xf32>
    %671 = math.rsqrt %670 : vector<16x1xf32>
    %672 = vector.broadcast %671 : vector<16x1xf32> to vector<16x64xf32>
    %673 = arith.mulf %663, %672 : vector<16x64xf32>
    %674 = vector.broadcast %656 : vector<1x64xf32> to vector<16x64xf32>
    %675 = arith.mulf %673, %674 : vector<16x64xf32>
    %676 = vector.broadcast %657 : vector<1x64xf32> to vector<16x64xf32>
    %677 = arith.addf %675, %676 : vector<16x64xf32>
    %678 = arith.truncf %677 : vector<16x64xf32> to vector<16x64xbf16>
    %c0_250 = arith.constant 0 : index
    %c0_251 = arith.constant 0 : index
    %679 = vector.load %arg24[%c0_250, %c0_251] : memref<64x128xbf16, #tpu.memory_space<vmem>>, vector<64x128xbf16>
    %cst_252 = arith.constant dense<0.000000e+00> : vector<16x128xf32>
    %680 = tpu.matmul %678, %679, %cst_252 {dimension_numbers = #tpu.dot_dimension_numbers<[1], [0], [0], [1], [0, 0, 1, 1], [], []>} : vector<16x64xbf16>, vector<64x128xbf16>, vector<16x128xf32> -> vector<16x128xf32>
    %c0_253 = arith.constant 0 : index
    %c0_254 = arith.constant 0 : index
    %681 = vector.load %arg25[%c0_253, %c0_254] : memref<1x128xf32, #tpu.memory_space<vmem>>, vector<1x128xf32>
    %682 = vector.broadcast %681 : vector<1x128xf32> to vector<16x128xf32>
    %683 = arith.addf %680, %682 : vector<16x128xf32>
    %cst_255 = arith.constant 0.000000e+00 : f32
    %684 = vector.broadcast %cst_255 : f32 to vector<16x128xf32>
    %685 = arith.maximumf %683, %684 : vector<16x128xf32>
    %686 = arith.truncf %685 : vector<16x128xf32> to vector<16x128xbf16>
    %c0_256 = arith.constant 0 : index
    %c0_257 = arith.constant 0 : index
    %687 = vector.load %arg26[%c0_256, %c0_257] : memref<128x64xbf16, #tpu.memory_space<vmem>>, vector<128x64xbf16>
    %cst_258 = arith.constant dense<0.000000e+00> : vector<16x64xf32>
    %688 = tpu.matmul %686, %687, %cst_258 {dimension_numbers = #tpu.dot_dimension_numbers<[1], [0], [0], [1], [0, 0, 1, 1], [], []>} : vector<16x128xbf16>, vector<128x64xbf16>, vector<16x64xf32> -> vector<16x64xf32>
    %c0_259 = arith.constant 0 : index
    %c0_260 = arith.constant 0 : index
    %689 = vector.load %arg27[%c0_259, %c0_260] : memref<1x64xf32, #tpu.memory_space<vmem>>, vector<1x64xf32>
    %690 = vector.broadcast %689 : vector<1x64xf32> to vector<16x64xf32>
    %691 = arith.addf %688, %690 : vector<16x64xf32>
    %692 = arith.addf %655, %691 : vector<16x64xf32>
    %c4 = arith.constant 4 : index
    %c0_261 = arith.constant 0 : index
    %c0_262 = arith.constant 0 : index
    %c0_263 = arith.constant 0 : index
    %693 = vector.load %arg41[%c4, %c0_261, %c0_262, %c0_263] : memref<12x2x8x8xf32, #tpu.memory_space<vmem>>, vector<1x2x8x8xf32>
    %694 = vector.shape_cast %693 : vector<1x2x8x8xf32> to vector<2x8x8xf32>
    %695 = vector.shape_cast %577 : vector<2x8x8xf32> to vector<1x2x8x8xf32>
    tpu.vector_store %arg41[%c4, %c0_261, %c0_262, %c0_263], %695 {strides = array<i32>} : memref<12x2x8x8xf32, #tpu.memory_space<vmem>>, vector<1x2x8x8xf32>,
    %c5 = arith.constant 5 : index
    %c0_264 = arith.constant 0 : index
    %c0_265 = arith.constant 0 : index
    %c0_266 = arith.constant 0 : index
    %696 = vector.load %arg41[%c5, %c0_264, %c0_265, %c0_266] : memref<12x2x8x8xf32, #tpu.memory_space<vmem>>, vector<1x2x8x8xf32>
    %697 = vector.shape_cast %696 : vector<1x2x8x8xf32> to vector<2x8x8xf32>
    %698 = vector.shape_cast %599 : vector<2x8x8xf32> to vector<1x2x8x8xf32>
    tpu.vector_store %arg41[%c5, %c0_264, %c0_265, %c0_266], %698 {strides = array<i32>} : memref<12x2x8x8xf32, #tpu.memory_space<vmem>>, vector<1x2x8x8xf32>,
    %c6 = arith.constant 6 : index
    %c0_267 = arith.constant 0 : index
    %c0_268 = arith.constant 0 : index
    %c0_269 = arith.constant 0 : index
    %699 = vector.load %arg41[%c6, %c0_267, %c0_268, %c0_269] : memref<12x2x8x8xf32, #tpu.memory_space<vmem>>, vector<1x2x8x8xf32>
    %700 = vector.shape_cast %699 : vector<1x2x8x8xf32> to vector<2x8x8xf32>
    %701 = vector.shape_cast %621 : vector<2x8x8xf32> to vector<1x2x8x8xf32>
    tpu.vector_store %arg41[%c6, %c0_267, %c0_268, %c0_269], %701 {strides = array<i32>} : memref<12x2x8x8xf32, #tpu.memory_space<vmem>>, vector<1x2x8x8xf32>,
    %c7 = arith.constant 7 : index
    %c0_270 = arith.constant 0 : index
    %c0_271 = arith.constant 0 : index
    %c0_272 = arith.constant 0 : index
    %702 = vector.load %arg41[%c7, %c0_270, %c0_271, %c0_272] : memref<12x2x8x8xf32, #tpu.memory_space<vmem>>, vector<1x2x8x8xf32>
    %703 = vector.shape_cast %702 : vector<1x2x8x8xf32> to vector<2x8x8xf32>
    %704 = vector.shape_cast %643 : vector<2x8x8xf32> to vector<1x2x8x8xf32>
    tpu.vector_store %arg41[%c7, %c0_270, %c0_271, %c0_272], %704 {strides = array<i32>} : memref<12x2x8x8xf32, #tpu.memory_space<vmem>>, vector<1x2x8x8xf32>,
    %c0_273 = arith.constant 0 : index
    %c0_274 = arith.constant 0 : index
    %705 = vector.load %arg28[%c0_273, %c0_274] : memref<1x64xf32, #tpu.memory_space<vmem>>, vector<1x64xf32>
    %c0_275 = arith.constant 0 : index
    %c0_276 = arith.constant 0 : index
    %706 = vector.load %arg29[%c0_275, %c0_276] : memref<1x64xf32, #tpu.memory_space<vmem>>, vector<1x64xf32>
    %cst_277 = arith.constant dense<0.000000e+00> : vector<16xf32>
    %707 = vector.multi_reduction <add>, %692, %cst_277 [1] : vector<16x64xf32> to vector<16xf32>
    %708 = vector.shape_cast %707 : vector<16xf32> to vector<16x1xf32>
    %cst_278 = arith.constant 6.400000e+01 : f32
    %709 = vector.broadcast %cst_278 : f32 to vector<16x1xf32>
    %710 = arith.divf %708, %709 : vector<16x1xf32>
    %711 = vector.broadcast %710 : vector<16x1xf32> to vector<16x64xf32>
    %712 = arith.subf %692, %711 : vector<16x64xf32>
    %713 = arith.mulf %712, %712 : vector<16x64xf32>
    %cst_279 = arith.constant dense<0.000000e+00> : vector<16xf32>
    %714 = vector.multi_reduction <add>, %713, %cst_279 [1] : vector<16x64xf32> to vector<16xf32>
    %715 = vector.shape_cast %714 : vector<16xf32> to vector<16x1xf32>
    %cst_280 = arith.constant 6.400000e+01 : f32
    %716 = vector.broadcast %cst_280 : f32 to vector<16x1xf32>
    %717 = arith.divf %715, %716 : vector<16x1xf32>
    %cst_281 = arith.constant 9.99999974E-6 : f32
    %718 = vector.broadcast %cst_281 : f32 to vector<16x1xf32>
    %719 = arith.addf %717, %718 : vector<16x1xf32>
    %720 = math.rsqrt %719 : vector<16x1xf32>
    %721 = vector.broadcast %720 : vector<16x1xf32> to vector<16x64xf32>
    %722 = arith.mulf %712, %721 : vector<16x64xf32>
    %723 = vector.broadcast %705 : vector<1x64xf32> to vector<16x64xf32>
    %724 = arith.mulf %722, %723 : vector<16x64xf32>
    %725 = vector.broadcast %706 : vector<1x64xf32> to vector<16x64xf32>
    %726 = arith.addf %724, %725 : vector<16x64xf32>
    %727 = arith.truncf %726 : vector<16x64xf32> to vector<16x64xbf16>
    %c0_282 = arith.constant 0 : index
    %c0_283 = arith.constant 0 : index
    %728 = vector.load %arg20[%c0_282, %c0_283] : memref<64x192xbf16, #tpu.memory_space<vmem>>, vector<64x192xbf16>
    %cst_284 = arith.constant dense<0.000000e+00> : vector<16x192xf32>
    %729 = tpu.matmul %727, %728, %cst_284 {dimension_numbers = #tpu.dot_dimension_numbers<[1], [0], [0], [1], [0, 0, 1, 1], [], []>} : vector<16x64xbf16>, vector<64x192xbf16>, vector<16x192xf32> -> vector<16x192xf32>
    %c0_285 = arith.constant 0 : index
    %c0_286 = arith.constant 0 : index
    %730 = vector.load %arg21[%c0_285, %c0_286] : memref<1x192xf32, #tpu.memory_space<vmem>>, vector<1x192xf32>
    %731 = vector.broadcast %730 : vector<1x192xf32> to vector<16x192xf32>
    %732 = arith.addf %729, %731 : vector<16x192xf32>
    %733 = vector.extract_strided_slice %732 {offsets = [0, 0], sizes = [16, 16], strides = [1, 1]} : vector<16x192xf32> to vector<16x16xf32>
    %734 = vector.shape_cast %733 : vector<16x16xf32> to vector<2x8x16xf32>
    %735 = vector.extract_strided_slice %732 {offsets = [0, 64], sizes = [16, 16], strides = [1, 1]} : vector<16x192xf32> to vector<16x16xf32>
    %736 = vector.shape_cast %735 : vector<16x16xf32> to vector<2x8x16xf32>
    %737 = vector.extract_strided_slice %732 {offsets = [0, 128], sizes = [16, 16], strides = [1, 1]} : vector<16x192xf32> to vector<16x16xf32>
    %738 = vector.shape_cast %737 : vector<16x16xf32> to vector<2x8x16xf32>
    %739 = arith.truncf %734 : vector<2x8x16xf32> to vector<2x8x16xbf16>
    %740 = arith.truncf %736 : vector<2x8x16xf32> to vector<2x8x16xbf16>
    "tpu.trace_start"() <{level = 10 : i32, message = "bqd,bkd->bqk"}> : () -> ()
    %cst_287 = arith.constant dense<0.000000e+00> : vector<2x8x8xf32>
    %741 = tpu.matmul %739, %740, %cst_287 {dimension_numbers = #tpu.dot_dimension_numbers<[2], [2], [1], [1], [0, 0, 0, 1, 1, 1], [0], [0]>} : vector<2x8x16xbf16>, vector<2x8x16xbf16>, vector<2x8x8xf32> -> vector<2x8x8xf32>
    "tpu.trace_stop"() : () -> ()
    %cst_288 = arith.constant dense<0xFF800000> : vector<2x8xf32>
    %742 = vector.multi_reduction <maximumf>, %741, %cst_288 [2] : vector<2x8x8xf32> to vector<2x8xf32>
    %743 = vector.shape_cast %742 : vector<2x8xf32> to vector<2x8x1xf32>
    %744 = vector.broadcast %743 : vector<2x8x1xf32> to vector<2x8x8xf32>
    %745 = arith.subf %741, %744 : vector<2x8x8xf32>
    %746 = math.exp %745 : vector<2x8x8xf32>
    %cst_289 = arith.constant dense<0.000000e+00> : vector<2x8xf32>
    %747 = vector.multi_reduction <add>, %746, %cst_289 [2] : vector<2x8x8xf32> to vector<2x8xf32>
    %748 = vector.shape_cast %747 : vector<2x8xf32> to vector<2x8x1xf32>
    %749 = vector.broadcast %748 : vector<2x8x1xf32> to vector<2x8x8xf32>
    %750 = arith.divf %746, %749 : vector<2x8x8xf32>
    %751 = arith.truncf %750 : vector<2x8x8xf32> to vector<2x8x8xbf16>
    %752 = arith.truncf %738 : vector<2x8x16xf32> to vector<2x8x16xbf16>
    "tpu.trace_start"() <{level = 10 : i32, message = "bqk,bkd->bqd"}> : () -> ()
    %cst_290 = arith.constant dense<0.000000e+00> : vector<2x8x16xf32>
    %753 = tpu.matmul %751, %752, %cst_290 {dimension_numbers = #tpu.dot_dimension_numbers<[2], [1], [1], [2], [0, 0, 0, 1, 1, 2], [0], [0]>} : vector<2x8x8xbf16>, vector<2x8x16xbf16>, vector<2x8x16xf32> -> vector<2x8x16xf32>
    "tpu.trace_stop"() : () -> ()
    %754 = vector.shape_cast %753 : vector<2x8x16xf32> to vector<16x16xf32>
    %755 = vector.extract_strided_slice %732 {offsets = [0, 16], sizes = [16, 16], strides = [1, 1]} : vector<16x192xf32> to vector<16x16xf32>
    %756 = vector.shape_cast %755 : vector<16x16xf32> to vector<2x8x16xf32>
    %757 = vector.extract_strided_slice %732 {offsets = [0, 80], sizes = [16, 16], strides = [1, 1]} : vector<16x192xf32> to vector<16x16xf32>
    %758 = vector.shape_cast %757 : vector<16x16xf32> to vector<2x8x16xf32>
    %759 = vector.extract_strided_slice %732 {offsets = [0, 144], sizes = [16, 16], strides = [1, 1]} : vector<16x192xf32> to vector<16x16xf32>
    %760 = vector.shape_cast %759 : vector<16x16xf32> to vector<2x8x16xf32>
    %761 = arith.truncf %756 : vector<2x8x16xf32> to vector<2x8x16xbf16>
    %762 = arith.truncf %758 : vector<2x8x16xf32> to vector<2x8x16xbf16>
    "tpu.trace_start"() <{level = 10 : i32, message = "bqd,bkd->bqk"}> : () -> ()
    %cst_291 = arith.constant dense<0.000000e+00> : vector<2x8x8xf32>
    %763 = tpu.matmul %761, %762, %cst_291 {dimension_numbers = #tpu.dot_dimension_numbers<[2], [2], [1], [1], [0, 0, 0, 1, 1, 1], [0], [0]>} : vector<2x8x16xbf16>, vector<2x8x16xbf16>, vector<2x8x8xf32> -> vector<2x8x8xf32>
    "tpu.trace_stop"() : () -> ()
    %cst_292 = arith.constant dense<0xFF800000> : vector<2x8xf32>
    %764 = vector.multi_reduction <maximumf>, %763, %cst_292 [2] : vector<2x8x8xf32> to vector<2x8xf32>
    %765 = vector.shape_cast %764 : vector<2x8xf32> to vector<2x8x1xf32>
    %766 = vector.broadcast %765 : vector<2x8x1xf32> to vector<2x8x8xf32>
    %767 = arith.subf %763, %766 : vector<2x8x8xf32>
    %768 = math.exp %767 : vector<2x8x8xf32>
    %cst_293 = arith.constant dense<0.000000e+00> : vector<2x8xf32>
    %769 = vector.multi_reduction <add>, %768, %cst_293 [2] : vector<2x8x8xf32> to vector<2x8xf32>
    %770 = vector.shape_cast %769 : vector<2x8xf32> to vector<2x8x1xf32>
    %771 = vector.broadcast %770 : vector<2x8x1xf32> to vector<2x8x8xf32>
    %772 = arith.divf %768, %771 : vector<2x8x8xf32>
    %773 = arith.truncf %772 : vector<2x8x8xf32> to vector<2x8x8xbf16>
    %774 = arith.truncf %760 : vector<2x8x16xf32> to vector<2x8x16xbf16>
    "tpu.trace_start"() <{level = 10 : i32, message = "bqk,bkd->bqd"}> : () -> ()
    %cst_294 = arith.constant dense<0.000000e+00> : vector<2x8x16xf32>
    %775 = tpu.matmul %773, %774, %cst_294 {dimension_numbers = #tpu.dot_dimension_numbers<[2], [1], [1], [2], [0, 0, 0, 1, 1, 2], [0], [0]>} : vector<2x8x8xbf16>, vector<2x8x16xbf16>, vector<2x8x16xf32> -> vector<2x8x16xf32>
    "tpu.trace_stop"() : () -> ()
    %776 = vector.shape_cast %775 : vector<2x8x16xf32> to vector<16x16xf32>
    %777 = vector.extract_strided_slice %732 {offsets = [0, 32], sizes = [16, 16], strides = [1, 1]} : vector<16x192xf32> to vector<16x16xf32>
    %778 = vector.shape_cast %777 : vector<16x16xf32> to vector<2x8x16xf32>
    %779 = vector.extract_strided_slice %732 {offsets = [0, 96], sizes = [16, 16], strides = [1, 1]} : vector<16x192xf32> to vector<16x16xf32>
    %780 = vector.shape_cast %779 : vector<16x16xf32> to vector<2x8x16xf32>
    %781 = vector.extract_strided_slice %732 {offsets = [0, 160], sizes = [16, 16], strides = [1, 1]} : vector<16x192xf32> to vector<16x16xf32>
    %782 = vector.shape_cast %781 : vector<16x16xf32> to vector<2x8x16xf32>
    %783 = arith.truncf %778 : vector<2x8x16xf32> to vector<2x8x16xbf16>
    %784 = arith.truncf %780 : vector<2x8x16xf32> to vector<2x8x16xbf16>
    "tpu.trace_start"() <{level = 10 : i32, message = "bqd,bkd->bqk"}> : () -> ()
    %cst_295 = arith.constant dense<0.000000e+00> : vector<2x8x8xf32>
    %785 = tpu.matmul %783, %784, %cst_295 {dimension_numbers = #tpu.dot_dimension_numbers<[2], [2], [1], [1], [0, 0, 0, 1, 1, 1], [0], [0]>} : vector<2x8x16xbf16>, vector<2x8x16xbf16>, vector<2x8x8xf32> -> vector<2x8x8xf32>
    "tpu.trace_stop"() : () -> ()
    %cst_296 = arith.constant dense<0xFF800000> : vector<2x8xf32>
    %786 = vector.multi_reduction <maximumf>, %785, %cst_296 [2] : vector<2x8x8xf32> to vector<2x8xf32>
    %787 = vector.shape_cast %786 : vector<2x8xf32> to vector<2x8x1xf32>
    %788 = vector.broadcast %787 : vector<2x8x1xf32> to vector<2x8x8xf32>
    %789 = arith.subf %785, %788 : vector<2x8x8xf32>
    %790 = math.exp %789 : vector<2x8x8xf32>
    %cst_297 = arith.constant dense<0.000000e+00> : vector<2x8xf32>
    %791 = vector.multi_reduction <add>, %790, %cst_297 [2] : vector<2x8x8xf32> to vector<2x8xf32>
    %792 = vector.shape_cast %791 : vector<2x8xf32> to vector<2x8x1xf32>
    %793 = vector.broadcast %792 : vector<2x8x1xf32> to vector<2x8x8xf32>
    %794 = arith.divf %790, %793 : vector<2x8x8xf32>
    %795 = arith.truncf %794 : vector<2x8x8xf32> to vector<2x8x8xbf16>
    %796 = arith.truncf %782 : vector<2x8x16xf32> to vector<2x8x16xbf16>
    "tpu.trace_start"() <{level = 10 : i32, message = "bqk,bkd->bqd"}> : () -> ()
    %cst_298 = arith.constant dense<0.000000e+00> : vector<2x8x16xf32>
    %797 = tpu.matmul %795, %796, %cst_298 {dimension_numbers = #tpu.dot_dimension_numbers<[2], [1], [1], [2], [0, 0, 0, 1, 1, 2], [0], [0]>} : vector<2x8x8xbf16>, vector<2x8x16xbf16>, vector<2x8x16xf32> -> vector<2x8x16xf32>
    "tpu.trace_stop"() : () -> ()
    %798 = vector.shape_cast %797 : vector<2x8x16xf32> to vector<16x16xf32>
    %799 = vector.extract_strided_slice %732 {offsets = [0, 48], sizes = [16, 16], strides = [1, 1]} : vector<16x192xf32> to vector<16x16xf32>
    %800 = vector.shape_cast %799 : vector<16x16xf32> to vector<2x8x16xf32>
    %801 = vector.extract_strided_slice %732 {offsets = [0, 112], sizes = [16, 16], strides = [1, 1]} : vector<16x192xf32> to vector<16x16xf32>
    %802 = vector.shape_cast %801 : vector<16x16xf32> to vector<2x8x16xf32>
    %803 = vector.extract_strided_slice %732 {offsets = [0, 176], sizes = [16, 16], strides = [1, 1]} : vector<16x192xf32> to vector<16x16xf32>
    %804 = vector.shape_cast %803 : vector<16x16xf32> to vector<2x8x16xf32>
    %805 = arith.truncf %800 : vector<2x8x16xf32> to vector<2x8x16xbf16>
    %806 = arith.truncf %802 : vector<2x8x16xf32> to vector<2x8x16xbf16>
    "tpu.trace_start"() <{level = 10 : i32, message = "bqd,bkd->bqk"}> : () -> ()
    %cst_299 = arith.constant dense<0.000000e+00> : vector<2x8x8xf32>
    %807 = tpu.matmul %805, %806, %cst_299 {dimension_numbers = #tpu.dot_dimension_numbers<[2], [2], [1], [1], [0, 0, 0, 1, 1, 1], [0], [0]>} : vector<2x8x16xbf16>, vector<2x8x16xbf16>, vector<2x8x8xf32> -> vector<2x8x8xf32>
    "tpu.trace_stop"() : () -> ()
    %cst_300 = arith.constant dense<0xFF800000> : vector<2x8xf32>
    %808 = vector.multi_reduction <maximumf>, %807, %cst_300 [2] : vector<2x8x8xf32> to vector<2x8xf32>
    %809 = vector.shape_cast %808 : vector<2x8xf32> to vector<2x8x1xf32>
    %810 = vector.broadcast %809 : vector<2x8x1xf32> to vector<2x8x8xf32>
    %811 = arith.subf %807, %810 : vector<2x8x8xf32>
    %812 = math.exp %811 : vector<2x8x8xf32>
    %cst_301 = arith.constant dense<0.000000e+00> : vector<2x8xf32>
    %813 = vector.multi_reduction <add>, %812, %cst_301 [2] : vector<2x8x8xf32> to vector<2x8xf32>
    %814 = vector.shape_cast %813 : vector<2x8xf32> to vector<2x8x1xf32>
    %815 = vector.broadcast %814 : vector<2x8x1xf32> to vector<2x8x8xf32>
    %816 = arith.divf %812, %815 : vector<2x8x8xf32>
    %817 = arith.truncf %816 : vector<2x8x8xf32> to vector<2x8x8xbf16>
    %818 = arith.truncf %804 : vector<2x8x16xf32> to vector<2x8x16xbf16>
    "tpu.trace_start"() <{level = 10 : i32, message = "bqk,bkd->bqd"}> : () -> ()
    %cst_302 = arith.constant dense<0.000000e+00> : vector<2x8x16xf32>
    %819 = tpu.matmul %817, %818, %cst_302 {dimension_numbers = #tpu.dot_dimension_numbers<[2], [1], [1], [2], [0, 0, 0, 1, 1, 2], [0], [0]>} : vector<2x8x8xbf16>, vector<2x8x16xbf16>, vector<2x8x16xf32> -> vector<2x8x16xf32>
    "tpu.trace_stop"() : () -> ()
    %820 = vector.shape_cast %819 : vector<2x8x16xf32> to vector<16x16xf32>
    %821 = tpu.concatenate %754, %776, %798, %820 in 1 : vector<16x16xf32>, vector<16x16xf32>, vector<16x16xf32>, vector<16x16xf32> -> vector<16x64xf32>
    %822 = arith.truncf %821 : vector<16x64xf32> to vector<16x64xbf16>
    %c0_303 = arith.constant 0 : index
    %c0_304 = arith.constant 0 : index
    %823 = vector.load %arg22[%c0_303, %c0_304] : memref<64x64xbf16, #tpu.memory_space<vmem>>, vector<64x64xbf16>
    %cst_305 = arith.constant dense<0.000000e+00> : vector<16x64xf32>
    %824 = tpu.matmul %822, %823, %cst_305 {dimension_numbers = #tpu.dot_dimension_numbers<[1], [0], [0], [1], [0, 0, 1, 1], [], []>} : vector<16x64xbf16>, vector<64x64xbf16>, vector<16x64xf32> -> vector<16x64xf32>
    %c0_306 = arith.constant 0 : index
    %c0_307 = arith.constant 0 : index
    %825 = vector.load %arg23[%c0_306, %c0_307] : memref<1x64xf32, #tpu.memory_space<vmem>>, vector<1x64xf32>
    %826 = vector.broadcast %825 : vector<1x64xf32> to vector<16x64xf32>
    %827 = arith.addf %824, %826 : vector<16x64xf32>
    %828 = arith.addf %692, %827 : vector<16x64xf32>
    %c0_308 = arith.constant 0 : index
    %c0_309 = arith.constant 0 : index
    %829 = vector.load %arg30[%c0_308, %c0_309] : memref<1x64xf32, #tpu.memory_space<vmem>>, vector<1x64xf32>
    %c0_310 = arith.constant 0 : index
    %c0_311 = arith.constant 0 : index
    %830 = vector.load %arg31[%c0_310, %c0_311] : memref<1x64xf32, #tpu.memory_space<vmem>>, vector<1x64xf32>
    %cst_312 = arith.constant dense<0.000000e+00> : vector<16xf32>
    %831 = vector.multi_reduction <add>, %828, %cst_312 [1] : vector<16x64xf32> to vector<16xf32>
    %832 = vector.shape_cast %831 : vector<16xf32> to vector<16x1xf32>
    %cst_313 = arith.constant 6.400000e+01 : f32
    %833 = vector.broadcast %cst_313 : f32 to vector<16x1xf32>
    %834 = arith.divf %832, %833 : vector<16x1xf32>
    %835 = vector.broadcast %834 : vector<16x1xf32> to vector<16x64xf32>
    %836 = arith.subf %828, %835 : vector<16x64xf32>
    %837 = arith.mulf %836, %836 : vector<16x64xf32>
    %cst_314 = arith.constant dense<0.000000e+00> : vector<16xf32>
    %838 = vector.multi_reduction <add>, %837, %cst_314 [1] : vector<16x64xf32> to vector<16xf32>
    %839 = vector.shape_cast %838 : vector<16xf32> to vector<16x1xf32>
    %cst_315 = arith.constant 6.400000e+01 : f32
    %840 = vector.broadcast %cst_315 : f32 to vector<16x1xf32>
    %841 = arith.divf %839, %840 : vector<16x1xf32>
    %cst_316 = arith.constant 9.99999974E-6 : f32
    %842 = vector.broadcast %cst_316 : f32 to vector<16x1xf32>
    %843 = arith.addf %841, %842 : vector<16x1xf32>
    %844 = math.rsqrt %843 : vector<16x1xf32>
    %845 = vector.broadcast %844 : vector<16x1xf32> to vector<16x64xf32>
    %846 = arith.mulf %836, %845 : vector<16x64xf32>
    %847 = vector.broadcast %829 : vector<1x64xf32> to vector<16x64xf32>
    %848 = arith.mulf %846, %847 : vector<16x64xf32>
    %849 = vector.broadcast %830 : vector<1x64xf32> to vector<16x64xf32>
    %850 = arith.addf %848, %849 : vector<16x64xf32>
    %851 = arith.truncf %850 : vector<16x64xf32> to vector<16x64xbf16>
    %c0_317 = arith.constant 0 : index
    %c0_318 = arith.constant 0 : index
    %852 = vector.load %arg24[%c0_317, %c0_318] : memref<64x128xbf16, #tpu.memory_space<vmem>>, vector<64x128xbf16>
    %cst_319 = arith.constant dense<0.000000e+00> : vector<16x128xf32>
    %853 = tpu.matmul %851, %852, %cst_319 {dimension_numbers = #tpu.dot_dimension_numbers<[1], [0], [0], [1], [0, 0, 1, 1], [], []>} : vector<16x64xbf16>, vector<64x128xbf16>, vector<16x128xf32> -> vector<16x128xf32>
    %c0_320 = arith.constant 0 : index
    %c0_321 = arith.constant 0 : index
    %854 = vector.load %arg25[%c0_320, %c0_321] : memref<1x128xf32, #tpu.memory_space<vmem>>, vector<1x128xf32>
    %855 = vector.broadcast %854 : vector<1x128xf32> to vector<16x128xf32>
    %856 = arith.addf %853, %855 : vector<16x128xf32>
    %cst_322 = arith.constant 0.000000e+00 : f32
    %857 = vector.broadcast %cst_322 : f32 to vector<16x128xf32>
    %858 = arith.maximumf %856, %857 : vector<16x128xf32>
    %859 = arith.truncf %858 : vector<16x128xf32> to vector<16x128xbf16>
    %c0_323 = arith.constant 0 : index
    %c0_324 = arith.constant 0 : index
    %860 = vector.load %arg26[%c0_323, %c0_324] : memref<128x64xbf16, #tpu.memory_space<vmem>>, vector<128x64xbf16>
    %cst_325 = arith.constant dense<0.000000e+00> : vector<16x64xf32>
    %861 = tpu.matmul %859, %860, %cst_325 {dimension_numbers = #tpu.dot_dimension_numbers<[1], [0], [0], [1], [0, 0, 1, 1], [], []>} : vector<16x128xbf16>, vector<128x64xbf16>, vector<16x64xf32> -> vector<16x64xf32>
    %c0_326 = arith.constant 0 : index
    %c0_327 = arith.constant 0 : index
    %862 = vector.load %arg27[%c0_326, %c0_327] : memref<1x64xf32, #tpu.memory_space<vmem>>, vector<1x64xf32>
    %863 = vector.broadcast %862 : vector<1x64xf32> to vector<16x64xf32>
    %864 = arith.addf %861, %863 : vector<16x64xf32>
    %865 = arith.addf %828, %864 : vector<16x64xf32>
    %c8 = arith.constant 8 : index
    %c0_328 = arith.constant 0 : index
    %c0_329 = arith.constant 0 : index
    %c0_330 = arith.constant 0 : index
    %866 = vector.load %arg41[%c8, %c0_328, %c0_329, %c0_330] : memref<12x2x8x8xf32, #tpu.memory_space<vmem>>, vector<1x2x8x8xf32>
    %867 = vector.shape_cast %866 : vector<1x2x8x8xf32> to vector<2x8x8xf32>
    %868 = vector.shape_cast %750 : vector<2x8x8xf32> to vector<1x2x8x8xf32>
    tpu.vector_store %arg41[%c8, %c0_328, %c0_329, %c0_330], %868 {strides = array<i32>} : memref<12x2x8x8xf32, #tpu.memory_space<vmem>>, vector<1x2x8x8xf32>,
    %c9 = arith.constant 9 : index
    %c0_331 = arith.constant 0 : index
    %c0_332 = arith.constant 0 : index
    %c0_333 = arith.constant 0 : index
    %869 = vector.load %arg41[%c9, %c0_331, %c0_332, %c0_333] : memref<12x2x8x8xf32, #tpu.memory_space<vmem>>, vector<1x2x8x8xf32>
    %870 = vector.shape_cast %869 : vector<1x2x8x8xf32> to vector<2x8x8xf32>
    %871 = vector.shape_cast %772 : vector<2x8x8xf32> to vector<1x2x8x8xf32>
    tpu.vector_store %arg41[%c9, %c0_331, %c0_332, %c0_333], %871 {strides = array<i32>} : memref<12x2x8x8xf32, #tpu.memory_space<vmem>>, vector<1x2x8x8xf32>,
    %c10 = arith.constant 10 : index
    %c0_334 = arith.constant 0 : index
    %c0_335 = arith.constant 0 : index
    %c0_336 = arith.constant 0 : index
    %872 = vector.load %arg41[%c10, %c0_334, %c0_335, %c0_336] : memref<12x2x8x8xf32, #tpu.memory_space<vmem>>, vector<1x2x8x8xf32>
    %873 = vector.shape_cast %872 : vector<1x2x8x8xf32> to vector<2x8x8xf32>
    %874 = vector.shape_cast %794 : vector<2x8x8xf32> to vector<1x2x8x8xf32>
    tpu.vector_store %arg41[%c10, %c0_334, %c0_335, %c0_336], %874 {strides = array<i32>} : memref<12x2x8x8xf32, #tpu.memory_space<vmem>>, vector<1x2x8x8xf32>,
    %c11 = arith.constant 11 : index
    %c0_337 = arith.constant 0 : index
    %c0_338 = arith.constant 0 : index
    %c0_339 = arith.constant 0 : index
    %875 = vector.load %arg41[%c11, %c0_337, %c0_338, %c0_339] : memref<12x2x8x8xf32, #tpu.memory_space<vmem>>, vector<1x2x8x8xf32>
    %876 = vector.shape_cast %875 : vector<1x2x8x8xf32> to vector<2x8x8xf32>
    %877 = vector.shape_cast %816 : vector<2x8x8xf32> to vector<1x2x8x8xf32>
    tpu.vector_store %arg41[%c11, %c0_337, %c0_338, %c0_339], %877 {strides = array<i32>} : memref<12x2x8x8xf32, #tpu.memory_space<vmem>>, vector<1x2x8x8xf32>,
    %878 = tpu.concatenate %519, %692, %865 in 1 : vector<16x64xf32>, vector<16x64xf32>, vector<16x64xf32> -> vector<16x192xf32>
    %c0_340 = arith.constant 0 : index
    %c0_341 = arith.constant 0 : index
    %879 = vector.load %arg39[%c0_340, %c0_341] : memref<16x192xf32, #tpu.memory_space<vmem>>, vector<16x192xf32>
    tpu.vector_store %arg39[%c0_340, %c0_341], %878 {strides = array<i32>} : memref<16x192xf32, #tpu.memory_space<vmem>>, vector<16x192xf32>,
    %880 = vector.shape_cast %865 : vector<16x64xf32> to vector<2x8x64xf32>
    %cst_342 = arith.constant dense<0.000000e+00> : vector<2x64xf32>
    %881 = vector.multi_reduction <add>, %880, %cst_342 [1] : vector<2x8x64xf32> to vector<2x64xf32>
    %cst_343 = arith.constant 8.000000e+00 : f32
    %882 = vector.broadcast %cst_343 : f32 to vector<2x64xf32>
    %883 = arith.divf %881, %882 : vector<2x64xf32>
    %884 = arith.truncf %351 : vector<2x64xf32> to vector<2x64xbf16>
    %c0_344 = arith.constant 0 : index
    %c0_345 = arith.constant 0 : index
    %885 = vector.load %arg32[%c0_344, %c0_345] : memref<64x64xbf16, #tpu.memory_space<vmem>>, vector<64x64xbf16>
    %cst_346 = arith.constant dense<0.000000e+00> : vector<2x64xf32>
    %886 = tpu.matmul %884, %885, %cst_346 {dimension_numbers = #tpu.dot_dimension_numbers<[1], [0], [0], [1], [0, 0, 1, 1], [], []>} : vector<2x64xbf16>, vector<64x64xbf16>, vector<2x64xf32> -> vector<2x64xf32>
    %887 = arith.truncf %883 : vector<2x64xf32> to vector<2x64xbf16>
    %c0_347 = arith.constant 0 : index
    %c0_348 = arith.constant 0 : index
    %888 = vector.load %arg33[%c0_347, %c0_348] : memref<64x64xbf16, #tpu.memory_space<vmem>>, vector<64x64xbf16>
    %cst_349 = arith.constant dense<0.000000e+00> : vector<2x64xf32>
    %889 = tpu.matmul %887, %888, %cst_349 {dimension_numbers = #tpu.dot_dimension_numbers<[1], [0], [0], [1], [0, 0, 1, 1], [], []>} : vector<2x64xbf16>, vector<64x64xbf16>, vector<2x64xf32> -> vector<2x64xf32>
    %890 = arith.addf %886, %889 : vector<2x64xf32>
    %c0_350 = arith.constant 0 : index
    %c0_351 = arith.constant 0 : index
    %891 = vector.load %arg34[%c0_350, %c0_351] : memref<1x64xf32, #tpu.memory_space<vmem>>, vector<1x64xf32>
    %892 = vector.broadcast %891 : vector<1x64xf32> to vector<2x64xf32>
    %893 = arith.addf %890, %892 : vector<2x64xf32>
    %cst_352 = arith.constant 0.000000e+00 : f32
    %894 = vector.broadcast %cst_352 : f32 to vector<2x64xf32>
    %895 = arith.maximumf %893, %894 : vector<2x64xf32>
    %896 = arith.truncf %895 : vector<2x64xf32> to vector<2x64xbf16>
    %c0_353 = arith.constant 0 : index
    %c0_354 = arith.constant 0 : index
    %897 = vector.load %arg35[%c0_353, %c0_354] : memref<64x64xbf16, #tpu.memory_space<vmem>>, vector<64x64xbf16>
    %cst_355 = arith.constant dense<0.000000e+00> : vector<2x64xf32>
    %898 = tpu.matmul %896, %897, %cst_355 {dimension_numbers = #tpu.dot_dimension_numbers<[1], [0], [0], [1], [0, 0, 1, 1], [], []>} : vector<2x64xbf16>, vector<64x64xbf16>, vector<2x64xf32> -> vector<2x64xf32>
    %c0_356 = arith.constant 0 : index
    %c0_357 = arith.constant 0 : index
    %899 = vector.load %arg36[%c0_356, %c0_357] : memref<1x64xf32, #tpu.memory_space<vmem>>, vector<1x64xf32>
    %900 = vector.broadcast %899 : vector<1x64xf32> to vector<2x64xf32>
    %901 = arith.addf %898, %900 : vector<2x64xf32>
    %902 = tpu.concatenate %351, %883, %895, %901 in 1 : vector<2x64xf32>, vector<2x64xf32>, vector<2x64xf32>, vector<2x64xf32> -> vector<2x256xf32>
    %c0_358 = arith.constant 0 : index
    %c0_359 = arith.constant 0 : index
    %903 = vector.load %arg37[%c0_358, %c0_359] : memref<2x256xf32, #tpu.memory_space<vmem>>, vector<2x256xf32>
    tpu.vector_store %arg37[%c0_358, %c0_359], %902 {strides = array<i32>} : memref<2x256xf32, #tpu.memory_space<vmem>>, vector<2x256xf32>,
    return
  }
  func.func @transform_0(%arg0: i32) -> (i32, i32) {
    %c0_i32 = arith.constant 0 : i32
    %c0_i32_0 = arith.constant 0 : i32
    %c0_i32_1 = arith.constant 0 : i32
    return %c0_i32, %c0_i32_0 : i32, i32
  }
  func.func @transform_1(%arg0: i32) -> (i32, i32) {
    %c0_i32 = arith.constant 0 : i32
    %c0_i32_0 = arith.constant 0 : i32
    %c0_i32_1 = arith.constant 0 : i32
    return %c0_i32, %c0_i32_0 : i32, i32
  }
  func.func @transform_2(%arg0: i32) -> (i32, i32) {
    %c0_i32 = arith.constant 0 : i32
    %c0_i32_0 = arith.constant 0 : i32
    %c0_i32_1 = arith.constant 0 : i32
    return %c0_i32, %c0_i32_0 : i32, i32
  }
  func.func @transform_3(%arg0: i32) -> (i32, i32) {
    %c0_i32 = arith.constant 0 : i32
    %c0_i32_0 = arith.constant 0 : i32
    %c0_i32_1 = arith.constant 0 : i32
    return %c0_i32, %c0_i32_0 : i32, i32
  }
  func.func @transform_4(%arg0: i32) -> (i32, i32) {
    %c0_i32 = arith.constant 0 : i32
    %c0_i32_0 = arith.constant 0 : i32
    %c0_i32_1 = arith.constant 0 : i32
    return %c0_i32, %c0_i32_0 : i32, i32
  }
  func.func @transform_5(%arg0: i32) -> (i32, i32) {
    %c0_i32 = arith.constant 0 : i32
    %c0_i32_0 = arith.constant 0 : i32
    %c0_i32_1 = arith.constant 0 : i32
    return %c0_i32, %c0_i32_0 : i32, i32
  }
  func.func @transform_6(%arg0: i32) -> (i32, i32) {
    %c0_i32 = arith.constant 0 : i32
    %c0_i32_0 = arith.constant 0 : i32
    %c0_i32_1 = arith.constant 0 : i32
    return %c0_i32, %c0_i32_0 : i32, i32
  }
  func.func @transform_7(%arg0: i32) -> (i32, i32) {
    %c0_i32 = arith.constant 0 : i32
    %c0_i32_0 = arith.constant 0 : i32
    %c0_i32_1 = arith.constant 0 : i32
    return %c0_i32, %c0_i32_0 : i32, i32
  }
  func.func @transform_8(%arg0: i32) -> (i32, i32) {
    %c0_i32 = arith.constant 0 : i32
    %c0_i32_0 = arith.constant 0 : i32
    %c0_i32_1 = arith.constant 0 : i32
    return %c0_i32, %c0_i32_0 : i32, i32
  }
  func.func @transform_9(%arg0: i32) -> (i32, i32) {
    %c0_i32 = arith.constant 0 : i32
    %c0_i32_0 = arith.constant 0 : i32
    %c0_i32_1 = arith.constant 0 : i32
    return %c0_i32, %c0_i32_0 : i32, i32
  }
  func.func @transform_10(%arg0: i32) -> (i32, i32) {
    %c0_i32 = arith.constant 0 : i32
    %c0_i32_0 = arith.constant 0 : i32
    %c0_i32_1 = arith.constant 0 : i32
    return %c0_i32, %c0_i32_0 : i32, i32
  }
  func.func @transform_11(%arg0: i32) -> (i32, i32) {
    %c0_i32 = arith.constant 0 : i32
    %c0_i32_0 = arith.constant 0 : i32
    %c0_i32_1 = arith.constant 0 : i32
    return %c0_i32, %c0_i32_0 : i32, i32
  }
  func.func @transform_12(%arg0: i32) -> (i32, i32) {
    %c0_i32 = arith.constant 0 : i32
    %c0_i32_0 = arith.constant 0 : i32
    %c0_i32_1 = arith.constant 0 : i32
    return %c0_i32, %c0_i32_0 : i32, i32
  }
  func.func @transform_13(%arg0: i32) -> (i32, i32) {
    %c0_i32 = arith.constant 0 : i32
    %c0_i32_0 = arith.constant 0 : i32
    %c0_i32_1 = arith.constant 0 : i32
    return %c0_i32, %c0_i32_0 : i32, i32
  }
  func.func @transform_14(%arg0: i32) -> (i32, i32) {
    %c0_i32 = arith.constant 0 : i32
    %c0_i32_0 = arith.constant 0 : i32
    %c0_i32_1 = arith.constant 0 : i32
    return %c0_i32, %c0_i32_0 : i32, i32
  }
  func.func @transform_15(%arg0: i32) -> (i32, i32) {
    %c0_i32 = arith.constant 0 : i32
    %c0_i32_0 = arith.constant 0 : i32
    %c0_i32_1 = arith.constant 0 : i32
    return %c0_i32, %c0_i32_0 : i32, i32
  }
  func.func @transform_16(%arg0: i32) -> (i32, i32) {
    %c0_i32 = arith.constant 0 : i32
    %c0_i32_0 = arith.constant 0 : i32
    %c0_i32_1 = arith.constant 0 : i32
    return %c0_i32, %c0_i32_0 : i32, i32
  }
  func.func @transform_17(%arg0: i32) -> (i32, i32) {
    %c0_i32 = arith.constant 0 : i32
    %c0_i32_0 = arith.constant 0 : i32
    %c0_i32_1 = arith.constant 0 : i32
    return %c0_i32, %c0_i32_0 : i32, i32
  }
  func.func @transform_18(%arg0: i32) -> (i32, i32) {
    %c0_i32 = arith.constant 0 : i32
    %c0_i32_0 = arith.constant 0 : i32
    %c0_i32_1 = arith.constant 0 : i32
    return %c0_i32, %c0_i32_0 : i32, i32
  }
  func.func @transform_19(%arg0: i32) -> (i32, i32) {
    %c0_i32 = arith.constant 0 : i32
    %c0_i32_0 = arith.constant 0 : i32
    %c0_i32_1 = arith.constant 0 : i32
    return %c0_i32, %c0_i32_0 : i32, i32
  }
  func.func @transform_20(%arg0: i32) -> (i32, i32) {
    %c0_i32 = arith.constant 0 : i32
    %c0_i32_0 = arith.constant 0 : i32
    %c0_i32_1 = arith.constant 0 : i32
    return %c0_i32, %c0_i32_0 : i32, i32
  }
  func.func @transform_21(%arg0: i32) -> (i32, i32) {
    %c0_i32 = arith.constant 0 : i32
    %c0_i32_0 = arith.constant 0 : i32
    %c0_i32_1 = arith.constant 0 : i32
    return %c0_i32, %c0_i32_0 : i32, i32
  }
  func.func @transform_22(%arg0: i32) -> (i32, i32) {
    %c0_i32 = arith.constant 0 : i32
    %c0_i32_0 = arith.constant 0 : i32
    %c0_i32_1 = arith.constant 0 : i32
    return %c0_i32, %c0_i32_0 : i32, i32
  }
  func.func @transform_23(%arg0: i32) -> (i32, i32) {
    %c0_i32 = arith.constant 0 : i32
    %c0_i32_0 = arith.constant 0 : i32
    %c0_i32_1 = arith.constant 0 : i32
    return %c0_i32, %c0_i32_0 : i32, i32
  }
  func.func @transform_24(%arg0: i32) -> (i32, i32) {
    %c0_i32 = arith.constant 0 : i32
    %c0_i32_0 = arith.constant 0 : i32
    %c0_i32_1 = arith.constant 0 : i32
    return %c0_i32, %c0_i32_0 : i32, i32
  }
  func.func @transform_25(%arg0: i32) -> (i32, i32) {
    %c0_i32 = arith.constant 0 : i32
    %c0_i32_0 = arith.constant 0 : i32
    %c0_i32_1 = arith.constant 0 : i32
    return %c0_i32, %c0_i32_0 : i32, i32
  }
  func.func @transform_26(%arg0: i32) -> (i32, i32) {
    %c0_i32 = arith.constant 0 : i32
    %c0_i32_0 = arith.constant 0 : i32
    %c0_i32_1 = arith.constant 0 : i32
    return %c0_i32, %c0_i32_0 : i32, i32
  }
  func.func @transform_27(%arg0: i32) -> (i32, i32) {
    %c0_i32 = arith.constant 0 : i32
    %c0_i32_0 = arith.constant 0 : i32
    %c0_i32_1 = arith.constant 0 : i32
    return %c0_i32, %c0_i32_0 : i32, i32
  }
  func.func @transform_28(%arg0: i32) -> (i32, i32) {
    %c0_i32 = arith.constant 0 : i32
    %c0_i32_0 = arith.constant 0 : i32
    %c0_i32_1 = arith.constant 0 : i32
    return %c0_i32, %c0_i32_0 : i32, i32
  }
  func.func @transform_29(%arg0: i32) -> (i32, i32) {
    %c0_i32 = arith.constant 0 : i32
    %c0_i32_0 = arith.constant 0 : i32
    %c0_i32_1 = arith.constant 0 : i32
    return %c0_i32, %c0_i32_0 : i32, i32
  }
  func.func @transform_30(%arg0: i32) -> (i32, i32) {
    %c0_i32 = arith.constant 0 : i32
    %c0_i32_0 = arith.constant 0 : i32
    %c0_i32_1 = arith.constant 0 : i32
    return %c0_i32, %c0_i32_0 : i32, i32
  }
  func.func @transform_31(%arg0: i32) -> (i32, i32) {
    %c0_i32 = arith.constant 0 : i32
    %c0_i32_0 = arith.constant 0 : i32
    %c0_i32_1 = arith.constant 0 : i32
    return %c0_i32, %c0_i32_0 : i32, i32
  }
  func.func @transform_32(%arg0: i32) -> (i32, i32) {
    %c0_i32 = arith.constant 0 : i32
    %c0_i32_0 = arith.constant 0 : i32
    %c0_i32_1 = arith.constant 0 : i32
    return %c0_i32, %c0_i32_0 : i32, i32
  }
  func.func @transform_33(%arg0: i32) -> (i32, i32) {
    %c0_i32 = arith.constant 0 : i32
    %c0_i32_0 = arith.constant 0 : i32
    %c0_i32_1 = arith.constant 0 : i32
    return %c0_i32, %c0_i32_0 : i32, i32
  }
  func.func @transform_34(%arg0: i32) -> (i32, i32) {
    %c0_i32 = arith.constant 0 : i32
    %c0_i32_0 = arith.constant 0 : i32
    %c0_i32_1 = arith.constant 0 : i32
    return %c0_i32, %c0_i32_0 : i32, i32
  }
  func.func @transform_35(%arg0: i32) -> (i32, i32) {
    %c0_i32 = arith.constant 0 : i32
    %c0_i32_0 = arith.constant 0 : i32
    %c0_i32_1 = arith.constant 0 : i32
    return %c0_i32, %c0_i32_0 : i32, i32
  }
  func.func @transform_36(%arg0: i32) -> (i32, i32) {
    %c0_i32 = arith.constant 0 : i32
    %c0_i32_0 = arith.constant 0 : i32
    %c0_i32_1 = arith.constant 0 : i32
    return %c0_i32, %c0_i32_0 : i32, i32
  }
  func.func @transform_37(%arg0: i32) -> (i32, i32) {
    %c0_i32 = arith.constant 0 : i32
    %c0_i32_0 = arith.constant 0 : i32
    %c0_i32_1 = arith.constant 0 : i32
    return %c0_i32, %c0_i32_0 : i32, i32
  }
  func.func @transform_38(%arg0: i32) -> (i32, i32) {
    %c0_i32 = arith.constant 0 : i32
    %c0_i32_0 = arith.constant 0 : i32
    %c0_i32_1 = arith.constant 0 : i32
    return %c0_i32, %c0_i32_0 : i32, i32
  }
  func.func @transform_39(%arg0: i32) -> (i32, i32, i32, i32) {
    %c0_i32 = arith.constant 0 : i32
    %c0_i32_0 = arith.constant 0 : i32
    %c0_i32_1 = arith.constant 0 : i32
    %c0_i32_2 = arith.constant 0 : i32
    %c0_i32_3 = arith.constant 0 : i32
    return %c0_i32, %c0_i32_0, %c0_i32_1, %c0_i32_2 : i32, i32, i32, i32
  }
  func.func @transform_40(%arg0: i32) -> (i32, i32, i32, i32) {
    %c0_i32 = arith.constant 0 : i32
    %c0_i32_0 = arith.constant 0 : i32
    %c0_i32_1 = arith.constant 0 : i32
    %c0_i32_2 = arith.constant 0 : i32
    %c0_i32_3 = arith.constant 0 : i32
    return %c0_i32, %c0_i32_0, %c0_i32_1, %c0_i32_2 : i32, i32, i32, i32
  }
}

</mosaic_0001>

<bundles_post_ra>
// kernel: quat_teacher_forward.1
= control target key start
LH: loop header
LB: loop body
LE: loop exit
PB: predicated region body
PF: predicated region fallthrough
CT: control target
= control target key end

     0   :  { %v9596_v0 = vmov 0.0   ;;  %s9597_s3 = smov 3   ;;  %vm9598_vm0 = vmmov 0   ;;  %vm224_vm1 = vcmask 785408   ;;  %s9599_s10 = smov 4   ;;  %vm273_vm2 = vcmask 523264   ;;  %s11354_s0 = inlined_call_operand.smem [shape: u32[41], index: -1, kind: input, shape index: {}] }
   0x1   :  { %8352 = vmatprep.subr.bf16.mxu0 %v9596_v0  ;;  %s7730_s6 = sld [smem:[%s11354_s0 + %s9597_s3]]   ;;  %8364 = vmatprep.mubr.msk.bf16.mxu0 %vm9598_vm0, %v9596_v0  ;;  %s9600_s14 = smov 2   ;;  %v9602_v32 = vmov 0   ;;  %v328_v57 = vlaneseq  ;;  %vm555_vm3 = vcmask 1043456   ;;  %vm429_vm4 = vcmask 130048  }
   0x2   :  { %s1_s9 = sld [smem:[%s11354_s0]]   ;;  %s9601_s18 = smov 7   ;;  %413 = vmatprep.mubr.bf16.mxu1 %v9602_v32  ;;  %vm525_vm5 = vcmask 64512   ;;  %vm1333_vm6 = vcmask 261120   ;;  %vm1336_vm7 = vcmask 392192   ;;  %vm7445_vm8 = vcmask 1041409  }
   0x3   :  { %s7731_s13 = sld [smem:[%s11354_s0 + %s9599_s10]]   ;;  %s9603_s22 = smov 15   ;;  %v329_v58 = vshrl.u32 %v328_v57, 7 }
   0x4   :  { %s9672_s17 = sld [smem:[%s11354_s0 + %s9600_s14]]   ;;  %s9604_s26 = smov 16  }
   0x5   :  { %s9691_s21 = sld [smem:[%s11354_s0 + %s9601_s18]]   ;;  %s9605_s30 = smov 8   ;;  %v9724_v59 = vsub.s32 0, %v329_v58  ;;  %v9727_v61 = vsub.s32 1, %v329_v58 }
   0x6   :  { %s9706_s25 = sld [smem:[%s11354_s0 + %s9603_s22]]   ;;  %s9606_s4 = smov 64  }
   0x7   :  { %v9233_v1 = vld [vmem:[%s7730_s6] sm:$0xff]   ;;  %v9234_v2 = vld [vmem:[%s7730_s6 + $0x8] sm:$0xff]   ;;  %v9235_v3 = vld [vmem:[%s7730_s6 + $0x10] sm:$0xff]   ;;  %s9712_s29 = sld [smem:[%s11354_s0 + %s9604_s26]]   ;;  %s9607_s5 = smov 48  }
   0x8   :  { %8353 = vmatpush3.bf16.msra.mxu0 %v9233_v1  ;;  %v9236_v4 = vld [vmem:[%s7730_s6 + $0x18] sm:$0xff]   ;;  %v9237_v5 = vld [vmem:[%s7730_s6 + $0x20] sm:$0xff]   ;;  %v9238_v6 = vld [vmem:[%s7730_s6 + $0x28] sm:$0xff]   ;;  %s9722_s3 = sld [smem:[%s11354_s0 + %s9605_s30]]   ;;  %s9608_s6 = smov 112  }
   0x9   :  { %8354 = vmatprep.subr.bf16.mxu0 %v9596_v0  ;;  %v9239_v7 = vld [vmem:[%s1_s9] sm:$0xff]   ;;  %s9609_s7 = smov 32   ;;  %s9610_s8 = smov 96  }
   0xa   :  { %v7768_v8 = vld [vmem:[%s7731_s13] ss:$0 sm:$0xff]  ;;  %v161_v13 = vld [vmem:[%s9672_s17 + $0x8] sm:$0xff]  ;;  %s9611_s9 = smov 80   ;;  %s9612_s10 = smov 39  }
   0xb   :  { %v160_v9 = vld [vmem:[%s9672_s17] sm:$0xff]  ;;  %v9243_v34 = vld [vmem:[%s9691_s21 + $0x14] ss:$8 sps:$4 sm:$0xff]   ;;  %v9245_v35 = vld [vmem:[%s9691_s21 + $0x10] ss:$8 sps:$4 sm:$0xff]   ;;  %s9914_s13 = sld [smem:[%s11354_s0 + %s9612_s10]]   ;;  %s9613_s14 = smov 9  }
   0xc   :  { %8355 = vmatpush3.bf16.msra.mxu0 %v9234_v2  ;;  %v9240_v31 = vld [vmem:[%s9691_s21 + $0x4] ss:$8 sps:$4 sm:$0xff]   ;;  %v9242_v33 = vld [vmem:[%s9691_s21] ss:$8 sps:$4 sm:$0xff]   ;;  %v9249_v38 = vld [vmem:[%s9691_s21 + $0x34] ss:$8 sps:$4 sm:$0xff]   ;;  %s9932_s18 = sld [smem:[%s11354_s0 + %s9613_s14]]  }
   0xd   :  { %8356 = vmatprep.subr.bf16.mxu0 %v9596_v0  ;;  %381 = vmatprep.subr.bf16.mxu1 %v9240_v31  ;;  %v9246_v36 = vld [vmem:[%s9691_s21 + $0x24] ss:$8 sps:$4 sm:$0xff]   ;;  %v9248_v37 = vld [vmem:[%s9691_s21 + $0x20] ss:$8 sps:$4 sm:$0xff]   ;;  %v9251_v39 = vld [vmem:[%s9691_s21 + $0x30] ss:$8 sps:$4 sm:$0xff]  }
   0xe   :  { %382 = vmatpush1.bf16.msra.mxu1 %v9242_v33  ;;  %v7777_v48 = vld [vmem:[%s9706_s25] ss:$0 sm:$0xff]  ;;  %s9614_s19 = smov 10   ;;  %s9615_s24 = smov 11  }
   0xf   :  { %383 = vmatprep.subr.bf16.mxu1 %v9243_v34  ;;  %v7778_v52 = vld [vmem:[%s9712_s29] ss:$0 sm:$0xff]  ;;  %s9957_s23 = sld [smem:[%s11354_s0 + %s9614_s19]]   ;;  %s9616_s1 = smov 13  }
  0x10   :  { %8357 = vmatpush3.bf16.msra.mxu0 %v9235_v3  ;;  %v326_v60 = vld [vmem:[%s9722_s3] sm:$0x3]  ;;  %s9977_s30 = sld [smem:[%s11354_s0 + %s9615_s24]]   ;;  %s9617_s12 = smov 17  }
  0x11   :  { %8358 = vmatprep.subr.bf16.mxu0 %v9596_v0  ;;  %v331_v62 = vrot.slane %v326_v60, %v9724_v59  ;;  %v335_v63 = vrot.slane %v326_v60, %v9727_v61  ;;  %s9989_s11 = sld [smem:[%s11354_s0 + %s9616_s1]]   ;;  %s9618_s19 = smov 18  }
  0x12   :  { %384 = vmatpush1.bf16.msra.mxu1 %v9245_v35  ;;  %s10006_s16 = sld [smem:[%s11354_s0 + %s9617_s12]]   ;;  %s9619_s27 = smov 12  }
  0x13   :  { %385 = vmatprep.subr.bf16.mxu1 %v9246_v36  ;;  %s10011_s24 = sld [smem:[%s11354_s0 + %s9618_s19]]   ;;  %s9620_s10 = smov 14  }
  0x14   :  { %8359 = vmatpush3.bf16.msra.mxu0 %v9236_v4  ;;  %s10024_s2 = sld [smem:[%s11354_s0 + %s9619_s27]]   ;;  %s9625_s28 = smov 27  }
  0x15   :  { %8360 = vmatprep.subr.bf16.mxu0 %v9596_v0  ;;  %s10032_s15 = sld [smem:[%s11354_s0 + %s9620_s10]]   ;;  %s9626_s12 = smov 28  }
  0x16   :  { %386 = vmatpush1.bf16.msra.mxu1 %v9248_v37  ;;  %s10402_s10 = sld [smem:[%s11354_s0 + %s9625_s28]]   ;;  %s9642_s14 = smov 35  }
  0x17   :  { %387 = vmatprep.subr.bf16.mxu1 %v9249_v38 }
  0x18   :  { %8361 = vmatpush3.bf16.msra.mxu0 %v9237_v5 }
  0x19   :  { %8362 = vmatprep.subr.bf16.mxu0 %v9596_v0 }
  0x1a   :  { %388 = vmatpush1.bf16.msra.mxu1 %v9251_v39 }
  0x1b   :  { %8368 = vmatprep.subr.bf16.mxu1 %v9596_v0 }
  0x1c   :  { %8363 = vmatpush3.bf16.msra.mxu0 %v9238_v6 }
  0x1d   :  { %8386 = vmatprep.subr.bf16.mxu0 %v9596_v0 }
  0x1f   :  { %8365 = vmatmul.mubr.msk.bf16.vlgmr.msra.gmra.mrb[0].mxu0 %vm224_vm1, %v9239_v7 }
  0x20   :  { %8388 = vmatprep.mubr.msk.bf16.mxu0 %vm9598_vm0, %v9596_v0 }
  0xf2   :  { %v262_v10 = vpop.f32.mrb[0].mxu0 }
  0xf3   :  { %v263_v11 = vadd.f32 %v7768_v8, %v262_v10  ;;  %v8366_v12 = vpop.f32.mrb[1].mxu0 }
  0xf4   :  { %v265_v14 = vpop.f32.mrb[2].mxu0 }
  0xf5   :  { %v9676_v15 = vadd.f32 %v263_v11, %v160_v9  ;;  %v266_v16 = vadd.f32 %v7768_v8, %v265_v14  ;;  %v8367_v17 = vpop.f32.mrb[3].mxu0 }
  0xf7   :  { %v9678_v18 = vadd.f32 %v266_v16, %v161_v13  ;;  %v274_v19 = vsel %vm273_vm2, %v9676_v15, 0.0 }
  0xf8   :  { %275 = vadd.xlane.f32.xlu0 %v274_v19 }
  0xf9   :  { %v277_v20 = vsel %vm273_vm2, %v9678_v18, 0.0 }
  0xfc   :  { %278 = vadd.xlane.f32.xlu0 %v277_v20 }
 0x185   :  { %v276_v21 = vpop.xlane.xlu0 %275 }
 0x186   :  { %v281_v22 = vmul.f32 0.015625, %v276_v21 }
 0x188   :  { %v283_v23 = vsub.f32 %v9676_v15, %v281_v22 }
 0x189   :  { %v279_v24 = vpop.xlane.xlu0 %278 }
 0x18a   :  { %v282_v25 = vmul.f32 0.015625, %v279_v24  ;;  %v285_v26 = vmul.f32 %v283_v23, %v283_v23 }
 0x18c   :  { %v284_v27 = vsub.f32 %v9678_v18, %v282_v25  ;;  %v287_v28 = vsel %vm273_vm2, %v285_v26, 0.0 }
 0x18d   :  { %288 = vadd.xlane.f32.xlu1 %v287_v28 }
 0x18e   :  { %v286_v29 = vmul.f32 %v284_v27, %v284_v27 }
 0x190   :  { %v290_v30 = vsel %vm273_vm2, %v286_v29, 0.0 }
 0x191   :  { %291 = vadd.xlane.f32.xlu1 %v290_v30 }
 0x21a   :  { %v289_v40 = vpop.xlane.xlu1 %288 }
 0x21b   :  { %v293_v41 = vmul.f32 0.015625, %v289_v40 }
 0x21d   :  { %v295_v42 = vadd.f32 1e-05, %v293_v41 }
 0x21e   :  { %v292_v43 = vpop.xlane.xlu1 %291 }
 0x21f   :  { %9394 = vrsqrt.f32 %v295_v42  ;;  %v294_v44 = vmul.f32 0.015625, %v292_v43 }
 0x221   :  { %v296_v45 = vadd.f32 1e-05, %v294_v44 }
 0x223   :  { %9396 = vrsqrt.f32 %v296_v45 }
 0x229   :  { %v9395_v46 = vpop.eup %9394 }
 0x22a   :  { %v299_v47 = vmul.f32 %v9395_v46, %v283_v23 }
 0x22c   :  { %v307_v51 = vmul.f32 %v7777_v48, %v299_v47 }
 0x22d   :  { %v9397_v49 = vpop.eup %9396 }
 0x22e   :  { %v300_v50 = vmul.f32 %v9397_v49, %v284_v27  ;;  %v315_v54 = vadd.f32 %v7778_v52, %v307_v51 }
 0x230   :  { %v308_v53 = vmul.f32 %v7777_v48, %v300_v50 }
 0x232   :  { %v316_v55 = vadd.f32 %v7778_v52, %v308_v53 }
 0x234   :  { %v317_v56 = vpack.c.bf16 %v316_v55, %v315_v54 }
 0x236   :  { %7787 = vmatmul.mubr.msk.bf16.vlgmr.msra.gmra.mrb[0].mxu1 %vm273_vm2, %v317_v56 }
 0x237   :  { %8370 = vmatprep.mubr.msk.bf16.mxu1 %vm9598_vm0, %v9596_v0 }
 0x309   :  { %v415_v1 = vpop.f32.mrb[0].mxu1 }
 0x30a   :  { %v416_v2 = vadd.f32 %v415_v1, %v331_v62  ;;  %v417_v3 = vpop.f32.mrb[1].mxu1 }
 0x30b   :  { %v418_v4 = vadd.f32 %v417_v3, %v335_v63  ;;  %v419_v5 = vpop.f32.mrb[2].mxu1 }
 0x30c   :  { %v9731_v6 = vpack.c.bf16 %v416_v2, %v416_v2  ;;  %v420_v7 = vadd.f32 %v419_v5, %v331_v62  ;;  %v421_v8 = vpop.f32.mrb[3].mxu1 }
 0x30d   :  { %v422_v9 = vadd.f32 %v421_v8, %v335_v63  ;;  %v9752_v19 = vpack.c.bf16 %v418_v4, %v418_v4 }
 0x30e   :  { %v9733_v10 = vpack.c.bf16 %v420_v7, %v420_v7  ;;  %427 = vrot.lane.b32.xlu0 %v9731_v6, %s9606_s4 }
 0x30f   :  { %v9737_v11 = vpack.c.bf16 %v422_v9, %v422_v9  ;;  %v557_v20 = vsel %vm555_vm3, %v9752_v19, 0 }
 0x310   :  { %477 = vrot.lane.b32.xlu1 %v9733_v10, %s9606_s4 }
 0x311   :  { %v603_v12 = vsel %vm555_vm3, %v9737_v11, 0 }
 0x312   :  { %8387 = vmatpush3.bf16.msra.mxu0 %v603_v12 }
 0x313   :  { %8398 = vmatprep.subr.bf16.mxu0 %v9596_v0 }
 0x380   :  { %v428_v13 = vpop.permute.xlu0 %427 }
 0x381   :  { %v434_v14 = vsel %vm429_vm4, %v428_v13, 0 }
 0x382   :  { %8369 = vmatpush3.bf16.xpose.msra.mxu1 %v434_v14  ;;  %v478_v16 = vpop.permute.xlu1 %477 }
 0x383   :  { %8374 = vmatprep.subr.bf16.mxu1 %v9596_v0  ;;  %v483_v17 = vsel %vm429_vm4, %v478_v16, 0 }
 0x389   :  { %8371 = vmatmul.mubr.msk.bf16.vlgmr.msra.gmra.mrb[4].mxu1 %vm429_vm4, %v9731_v6 }
 0x38a   :  { %8375 = vmatpush3.bf16.xpose.msra.mxu1 %v483_v17  ;;  %8376 = vmatprep.mubr.msk.bf16.mxu1 %vm9598_vm0, %v9596_v0 }
 0x38b   :  { %8380 = vmatprep.subr.bf16.mxu1 %v9596_v0 }
 0x391   :  { %8377 = vmatmul.mubr.msk.bf16.vlgmr.msra.gmra.mrb[8].mxu1 %vm429_vm4, %v9733_v10 }
 0x392   :  { %8381 = vmatpush3.bf16.msra.mxu1 %v557_v20  ;;  %8382 = vmatprep.mubr.msk.bf16.mxu1 %vm9598_vm0, %v9596_v0 }
 0x393   :  { %8392 = vmatprep.subr.bf16.mxu1 %v9596_v0 }
 0x45c   :  { %v470_v21 = vpop.f32.mrb[4].mxu1 }
 0x45d   :  { %v8372_v22 = vpop.f32.mrb[5].mxu1  ;;  %v526_v23 = vsel %vm525_vm5, %v470_v21, -inf }
 0x45e   :  { %527 = vmax.xlane.f32.xlu1 %v526_v23  ;;  %v473_v24 = vpop.f32.mrb[6].mxu1 }
 0x45f   :  { %v8373_v25 = vpop.f32.mrb[7].mxu1 }
 0x464   :  { %v519_v26 = vpop.f32.mrb[8].mxu1 }
 0x465   :  { %v8378_v27 = vpop.f32.mrb[9].mxu1  ;;  %v529_v28 = vsel %vm525_vm5, %v519_v26, -inf }
 0x466   :  { %530 = vmax.xlane.f32.xlu0 %v529_v28  ;;  %v522_v29 = vpop.f32.mrb[10].mxu1 }
 0x467   :  { %v8379_v30 = vpop.f32.mrb[11].mxu1 }
 0x46f   :  { %697 = vrot.lane.b32.xlu1 %v9733_v10, %s9607_s5 }
 0x4eb   :  { %v528_v31 = vpop.xlane.xlu1 %527 }
 0x4ec   :  { %v532_v33 = vsub.f32 %v470_v21, %v528_v31 }
 0x4ee   :  { %v534_v34 = vmul.f32 1.442695, %v532_v33 }
 0x4ef   :  { %v698_v43 = vpop.permute.xlu1 %697 }
 0x4f0   :  { %9398 = vpow2.f32 %v534_v34  ;;  %v703_v54 = vsel %vm429_vm4, %v698_v43, 0 }
 0x4f3   :  { %v531_v35 = vpop.xlane.xlu0 %530 }
 0x4f4   :  { %v533_v36 = vsub.f32 %v519_v26, %v531_v35 }
 0x4f6   :  { %v536_v37 = vmul.f32 1.442695, %v533_v36 }
 0x4f8   :  { %9400 = vpow2.f32 %v536_v37 }
 0x4fa   :  { %v9399_v38 = vpop.eup %9398 }
 0x4fb   :  { %v538_v39 = vsel %vm525_vm5, %v9399_v38, 0.0 }
 0x4fc   :  { %539 = vadd.xlane.f32.xlu0 %v538_v39 }
 0x502   :  { %v9401_v40 = vpop.eup %9400 }
 0x503   :  { %v541_v41 = vsel %vm525_vm5, %v9401_v40, 0.0 }
 0x504   :  { %542 = vadd.xlane.f32.xlu1 %v541_v41 }
 0x512   :  { %647 = vrot.lane.b32.xlu0 %v9731_v6, %s9607_s5 }
 0x515   :  { %645 = vrot.lane.b32.xlu1 %v9731_v6, %s9608_s6 }
 0x519   :  { %695 = vrot.lane.b32.xlu1 %v9733_v10, %s9608_s6 }
 0x589   :  { %v540_v42 = vpop.xlane.xlu0 %539 }
 0x58a   :  { %9402 = vrcp.f32 %v540_v42 }
 0x58d   :  { %v648_v47 = vpop.permute.xlu0 %647 }
 0x58e   :  { %v653_v49 = vsel %vm429_vm4, %v648_v47, 0 }
 0x591   :  { %v543_v44 = vpop.xlane.xlu1 %542 }
 0x592   :  { %9404 = vrcp.f32 %v543_v44 }
 0x594   :  { %v9403_v45 = vpop.eup %9402 }
 0x595   :  { %v9773_v46 = vmul.f32 %v9403_v45, %v9399_v38  ;;  %v646_v53 = vpop.permute.xlu1 %645 }
 0x597   :  { %v548_v48 = vpack.c.bf16 %v9773_v46, %v9773_v46 }
 0x599   :  { %8383 = vmatmul.mubr.msk.bf16.vlgmr.msra.gmra.mrb[12].mxu1 %vm525_vm5, %v548_v48  ;;  %v696_v55 = vpop.permute.xlu1 %695 }
 0x59a   :  { %8393 = vmatpush3.bf16.xpose.msra.mxu1 %v653_v49  ;;  %8394 = vmatprep.mubr.msk.bf16.mxu1 %vm9598_vm0, %v9596_v0 }
 0x59b   :  { %8404 = vmatprep.subr.bf16.mxu1 %v9596_v0 }
 0x59c   :  { %v9405_v50 = vpop.eup %9404 }
 0x59d   :  { %v9782_v51 = vmul.f32 %v9405_v50, %v9401_v40 }
 0x59f   :  { %v549_v52 = vpack.c.bf16 %v9782_v51, %v9782_v51 }
 0x5a1   :  { %8389 = vmatmul.mubr.msk.bf16.vlgmr.msra.gmra.mrb[4].mxu0 %vm525_vm5, %v549_v52  ;;  %8395 = vmatmul.mubr.msk.bf16.vlgmr.msra.gmra.mrb[16].mxu1 %vm429_vm4, %v646_v53 }
 0x5a2   :  { %8399 = vmatpush3.bf16.xpose.msra.mxu0 %v703_v54  ;;  %8400 = vmatprep.mubr.msk.bf16.mxu0 %vm9598_vm0, %v9596_v0 }
 0x5a3   :  { %8410 = vmatprep.subr.bf16.mxu0 %v9596_v0  ;;  %8406 = vmatprep.mubr.msk.bf16.mxu1 %vm9598_vm0, %v9596_v0 }
 0x5a9   :  { %8401 = vmatmul.mubr.msk.bf16.vlgmr.msra.gmra.mrb[8].mxu0 %vm429_vm4, %v696_v55 }
 0x5aa   :  { %8412 = vmatprep.mubr.msk.bf16.mxu0 %vm9598_vm0, %v9596_v0 }
 0x66c   :  { %v9797_v56 = vpop.f32.mrb[12].mxu1 }
 0x66d   :  { %v8384_v57 = vpop.f32.mrb[13].mxu1 }
 0x66e   :  { %v596_v58 = vpop.f32.mrb[14].mxu1 }
 0x66f   :  { %v8385_v60 = vpop.f32.mrb[15].mxu1 }
 0x674   :  { %v9799_v62 = vpop.f32.mrb[4].mxu0  ;;  %v689_v63 = vpop.f32.mrb[16].mxu1 }
 0x675   :  { %v8390_v1 = vpop.f32.mrb[5].mxu0  ;;  %v8396_v2 = vpop.f32.mrb[17].mxu1  ;;  %v745_v3 = vsel %vm525_vm5, %v689_v63, -inf }
 0x676   :  { %746 = vmax.xlane.f32.xlu0 %v745_v3  ;;  %v642_v4 = vpop.f32.mrb[6].mxu0  ;;  %v692_v5 = vpop.f32.mrb[18].mxu1 }
 0x677   :  { %v8391_v7 = vpop.f32.mrb[7].mxu0  ;;  %v8397_v8 = vpop.f32.mrb[19].mxu1 }
 0x67c   :  { %v739_v9 = vpop.f32.mrb[8].mxu0 }
 0x67d   :  { %v8402_v12 = vpop.f32.mrb[9].mxu0  ;;  %v748_v13 = vsel %vm525_vm5, %v739_v9, -inf }
 0x67e   :  { %749 = vmax.xlane.f32.xlu1 %v748_v13  ;;  %v742_v14 = vpop.f32.mrb[10].mxu0 }
 0x67f   :  { %v8403_v16 = vpop.f32.mrb[11].mxu0 }
 0x68f   :  { %819 = vrot.lane.b32.xlu1 %v9737_v11, %s9608_s6 }
 0x693   :  { %869 = vrot.lane.b32.xlu1 %v9731_v6, %s9609_s7 }
 0x697   :  { %919 = vrot.lane.b32.xlu1 %v9733_v10, %s9609_s7 }
 0x69b   :  { %917 = vrot.lane.b32.xlu1 %v9733_v10, %s9610_s8 }
 0x703   :  { %v747_v17 = vpop.xlane.xlu0 %746 }
 0x704   :  { %v751_v20 = vsub.f32 %v689_v63, %v747_v17 }
 0x706   :  { %v753_v21 = vmul.f32 1.442695, %v751_v20 }
 0x708   :  { %9406 = vpow2.f32 %v753_v21 }
 0x70b   :  { %v750_v22 = vpop.xlane.xlu1 %749 }
 0x70c   :  { %v752_v23 = vsub.f32 %v739_v9, %v750_v22 }
 0x70e   :  { %v755_v24 = vmul.f32 1.442695, %v752_v23 }
 0x70f   :  { %v820_v25 = vpop.permute.xlu1 %819 }
 0x710   :  { %9408 = vpow2.f32 %v755_v24  ;;  %v825_v26 = vsel %vm555_vm3, %v820_v25, 0 }
 0x711   :  { %8411 = vmatpush3.bf16.msra.mxu0 %v825_v26 }
 0x712   :  { %v9407_v27 = vpop.eup %9406  ;;  %8422 = vmatprep.subr.bf16.mxu0 %v9596_v0 }
 0x713   :  { %v757_v28 = vsel %vm525_vm5, %v9407_v27, 0.0  ;;  %v870_v39 = vpop.permute.xlu1 %869 }
 0x714   :  { %758 = vadd.xlane.f32.xlu0 %v757_v28  ;;  %v875_v43 = vsel %vm429_vm4, %v870_v39, 0 }
 0x717   :  { %v920_v42 = vpop.permute.xlu1 %919 }
 0x718   :  { %v925_v45 = vsel %vm429_vm4, %v920_v42, 0 }
 0x71a   :  { %v9409_v29 = vpop.eup %9408 }
 0x71b   :  { %v760_v30 = vsel %vm525_vm5, %v9409_v29, 0.0  ;;  %v918_v48 = vpop.permute.xlu1 %917 }
 0x71c   :  { %761 = vadd.xlane.f32.xlu0 %v760_v30 }
 0x732   :  { %770 = vrot.lane.b32.xlu0 %v9752_v19, %s9608_s6 }
 0x736   :  { %867 = vrot.lane.b32.xlu0 %v9731_v6, %s9610_s8 }
 0x7a1   :  { %v759_v31 = vpop.xlane.xlu0 %758 }
 0x7a2   :  { %9410 = vrcp.f32 %v759_v31 }
 0x7a9   :  { %v762_v33 = vpop.xlane.xlu0 %761 }
 0x7aa   :  { %9412 = vrcp.f32 %v762_v33 }
 0x7ac   :  { %v9411_v34 = vpop.eup %9410 }
 0x7ad   :  { %v9819_v35 = vmul.f32 %v9411_v34, %v9407_v27  ;;  %v771_v36 = vpop.permute.xlu0 %770 }
 0x7ae   :  { %v776_v37 = vsel %vm555_vm3, %v771_v36, 0 }
 0x7af   :  { %8405 = vmatpush3.bf16.msra.mxu1 %v776_v37  ;;  %v767_v38 = vpack.c.bf16 %v9819_v35, %v9819_v35  ;;  %v1670_v34 = vadd.f32 %v9819_v35, %v9773_v46 }
 0x7b0   :  { %8416 = vmatprep.subr.bf16.mxu1 %v9596_v0 }
 0x7b1   :  { %v868_v47 = vpop.permute.xlu0 %867 }
 0x7b2   :  { %8407 = vmatmul.mubr.msk.bf16.vlgmr.msra.gmra.mrb[20].mxu1 %vm525_vm5, %v767_v38 }
 0x7b3   :  { %8418 = vmatprep.mubr.msk.bf16.mxu1 %vm9598_vm0, %v9596_v0 }
 0x7b4   :  { %v9413_v40 = vpop.eup %9412 }
 0x7b5   :  { %v9828_v41 = vmul.f32 %v9413_v40, %v9409_v29 }
 0x7b7   :  { %v768_v44 = vpack.c.bf16 %v9828_v41, %v9828_v41  ;;  %v1671_v39 = vadd.f32 %v9828_v41, %v9782_v51 }
 0x7b8   :  { %8417 = vmatpush3.bf16.xpose.msra.mxu1 %v875_v43 }
 0x7b9   :  { %8413 = vmatmul.mubr.msk.bf16.vlgmr.msra.gmra.mrb[12].mxu0 %vm525_vm5, %v768_v44  ;;  %8428 = vmatprep.subr.bf16.mxu1 %v9596_v0 }
 0x7ba   :  { %8423 = vmatpush3.bf16.xpose.msra.mxu0 %v925_v45  ;;  %8424 = vmatprep.mubr.msk.bf16.mxu0 %vm9598_vm0, %v9596_v0 }
 0x7bb   :  { %8434 = vmatprep.subr.bf16.mxu0 %v9596_v0 }
 0x7bf   :  { %8419 = vmatmul.mubr.msk.bf16.vlgmr.msra.gmra.mrb[24].mxu1 %vm429_vm4, %v868_v47 }
 0x7c0   :  { %8430 = vmatprep.mubr.msk.bf16.mxu1 %vm9598_vm0, %v9596_v0 }
 0x7c1   :  { %8425 = vmatmul.mubr.msk.bf16.vlgmr.msra.gmra.mrb[16].mxu0 %vm429_vm4, %v918_v48 }
 0x7c2   :  { %8436 = vmatprep.mubr.msk.bf16.mxu0 %vm9598_vm0, %v9596_v0 }
 0x885   :  { %v9845_v49 = vpop.f32.mrb[20].mxu1 }
 0x886   :  { %v8408_v50 = vpop.f32.mrb[21].mxu1 }
 0x887   :  { %v815_v52 = vpop.f32.mrb[22].mxu1 }
 0x888   :  { %v8409_v53 = vpop.f32.mrb[23].mxu1 }
 0x88c   :  { %v9847_v54 = vpop.f32.mrb[12].mxu0 }
 0x88d   :  { %v9158_v55 = vpack.i.bf16 %v9847_v54, %v9845_v49  ;;  %v8414_v57 = vpop.f32.mrb[13].mxu0 }
 0x88e   :  { %v864_v58 = vpop.f32.mrb[14].mxu0 }
 0x88f   :  { %v8415_v60 = vpop.f32.mrb[15].mxu0 }
 0x892   :  { %v911_v63 = vpop.f32.mrb[24].mxu1 }
 0x893   :  { %v8420_v1 = vpop.f32.mrb[25].mxu1  ;;  %v967_v2 = vsel %vm525_vm5, %v911_v63, -inf }
 0x894   :  { %968 = vmax.xlane.f32.xlu0 %v967_v2  ;;  %v914_v3 = vpop.f32.mrb[26].mxu1  ;;  %v961_v4 = vpop.f32.mrb[16].mxu0 }
 0x895   :  { %v8421_v5 = vpop.f32.mrb[27].mxu1  ;;  %v8426_v7 = vpop.f32.mrb[17].mxu0  ;;  %v970_v8 = vsel %vm525_vm5, %v961_v4, -inf }
 0x896   :  { %971 = vmax.xlane.f32.xlu1 %v970_v8  ;;  %v964_v9 = vpop.f32.mrb[18].mxu0 }
 0x897   :  { %v8427_v12 = vpop.f32.mrb[19].mxu0 }
 0x8a7   :  { %1039 = vrot.lane.b32.xlu1 %v9737_v11, %s9610_s8 }
 0x8ab   :  { %1089 = vrot.lane.b32.xlu1 %v9731_v6, %s9604_s26 }
 0x8af   :  { %1139 = vrot.lane.b32.xlu1 %v9733_v10, %s9604_s26 }
 0x8b3   :  { %1137 = vrot.lane.b32.xlu1 %v9733_v10, %s9611_s9 }
 0x921   :  { %v969_v13 = vpop.xlane.xlu0 %968 }
 0x922   :  { %v973_v14 = vsub.f32 %v911_v63, %v969_v13 }
 0x923   :  { %v972_v16 = vpop.xlane.xlu1 %971 }
 0x924   :  { %v975_v17 = vmul.f32 1.442695, %v973_v14  ;;  %v974_v20 = vsub.f32 %v961_v4, %v972_v16 }
 0x926   :  { %9414 = vpow2.f32 %v975_v17  ;;  %v977_v21 = vmul.f32 1.442695, %v974_v20 }
 0x927   :  { %v1040_v22 = vpop.permute.xlu1 %1039 }
 0x928   :  { %9416 = vpow2.f32 %v977_v21  ;;  %v1045_v23 = vsel %vm555_vm3, %v1040_v22, 0 }
 0x929   :  { %8435 = vmatpush3.bf16.msra.mxu0 %v1045_v23 }
 0x92a   :  { %8446 = vmatprep.subr.bf16.mxu0 %v9596_v0 }
 0x92b   :  { %v1090_v33 = vpop.permute.xlu1 %1089 }
 0x92c   :  { %v1095_v43 = vsel %vm429_vm4, %v1090_v33, 0 }
 0x92f   :  { %v1140_v42 = vpop.permute.xlu1 %1139 }
 0x930   :  { %v9415_v24 = vpop.eup %9414  ;;  %v1145_v35 = vsel %vm429_vm4, %v1140_v42, 0 }
 0x931   :  { %v979_v25 = vsel %vm525_vm5, %v9415_v24, 0.0 }
 0x932   :  { %v9417_v26 = vpop.eup %9416  ;;  %980 = vadd.xlane.f32.xlu0 %v979_v25 }
 0x933   :  { %v982_v10 = vsel %vm525_vm5, %v9417_v26, 0.0  ;;  %v1138_v41 = vpop.permute.xlu1 %1137 }
 0x936   :  { %983 = vadd.xlane.f32.xlu0 %v982_v10 }
 0x94c   :  { %991 = vrot.lane.b32.xlu0 %v9752_v19, %s9610_s8 }
 0x950   :  { %1087 = vrot.lane.b32.xlu0 %v9731_v6, %s9611_s9 }
 0x9bf   :  { %v981_v27 = vpop.xlane.xlu0 %980 }
 0x9c0   :  { %9418 = vrcp.f32 %v981_v27 }
 0x9c3   :  { %v984_v28 = vpop.xlane.xlu0 %983 }
 0x9c4   :  { %9420 = vrcp.f32 %v984_v28 }
 0x9c7   :  { %v992_v29 = vpop.permute.xlu0 %991 }
 0x9c8   :  { %v997_v30 = vsel %vm555_vm3, %v992_v29, 0 }
 0x9c9   :  { %8429 = vmatpush3.bf16.msra.mxu1 %v997_v30 }
 0x9ca   :  { %v9419_v31 = vpop.eup %9418  ;;  %8440 = vmatprep.subr.bf16.mxu1 %v9596_v0 }
 0x9cb   :  { %v986_v36 = vmul.f32 %v9419_v31, %v9415_v24  ;;  %v1088_v51 = vpop.permute.xlu0 %1087 }
 0x9cd   :  { %v9873_v37 = vadd.f32 %v1670_v34, %v986_v36  ;;  %v989_v38 = vpack.c.bf16 %v986_v36, %v986_v36 }
 0x9ce   :  { %v9421_v6 = vpop.eup %9420 }
 0x9cf   :  { %v988_v40 = vmul.f32 %v9421_v6, %v9417_v26  ;;  %8431 = vmatmul.mubr.msk.bf16.vlgmr.msra.gmra.mrb[28].mxu1 %vm525_vm5, %v989_v38  ;;  %v9253_v6 = vld [vmem:[%s9932_s18 + $0x8] sm:$0xff]  }
 0x9d0   :  { %8442 = vmatprep.mubr.msk.bf16.mxu1 %vm9598_vm0, %v9596_v0 }
 0x9d1   :  { %v9881_v44 = vadd.f32 %v1671_v39, %v988_v40  ;;  %v990_v46 = vpack.c.bf16 %v988_v40, %v988_v40  ;;  %v9254_v39 = vld [vmem:[%s9932_s18 + $0x10] sm:$0xff]   ;;  %v9255_v40 = vld [vmem:[%s9932_s18 + $0x18] sm:$0xff]  }
 0x9d2   :  { %8441 = vmatpush3.bf16.xpose.msra.mxu1 %v1095_v43 }
 0x9d3   :  { %8437 = vmatmul.mubr.msk.bf16.vlgmr.msra.gmra.mrb[20].mxu0 %vm525_vm5, %v990_v46  ;;  %8452 = vmatprep.subr.bf16.mxu1 %v9596_v0 }
 0x9d4   :  { %8447 = vmatpush3.bf16.xpose.msra.mxu0 %v1145_v35  ;;  %8448 = vmatprep.mubr.msk.bf16.mxu0 %vm9598_vm0, %v9596_v0 }
 0x9d5   :  { %8458 = vmatprep.subr.bf16.mxu0 %v9596_v0 }
 0x9d9   :  { %8443 = vmatmul.mubr.msk.bf16.vlgmr.msra.gmra.mrb[32].mxu1 %vm429_vm4, %v1088_v51 }
 0x9da   :  { %8454 = vmatprep.mubr.msk.bf16.mxu1 %vm9598_vm0, %v9596_v0 }
 0x9db   :  { %8449 = vmatmul.mubr.msk.bf16.vlgmr.msra.gmra.mrb[24].mxu0 %vm429_vm4, %v1138_v41 }
 0x9dc   :  { %8460 = vmatprep.mubr.msk.bf16.mxu0 %vm9598_vm0, %v9596_v0 }
 0xaa2   :  { %v1033_v45 = vpop.f32.mrb[28].mxu1 }
 0xaa3   :  { %v8432_v47 = vpop.f32.mrb[29].mxu1 }
 0xaa4   :  { %v1036_v48 = vpop.f32.mrb[30].mxu1 }
 0xaa5   :  { %v8433_v50 = vpop.f32.mrb[31].mxu1 }
 0xaa6   :  { %v1081_v52 = vpop.f32.mrb[20].mxu0 }
 0xaa7   :  { %v9163_v53 = vpack.i.bf16 %v1081_v52, %v1033_v45  ;;  %v8438_v57 = vpop.f32.mrb[21].mxu0 }
 0xaa8   :  { %v1084_v58 = vpop.f32.mrb[22].mxu0 }
 0xaa9   :  { %v8439_v60 = vpop.f32.mrb[23].mxu0 }
 0xaac   :  { %v1131_v63 = vpop.f32.mrb[32].mxu1 }
 0xaad   :  { %v8444_v1 = vpop.f32.mrb[33].mxu1  ;;  %v1187_v2 = vsel %vm525_vm5, %v1131_v63, -inf }
 0xaae   :  { %1188 = vmax.xlane.f32.xlu0 %v1187_v2  ;;  %v1134_v3 = vpop.f32.mrb[34].mxu1  ;;  %v1181_v4 = vpop.f32.mrb[24].mxu0 }
 0xaaf   :  { %v8445_v5 = vpop.f32.mrb[35].mxu1  ;;  %v8450_v7 = vpop.f32.mrb[25].mxu0  ;;  %v1190_v8 = vsel %vm525_vm5, %v1181_v4, -inf }
 0xab0   :  { %1191 = vmax.xlane.f32.xlu1 %v1190_v8  ;;  %v1184_v9 = vpop.f32.mrb[26].mxu0 }
 0xab1   :  { %v8451_v12 = vpop.f32.mrb[27].mxu0 }
 0xac1   :  { %1259 = vrot.lane.b32.xlu1 %v9737_v11, %s9611_s9 }
 0xac5   :  { %9159 = vrot.lane.b32.xlu1 %v9158_v55, %s9604_s26 }
 0xac9   :  { %9164 = vrot.lane.b32.xlu1 %v9163_v53, %s9609_s7 }
 0xb3b   :  { %v1189_v13 = vpop.xlane.xlu0 %1188 }
 0xb3c   :  { %v1193_v14 = vsub.f32 %v1131_v63, %v1189_v13 }
 0xb3d   :  { %v1192_v16 = vpop.xlane.xlu1 %1191 }
 0xb3e   :  { %v1195_v17 = vmul.f32 1.442695, %v1193_v14  ;;  %v1194_v20 = vsub.f32 %v1181_v4, %v1192_v16 }
 0xb40   :  { %9422 = vpow2.f32 %v1195_v17  ;;  %v1197_v21 = vmul.f32 1.442695, %v1194_v20 }
 0xb41   :  { %v1260_v22 = vpop.permute.xlu1 %1259 }
 0xb42   :  { %9424 = vpow2.f32 %v1197_v21  ;;  %v1265_v23 = vsel %vm555_vm3, %v1260_v22, 0 }
 0xb43   :  { %8459 = vmatpush3.bf16.msra.mxu0 %v1265_v23 }
 0xb44   :  { %8476 = vmatprep.subr.bf16.mxu0 %v9596_v0 }
 0xb45   :  { %v9160_v48 = vpop.permute.xlu1 %9159 }
 0xb46   :  { %v9162_v52 = vunpack.i.h.bf16 %v9160_v48  ;;  %v9161_v53 = vunpack.i.l.bf16 %v9160_v48 }
 0xb48   :  { %v1332_v63 = vsel %vm429_vm4, %v9799_v62, %v9162_v52  ;;  %v1331_v1 = vsel %vm429_vm4, %v9797_v56, %v9161_v53  ;;  %v7804_v56 = vld [vmem:[%s9957_s23] ss:$0 sm:$0xff] }
 0xb49   :  { %v9165_v50 = vpop.permute.xlu1 %9164 }
 0xb4a   :  { %v9423_v11 = vpop.eup %9422  ;;  %v9167_v57 = vunpack.i.h.bf16 %v9165_v50  ;;  %v9166_v58 = vunpack.i.l.bf16 %v9165_v50 }
 0xb4b   :  { %v1199_v49 = vsel %vm525_vm5, %v9423_v11, 0.0 }
 0xb4c   :  { %v9425_v54 = vpop.eup %9424  ;;  %1200 = vadd.xlane.f32.xlu0 %v1199_v49  ;;  %v1334_v4 = vsel %vm1333_vm6, %v1331_v1, %v9166_v58  ;;  %v1335_v5 = vsel %vm1333_vm6, %v1332_v63, %v9167_v57  ;;  %v9266_v57 = vld [vmem:[%s9989_s11 + $0x30] sm:$0xff]   ;;  %v9267_v58 = vld [vmem:[%s9989_s11 + $0x38] sm:$0xff]  }
 0xb4d   :  { %v1202_v55 = vsel %vm525_vm5, %v9425_v54, 0.0 }
 0xb50   :  { %1203 = vadd.xlane.f32.xlu0 %v1202_v55 }
 0xb66   :  { %1211 = vrot.lane.b32.xlu0 %v9752_v19, %s9611_s9 }
 0xbd9   :  { %v1201_v24 = vpop.xlane.xlu0 %1200 }
 0xbda   :  { %9426 = vrcp.f32 %v1201_v24 }
 0xbdd   :  { %v1204_v25 = vpop.xlane.xlu0 %1203 }
 0xbde   :  { %9428 = vrcp.f32 %v1204_v25 }
 0xbe1   :  { %v1212_v26 = vpop.permute.xlu0 %1211 }
 0xbe2   :  { %v1217_v10 = vsel %vm555_vm3, %v1212_v26, 0 }
 0xbe3   :  { %8453 = vmatpush3.bf16.msra.mxu1 %v1217_v10 }
 0xbe4   :  { %v9427_v27 = vpop.eup %9426  ;;  %8464 = vmatprep.subr.bf16.mxu1 %v9596_v0 }
 0xbe5   :  { %v1206_v19 = vmul.f32 %v9427_v27, %v9423_v11  ;;  %v9256_v27 = vld [vmem:[%s9977_s30] sm:$0xff]  }
 0xbe7   :  { %v1674_v28 = vadd.f32 %v9873_v37, %v1206_v19  ;;  %v1209_v29 = vpack.c.bf16 %v1206_v19, %v1206_v19  ;;  %v9252_v37 = vld [vmem:[%s9932_s18] sm:$0xff]   ;;  %v9257_v19 = vld [vmem:[%s9977_s30 + $0x8] sm:$0xff]  }
 0xbe8   :  { %v9429_v30 = vpop.eup %9428 }
 0xbe9   :  { %v1676_v31 = vmul.f32 0.25, %v1674_v28  ;;  %v1208_v33 = vmul.f32 %v9429_v30, %v9425_v54  ;;  %8455 = vmatmul.mubr.msk.bf16.vlgmr.msra.gmra.mrb[36].mxu1 %vm525_vm5, %v1209_v29  ;;  %v9258_v28 = vld [vmem:[%s9977_s30 + $0x10] sm:$0xff]   ;;  %v9259_v29 = vld [vmem:[%s9977_s30 + $0x18] sm:$0xff]   ;;  %v9260_v30 = vld [vmem:[%s9989_s11] sm:$0xff]  }
 0xbea   :  { %8472 = vmatprep.mubr.msk.bf16.mxu1 %vm9598_vm0, %v9596_v0  ;;  %8465 = vmatpush3.bf16.msra.mxu1 %v9252_v37 }
 0xbeb   :  { %1678 = vst.msk [vmem:[%s9914_s13] sm:$0xff] %vm525_vm5, %v1676_v31  ;;  %v1675_v34 = vadd.f32 %v9881_v44, %v1208_v33  ;;  %v1210_v36 = vpack.c.bf16 %v1208_v33, %v1208_v33  ;;  %8466 = vmatprep.subr.bf16.mxu1 %v9596_v0  ;;  %v9261_v31 = vld [vmem:[%s9989_s11 + $0x8] sm:$0xff]   ;;  %v9262_v33 = vld [vmem:[%s9989_s11 + $0x10] sm:$0xff]  }
 0xbed   :  { %v1677_v38 = vmul.f32 0.25, %v1675_v34  ;;  %8461 = vmatmul.mubr.msk.bf16.vlgmr.msra.gmra.mrb[28].mxu0 %vm525_vm5, %v1210_v36  ;;  %v9263_v34 = vld [vmem:[%s9989_s11 + $0x18] sm:$0xff]   ;;  %v9264_v36 = vld [vmem:[%s9989_s11 + $0x20] sm:$0xff]  }
 0xbee   :  { %8484 = vmatprep.mubr.msk.bf16.mxu0 %vm9598_vm0, %v9596_v0  ;;  %8467 = vmatpush3.bf16.msra.mxu1 %v9253_v6 }
 0xbef   :  { %1679 = vst.msk [vmem:[%s9914_s13 + $0x8] sm:$0xff] %vm525_vm5, %v1677_v38  ;;  %8468 = vmatprep.subr.bf16.mxu1 %v9596_v0  ;;  %8477 = vmatpush3.bf16.msra.mxu0 %v9256_v27  ;;  %v9265_v38 = vld [vmem:[%s9989_s11 + $0x28] sm:$0xff]  }
 0xbf0   :  { %8478 = vmatprep.subr.bf16.mxu0 %v9596_v0  ;;  %v9270_v27 = vld [vmem:[%s9691_s21 + $0x4] ss:$8 sps:$4 sm:$0xff]  }
 0xbf2   :  { %8469 = vmatpush3.bf16.msra.mxu1 %v9254_v39 }
 0xbf3   :  { %8470 = vmatprep.subr.bf16.mxu1 %v9596_v0  ;;  %8479 = vmatpush3.bf16.msra.mxu0 %v9257_v19  ;;  %v9268_v19 = vld [vmem:[%s9691_s21] ss:$8 sps:$4 sm:$0xff]  }
 0xbf4   :  { %8480 = vmatprep.subr.bf16.mxu0 %v9596_v0 }
 0xbf6   :  { %8471 = vmatpush3.bf16.msra.mxu1 %v9255_v40 }
 0xbf7   :  { %8488 = vmatprep.subr.bf16.mxu1 %v9596_v0  ;;  %8481 = vmatpush3.bf16.msra.mxu0 %v9258_v28  ;;  %v9273_v28 = vld [vmem:[%s9691_s21 + $0x14] ss:$8 sps:$4 sm:$0xff]  }
 0xbf8   :  { %8482 = vmatprep.subr.bf16.mxu0 %v9596_v0 }
 0xbfb   :  { %8483 = vmatpush3.bf16.msra.mxu0 %v9259_v29  ;;  %v9271_v29 = vld [vmem:[%s9691_s21 + $0x10] ss:$8 sps:$4 sm:$0xff]  }
 0xbfc   :  { %1788 = vmatprep.subr.bf16.mxu0 %v9270_v27 }
 0xcbc   :  { %v1253_v42 = vpop.f32.mrb[36].mxu1 }
 0xcbd   :  { %v8456_v43 = vpop.f32.mrb[37].mxu1 }
 0xcbe   :  { %v1256_v44 = vpop.f32.mrb[38].mxu1 }
 0xcbf   :  { %v8457_v46 = vpop.f32.mrb[39].mxu1 }
 0xcc0   :  { %v1301_v35 = vpop.f32.mrb[28].mxu0 }
 0xcc1   :  { %v9168_v51 = vpack.i.bf16 %v1301_v35, %v1253_v42  ;;  %v8462_v41 = vpop.f32.mrb[29].mxu0  ;;  %v7810_v35 = vld [vmem:[%s10006_s16] ss:$0 sm:$0xff] }
 0xcc2   :  { %v1304_v45 = vpop.f32.mrb[30].mxu0 }
 0xcc3   :  { %9169 = vrot.lane.b32.xlu0 %v9168_v51, %s9607_s5  ;;  %v8463_v47 = vpop.f32.mrb[31].mxu0 }
 0xcc4   :  { %v7811_v47 = vld [vmem:[%s10011_s24] ss:$0 sm:$0xff] }
 0xd35   :  { %v9170_v60 = vpop.permute.xlu0 %9169 }
 0xd36   :  { %v9172_v2 = vunpack.i.h.bf16 %v9170_v60  ;;  %v9171_v3 = vunpack.i.l.bf16 %v9170_v60  ;;  %v7812_v60 = vld [vmem:[%s10024_s2] ss:$0 sm:$0xff] }
 0xd38   :  { %v1338_v7 = vsel %vm1336_vm7, %v1335_v5, %v9172_v2  ;;  %v1337_v8 = vsel %vm1336_vm7, %v1334_v4, %v9171_v3 }
 0xd39   :  { %v1339_v9 = vpack.c.bf16 %v1338_v7, %v1337_v8 }
 0xd3b   :  { %8473 = vmatmul.mubr.msk.bf16.vlgmr.msra.gmra.mrb[40].mxu1 %vm273_vm2, %v1339_v9 }
 0xd3c   :  { %8504 = vmatprep.mubr.msk.bf16.mxu1 %vm9598_vm0, %v9596_v0  ;;  %8489 = vmatpush3.bf16.msra.mxu1 %v9260_v30  ;;  %v9276_v30 = vld [vmem:[%s9691_s21 + $0x24] ss:$8 sps:$4 sm:$0xff]  }
 0xd3d   :  { %8490 = vmatprep.subr.bf16.mxu1 %v9596_v0 }
 0xd40   :  { %8491 = vmatpush3.bf16.msra.mxu1 %v9261_v31  ;;  %v9274_v31 = vld [vmem:[%s9691_s21 + $0x20] ss:$8 sps:$4 sm:$0xff]  }
 0xd41   :  { %8492 = vmatprep.subr.bf16.mxu1 %v9596_v0 }
 0xd44   :  { %8493 = vmatpush3.bf16.msra.mxu1 %v9262_v33  ;;  %v9277_v33 = vld [vmem:[%s9691_s21 + $0x30] ss:$8 sps:$4 sm:$0xff]  }
 0xd45   :  { %8494 = vmatprep.subr.bf16.mxu1 %v9596_v0 }
 0xd48   :  { %8495 = vmatpush3.bf16.msra.mxu1 %v9263_v34  ;;  %v9279_v34 = vld [vmem:[%s9691_s21 + $0x34] ss:$8 sps:$4 sm:$0xff]   ;;  %s9621_s21 = smov 5  }
 0xd49   :  { %8496 = vmatprep.subr.bf16.mxu1 %v9596_v0 }
 0xd4c   :  { %8497 = vmatpush3.bf16.msra.mxu1 %v9264_v36 }
 0xd4d   :  { %8498 = vmatprep.subr.bf16.mxu1 %v9596_v0 }
 0xd50   :  { %8499 = vmatpush3.bf16.msra.mxu1 %v9265_v38 }
 0xd51   :  { %8500 = vmatprep.subr.bf16.mxu1 %v9596_v0 }
 0xd54   :  { %8501 = vmatpush3.bf16.msra.mxu1 %v9266_v57 }
 0xd55   :  { %8502 = vmatprep.subr.bf16.mxu1 %v9596_v0 }
 0xd58   :  { %8503 = vmatpush3.bf16.msra.mxu1 %v9267_v58 }
 0xd59   :  { %8520 = vmatprep.subr.bf16.mxu1 %v9596_v0 }
 0xe0e   :  { %v1416_v62 = vpop.f32.mrb[40].mxu1 }
 0xe0f   :  { %v1417_v12 = vadd.f32 %v7804_v56, %v1416_v62  ;;  %v8474_v13 = vpop.f32.mrb[41].mxu1 }
 0xe10   :  { %v1419_v14 = vpop.f32.mrb[42].mxu1 }
 0xe11   :  { %v9961_v16 = vadd.f32 %v1417_v12, %v9676_v15  ;;  %v1420_v17 = vadd.f32 %v7804_v56, %v1419_v14  ;;  %v8475_v20 = vpop.f32.mrb[43].mxu1  ;;  %v7818_v56 = vld [vmem:[%s10032_s15] ss:$0 sm:$0xff] }
 0xe13   :  { %v9964_v21 = vadd.f32 %v1420_v17, %v9678_v18  ;;  %v1427_v22 = vsel %vm273_vm2, %v9961_v16, 0.0 }
 0xe14   :  { %1428 = vadd.xlane.f32.xlu1 %v1427_v22 }
 0xe15   :  { %v1430_v23 = vsel %vm273_vm2, %v9964_v21, 0.0 }
 0xe16   :  { %1431 = vadd.xlane.f32.xlu0 %v1430_v23 }
 0xea1   :  { %v1429_v11 = vpop.xlane.xlu1 %1428 }
 0xea2   :  { %v1433_v49 = vmul.f32 0.015625, %v1429_v11 }
 0xea3   :  { %v1432_v54 = vpop.xlane.xlu0 %1431 }
 0xea4   :  { %v1435_v55 = vsub.f32 %v9961_v16, %v1433_v49  ;;  %v1434_v15 = vmul.f32 0.015625, %v1432_v54 }
 0xea6   :  { %v1436_v24 = vsub.f32 %v9964_v21, %v1434_v15  ;;  %v1437_v25 = vmul.f32 %v1435_v55, %v1435_v55 }
 0xea8   :  { %v1439_v18 = vsel %vm273_vm2, %v1437_v25, 0.0  ;;  %v1438_v26 = vmul.f32 %v1436_v24, %v1436_v24 }
 0xea9   :  { %1440 = vadd.xlane.f32.xlu0 %v1439_v18 }
 0xeaa   :  { %v1442_v10 = vsel %vm273_vm2, %v1438_v26, 0.0 }
 0xead   :  { %1443 = vadd.xlane.f32.xlu0 %v1442_v10 }
 0xf36   :  { %v1441_v37 = vpop.xlane.xlu0 %1440 }
 0xf37   :  { %v1445_v6 = vmul.f32 0.015625, %v1441_v37 }
 0xf39   :  { %v1447_v39 = vadd.f32 1e-05, %v1445_v6 }
 0xf3a   :  { %v1444_v40 = vpop.xlane.xlu0 %1443 }
 0xf3b   :  { %9430 = vrsqrt.f32 %v1447_v39  ;;  %v1446_v42 = vmul.f32 0.015625, %v1444_v40 }
 0xf3d   :  { %v1448_v43 = vadd.f32 1e-05, %v1446_v42 }
 0xf3f   :  { %9432 = vrsqrt.f32 %v1448_v43  ;;  %v7827_v43 = vld [vmem:[%s9706_s25] ss:$0 sm:$0xff]  ;;  %s9627_s25 = smov 20  }
 0xf45   :  { %v9431_v44 = vpop.eup %9430 }
 0xf46   :  { %v1451_v46 = vmul.f32 %v9431_v44, %v1435_v55 }
 0xf48   :  { %v1459_v41 = vmul.f32 %v7810_v35, %v1451_v46 }
 0xf49   :  { %v9433_v51 = vpop.eup %9432 }
 0xf4a   :  { %v1452_v45 = vmul.f32 %v9433_v51, %v1436_v24  ;;  %v1467_v50 = vadd.f32 %v7811_v47, %v1459_v41  ;;  %v7828_v41 = vld [vmem:[%s9712_s29] ss:$0 sm:$0xff]  ;;  %s9636_s29 = smov 26  }
 0xf4c   :  { %v1460_v48 = vmul.f32 %v7810_v35, %v1452_v45 }
 0xf4e   :  { %v1468_v52 = vadd.f32 %v7811_v47, %v1460_v48 }
 0xf50   :  { %v1469_v53 = vpack.c.bf16 %v1468_v52, %v1467_v50  ;;  %v1733_v52 = vld [vmem:[%s9722_s3] sm:$0x3]  ;;  %s10304_s3 = sld [smem:[%s11354_s0 + %s9621_s21]]  }
 0xf51   :  { %v1742_v57 = vrot.slane %v1733_v52, %v9727_v61  ;;  %s10407_s21 = sld [smem:[%s11354_s0 + %s9626_s12]]  }
 0xf52   :  { %8485 = vmatmul.mubr.msk.bf16.vlgmr.msra.gmra.mrb[32].mxu0 %vm273_vm2, %v1469_v53  ;;  %v1738_v53 = vrot.slane %v1733_v52, %v9724_v59 }
 0xf53   :  { %1820 = vmatprep.mubr.bf16.mxu0 %v9602_v32  ;;  %1789 = vmatpush1.bf16.msra.mxu0 %v9268_v19 }
 0xf54   :  { %1790 = vmatprep.subr.bf16.mxu0 %v9273_v28 }
 0xf57   :  { %1791 = vmatpush1.bf16.msra.mxu0 %v9271_v29 }
 0xf58   :  { %1792 = vmatprep.subr.bf16.mxu0 %v9276_v30 }
 0xf5b   :  { %1793 = vmatpush1.bf16.msra.mxu0 %v9274_v31 }
 0xf5c   :  { %1794 = vmatprep.subr.bf16.mxu0 %v9279_v34 }
 0xf5f   :  { %1795 = vmatpush1.bf16.msra.mxu0 %v9277_v33 }
 0xf60   :  { %8508 = vmatprep.subr.bf16.mxu0 %v9596_v0 }
0x1025   :  { %v1546_v63 = vpop.f32.mrb[32].mxu0 }
0x1026   :  { %v1547_v1 = vadd.f32 %v7812_v60, %v1546_v63  ;;  %v8486_v2 = vpop.f32.mrb[33].mxu0 }
0x1027   :  { %v1549_v3 = vpop.f32.mrb[34].mxu0 }
0x1028   :  { %v1550_v4 = vadd.f32 %v7812_v60, %v1549_v3  ;;  %v8487_v5 = vpop.f32.mrb[35].mxu0  ;;  %v1553_v7 = vmax.f32 %v1547_v1, 0.0 }
0x102a   :  { %v1554_v8 = vmax.f32 %v1550_v4, 0.0 }
0x102c   :  { %v1555_v9 = vpack.c.bf16 %v1554_v8, %v1553_v7 }
0x102e   :  { %8505 = vmatmul.mubr.bf16.vlgmr.msra.gmra.mrb[44].mxu1 %v1555_v9 }
0x102f   :  { %8522 = vmatprep.mubr.msk.bf16.mxu1 %vm9598_vm0, %v9596_v0 }
0x1101   :  { %v1661_v62 = vpop.f32.mrb[44].mxu1 }
0x1102   :  { %v1662_v12 = vadd.f32 %v7818_v56, %v1661_v62  ;;  %v8506_v13 = vpop.f32.mrb[45].mxu1 }
0x1103   :  { %v1664_v14 = vpop.f32.mrb[46].mxu1 }
0x1104   :  { %v10036_v17 = vadd.f32 %v1662_v12, %v9961_v16  ;;  %v1665_v20 = vadd.f32 %v7818_v56, %v1664_v14  ;;  %v8507_v22 = vpop.f32.mrb[47].mxu1 }
0x1106   :  { %v10039_v23 = vadd.f32 %v1665_v20, %v9964_v21  ;;  %v1682_v11 = vsel %vm273_vm2, %v10036_v17, 0.0 }
0x1107   :  { %1683 = vadd.xlane.f32.xlu1 %v1682_v11 }
0x1108   :  { %v1685_v49 = vsel %vm273_vm2, %v10039_v23, 0.0 }
0x1109   :  { %1686 = vadd.xlane.f32.xlu0 %v1685_v49 }
0x1194   :  { %v1684_v54 = vpop.xlane.xlu1 %1683 }
0x1195   :  { %v1688_v55 = vmul.f32 0.015625, %v1684_v54 }
0x1196   :  { %v1687_v16 = vpop.xlane.xlu0 %1686 }
0x1197   :  { %v1690_v15 = vsub.f32 %v10036_v17, %v1688_v55  ;;  %v1689_v24 = vmul.f32 0.015625, %v1687_v16 }
0x1199   :  { %v1691_v21 = vsub.f32 %v10039_v23, %v1689_v24  ;;  %v1692_v25 = vmul.f32 %v1690_v15, %v1690_v15 }
0x119b   :  { %v1694_v18 = vsel %vm273_vm2, %v1692_v25, 0.0  ;;  %v1693_v26 = vmul.f32 %v1691_v21, %v1691_v21 }
0x119c   :  { %1695 = vadd.xlane.f32.xlu1 %v1694_v18 }
0x119d   :  { %v1697_v10 = vsel %vm273_vm2, %v1693_v26, 0.0 }
0x119e   :  { %1698 = vadd.xlane.f32.xlu0 %v1697_v10 }
0x1229   :  { %v1696_v36 = vpop.xlane.xlu1 %1695 }
0x122a   :  { %v1700_v38 = vmul.f32 0.015625, %v1696_v36 }
0x122b   :  { %v1699_v37 = vpop.xlane.xlu0 %1698 }
0x122c   :  { %v1702_v6 = vadd.f32 1e-05, %v1700_v38  ;;  %v1701_v39 = vmul.f32 0.015625, %v1699_v37 }
0x122e   :  { %9434 = vrsqrt.f32 %v1702_v6  ;;  %v1703_v40 = vadd.f32 1e-05, %v1701_v39 }
0x1230   :  { %9436 = vrsqrt.f32 %v1703_v40 }
0x1238   :  { %v9435_v42 = vpop.eup %9434 }
0x1239   :  { %v1706_v44 = vmul.f32 %v9435_v42, %v1690_v15 }
0x123a   :  { %v9437_v46 = vpop.eup %9436 }
0x123b   :  { %v1714_v35 = vmul.f32 %v7827_v43, %v1706_v44  ;;  %v1707_v51 = vmul.f32 %v9437_v46, %v1691_v21 }
0x123d   :  { %v1715_v45 = vmul.f32 %v7827_v43, %v1707_v51  ;;  %v1722_v47 = vadd.f32 %v7828_v41, %v1714_v35 }
0x123f   :  { %v1723_v48 = vadd.f32 %v7828_v41, %v1715_v45 }
0x1241   :  { %v1724_v50 = vpack.c.bf16 %v1723_v48, %v1722_v47 }
0x1243   :  { %7837 = vmatmul.mubr.msk.bf16.vlgmr.msra.gmra.mrb[36].mxu0 %vm273_vm2, %v1724_v50 }
0x1244   :  { %8510 = vmatprep.mubr.msk.bf16.mxu0 %vm9598_vm0, %v9596_v0 }
0x1316   :  { %v1822_v58 = vpop.f32.mrb[36].mxu0 }
0x1317   :  { %v1823_v60 = vadd.f32 %v1822_v58, %v1738_v53  ;;  %v1824_v63 = vpop.f32.mrb[37].mxu0 }
0x1318   :  { %v1825_v1 = vadd.f32 %v1824_v63, %v1742_v57  ;;  %v1826_v2 = vpop.f32.mrb[38].mxu0 }
0x1319   :  { %v10066_v3 = vpack.c.bf16 %v1823_v60, %v1823_v60  ;;  %v1827_v4 = vadd.f32 %v1826_v2, %v1738_v53  ;;  %v1828_v5 = vpop.f32.mrb[39].mxu0 }
0x131a   :  { %v10068_v7 = vpack.c.bf16 %v1825_v1, %v1825_v1  ;;  %v1829_v8 = vadd.f32 %v1828_v5, %v1742_v57 }
0x131b   :  { %v10070_v9 = vpack.c.bf16 %v1827_v4, %v1827_v4  ;;  %1834 = vrot.lane.b32.xlu1 %v10066_v3, %s9606_s4 }
0x131c   :  { %v1961_v56 = vsel %vm555_vm3, %v10068_v7, 0  ;;  %v10087_v20 = vpack.c.bf16 %v1829_v8, %v1829_v8 }
0x131d   :  { %1883 = vrot.lane.b32.xlu0 %v10070_v9, %s9606_s4  ;;  %8521 = vmatpush3.bf16.msra.mxu1 %v1961_v56 }
0x131e   :  { %8532 = vmatprep.subr.bf16.mxu1 %v9596_v0  ;;  %v2007_v22 = vsel %vm555_vm3, %v10087_v20, 0 }
0x138d   :  { %v1835_v62 = vpop.permute.xlu1 %1834 }
0x138e   :  { %v1840_v12 = vsel %vm429_vm4, %v1835_v62, 0 }
0x138f   :  { %8509 = vmatpush3.bf16.xpose.msra.mxu0 %v1840_v12  ;;  %v1884_v13 = vpop.permute.xlu0 %1883 }
0x1390   :  { %8514 = vmatprep.subr.bf16.mxu0 %v9596_v0  ;;  %v1889_v14 = vsel %vm429_vm4, %v1884_v13, 0 }
0x1396   :  { %8511 = vmatmul.mubr.msk.bf16.vlgmr.msra.gmra.mrb[40].mxu0 %vm429_vm4, %v10066_v3 }
0x1397   :  { %8515 = vmatpush3.bf16.xpose.msra.mxu0 %v1889_v14  ;;  %8516 = vmatprep.mubr.msk.bf16.mxu0 %vm9598_vm0, %v9596_v0 }
0x1398   :  { %8526 = vmatprep.subr.bf16.mxu0 %v9596_v0 }
0x139e   :  { %8517 = vmatmul.mubr.msk.bf16.vlgmr.msra.gmra.mrb[44].mxu0 %vm429_vm4, %v10070_v9 }
0x139f   :  { %8527 = vmatpush3.bf16.msra.mxu0 %v2007_v22  ;;  %8528 = vmatprep.mubr.msk.bf16.mxu0 %vm9598_vm0, %v9596_v0 }
0x13a0   :  { %8538 = vmatprep.subr.bf16.mxu0 %v9596_v0 }
0x1469   :  { %v1876_v11 = vpop.f32.mrb[40].mxu0 }
0x146a   :  { %v8512_v49 = vpop.f32.mrb[41].mxu0  ;;  %v1931_v54 = vsel %vm525_vm5, %v1876_v11, -inf }
0x146b   :  { %1932 = vmax.xlane.f32.xlu1 %v1931_v54  ;;  %v1879_v55 = vpop.f32.mrb[42].mxu0 }
0x146c   :  { %v8513_v16 = vpop.f32.mrb[43].mxu0 }
0x1471   :  { %v1925_v15 = vpop.f32.mrb[44].mxu0 }
0x1472   :  { %v8518_v24 = vpop.f32.mrb[45].mxu0  ;;  %v1934_v21 = vsel %vm525_vm5, %v1925_v15, -inf }
0x1473   :  { %1935 = vmax.xlane.f32.xlu0 %v1934_v21  ;;  %v1928_v25 = vpop.f32.mrb[46].mxu0 }
0x1474   :  { %v8519_v18 = vpop.f32.mrb[47].mxu0 }
0x147c   :  { %2051 = vrot.lane.b32.xlu1 %v10066_v3, %s9607_s5 }
0x14f8   :  { %v1933_v26 = vpop.xlane.xlu1 %1932 }
0x14f9   :  { %v1937_v10 = vsub.f32 %v1876_v11, %v1933_v26 }
0x14fb   :  { %v1939_v27 = vmul.f32 1.442695, %v1937_v10 }
0x14fc   :  { %v2052_v36 = vpop.permute.xlu1 %2051 }
0x14fd   :  { %9438 = vpow2.f32 %v1939_v27  ;;  %v2057_v42 = vsel %vm429_vm4, %v2052_v36, 0 }
0x1500   :  { %v1936_v19 = vpop.xlane.xlu0 %1935 }
0x1501   :  { %v1938_v28 = vsub.f32 %v1925_v15, %v1936_v19 }
0x1503   :  { %v1941_v29 = vmul.f32 1.442695, %v1938_v28 }
0x1505   :  { %9440 = vpow2.f32 %v1941_v29 }
0x1507   :  { %v9439_v30 = vpop.eup %9438 }
0x1508   :  { %v1943_v31 = vsel %vm525_vm5, %v9439_v30, 0.0 }
0x1509   :  { %1944 = vadd.xlane.f32.xlu1 %v1943_v31 }
0x150f   :  { %v9441_v33 = vpop.eup %9440 }
0x1510   :  { %v1946_v34 = vsel %vm525_vm5, %v9441_v33, 0.0 }
0x1511   :  { %1947 = vadd.xlane.f32.xlu0 %v1946_v34 }
0x151a   :  { %2049 = vrot.lane.b32.xlu1 %v10066_v3, %s9608_s6 }
0x151e   :  { %2099 = vrot.lane.b32.xlu1 %v10070_v9, %s9608_s6 }
0x1527   :  { %2101 = vrot.lane.b32.xlu0 %v10070_v9, %s9607_s5 }
0x1596   :  { %v1945_v38 = vpop.xlane.xlu1 %1944 }
0x1597   :  { %9442 = vrcp.f32 %v1945_v38 }
0x159a   :  { %v2050_v51 = vpop.permute.xlu1 %2049 }
0x159e   :  { %v1948_v37 = vpop.xlane.xlu0 %1947  ;;  %v2100_v45 = vpop.permute.xlu1 %2099 }
0x159f   :  { %9444 = vrcp.f32 %v1948_v37 }
0x15a1   :  { %v9443_v6 = vpop.eup %9442 }
0x15a2   :  { %v10108_v39 = vmul.f32 %v9443_v6, %v9439_v30  ;;  %v2102_v46 = vpop.permute.xlu0 %2101 }
0x15a3   :  { %v2107_v41 = vsel %vm429_vm4, %v2102_v46, 0 }
0x15a4   :  { %v1953_v40 = vpack.c.bf16 %v10108_v39, %v10108_v39 }
0x15a6   :  { %8523 = vmatmul.mubr.msk.bf16.vlgmr.msra.gmra.mrb[48].mxu1 %vm525_vm5, %v1953_v40 }
0x15a7   :  { %8533 = vmatpush3.bf16.xpose.msra.mxu1 %v2057_v42  ;;  %8534 = vmatprep.mubr.msk.bf16.mxu1 %vm9598_vm0, %v9596_v0 }
0x15a8   :  { %8544 = vmatprep.subr.bf16.mxu1 %v9596_v0 }
0x15a9   :  { %v9445_v43 = vpop.eup %9444 }
0x15aa   :  { %v10117_v44 = vmul.f32 %v9445_v43, %v9441_v33 }
0x15ac   :  { %v1954_v35 = vpack.c.bf16 %v10117_v44, %v10117_v44 }
0x15ae   :  { %8529 = vmatmul.mubr.msk.bf16.vlgmr.msra.gmra.mrb[48].mxu0 %vm525_vm5, %v1954_v35  ;;  %8535 = vmatmul.mubr.msk.bf16.vlgmr.msra.gmra.mrb[52].mxu1 %vm429_vm4, %v2050_v51 }
0x15af   :  { %8539 = vmatpush3.bf16.xpose.msra.mxu0 %v2107_v41  ;;  %8540 = vmatprep.mubr.msk.bf16.mxu0 %vm9598_vm0, %v9596_v0 }
0x15b0   :  { %8550 = vmatprep.subr.bf16.mxu0 %v9596_v0  ;;  %8546 = vmatprep.mubr.msk.bf16.mxu1 %vm9598_vm0, %v9596_v0 }
0x15b6   :  { %8541 = vmatmul.mubr.msk.bf16.vlgmr.msra.gmra.mrb[52].mxu0 %vm429_vm4, %v2100_v45 }
0x15b7   :  { %8552 = vmatprep.mubr.msk.bf16.mxu0 %vm9598_vm0, %v9596_v0 }
0x1679   :  { %v10132_v47 = vpop.f32.mrb[48].mxu1 }
0x167a   :  { %v8524_v48 = vpop.f32.mrb[49].mxu1 }
0x167b   :  { %v2000_v50 = vpop.f32.mrb[50].mxu1 }
0x167c   :  { %v8525_v52 = vpop.f32.mrb[51].mxu1 }
0x1681   :  { %v10134_v53 = vpop.f32.mrb[48].mxu0  ;;  %v2093_v57 = vpop.f32.mrb[52].mxu1 }
0x1682   :  { %v8530_v58 = vpop.f32.mrb[49].mxu0  ;;  %v8536_v60 = vpop.f32.mrb[53].mxu1  ;;  %v2149_v63 = vsel %vm525_vm5, %v2093_v57, -inf }
0x1683   :  { %2150 = vmax.xlane.f32.xlu1 %v2149_v63  ;;  %v2046_v1 = vpop.f32.mrb[50].mxu0  ;;  %v2096_v2 = vpop.f32.mrb[54].mxu1 }
0x1684   :  { %v8531_v4 = vpop.f32.mrb[51].mxu0  ;;  %v8537_v5 = vpop.f32.mrb[55].mxu1 }
0x1689   :  { %v2143_v8 = vpop.f32.mrb[52].mxu0 }
0x168a   :  { %v8542_v56 = vpop.f32.mrb[53].mxu0  ;;  %v2152_v62 = vsel %vm525_vm5, %v2143_v8, -inf }
0x168b   :  { %2153 = vmax.xlane.f32.xlu0 %v2152_v62  ;;  %v2146_v12 = vpop.f32.mrb[54].mxu0 }
0x168c   :  { %v8543_v13 = vpop.f32.mrb[55].mxu0 }
0x1694   :  { %2174 = vrot.lane.b32.xlu1 %v10068_v7, %s9608_s6 }
0x1698   :  { %2273 = vrot.lane.b32.xlu1 %v10066_v3, %s9609_s7 }
0x169c   :  { %2323 = vrot.lane.b32.xlu1 %v10070_v9, %s9609_s7 }
0x16a0   :  { %2271 = vrot.lane.b32.xlu1 %v10066_v3, %s9610_s8 }
0x1710   :  { %v2151_v14 = vpop.xlane.xlu1 %2150 }
0x1711   :  { %v2155_v22 = vsub.f32 %v2093_v57, %v2151_v14 }
0x1713   :  { %v2157_v11 = vmul.f32 1.442695, %v2155_v22 }
0x1714   :  { %v2175_v49 = vpop.permute.xlu1 %2174 }
0x1715   :  { %9446 = vpow2.f32 %v2157_v11  ;;  %v2180_v54 = vsel %vm555_vm3, %v2175_v49, 0 }
0x1716   :  { %8545 = vmatpush3.bf16.msra.mxu1 %v2180_v54 }
0x1717   :  { %8556 = vmatprep.subr.bf16.mxu1 %v9596_v0 }
0x1718   :  { %v2154_v55 = vpop.xlane.xlu0 %2153  ;;  %v2274_v19 = vpop.permute.xlu1 %2273 }
0x1719   :  { %v2156_v16 = vsub.f32 %v2143_v8, %v2154_v55  ;;  %v2279_v33 = vsel %vm429_vm4, %v2274_v19, 0 }
0x171b   :  { %v2159_v15 = vmul.f32 1.442695, %v2156_v16 }
0x171c   :  { %v2324_v34 = vpop.permute.xlu1 %2323 }
0x171d   :  { %9448 = vpow2.f32 %v2159_v15  ;;  %v2329_v40 = vsel %vm429_vm4, %v2324_v34, 0 }
0x171f   :  { %v9447_v24 = vpop.eup %9446 }
0x1720   :  { %v2161_v21 = vsel %vm525_vm5, %v9447_v24, 0.0  ;;  %v2272_v6 = vpop.permute.xlu1 %2271 }
0x1721   :  { %2162 = vadd.xlane.f32.xlu0 %v2161_v21 }
0x1727   :  { %v9449_v25 = vpop.eup %9448 }
0x1728   :  { %v2164_v18 = vsel %vm525_vm5, %v9449_v25, 0.0 }
0x1729   :  { %2165 = vadd.xlane.f32.xlu0 %v2164_v18 }
0x173f   :  { %2223 = vrot.lane.b32.xlu0 %v10087_v20, %s9608_s6 }
0x1743   :  { %2321 = vrot.lane.b32.xlu0 %v10070_v9, %s9610_s8 }
0x17ae   :  { %v2163_v26 = vpop.xlane.xlu0 %2162 }
0x17af   :  { %9450 = vrcp.f32 %v2163_v26 }
0x17b6   :  { %v2166_v10 = vpop.xlane.xlu0 %2165 }
0x17b7   :  { %9452 = vrcp.f32 %v2166_v10 }
0x17b9   :  { %v9451_v27 = vpop.eup %9450 }
0x17ba   :  { %v10154_v28 = vmul.f32 %v9451_v27, %v9447_v24  ;;  %v2224_v29 = vpop.permute.xlu0 %2223 }
0x17bb   :  { %v2229_v30 = vsel %vm555_vm3, %v2224_v29, 0 }
0x17bc   :  { %8551 = vmatpush3.bf16.msra.mxu0 %v2229_v30  ;;  %v2171_v31 = vpack.c.bf16 %v10154_v28, %v10154_v28  ;;  %v3072_v26 = vadd.f32 %v10154_v28, %v10108_v39 }
0x17bd   :  { %8562 = vmatprep.subr.bf16.mxu0 %v9596_v0 }
0x17be   :  { %8547 = vmatmul.mubr.msk.bf16.vlgmr.msra.gmra.mrb[56].mxu1 %vm525_vm5, %v2171_v31  ;;  %v2322_v42 = vpop.permute.xlu0 %2321 }
0x17bf   :  { %8557 = vmatpush3.bf16.xpose.msra.mxu1 %v2279_v33  ;;  %8558 = vmatprep.mubr.msk.bf16.mxu1 %vm9598_vm0, %v9596_v0 }
0x17c0   :  { %8568 = vmatprep.subr.bf16.mxu1 %v9596_v0 }
0x17c1   :  { %v9453_v36 = vpop.eup %9452 }
0x17c2   :  { %v10165_v38 = vmul.f32 %v9453_v36, %v9449_v25 }
0x17c4   :  { %v2172_v37 = vpack.c.bf16 %v10165_v38, %v10165_v38  ;;  %v3073_v28 = vadd.f32 %v10165_v38, %v10117_v44 }
0x17c6   :  { %8553 = vmatmul.mubr.msk.bf16.vlgmr.msra.gmra.mrb[56].mxu0 %vm525_vm5, %v2172_v37  ;;  %8559 = vmatmul.mubr.msk.bf16.vlgmr.msra.gmra.mrb[60].mxu1 %vm429_vm4, %v2272_v6 }
0x17c7   :  { %8563 = vmatpush3.bf16.xpose.msra.mxu0 %v2329_v40  ;;  %8564 = vmatprep.mubr.msk.bf16.mxu0 %vm9598_vm0, %v9596_v0 }
0x17c8   :  { %8574 = vmatprep.subr.bf16.mxu0 %v9596_v0  ;;  %8570 = vmatprep.mubr.msk.bf16.mxu1 %vm9598_vm0, %v9596_v0 }
0x17ce   :  { %8565 = vmatmul.mubr.msk.bf16.vlgmr.msra.gmra.mrb[60].mxu0 %vm429_vm4, %v2322_v42 }
0x17cf   :  { %8576 = vmatprep.mubr.msk.bf16.mxu0 %vm9598_vm0, %v9596_v0 }
0x1891   :  { %v10180_v43 = vpop.f32.mrb[56].mxu1 }
0x1892   :  { %v8548_v46 = vpop.f32.mrb[57].mxu1 }
0x1893   :  { %v2219_v35 = vpop.f32.mrb[58].mxu1 }
0x1894   :  { %v8549_v51 = vpop.f32.mrb[59].mxu1 }
0x1899   :  { %v10182_v41 = vpop.f32.mrb[56].mxu0  ;;  %v2315_v45 = vpop.f32.mrb[60].mxu1 }
0x189a   :  { %v9173_v48 = vpack.i.bf16 %v10182_v41, %v10180_v43  ;;  %v8554_v50 = vpop.f32.mrb[57].mxu0  ;;  %v8560_v52 = vpop.f32.mrb[61].mxu1  ;;  %v2371_v57 = vsel %vm525_vm5, %v2315_v45, -inf }
0x189b   :  { %2372 = vmax.xlane.f32.xlu1 %v2371_v57  ;;  %v2268_v58 = vpop.f32.mrb[58].mxu0  ;;  %v2318_v60 = vpop.f32.mrb[62].mxu1 }
0x189c   :  { %v8555_v63 = vpop.f32.mrb[59].mxu0  ;;  %v8561_v1 = vpop.f32.mrb[63].mxu1 }
0x18a1   :  { %v2365_v2 = vpop.f32.mrb[60].mxu0 }
0x18a2   :  { %v8566_v4 = vpop.f32.mrb[61].mxu0  ;;  %v2374_v5 = vsel %vm525_vm5, %v2365_v2, -inf }
0x18a3   :  { %2375 = vmax.xlane.f32.xlu0 %v2374_v5  ;;  %v2368_v8 = vpop.f32.mrb[62].mxu0 }
0x18a4   :  { %v8567_v56 = vpop.f32.mrb[63].mxu0 }
0x18ac   :  { %2395 = vrot.lane.b32.xlu1 %v10068_v7, %s9610_s8 }
0x18b0   :  { %2493 = vrot.lane.b32.xlu1 %v10066_v3, %s9604_s26 }
0x18b4   :  { %2543 = vrot.lane.b32.xlu1 %v10070_v9, %s9604_s26 }
0x18b8   :  { %2491 = vrot.lane.b32.xlu1 %v10066_v3, %s9611_s9 }
0x1928   :  { %v2373_v62 = vpop.xlane.xlu1 %2372 }
0x1929   :  { %v2377_v12 = vsub.f32 %v2315_v45, %v2373_v62 }
0x192b   :  { %v2379_v13 = vmul.f32 1.442695, %v2377_v12 }
0x192c   :  { %v2396_v14 = vpop.permute.xlu1 %2395 }
0x192d   :  { %9454 = vpow2.f32 %v2379_v13  ;;  %v2401_v22 = vsel %vm555_vm3, %v2396_v14, 0 }
0x192e   :  { %8569 = vmatpush3.bf16.msra.mxu1 %v2401_v22 }
0x192f   :  { %8580 = vmatprep.subr.bf16.mxu1 %v9596_v0 }
0x1930   :  { %v2376_v11 = vpop.xlane.xlu0 %2375  ;;  %v2494_v18 = vpop.permute.xlu1 %2493 }
0x1931   :  { %v2378_v49 = vsub.f32 %v2365_v2, %v2376_v11 }
0x1933   :  { %v2381_v54 = vmul.f32 1.442695, %v2378_v49 }
0x1934   :  { %v2544_v31 = vpop.permute.xlu1 %2543 }
0x1935   :  { %9456 = vpow2.f32 %v2381_v54  ;;  %v2549_v6 = vsel %vm429_vm4, %v2544_v31, 0  ;;  %v9282_v31 = vld [vmem:[%s9932_s18 + $0x10] sm:$0xff]  }
0x1937   :  { %v9455_v55 = vpop.eup %9454 }
0x1938   :  { %v2383_v16 = vsel %vm525_vm5, %v9455_v55, 0.0  ;;  %v2492_v37 = vpop.permute.xlu1 %2491 }
0x1939   :  { %2384 = vadd.xlane.f32.xlu0 %v2383_v16 }
0x193f   :  { %v9457_v15 = vpop.eup %9456 }
0x1940   :  { %v2386_v3 = vsel %vm525_vm5, %v9457_v15, 0.0 }
0x1941   :  { %2387 = vadd.xlane.f32.xlu0 %v2386_v3 }
0x1957   :  { %2443 = vrot.lane.b32.xlu0 %v10087_v20, %s9610_s8 }
0x195b   :  { %2541 = vrot.lane.b32.xlu0 %v10070_v9, %s9611_s9  ;;  %v2499_v9 = vsel %vm429_vm4, %v2494_v18, 0 }
0x19c6   :  { %v2385_v24 = vpop.xlane.xlu0 %2384 }
0x19c7   :  { %9458 = vrcp.f32 %v2385_v24 }
0x19ce   :  { %v2388_v21 = vpop.xlane.xlu0 %2387 }
0x19cf   :  { %9460 = vrcp.f32 %v2388_v21 }
0x19d1   :  { %v9459_v25 = vpop.eup %9458 }
0x19d2   :  { %v2390_v10 = vmul.f32 %v9459_v25, %v9455_v55  ;;  %v2444_v27 = vpop.permute.xlu0 %2443 }
0x19d3   :  { %v2449_v19 = vsel %vm555_vm3, %v2444_v27, 0 }
0x19d4   :  { %v10207_v29 = vadd.f32 %v3072_v26, %v2390_v10  ;;  %8575 = vmatpush3.bf16.msra.mxu0 %v2449_v19  ;;  %v2393_v30 = vpack.c.bf16 %v2390_v10, %v2390_v10 }
0x19d5   :  { %8586 = vmatprep.subr.bf16.mxu0 %v9596_v0 }
0x19d6   :  { %8571 = vmatmul.mubr.msk.bf16.vlgmr.msra.gmra.mrb[64].mxu1 %vm525_vm5, %v2393_v30  ;;  %v2542_v44 = vpop.permute.xlu0 %2541  ;;  %v9280_v30 = vld [vmem:[%s9932_s18] sm:$0xff]  }
0x19d7   :  { %8581 = vmatpush3.bf16.xpose.msra.mxu1 %v2499_v9  ;;  %8582 = vmatprep.mubr.msk.bf16.mxu1 %vm9598_vm0, %v9596_v0  ;;  %v9281_v9 = vld [vmem:[%s9932_s18 + $0x8] sm:$0xff]  }
0x19d8   :  { %8592 = vmatprep.subr.bf16.mxu1 %v9596_v0 }
0x19d9   :  { %v9461_v39 = vpop.eup %9460 }
0x19da   :  { %v2392_v33 = vmul.f32 %v9461_v39, %v9457_v15  ;;  %v9283_v39 = vld [vmem:[%s9932_s18 + $0x18] sm:$0xff]   ;;  %s9628_s18 = smov 40  }
0x19dc   :  { %v10217_v34 = vadd.f32 %v3073_v28, %v2392_v33  ;;  %v2394_v36 = vpack.c.bf16 %v2392_v33, %v2392_v33 }
0x19de   :  { %8577 = vmatmul.mubr.msk.bf16.vlgmr.msra.gmra.mrb[64].mxu0 %vm525_vm5, %v2394_v36  ;;  %8583 = vmatmul.mubr.msk.bf16.vlgmr.msra.gmra.mrb[68].mxu1 %vm429_vm4, %v2492_v37 }
0x19df   :  { %8587 = vmatpush3.bf16.xpose.msra.mxu0 %v2549_v6  ;;  %8588 = vmatprep.mubr.msk.bf16.mxu0 %vm9598_vm0, %v9596_v0 }
0x19e0   :  { %8598 = vmatprep.subr.bf16.mxu0 %v9596_v0  ;;  %8594 = vmatprep.mubr.msk.bf16.mxu1 %vm9598_vm0, %v9596_v0 }
0x19e6   :  { %8589 = vmatmul.mubr.msk.bf16.vlgmr.msra.gmra.mrb[68].mxu0 %vm429_vm4, %v2542_v44 }
0x19e7   :  { %8600 = vmatprep.mubr.msk.bf16.mxu0 %vm9598_vm0, %v9596_v0 }
0x1aa9   :  { %v2437_v38 = vpop.f32.mrb[64].mxu1 }
0x1aaa   :  { %v8572_v40 = vpop.f32.mrb[65].mxu1 }
0x1aab   :  { %v2440_v42 = vpop.f32.mrb[66].mxu1 }
0x1aac   :  { %v8573_v46 = vpop.f32.mrb[67].mxu1 }
0x1ab1   :  { %v2485_v35 = vpop.f32.mrb[64].mxu0  ;;  %v2535_v51 = vpop.f32.mrb[68].mxu1 }
0x1ab2   :  { %v9178_v45 = vpack.i.bf16 %v2485_v35, %v2437_v38  ;;  %v8578_v50 = vpop.f32.mrb[65].mxu0  ;;  %v8584_v52 = vpop.f32.mrb[69].mxu1  ;;  %v2591_v57 = vsel %vm525_vm5, %v2535_v51, -inf }
0x1ab3   :  { %2592 = vmax.xlane.f32.xlu1 %v2591_v57  ;;  %v2488_v58 = vpop.f32.mrb[66].mxu0  ;;  %v2538_v60 = vpop.f32.mrb[70].mxu1 }
0x1ab4   :  { %v8579_v63 = vpop.f32.mrb[67].mxu0  ;;  %v8585_v1 = vpop.f32.mrb[71].mxu1 }
0x1ab9   :  { %v2585_v2 = vpop.f32.mrb[68].mxu0 }
0x1aba   :  { %v8590_v4 = vpop.f32.mrb[69].mxu0  ;;  %v2594_v5 = vsel %vm525_vm5, %v2585_v2, -inf }
0x1abb   :  { %2595 = vmax.xlane.f32.xlu0 %v2594_v5  ;;  %v2588_v8 = vpop.f32.mrb[70].mxu0 }
0x1abc   :  { %v8591_v56 = vpop.f32.mrb[71].mxu0 }
0x1ac4   :  { %2615 = vrot.lane.b32.xlu1 %v10068_v7, %s9611_s9 }
0x1ac8   :  { %9174 = vrot.lane.b32.xlu1 %v9173_v48, %s9604_s26 }
0x1acc   :  { %9179 = vrot.lane.b32.xlu1 %v9178_v45, %s9609_s7 }
0x1b40   :  { %v2593_v62 = vpop.xlane.xlu1 %2592 }
0x1b41   :  { %v2597_v12 = vsub.f32 %v2535_v51, %v2593_v62 }
0x1b43   :  { %v2599_v13 = vmul.f32 1.442695, %v2597_v12 }
0x1b44   :  { %v2616_v14 = vpop.permute.xlu1 %2615 }
0x1b45   :  { %9462 = vpow2.f32 %v2599_v13  ;;  %v2621_v22 = vsel %vm555_vm3, %v2616_v14, 0 }
0x1b46   :  { %8593 = vmatpush3.bf16.msra.mxu1 %v2621_v22 }
0x1b47   :  { %8604 = vmatprep.subr.bf16.mxu1 %v9596_v0 }
0x1b48   :  { %v2596_v11 = vpop.xlane.xlu0 %2595  ;;  %v9175_v42 = vpop.permute.xlu1 %9174 }
0x1b49   :  { %v2598_v49 = vsub.f32 %v2585_v2, %v2596_v11  ;;  %v9177_v35 = vunpack.i.h.bf16 %v9175_v42  ;;  %v9176_v51 = vunpack.i.l.bf16 %v9175_v42 }
0x1b4b   :  { %v2601_v7 = vmul.f32 1.442695, %v2598_v49  ;;  %v2736_v57 = vsel %vm429_vm4, %v10134_v53, %v9177_v35  ;;  %v2735_v58 = vsel %vm429_vm4, %v10132_v47, %v9176_v51  ;;  %v7854_v53 = vld [vmem:[%s9957_s23] ss:$0 sm:$0xff]  ;;  %s9633_s23 = smov 29  }
0x1b4c   :  { %v9180_v46 = vpop.permute.xlu1 %9179  ;;  %s10685_s20 = sld [smem:[%s11354_s0 + %s9633_s23]]   ;;  %s9643_s23 = smov 36  }
0x1b4d   :  { %9464 = vpow2.f32 %v2601_v7  ;;  %v9182_v45 = vunpack.i.h.bf16 %v9180_v46  ;;  %v9181_v50 = vunpack.i.l.bf16 %v9180_v46  ;;  %v7861_v46 = vld [vmem:[%s10011_s24] ss:$0 sm:$0xff]  ;;  %s9641_s24 = smov 33  }
0x1b4e   :  { %s7760_s12 = sld [smem:[%s11354_s0 + %s9641_s24]]  }
0x1b4f   :  { %v9463_v54 = vpop.eup %9462  ;;  %v2738_v1 = vsel %vm1333_vm6, %v2736_v57, %v9182_v45  ;;  %v2737_v2 = vsel %vm1333_vm6, %v2735_v58, %v9181_v50  ;;  %v9288_v50 = vld [vmem:[%s10304_s3] sm:$0xff]   ;;  %v9296_v58 = vld [vmem:[%s9989_s11 + $0x30] sm:$0xff]   ;;  %s7762_s3 = sld [smem:[%s11354_s0 + %s9642_s14]]  }
0x1b50   :  { %v2603_v43 = vsel %vm525_vm5, %v9463_v54, 0.0 }
0x1b51   :  { %2604 = vadd.xlane.f32.xlu0 %v2603_v43 }
0x1b57   :  { %v9465_v41 = vpop.eup %9464 }
0x1b58   :  { %v2606_v48 = vsel %vm525_vm5, %v9465_v41, 0.0 }
0x1b59   :  { %2607 = vadd.xlane.f32.xlu0 %v2606_v48 }
0x1b6f   :  { %2663 = vrot.lane.b32.xlu0 %v10087_v20, %s9611_s9 }
0x1bde   :  { %v2605_v55 = vpop.xlane.xlu0 %2604 }
0x1bdf   :  { %9466 = vrcp.f32 %v2605_v55 }
0x1be6   :  { %v2608_v16 = vpop.xlane.xlu0 %2607 }
0x1be7   :  { %9468 = vrcp.f32 %v2608_v16 }
0x1be9   :  { %v9467_v15 = vpop.eup %9466 }
0x1bea   :  { %v2610_v3 = vmul.f32 %v9467_v15, %v9463_v54  ;;  %v2664_v24 = vpop.permute.xlu0 %2663 }
0x1beb   :  { %v2669_v21 = vsel %vm555_vm3, %v2664_v24, 0 }
0x1bec   :  { %v3076_v25 = vadd.f32 %v10207_v29, %v2610_v3  ;;  %8599 = vmatpush3.bf16.msra.mxu0 %v2669_v21  ;;  %v2613_v18 = vpack.c.bf16 %v2610_v3, %v2610_v3 }
0x1bed   :  { %8616 = vmatprep.subr.bf16.mxu0 %v9596_v0 }
0x1bee   :  { %v3078_v20 = vmul.f32 0.25, %v3076_v25  ;;  %8595 = vmatmul.mubr.msk.bf16.vlgmr.msra.gmra.mrb[72].mxu1 %vm525_vm5, %v2613_v18  ;;  %v9284_v25 = vld [vmem:[%s9977_s30] sm:$0xff]   ;;  %v9285_v18 = vld [vmem:[%s9977_s30 + $0x8] sm:$0xff]  }
0x1bef   :  { %8612 = vmatprep.mubr.msk.bf16.mxu1 %vm9598_vm0, %v9596_v0  ;;  %8605 = vmatpush3.bf16.msra.mxu1 %v9280_v30  ;;  %v9294_v30 = vld [vmem:[%s9989_s11 + $0x20] sm:$0xff]  }
0x1bf0   :  { %7877 = vst.msk [vmem:[%s9914_s13 + $0x10] sm:$0xff] %vm525_vm5, %v3078_v20  ;;  %8606 = vmatprep.subr.bf16.mxu1 %v9596_v0  ;;  %v9286_v20 = vld [vmem:[%s9977_s30 + $0x10] sm:$0xff]  }
0x1bf1   :  { %v9469_v26 = vpop.eup %9468 }
0x1bf2   :  { %v2612_v10 = vmul.f32 %v9469_v26, %v9465_v41  ;;  %v9287_v26 = vld [vmem:[%s9977_s30 + $0x18] sm:$0xff]   ;;  %s9623_s30 = smov 6  }
0x1bf3   :  { %8607 = vmatpush3.bf16.msra.mxu1 %v9281_v9  ;;  %v9295_v9 = vld [vmem:[%s9989_s11 + $0x28] sm:$0xff]   ;;  %s7733_s22 = sld [smem:[%s11354_s0 + %s9623_s30]]  }
0x1bf4   :  { %v3077_v27 = vadd.f32 %v10217_v34, %v2612_v10  ;;  %v2614_v19 = vpack.c.bf16 %v2612_v10, %v2612_v10  ;;  %8608 = vmatprep.subr.bf16.mxu1 %v9596_v0  ;;  %v9290_v10 = vld [vmem:[%s9989_s11] sm:$0xff]   ;;  %s10469_s30 = sld [smem:[%s11354_s0 + %s9628_s18]]  }
0x1bf6   :  { %v3079_v29 = vmul.f32 0.25, %v3077_v27  ;;  %8601 = vmatmul.mubr.msk.bf16.vlgmr.msra.gmra.mrb[72].mxu0 %vm525_vm5, %v2614_v19  ;;  %v9291_v27 = vld [vmem:[%s9989_s11 + $0x8] sm:$0xff]   ;;  %v9292_v19 = vld [vmem:[%s9989_s11 + $0x10] sm:$0xff]  }
0x1bf7   :  { %8624 = vmatprep.mubr.msk.bf16.mxu0 %vm9598_vm0, %v9596_v0  ;;  %8609 = vmatpush3.bf16.msra.mxu1 %v9282_v31 }
0x1bf8   :  { %7878 = vst.msk [vmem:[%s9914_s13 + $0x18] sm:$0xff] %vm525_vm5, %v3079_v29  ;;  %8610 = vmatprep.subr.bf16.mxu1 %v9596_v0  ;;  %8617 = vmatpush3.bf16.msra.mxu0 %v9284_v25  ;;  %s9622_s13 = smov 1   ;;  %v9293_v29 = vld [vmem:[%s9989_s11 + $0x18] sm:$0xff]  }
0x1bf9   :  { %8618 = vmatprep.subr.bf16.mxu0 %v9596_v0  ;;  %s10310_s19 = sld [smem:[%s11354_s0 + %s9622_s13]]  }
0x1bfa   :  { %s10419_s13 = sld [smem:[%s11354_s0 + %s9627_s25]]   ;;  %s9632_s25 = smov 25  }
0x1bfb   :  { %8611 = vmatpush3.bf16.msra.mxu1 %v9283_v39  ;;  %s10668_s18 = sld [smem:[%s11354_s0 + %s9632_s25]]  }
0x1bfc   :  { %8628 = vmatprep.subr.bf16.mxu1 %v9596_v0  ;;  %8619 = vmatpush3.bf16.msra.mxu0 %v9285_v18 }
0x1bfd   :  { %8620 = vmatprep.subr.bf16.mxu0 %v9596_v0 }
0x1bff   :  { %v9289_v57 = vld [vmem:[%s10310_s19] sm:$0xff]   ;;  %s10711_s19 = sld [smem:[%s11354_s0 + %s9636_s29]]  }
0x1c00   :  { %8621 = vmatpush3.bf16.msra.mxu0 %v9286_v20 }
0x1c01   :  { %8622 = vmatprep.subr.bf16.mxu0 %v9596_v0 }
0x1c04   :  { %8623 = vmatpush3.bf16.msra.mxu0 %v9287_v26 }
0x1c05   :  { %8648 = vmatprep.subr.bf16.mxu0 %v9596_v0 }
0x1cc1   :  { %v2657_v28 = vpop.f32.mrb[72].mxu1 }
0x1cc2   :  { %v8596_v33 = vpop.f32.mrb[73].mxu1 }
0x1cc3   :  { %v2660_v34 = vpop.f32.mrb[74].mxu1 }
0x1cc4   :  { %v8597_v36 = vpop.f32.mrb[75].mxu1 }
0x1cc9   :  { %v2705_v37 = vpop.f32.mrb[72].mxu0 }
0x1cca   :  { %v9183_v6 = vpack.i.bf16 %v2705_v37, %v2657_v28  ;;  %v8602_v44 = vpop.f32.mrb[73].mxu0 }
0x1ccb   :  { %v2708_v38 = vpop.f32.mrb[74].mxu0  ;;  %v7860_v44 = vld [vmem:[%s10006_s16] ss:$0 sm:$0xff]  ;;  %s9629_s16 = smov 21  }
0x1ccc   :  { %9184 = vrot.lane.b32.xlu1 %v9183_v6, %s9607_s5  ;;  %v8603_v40 = vpop.f32.mrb[75].mxu0 }
0x1d3e   :  { %v9185_v52 = vpop.permute.xlu1 %9184 }
0x1d3f   :  { %v9187_v60 = vunpack.i.h.bf16 %v9185_v52  ;;  %v9186_v63 = vunpack.i.l.bf16 %v9185_v52 }
0x1d41   :  { %v2740_v4 = vsel %vm1336_vm7, %v2738_v1, %v9187_v60  ;;  %v2739_v5 = vsel %vm1336_vm7, %v2737_v2, %v9186_v63  ;;  %v9297_v60 = vld [vmem:[%s9989_s11 + $0x38] sm:$0xff]   ;;  %v7862_v63 = vld [vmem:[%s10024_s2] ss:$0 sm:$0xff]  ;;  %s9630_s11 = smov 22   ;;  %s9631_s2 = smov 23  }
0x1d42   :  { %v2741_v8 = vpack.c.bf16 %v2740_v4, %v2739_v5  ;;  %s10636_s1 = sld [smem:[%s11354_s0 + %s9630_s11]]  }
0x1d44   :  { %8613 = vmatmul.mubr.msk.bf16.vlgmr.msra.gmra.mrb[76].mxu1 %vm273_vm2, %v2741_v8 }
0x1d45   :  { %8644 = vmatprep.mubr.msk.bf16.mxu1 %vm9598_vm0, %v9596_v0  ;;  %8629 = vmatpush3.bf16.msra.mxu1 %v9290_v10 }
0x1d46   :  { %8630 = vmatprep.subr.bf16.mxu1 %v9596_v0 }
0x1d49   :  { %8631 = vmatpush3.bf16.msra.mxu1 %v9291_v27 }
0x1d4a   :  { %8632 = vmatprep.subr.bf16.mxu1 %v9596_v0 }
0x1d4d   :  { %8633 = vmatpush3.bf16.msra.mxu1 %v9292_v19 }
0x1d4e   :  { %8634 = vmatprep.subr.bf16.mxu1 %v9596_v0 }
0x1d51   :  { %8635 = vmatpush3.bf16.msra.mxu1 %v9293_v29 }
0x1d52   :  { %8636 = vmatprep.subr.bf16.mxu1 %v9596_v0 }
0x1d55   :  { %8637 = vmatpush3.bf16.msra.mxu1 %v9294_v30 }
0x1d56   :  { %8638 = vmatprep.subr.bf16.mxu1 %v9596_v0 }
0x1d59   :  { %8639 = vmatpush3.bf16.msra.mxu1 %v9295_v9 }
0x1d5a   :  { %8640 = vmatprep.subr.bf16.mxu1 %v9596_v0 }
0x1d5d   :  { %8641 = vmatpush3.bf16.msra.mxu1 %v9296_v58 }
0x1d5e   :  { %8642 = vmatprep.subr.bf16.mxu1 %v9596_v0 }
0x1d61   :  { %8643 = vmatpush3.bf16.msra.mxu1 %v9297_v60 }
0x1d62   :  { %8660 = vmatprep.subr.bf16.mxu1 %v9596_v0 }
0x1e17   :  { %v2818_v56 = vpop.f32.mrb[76].mxu1 }
0x1e18   :  { %v2819_v62 = vadd.f32 %v7854_v53, %v2818_v56  ;;  %v8614_v47 = vpop.f32.mrb[77].mxu1 }
0x1e19   :  { %v2821_v12 = vpop.f32.mrb[78].mxu1  ;;  %v7879_v47 = vld [vmem:[%s7733_s22] ss:$0 sm:$0xff]  ;;  %s9634_s22 = smov 30  }
0x1e1a   :  { %v10281_v13 = vadd.f32 %v2819_v62, %v10036_v17  ;;  %v2822_v14 = vadd.f32 %v7854_v53, %v2821_v12  ;;  %v8615_v22 = vpop.f32.mrb[79].mxu1  ;;  %s10690_s28 = sld [smem:[%s11354_s0 + %s9634_s22]]  }
0x1e1c   :  { %v10284_v11 = vadd.f32 %v2822_v14, %v10039_v23  ;;  %v2829_v49 = vsel %vm273_vm2, %v10281_v13, 0.0 }
0x1e1d   :  { %2830 = vadd.xlane.f32.xlu0 %v2829_v49 }
0x1e1e   :  { %v2832_v7 = vsel %vm273_vm2, %v10284_v11, 0.0 }
0x1e1f   :  { %2833 = vadd.xlane.f32.xlu1 %v2832_v7 }
0x1eaa   :  { %v2831_v54 = vpop.xlane.xlu0 %2830 }
0x1eab   :  { %v2835_v43 = vmul.f32 0.015625, %v2831_v54  ;;  %v9594_v54 = vld [vmem:[%s9672_s17] sm:$0xff] }
0x1eac   :  { %v2834_v41 = vpop.xlane.xlu1 %2833 }
0x1ead   :  { %v2837_v48 = vsub.f32 %v10281_v13, %v2835_v43  ;;  %v2836_v55 = vmul.f32 0.015625, %v2834_v41 }
0x1eaf   :  { %v2838_v16 = vsub.f32 %v10284_v11, %v2836_v55  ;;  %v2839_v15 = vmul.f32 %v2837_v48, %v2837_v48  ;;  %v9595_v55 = vld [vmem:[%s9672_s17 + $0x8] sm:$0xff]  ;;  %s9624_s17 = smov 19  }
0x1eb0   :  { %s10368_s27 = sld [smem:[%s11354_s0 + %s9624_s17]]  }
0x1eb1   :  { %v2841_v3 = vsel %vm273_vm2, %v2839_v15, 0.0  ;;  %v2840_v24 = vmul.f32 %v2838_v16, %v2838_v16  ;;  %s10611_s17 = sld [smem:[%s11354_s0 + %s9629_s16]]   ;;  %s9640_s16 = smov 34  }
0x1eb2   :  { %2842 = vadd.xlane.f32.xlu0 %v2841_v3  ;;  %s7761_s11 = sld [smem:[%s11354_s0 + %s9640_s16]]  }
0x1eb3   :  { %v2844_v21 = vsel %vm273_vm2, %v2840_v24, 0.0 }
0x1eb6   :  { %2845 = vadd.xlane.f32.xlu0 %v2844_v21  ;;  %v9300_v30 = vld [vmem:[%s10368_s27 + $0x4] ss:$8 sps:$4 sm:$0xff]   ;;  %v9298_v9 = vld [vmem:[%s10368_s27] ss:$8 sps:$4 sm:$0xff]  }
0x1f3f   :  { %v2843_v31 = vpop.xlane.xlu0 %2842 }
0x1f40   :  { %v2847_v39 = vmul.f32 0.015625, %v2843_v31  ;;  %v9303_v31 = vld [vmem:[%s10368_s27 + $0x14] ss:$8 sps:$4 sm:$0xff]  }
0x1f42   :  { %v2849_v28 = vadd.f32 1e-05, %v2847_v39  ;;  %v9301_v39 = vld [vmem:[%s10368_s27 + $0x10] ss:$8 sps:$4 sm:$0xff]  }
0x1f43   :  { %v2846_v33 = vpop.xlane.xlu0 %2845 }
0x1f44   :  { %9470 = vrsqrt.f32 %v2849_v28  ;;  %v2848_v34 = vmul.f32 0.015625, %v2846_v33  ;;  %v9306_v28 = vld [vmem:[%s10368_s27 + $0x24] ss:$8 sps:$4 sm:$0xff]   ;;  %v9304_v33 = vld [vmem:[%s10368_s27 + $0x20] ss:$8 sps:$4 sm:$0xff]  }
0x1f46   :  { %v2850_v36 = vadd.f32 1e-05, %v2848_v34  ;;  %v9307_v34 = vld [vmem:[%s10368_s27 + $0x30] ss:$8 sps:$4 sm:$0xff]  }
0x1f48   :  { %9472 = vrsqrt.f32 %v2850_v36  ;;  %v9309_v36 = vld [vmem:[%s10368_s27 + $0x34] ss:$8 sps:$4 sm:$0xff]  }
0x1f4e   :  { %v9471_v37 = vpop.eup %9470 }
0x1f4f   :  { %v2853_v6 = vmul.f32 %v9471_v37, %v2837_v48  ;;  %v7868_v37 = vld [vmem:[%s10032_s15] ss:$0 sm:$0xff]  ;;  %s10656_s15 = sld [smem:[%s11354_s0 + %s9631_s2]]   ;;  %s9635_s2 = smov 24  }
0x1f50   :  { %s10703_s25 = sld [smem:[%s11354_s0 + %s9635_s2]]  }
0x1f51   :  { %v2861_v40 = vmul.f32 %v7860_v44, %v2853_v6 }
0x1f52   :  { %v9473_v38 = vpop.eup %9472 }
0x1f53   :  { %v2854_v42 = vmul.f32 %v9473_v38, %v2838_v16  ;;  %v2869_v51 = vadd.f32 %v7861_v46, %v2861_v40 }
0x1f55   :  { %v2862_v35 = vmul.f32 %v7860_v44, %v2854_v42 }
0x1f57   :  { %v2870_v45 = vadd.f32 %v7861_v46, %v2862_v35 }
0x1f59   :  { %v2871_v52 = vpack.c.bf16 %v2870_v45, %v2869_v51 }
0x1f5b   :  { %8625 = vmatmul.mubr.msk.bf16.vlgmr.msra.gmra.mrb[76].mxu0 %vm273_vm2, %v2871_v52 }
0x1f5c   :  { %8649 = vmatpush3.bf16.msra.mxu0 %v9288_v50  ;;  %8650 = vmatprep.mubr.msk.bf16.mxu0 %vm9598_vm0, %v9596_v0 }
0x1f5d   :  { %3288 = vmatprep.subr.bf16.mxu0 %v9300_v30 }
0x1f63   :  { %8651 = vmatmul.mubr.msk.bf16.vlgmr.msra.gmra.mrb[80].mxu0 %vm429_vm4, %v9289_v57 }
0x1f64   :  { %3320 = vmatprep.mubr.bf16.mxu0 %v9602_v32  ;;  %3289 = vmatpush1.bf16.msra.mxu0 %v9298_v9 }
0x1f65   :  { %3290 = vmatprep.subr.bf16.mxu0 %v9303_v31 }
0x1f68   :  { %3291 = vmatpush1.bf16.msra.mxu0 %v9301_v39 }
0x1f69   :  { %3292 = vmatprep.subr.bf16.mxu0 %v9306_v28 }
0x1f6c   :  { %3293 = vmatpush1.bf16.msra.mxu0 %v9304_v33 }
0x1f6d   :  { %3294 = vmatprep.subr.bf16.mxu0 %v9309_v36 }
0x1f70   :  { %3295 = vmatpush1.bf16.msra.mxu0 %v9307_v34 }
0x1f71   :  { %8654 = vmatprep.subr.bf16.mxu0 %v9596_v0 }
0x202e   :  { %v2948_v1 = vpop.f32.mrb[76].mxu0 }
0x202f   :  { %v2949_v2 = vadd.f32 %v7862_v63, %v2948_v1  ;;  %v8626_v4 = vpop.f32.mrb[77].mxu0 }
0x2030   :  { %v2951_v5 = vpop.f32.mrb[78].mxu0 }
0x2031   :  { %v2952_v8 = vadd.f32 %v7862_v63, %v2951_v5  ;;  %v8627_v53 = vpop.f32.mrb[79].mxu0  ;;  %v2955_v56 = vmax.f32 %v2949_v2, 0.0 }
0x2033   :  { %v2956_v62 = vmax.f32 %v2952_v8, 0.0 }
0x2035   :  { %v2957_v12 = vpack.c.bf16 %v2956_v62, %v2955_v56 }
0x2036   :  { %v3171_v14 = vpop.f32.mrb[80].mxu0 }
0x2037   :  { %v3172_v22 = vadd.f32 %v7879_v47, %v3171_v14  ;;  %8645 = vmatmul.mubr.bf16.vlgmr.msra.gmra.mrb[80].mxu1 %v2957_v12  ;;  %v8652_v49 = vpop.f32.mrb[81].mxu0 }
0x2038   :  { %v3174_v7 = vpop.f32.mrb[82].mxu0  ;;  %8662 = vmatprep.mubr.msk.bf16.mxu1 %vm9598_vm0, %v9596_v0 }
0x2039   :  { %v10344_v43 = vadd.f32 %v9594_v54, %v3172_v22  ;;  %v3175_v41 = vadd.f32 %v7879_v47, %v3174_v7  ;;  %v8653_v48 = vpop.f32.mrb[83].mxu0 }
0x203b   :  { %v10347_v16 = vadd.f32 %v9595_v55, %v3175_v41  ;;  %v3182_v15 = vsel %vm273_vm2, %v10344_v43, 0.0  ;;  %v7883_v41 = vld [vmem:[%s10402_s10] ss:$0 sm:$0xff] }
0x203c   :  { %3183 = vadd.xlane.f32.xlu0 %v3182_v15 }
0x203d   :  { %v3185_v3 = vsel %vm273_vm2, %v10347_v16, 0.0 }
0x203e   :  { %3186 = vadd.xlane.f32.xlu1 %v3185_v3 }
0x20c9   :  { %v3184_v24 = vpop.xlane.xlu0 %3183 }
0x20ca   :  { %v3188_v21 = vmul.f32 0.015625, %v3184_v24  ;;  %v7884_v24 = vld [vmem:[%s10407_s21] ss:$0 sm:$0xff] }
0x20cb   :  { %v3187_v25 = vpop.xlane.xlu1 %3186 }
0x20cc   :  { %v10354_v18 = vsub.f32 %v10344_v43, %v3188_v21  ;;  %v3189_v20 = vmul.f32 0.015625, %v3187_v25 }
0x20ce   :  { %v10357_v26 = vsub.f32 %v10347_v16, %v3189_v20  ;;  %v3192_v10 = vmul.f32 %v10354_v18, %v10354_v18 }
0x20d0   :  { %v3194_v27 = vsel %vm273_vm2, %v3192_v10, 0.0  ;;  %v3193_v19 = vmul.f32 %v10357_v26, %v10357_v26 }
0x20d1   :  { %3195 = vadd.xlane.f32.xlu0 %v3194_v27 }
0x20d2   :  { %v3197_v29 = vsel %vm273_vm2, %v3193_v19, 0.0 }
0x20d3   :  { %3198 = vadd.xlane.f32.xlu1 %v3197_v29 }
0x210a   :  { %v3063_v6 = vpop.f32.mrb[80].mxu1 }
0x210b   :  { %v3064_v44 = vadd.f32 %v7868_v37, %v3063_v6  ;;  %v8646_v38 = vpop.f32.mrb[81].mxu1 }
0x210c   :  { %v3066_v40 = vpop.f32.mrb[82].mxu1 }
0x210d   :  { %v10381_v42 = vadd.f32 %v3064_v44, %v10281_v13  ;;  %v3067_v46 = vadd.f32 %v7868_v37, %v3066_v40  ;;  %v8647_v35 = vpop.f32.mrb[83].mxu1 }
0x210f   :  { %v3095_v51 = vsel %vm273_vm2, %v10381_v42, 0.0  ;;  %v10386_v45 = vadd.f32 %v3067_v46, %v10284_v11 }
0x2110   :  { %v3096_v50 = vrot.slane %v3095_v51, 4 }
0x2111   :  { %v3102_v52 = vsel %vm273_vm2, %v10386_v45, 0.0 }
0x2112   :  { %v3097_v57 = vadd.f32 %v3096_v50, %v3095_v51  ;;  %v3103_v58 = vrot.slane %v3102_v52, 4 }
0x2114   :  { %v3098_v60 = vrot.slane %v3097_v57, 2  ;;  %v3104_v63 = vadd.f32 %v3103_v58, %v3102_v52 }
0x2116   :  { %v3099_v1 = vadd.f32 %v3098_v60, %v3097_v57  ;;  %v3105_v2 = vrot.slane %v3104_v63, 2 }
0x2118   :  { %v3100_v13 = vrot.slane %v3099_v1, 1  ;;  %v3106_v4 = vadd.f32 %v3105_v2, %v3104_v63 }
0x211a   :  { %v3101_v5 = vadd.f32 %v3100_v13, %v3099_v1  ;;  %v3107_v8 = vrot.slane %v3106_v4, 1 }
0x211c   :  { %v3108_v53 = vadd.f32 %v3107_v8, %v3106_v4  ;;  %v10390_v56 = vmul.f32 0.125, %v3101_v5 }
0x211e   :  { %v10392_v11 = vmul.f32 0.125, %v3108_v53 }
0x2120   :  { %v10397_v62 = vsel %vm7445_vm8, %v10392_v11, %v10390_v56 }
0x215e   :  { %v3196_v47 = vpop.xlane.xlu0 %3195 }
0x215f   :  { %v3200_v12 = vmul.f32 0.015625, %v3196_v47 }
0x2160   :  { %v3199_v14 = vpop.xlane.xlu1 %3198 }
0x2161   :  { %v3202_v22 = vadd.f32 1e-05, %v3200_v12  ;;  %v3201_v49 = vmul.f32 0.015625, %v3199_v14 }
0x2163   :  { %9474 = vrsqrt.f32 %v3202_v22  ;;  %v3203_v7 = vadd.f32 1e-05, %v3201_v49 }
0x2165   :  { %9476 = vrsqrt.f32 %v3203_v7 }
0x216d   :  { %v9475_v54 = vpop.eup %9474 }
0x216e   :  { %v3206_v48 = vmul.f32 %v9475_v54, %v10354_v18  ;;  %v3233_v18 = vld [vmem:[%s10419_s13] sm:$0x3] }
0x216f   :  { %v9477_v55 = vpop.eup %9476  ;;  %v3242_v33 = vrot.slane %v3233_v18, %v9727_v61 }
0x2170   :  { %v3214_v15 = vmul.f32 %v7883_v41, %v3206_v48  ;;  %v3207_v3 = vmul.f32 %v9477_v55, %v10357_v26  ;;  %v3238_v26 = vrot.slane %v3233_v18, %v9724_v59 }
0x2172   :  { %v3215_v21 = vmul.f32 %v7883_v41, %v3207_v3  ;;  %v3222_v25 = vadd.f32 %v7884_v24, %v3214_v15 }
0x2174   :  { %v3223_v20 = vadd.f32 %v7884_v24, %v3215_v21 }
0x2176   :  { %v3224_v10 = vpack.c.bf16 %v3223_v20, %v3222_v25 }
0x2178   :  { %7893 = vmatmul.mubr.msk.bf16.vlgmr.msra.gmra.mrb[84].mxu0 %vm273_vm2, %v3224_v10 }
0x2179   :  { %8656 = vmatprep.mubr.msk.bf16.mxu0 %vm9598_vm0, %v9596_v0 }
0x224b   :  { %v3322_v27 = vpop.f32.mrb[84].mxu0 }
0x224c   :  { %v3323_v19 = vadd.f32 %v3322_v27, %v3238_v26  ;;  %v3324_v29 = vpop.f32.mrb[85].mxu0 }
0x224d   :  { %v3326_v30 = vpop.f32.mrb[86].mxu0  ;;  %v3325_v36 = vadd.f32 %v3324_v29, %v3242_v33 }
0x224e   :  { %v10423_v9 = vpack.c.bf16 %v3323_v19, %v3323_v19  ;;  %v3327_v31 = vadd.f32 %v3326_v30, %v3238_v26  ;;  %v3328_v39 = vpop.f32.mrb[87].mxu0 }
0x224f   :  { %v3329_v44 = vadd.f32 %v3328_v39, %v3242_v33  ;;  %v10435_v40 = vpack.c.bf16 %v3325_v36, %v3325_v36 }
0x2250   :  { %v10425_v28 = vpack.c.bf16 %v3327_v31, %v3327_v31  ;;  %3334 = vrot.lane.b32.xlu0 %v10423_v9, %s9606_s4 }
0x2251   :  { %v10438_v46 = vpack.c.bf16 %v3329_v44, %v3329_v44  ;;  %v3461_v35 = vsel %vm555_vm3, %v10435_v40, 0 }
0x2252   :  { %3383 = vrot.lane.b32.xlu1 %v10425_v28, %s9606_s4 }
0x2253   :  { %v3507_v51 = vsel %vm555_vm3, %v10438_v46, 0 }
0x22c2   :  { %v3335_v34 = vpop.permute.xlu0 %3334 }
0x22c3   :  { %v3340_v37 = vsel %vm429_vm4, %v3335_v34, 0 }
0x22c4   :  { %v3384_v6 = vpop.permute.xlu1 %3383  ;;  %8655 = vmatpush3.bf16.xpose.msra.mxu0 %v3340_v37 }
0x22c5   :  { %v3389_v38 = vsel %vm429_vm4, %v3384_v6, 0  ;;  %8666 = vmatprep.subr.bf16.mxu0 %v9596_v0 }
0x22c6   :  { %8661 = vmatpush3.bf16.xpose.msra.mxu1 %v3389_v38 }
0x22c7   :  { %8672 = vmatprep.subr.bf16.mxu1 %v9596_v0 }
0x22cb   :  { %8657 = vmatmul.mubr.msk.bf16.vlgmr.msra.gmra.mrb[88].mxu0 %vm429_vm4, %v10423_v9 }
0x22cc   :  { %8667 = vmatpush3.bf16.msra.mxu0 %v3461_v35  ;;  %8668 = vmatprep.mubr.msk.bf16.mxu0 %vm9598_vm0, %v9596_v0 }
0x22cd   :  { %8663 = vmatmul.mubr.msk.bf16.vlgmr.msra.gmra.mrb[84].mxu1 %vm429_vm4, %v10425_v28  ;;  %8678 = vmatprep.subr.bf16.mxu0 %v9596_v0 }
0x22ce   :  { %8673 = vmatpush3.bf16.msra.mxu1 %v3507_v51  ;;  %8674 = vmatprep.mubr.msk.bf16.mxu1 %vm9598_vm0, %v9596_v0 }
0x22cf   :  { %8684 = vmatprep.subr.bf16.mxu1 %v9596_v0 }
0x239e   :  { %v3376_v50 = vpop.f32.mrb[88].mxu0 }
0x239f   :  { %v8658_v52 = vpop.f32.mrb[89].mxu0  ;;  %v3431_v57 = vsel %vm525_vm5, %v3376_v50, -inf }
0x23a0   :  { %v3425_v58 = vpop.f32.mrb[84].mxu1  ;;  %3432 = vmax.xlane.f32.xlu1 %v3431_v57  ;;  %v3379_v60 = vpop.f32.mrb[90].mxu0 }
0x23a1   :  { %v8659_v63 = vpop.f32.mrb[91].mxu0  ;;  %v8664_v1 = vpop.f32.mrb[85].mxu1  ;;  %v3434_v2 = vsel %vm525_vm5, %v3425_v58, -inf }
0x23a2   :  { %v3428_v13 = vpop.f32.mrb[86].mxu1  ;;  %3435 = vmax.xlane.f32.xlu0 %v3434_v2 }
0x23a3   :  { %v8665_v4 = vpop.f32.mrb[87].mxu1 }
0x23b1   :  { %3601 = vrot.lane.b32.xlu1 %v10425_v28, %s9607_s5 }
0x242d   :  { %v3433_v5 = vpop.xlane.xlu1 %3432 }
0x242e   :  { %v3437_v8 = vsub.f32 %v3376_v50, %v3433_v5 }
0x242f   :  { %v3436_v53 = vpop.xlane.xlu0 %3435 }
0x2430   :  { %v3439_v47 = vmul.f32 1.442695, %v3437_v8  ;;  %v3438_v12 = vsub.f32 %v3425_v58, %v3436_v53 }
0x2431   :  { %v3602_v41 = vpop.permute.xlu1 %3601 }
0x2432   :  { %9478 = vpow2.f32 %v3439_v47  ;;  %v3441_v14 = vmul.f32 1.442695, %v3438_v12  ;;  %v3607_v26 = vsel %vm429_vm4, %v3602_v41, 0 }
0x2434   :  { %9480 = vpow2.f32 %v3441_v14 }
0x243c   :  { %v9479_v22 = vpop.eup %9478 }
0x243d   :  { %v3443_v49 = vsel %vm525_vm5, %v9479_v22, 0.0 }
0x243e   :  { %v9481_v7 = vpop.eup %9480  ;;  %3444 = vadd.xlane.f32.xlu0 %v3443_v49 }
0x243f   :  { %v3446_v54 = vsel %vm525_vm5, %v9481_v7, 0.0 }
0x2440   :  { %3447 = vadd.xlane.f32.xlu1 %v3446_v54 }
0x2451   :  { %3549 = vrot.lane.b32.xlu1 %v10423_v9, %s9608_s6 }
0x2454   :  { %3551 = vrot.lane.b32.xlu0 %v10423_v9, %s9607_s5 }
0x2455   :  { %3599 = vrot.lane.b32.xlu1 %v10425_v28, %s9608_s6 }
0x24cb   :  { %v3445_v48 = vpop.xlane.xlu0 %3444 }
0x24cc   :  { %9482 = vrcp.f32 %v3445_v48 }
0x24cd   :  { %v3448_v55 = vpop.xlane.xlu1 %3447 }
0x24ce   :  { %9484 = vrcp.f32 %v3448_v55 }
0x24cf   :  { %v3552_v21 = vpop.permute.xlu0 %3551 }
0x24d0   :  { %v3557_v10 = vsel %vm429_vm4, %v3552_v21, 0 }
0x24d1   :  { %v3550_v27 = vpop.permute.xlu1 %3549 }
0x24d5   :  { %v3600_v19 = vpop.permute.xlu1 %3599 }
0x24d6   :  { %v9483_v15 = vpop.eup %9482 }
0x24d7   :  { %v3450_v3 = vmul.f32 %v9483_v15, %v9479_v22 }
0x24d8   :  { %v9485_v24 = vpop.eup %9484 }
0x24d9   :  { %4572 = vst.msk [vmem:[%s10469_s30] sm:$0xff] %vm525_vm5, %v3450_v3  ;;  %v3452_v25 = vmul.f32 %v9485_v24, %v9481_v7  ;;  %v3453_v20 = vpack.c.bf16 %v3450_v3, %v3450_v3 }
0x24db   :  { %4573 = vst.msk [vmem:[%s10469_s30 + $0x8] sm:$0xff] %vm525_vm5, %v3452_v25  ;;  %8669 = vmatmul.mubr.msk.bf16.vlgmr.msra.gmra.mrb[92].mxu0 %vm525_vm5, %v3453_v20  ;;  %v3454_v18 = vpack.c.bf16 %v3452_v25, %v3452_v25 }
0x24dc   :  { %8679 = vmatpush3.bf16.xpose.msra.mxu0 %v3557_v10  ;;  %8680 = vmatprep.mubr.msk.bf16.mxu0 %vm9598_vm0, %v9596_v0 }
0x24dd   :  { %8675 = vmatmul.mubr.msk.bf16.vlgmr.msra.gmra.mrb[88].mxu1 %vm525_vm5, %v3454_v18  ;;  %8690 = vmatprep.subr.bf16.mxu0 %v9596_v0 }
0x24de   :  { %8685 = vmatpush3.bf16.xpose.msra.mxu1 %v3607_v26  ;;  %8686 = vmatprep.mubr.msk.bf16.mxu1 %vm9598_vm0, %v9596_v0 }
0x24df   :  { %8696 = vmatprep.subr.bf16.mxu1 %v9596_v0 }
0x24e3   :  { %8681 = vmatmul.mubr.msk.bf16.vlgmr.msra.gmra.mrb[96].mxu0 %vm429_vm4, %v3550_v27 }
0x24e4   :  { %8692 = vmatprep.mubr.msk.bf16.mxu0 %vm9598_vm0, %v9596_v0 }
0x24e5   :  { %8687 = vmatmul.mubr.msk.bf16.vlgmr.msra.gmra.mrb[92].mxu1 %vm429_vm4, %v3600_v19 }
0x24e6   :  { %8698 = vmatprep.mubr.msk.bf16.mxu1 %vm9598_vm0, %v9596_v0 }
0x25ae   :  { %v10491_v29 = vpop.f32.mrb[92].mxu0 }
0x25af   :  { %v8670_v30 = vpop.f32.mrb[93].mxu0 }
0x25b0   :  { %v3500_v31 = vpop.f32.mrb[94].mxu0  ;;  %v10493_v39 = vpop.f32.mrb[88].mxu1 }
0x25b1   :  { %v8671_v33 = vpop.f32.mrb[95].mxu0  ;;  %v8676_v34 = vpop.f32.mrb[89].mxu1 }
0x25b2   :  { %v3546_v36 = vpop.f32.mrb[90].mxu1 }
0x25b3   :  { %v8677_v37 = vpop.f32.mrb[91].mxu1 }
0x25b6   :  { %v3593_v6 = vpop.f32.mrb[96].mxu0 }
0x25b7   :  { %v8682_v44 = vpop.f32.mrb[97].mxu0  ;;  %v3649_v38 = vsel %vm525_vm5, %v3593_v6, -inf }
0x25b8   :  { %v3643_v35 = vpop.f32.mrb[92].mxu1  ;;  %3650 = vmax.xlane.f32.xlu0 %v3649_v38  ;;  %v3596_v51 = vpop.f32.mrb[98].mxu0 }
0x25b9   :  { %v8683_v50 = vpop.f32.mrb[99].mxu0  ;;  %v8688_v52 = vpop.f32.mrb[93].mxu1  ;;  %v3652_v57 = vsel %vm525_vm5, %v3643_v35, -inf }
0x25ba   :  { %3653 = vmax.xlane.f32.xlu1 %v3652_v57  ;;  %v3646_v58 = vpop.f32.mrb[94].mxu1 }
0x25bb   :  { %v8689_v60 = vpop.f32.mrb[95].mxu1 }
0x25cb   :  { %3723 = vrot.lane.b32.xlu1 %v10438_v46, %s9608_s6 }
0x25cf   :  { %3773 = vrot.lane.b32.xlu1 %v10423_v9, %s9609_s7 }
0x25d3   :  { %3823 = vrot.lane.b32.xlu1 %v10425_v28, %s9609_s7 }
0x25d7   :  { %3821 = vrot.lane.b32.xlu1 %v10425_v28, %s9610_s8 }
0x2645   :  { %v3651_v63 = vpop.xlane.xlu0 %3650 }
0x2646   :  { %v3655_v1 = vsub.f32 %v3593_v6, %v3651_v63 }
0x2647   :  { %v3654_v2 = vpop.xlane.xlu1 %3653 }
0x2648   :  { %v3657_v13 = vmul.f32 1.442695, %v3655_v1  ;;  %v3656_v4 = vsub.f32 %v3643_v35, %v3654_v2 }
0x264a   :  { %9486 = vpow2.f32 %v3657_v13  ;;  %v3659_v5 = vmul.f32 1.442695, %v3656_v4 }
0x264b   :  { %v3724_v8 = vpop.permute.xlu1 %3723 }
0x264c   :  { %9488 = vpow2.f32 %v3659_v5  ;;  %v3729_v53 = vsel %vm555_vm3, %v3724_v8, 0 }
0x264d   :  { %8697 = vmatpush3.bf16.msra.mxu1 %v3729_v53 }
0x264e   :  { %8708 = vmatprep.subr.bf16.mxu1 %v9596_v0 }
0x264f   :  { %v3774_v55 = vpop.permute.xlu1 %3773 }
0x2650   :  { %v3779_v20 = vsel %vm429_vm4, %v3774_v55, 0 }
0x2653   :  { %v3824_v25 = vpop.permute.xlu1 %3823 }
0x2654   :  { %v9487_v47 = vpop.eup %9486  ;;  %v3829_v18 = vsel %vm429_vm4, %v3824_v25, 0 }
0x2655   :  { %v3661_v12 = vsel %vm525_vm5, %v9487_v47, 0.0 }
0x2656   :  { %v9489_v14 = vpop.eup %9488  ;;  %3662 = vadd.xlane.f32.xlu0 %v3661_v12 }
0x2657   :  { %v3664_v22 = vsel %vm525_vm5, %v9489_v14, 0.0  ;;  %v3822_v27 = vpop.permute.xlu1 %3821 }
0x265a   :  { %3665 = vadd.xlane.f32.xlu0 %v3664_v22 }
0x2670   :  { %3674 = vrot.lane.b32.xlu0 %v10435_v40, %s9608_s6 }
0x2674   :  { %3771 = vrot.lane.b32.xlu0 %v10423_v9, %s9610_s8 }
0x26e3   :  { %v3663_v49 = vpop.xlane.xlu0 %3662 }
0x26e4   :  { %9490 = vrcp.f32 %v3663_v49 }
0x26e7   :  { %v3666_v7 = vpop.xlane.xlu0 %3665 }
0x26e8   :  { %9492 = vrcp.f32 %v3666_v7 }
0x26eb   :  { %v3675_v54 = vpop.permute.xlu0 %3674 }
0x26ec   :  { %v3680_v41 = vsel %vm555_vm3, %v3675_v54, 0 }
0x26ed   :  { %8691 = vmatpush3.bf16.msra.mxu0 %v3680_v41 }
0x26ee   :  { %v9491_v48 = vpop.eup %9490  ;;  %8702 = vmatprep.subr.bf16.mxu0 %v9596_v0 }
0x26ef   :  { %v3668_v15 = vmul.f32 %v9491_v48, %v9487_v47  ;;  %v3772_v26 = vpop.permute.xlu0 %3771 }
0x26f1   :  { %7933 = vst.msk [vmem:[%s10469_s30 + $0x10] sm:$0xff] %vm525_vm5, %v3668_v15  ;;  %v3671_v3 = vpack.c.bf16 %v3668_v15, %v3668_v15 }
0x26f2   :  { %v9493_v24 = vpop.eup %9492 }
0x26f3   :  { %v3670_v21 = vmul.f32 %v9493_v24, %v9489_v14  ;;  %8693 = vmatmul.mubr.msk.bf16.vlgmr.msra.gmra.mrb[100].mxu0 %vm525_vm5, %v3671_v3 }
0x26f4   :  { %8704 = vmatprep.mubr.msk.bf16.mxu0 %vm9598_vm0, %v9596_v0 }
0x26f5   :  { %7934 = vst.msk [vmem:[%s10469_s30 + $0x18] sm:$0xff] %vm525_vm5, %v3670_v21  ;;  %v3672_v10 = vpack.c.bf16 %v3670_v21, %v3670_v21 }
0x26f6   :  { %8703 = vmatpush3.bf16.xpose.msra.mxu0 %v3779_v20 }
0x26f7   :  { %8699 = vmatmul.mubr.msk.bf16.vlgmr.msra.gmra.mrb[96].mxu1 %vm525_vm5, %v3672_v10  ;;  %8714 = vmatprep.subr.bf16.mxu0 %v9596_v0 }
0x26f8   :  { %8709 = vmatpush3.bf16.xpose.msra.mxu1 %v3829_v18  ;;  %8710 = vmatprep.mubr.msk.bf16.mxu1 %vm9598_vm0, %v9596_v0 }
0x26f9   :  { %8720 = vmatprep.subr.bf16.mxu1 %v9596_v0 }
0x26fd   :  { %8705 = vmatmul.mubr.msk.bf16.vlgmr.msra.gmra.mrb[104].mxu0 %vm429_vm4, %v3772_v26 }
0x26fe   :  { %8716 = vmatprep.mubr.msk.bf16.mxu0 %vm9598_vm0, %v9596_v0 }
0x26ff   :  { %8711 = vmatmul.mubr.msk.bf16.vlgmr.msra.gmra.mrb[100].mxu1 %vm429_vm4, %v3822_v27 }
0x2700   :  { %8722 = vmatprep.mubr.msk.bf16.mxu1 %vm9598_vm0, %v9596_v0 }
0x27c6   :  { %v10535_v19 = vpop.f32.mrb[100].mxu0 }
0x27c7   :  { %v8694_v30 = vpop.f32.mrb[101].mxu0 }
0x27c8   :  { %v3719_v31 = vpop.f32.mrb[102].mxu0 }
0x27c9   :  { %v8695_v33 = vpop.f32.mrb[103].mxu0 }
0x27ca   :  { %v10537_v34 = vpop.f32.mrb[96].mxu1 }
0x27cb   :  { %v9188_v36 = vpack.i.bf16 %v10537_v34, %v10535_v19  ;;  %v8700_v37 = vpop.f32.mrb[97].mxu1 }
0x27cc   :  { %v3768_v6 = vpop.f32.mrb[98].mxu1 }
0x27cd   :  { %v8701_v44 = vpop.f32.mrb[99].mxu1 }
0x27d0   :  { %v3815_v38 = vpop.f32.mrb[104].mxu0 }
0x27d1   :  { %v8706_v35 = vpop.f32.mrb[105].mxu0  ;;  %v3871_v51 = vsel %vm525_vm5, %v3815_v38, -inf }
0x27d2   :  { %v3865_v50 = vpop.f32.mrb[100].mxu1  ;;  %3872 = vmax.xlane.f32.xlu0 %v3871_v51  ;;  %v3818_v52 = vpop.f32.mrb[106].mxu0 }
0x27d3   :  { %v8707_v57 = vpop.f32.mrb[107].mxu0  ;;  %v8712_v58 = vpop.f32.mrb[101].mxu1  ;;  %v3874_v60 = vsel %vm525_vm5, %v3865_v50, -inf }
0x27d4   :  { %3875 = vmax.xlane.f32.xlu1 %v3874_v60  ;;  %v3868_v63 = vpop.f32.mrb[102].mxu1 }
0x27d5   :  { %v8713_v1 = vpop.f32.mrb[103].mxu1 }
0x27e5   :  { %3943 = vrot.lane.b32.xlu1 %v10438_v46, %s9610_s8 }
0x27e9   :  { %3993 = vrot.lane.b32.xlu1 %v10423_v9, %s9604_s26 }
0x27ed   :  { %4043 = vrot.lane.b32.xlu1 %v10425_v28, %s9604_s26 }
0x27f1   :  { %4041 = vrot.lane.b32.xlu1 %v10425_v28, %s9611_s9 }
0x285f   :  { %v3873_v2 = vpop.xlane.xlu0 %3872 }
0x2860   :  { %v3877_v13 = vsub.f32 %v3815_v38, %v3873_v2 }
0x2861   :  { %v3876_v4 = vpop.xlane.xlu1 %3875 }
0x2862   :  { %v3879_v5 = vmul.f32 1.442695, %v3877_v13  ;;  %v3878_v8 = vsub.f32 %v3865_v50, %v3876_v4 }
0x2864   :  { %9494 = vpow2.f32 %v3879_v5  ;;  %v3881_v53 = vmul.f32 1.442695, %v3878_v8 }
0x2865   :  { %v3944_v47 = vpop.permute.xlu1 %3943 }
0x2866   :  { %9496 = vpow2.f32 %v3881_v53  ;;  %v3949_v12 = vsel %vm555_vm3, %v3944_v47, 0 }
0x2867   :  { %8721 = vmatpush3.bf16.msra.mxu1 %v3949_v12 }
0x2868   :  { %8732 = vmatprep.subr.bf16.mxu1 %v9596_v0 }
0x2869   :  { %v3994_v15 = vpop.permute.xlu1 %3993 }
0x286a   :  { %v3999_v20 = vsel %vm429_vm4, %v3994_v15, 0 }
0x286e   :  { %v9495_v14 = vpop.eup %9494 }
0x286f   :  { %v3883_v22 = vsel %vm525_vm5, %v9495_v14, 0.0 }
0x2870   :  { %v9497_v49 = vpop.eup %9496  ;;  %3884 = vadd.xlane.f32.xlu0 %v3883_v22 }
0x2871   :  { %v3886_v28 = vsel %vm525_vm5, %v9497_v49, 0.0 }
0x2874   :  { %3887 = vadd.xlane.f32.xlu0 %v3886_v28 }
0x288a   :  { %3895 = vrot.lane.b32.xlu0 %v10435_v40, %s9610_s8 }
0x288e   :  { %3991 = vrot.lane.b32.xlu0 %v10423_v9, %s9611_s9  ;;  %v4044_v9 = vpop.permute.xlu1 %4043 }
0x288f   :  { %v4049_v18 = vsel %vm429_vm4, %v4044_v9, 0  ;;  %v9312_v9 = vld [vmem:[%s10611_s17 + $0x10] sm:$0xff]  }
0x2892   :  { %v4042_v27 = vpop.permute.xlu1 %4041 }
0x28fd   :  { %v3885_v7 = vpop.xlane.xlu0 %3884 }
0x28fe   :  { %9498 = vrcp.f32 %v3885_v7 }
0x2901   :  { %v3888_v54 = vpop.xlane.xlu0 %3887 }
0x2902   :  { %9500 = vrcp.f32 %v3888_v54 }
0x2905   :  { %v3896_v41 = vpop.permute.xlu0 %3895 }
0x2906   :  { %v3901_v48 = vsel %vm555_vm3, %v3896_v41, 0 }
0x2907   :  { %8715 = vmatpush3.bf16.msra.mxu0 %v3901_v48 }
0x2908   :  { %v9499_v55 = vpop.eup %9498  ;;  %8726 = vmatprep.subr.bf16.mxu0 %v9596_v0 }
0x2909   :  { %v3890_v3 = vmul.f32 %v9499_v55, %v9495_v14  ;;  %v3992_v26 = vpop.permute.xlu0 %3991 }
0x290b   :  { %7935 = vst.msk [vmem:[%s10469_s30 + $0x20] sm:$0xff] %vm525_vm5, %v3890_v3  ;;  %v3893_v24 = vpack.c.bf16 %v3890_v3, %v3890_v3 }
0x290c   :  { %v9501_v21 = vpop.eup %9500 }
0x290d   :  { %v3892_v25 = vmul.f32 %v9501_v21, %v9497_v49  ;;  %8717 = vmatmul.mubr.msk.bf16.vlgmr.msra.gmra.mrb[108].mxu0 %vm525_vm5, %v3893_v24  ;;  %v9310_v21 = vld [vmem:[%s10611_s17] sm:$0xff]  }
0x290e   :  { %8728 = vmatprep.mubr.msk.bf16.mxu0 %vm9598_vm0, %v9596_v0 }
0x290f   :  { %7936 = vst.msk [vmem:[%s10469_s30 + $0x28] sm:$0xff] %vm525_vm5, %v3892_v25  ;;  %v3894_v10 = vpack.c.bf16 %v3892_v25, %v3892_v25  ;;  %v9311_v25 = vld [vmem:[%s10611_s17 + $0x8] sm:$0xff]  }
0x2910   :  { %8727 = vmatpush3.bf16.xpose.msra.mxu0 %v3999_v20  ;;  %v9313_v20 = vld [vmem:[%s10611_s17 + $0x18] sm:$0xff]  }
0x2911   :  { %8723 = vmatmul.mubr.msk.bf16.vlgmr.msra.gmra.mrb[104].mxu1 %vm525_vm5, %v3894_v10  ;;  %8738 = vmatprep.subr.bf16.mxu0 %v9596_v0 }
0x2912   :  { %8733 = vmatpush3.bf16.xpose.msra.mxu1 %v4049_v18  ;;  %8734 = vmatprep.mubr.msk.bf16.mxu1 %vm9598_vm0, %v9596_v0 }
0x2913   :  { %8744 = vmatprep.subr.bf16.mxu1 %v9596_v0 }
0x2917   :  { %8729 = vmatmul.mubr.msk.bf16.vlgmr.msra.gmra.mrb[112].mxu0 %vm429_vm4, %v3992_v26 }
0x2918   :  { %8740 = vmatprep.mubr.msk.bf16.mxu0 %vm9598_vm0, %v9596_v0 }
0x2919   :  { %8735 = vmatmul.mubr.msk.bf16.vlgmr.msra.gmra.mrb[108].mxu1 %vm429_vm4, %v4042_v27 }
0x291a   :  { %8746 = vmatprep.mubr.msk.bf16.mxu1 %vm9598_vm0, %v9596_v0 }
0x29e0   :  { %v3937_v30 = vpop.f32.mrb[108].mxu0 }
0x29e1   :  { %v8718_v31 = vpop.f32.mrb[109].mxu0 }
0x29e2   :  { %v3940_v33 = vpop.f32.mrb[110].mxu0 }
0x29e3   :  { %v8719_v37 = vpop.f32.mrb[111].mxu0 }
0x29e4   :  { %v3985_v6 = vpop.f32.mrb[104].mxu1 }
0x29e5   :  { %v9193_v44 = vpack.i.bf16 %v3985_v6, %v3937_v30  ;;  %v8724_v38 = vpop.f32.mrb[105].mxu1 }
0x29e6   :  { %v3988_v35 = vpop.f32.mrb[106].mxu1 }
0x29e7   :  { %v8725_v51 = vpop.f32.mrb[107].mxu1 }
0x29ea   :  { %v4035_v50 = vpop.f32.mrb[112].mxu0 }
0x29eb   :  { %v8730_v52 = vpop.f32.mrb[113].mxu0  ;;  %v4091_v57 = vsel %vm525_vm5, %v4035_v50, -inf }
0x29ec   :  { %v4085_v58 = vpop.f32.mrb[108].mxu1  ;;  %4092 = vmax.xlane.f32.xlu0 %v4091_v57  ;;  %v4038_v60 = vpop.f32.mrb[114].mxu0 }
0x29ed   :  { %v8731_v63 = vpop.f32.mrb[115].mxu0  ;;  %v8736_v1 = vpop.f32.mrb[109].mxu1  ;;  %v4094_v2 = vsel %vm525_vm5, %v4085_v58, -inf }
0x29ee   :  { %4095 = vmax.xlane.f32.xlu1 %v4094_v2  ;;  %v4088_v13 = vpop.f32.mrb[110].mxu1 }
0x29ef   :  { %v8737_v4 = vpop.f32.mrb[111].mxu1 }
0x29ff   :  { %4163 = vrot.lane.b32.xlu1 %v10438_v46, %s9611_s9 }
0x2a03   :  { %9189 = vrot.lane.b32.xlu1 %v9188_v36, %s9604_s26 }
0x2a07   :  { %9194 = vrot.lane.b32.xlu1 %v9193_v44, %s9609_s7 }
0x2a79   :  { %v4093_v5 = vpop.xlane.xlu0 %4092 }
0x2a7a   :  { %v4097_v8 = vsub.f32 %v4035_v50, %v4093_v5 }
0x2a7b   :  { %v4096_v53 = vpop.xlane.xlu1 %4095 }
0x2a7c   :  { %v4099_v47 = vmul.f32 1.442695, %v4097_v8  ;;  %v4098_v12 = vsub.f32 %v4085_v58, %v4096_v53 }
0x2a7e   :  { %9502 = vpow2.f32 %v4099_v47  ;;  %v4101_v14 = vmul.f32 1.442695, %v4098_v12 }
0x2a7f   :  { %v4164_v22 = vpop.permute.xlu1 %4163 }
0x2a80   :  { %9504 = vpow2.f32 %v4101_v14  ;;  %v4169_v49 = vsel %vm555_vm3, %v4164_v22, 0 }
0x2a81   :  { %8745 = vmatpush3.bf16.msra.mxu1 %v4169_v49 }
0x2a82   :  { %8762 = vmatprep.subr.bf16.mxu1 %v9596_v0 }
0x2a83   :  { %v9190_v44 = vpop.permute.xlu1 %9189 }
0x2a84   :  { %v9192_v35 = vunpack.i.h.bf16 %v9190_v44  ;;  %v9191_v51 = vunpack.i.l.bf16 %v9190_v44 }
0x2a86   :  { %v4236_v58 = vsel %vm429_vm4, %v10493_v39, %v9192_v35  ;;  %v4235_v60 = vsel %vm429_vm4, %v10491_v29, %v9191_v51  ;;  %v7910_v29 = vld [vmem:[%s10636_s1] ss:$0 sm:$0xff] }
0x2a87   :  { %v9195_v38 = vpop.permute.xlu1 %9194  ;;  %v7916_v35 = vld [vmem:[%s10685_s20] ss:$0 sm:$0xff] }
0x2a88   :  { %v9503_v46 = vpop.eup %9502  ;;  %v9197_v50 = vunpack.i.h.bf16 %v9195_v38  ;;  %v9196_v52 = vunpack.i.l.bf16 %v9195_v38 }
0x2a89   :  { %v4103_v19 = vsel %vm525_vm5, %v9503_v46, 0.0 }
0x2a8a   :  { %v9505_v34 = vpop.eup %9504  ;;  %4104 = vadd.xlane.f32.xlu0 %v4103_v19  ;;  %v4238_v2 = vsel %vm1333_vm6, %v4236_v58, %v9197_v50  ;;  %v4237_v13 = vsel %vm1333_vm6, %v4235_v60, %v9196_v52 }
0x2a8b   :  { %v4106_v36 = vsel %vm525_vm5, %v9505_v34, 0.0 }
0x2a8e   :  { %4107 = vadd.xlane.f32.xlu0 %v4106_v36 }
0x2aa4   :  { %4115 = vrot.lane.b32.xlu0 %v10435_v40, %s9611_s9 }
0x2b17   :  { %v4105_v28 = vpop.xlane.xlu0 %4104 }
0x2b18   :  { %9506 = vrcp.f32 %v4105_v28 }
0x2b1b   :  { %v4108_v7 = vpop.xlane.xlu0 %4107 }
0x2b1c   :  { %9508 = vrcp.f32 %v4108_v7 }
0x2b1f   :  { %v4116_v54 = vpop.permute.xlu0 %4115 }
0x2b20   :  { %v4121_v41 = vsel %vm555_vm3, %v4116_v54, 0 }
0x2b21   :  { %8739 = vmatpush3.bf16.msra.mxu0 %v4121_v41 }
0x2b22   :  { %v9507_v48 = vpop.eup %9506  ;;  %8750 = vmatprep.subr.bf16.mxu0 %v9596_v0 }
0x2b23   :  { %v4110_v55 = vmul.f32 %v9507_v48, %v9503_v46 }
0x2b25   :  { %7937 = vst.msk [vmem:[%s10469_s30 + $0x30] sm:$0xff] %vm525_vm5, %v4110_v55  ;;  %v4113_v15 = vpack.c.bf16 %v4110_v55, %v4110_v55 }
0x2b26   :  { %v9509_v3 = vpop.eup %9508 }
0x2b27   :  { %v4112_v24 = vmul.f32 %v9509_v3, %v9505_v34  ;;  %8741 = vmatmul.mubr.msk.bf16.vlgmr.msra.gmra.mrb[116].mxu0 %vm525_vm5, %v4113_v15  ;;  %v9314_v3 = vld [vmem:[%s10656_s15] sm:$0xff]  }
0x2b28   :  { %8758 = vmatprep.mubr.msk.bf16.mxu0 %vm9598_vm0, %v9596_v0  ;;  %8751 = vmatpush3.bf16.msra.mxu0 %v9310_v21  ;;  %v9317_v21 = vld [vmem:[%s10656_s15 + $0x18] sm:$0xff]  }
0x2b29   :  { %7938 = vst.msk [vmem:[%s10469_s30 + $0x38] sm:$0xff] %vm525_vm5, %v4112_v24  ;;  %v4114_v40 = vpack.c.bf16 %v4112_v24, %v4112_v24  ;;  %8752 = vmatprep.subr.bf16.mxu0 %v9596_v0  ;;  %v9315_v24 = vld [vmem:[%s10656_s15 + $0x8] sm:$0xff]  }
0x2b2b   :  { %8747 = vmatmul.mubr.msk.bf16.vlgmr.msra.gmra.mrb[112].mxu1 %vm525_vm5, %v4114_v40  ;;  %v9316_v40 = vld [vmem:[%s10656_s15 + $0x10] sm:$0xff]  }
0x2b2c   :  { %8770 = vmatprep.mubr.msk.bf16.mxu1 %vm9598_vm0, %v9596_v0  ;;  %8753 = vmatpush3.bf16.msra.mxu0 %v9311_v25  ;;  %v9318_v25 = vld [vmem:[%s10668_s18] sm:$0xff]  }
0x2b2d   :  { %8754 = vmatprep.subr.bf16.mxu0 %v9596_v0  ;;  %8763 = vmatpush3.bf16.msra.mxu1 %v9314_v3 }
0x2b2e   :  { %8764 = vmatprep.subr.bf16.mxu1 %v9596_v0 }
0x2b30   :  { %8755 = vmatpush3.bf16.msra.mxu0 %v9312_v9  ;;  %v9319_v9 = vld [vmem:[%s10668_s18 + $0x8] sm:$0xff]  }
0x2b31   :  { %8756 = vmatprep.subr.bf16.mxu0 %v9596_v0  ;;  %8765 = vmatpush3.bf16.msra.mxu1 %v9315_v24 }
0x2b32   :  { %8766 = vmatprep.subr.bf16.mxu1 %v9596_v0 }
0x2b34   :  { %8757 = vmatpush3.bf16.msra.mxu0 %v9313_v20  ;;  %v9320_v20 = vld [vmem:[%s10668_s18 + $0x10] sm:$0xff]  }
0x2b35   :  { %8774 = vmatprep.subr.bf16.mxu0 %v9596_v0  ;;  %8767 = vmatpush3.bf16.msra.mxu1 %v9316_v40 }
0x2b36   :  { %8768 = vmatprep.subr.bf16.mxu1 %v9596_v0 }
0x2b39   :  { %8769 = vmatpush3.bf16.msra.mxu1 %v9317_v21 }
0x2bfa   :  { %v4157_v10 = vpop.f32.mrb[116].mxu0 }
0x2bfb   :  { %v8742_v18 = vpop.f32.mrb[117].mxu0 }
0x2bfc   :  { %v4160_v26 = vpop.f32.mrb[118].mxu0  ;;  %v9322_v18 = vld [vmem:[%s10668_s18 + $0x20] sm:$0xff]  }
0x2bfd   :  { %v8743_v27 = vpop.f32.mrb[119].mxu0  ;;  %v9323_v26 = vld [vmem:[%s10668_s18 + $0x28] sm:$0xff]  }
0x2bfe   :  { %v4205_v30 = vpop.f32.mrb[112].mxu1 }
0x2bff   :  { %v9198_v31 = vpack.i.bf16 %v4205_v30, %v4157_v10  ;;  %v8748_v33 = vpop.f32.mrb[113].mxu1  ;;  %v9321_v10 = vld [vmem:[%s10668_s18 + $0x18] sm:$0xff]  }
0x2c00   :  { %v4208_v37 = vpop.f32.mrb[114].mxu1 }
0x2c01   :  { %v8749_v6 = vpop.f32.mrb[115].mxu1  ;;  %9199 = vrot.lane.b32.xlu0 %v9198_v31, %s9607_s5 }
0x2c73   :  { %v9200_v57 = vpop.permute.xlu0 %9199 }
0x2c74   :  { %v9202_v63 = vunpack.i.h.bf16 %v9200_v57  ;;  %v9201_v1 = vunpack.i.l.bf16 %v9200_v57  ;;  %v7917_v57 = vld [vmem:[%s10690_s28] ss:$0 sm:$0xff] }
0x2c76   :  { %v4240_v4 = vsel %vm1336_vm7, %v4238_v2, %v9202_v63  ;;  %v4239_v5 = vsel %vm1336_vm7, %v4237_v13, %v9201_v1  ;;  %v9324_v2 = vld [vmem:[%s10668_s18 + $0x30] sm:$0xff]   ;;  %v9325_v13 = vld [vmem:[%s10668_s18 + $0x38] sm:$0xff]  }
0x2c77   :  { %v4241_v8 = vpack.c.bf16 %v4240_v4, %v4239_v5  ;;  %v7918_v4 = vld [vmem:[%s10703_s25] ss:$0 sm:$0xff] }
0x2c79   :  { %8759 = vmatmul.mubr.msk.bf16.vlgmr.msra.gmra.mrb[120].mxu0 %vm273_vm2, %v4241_v8 }
0x2c7a   :  { %8790 = vmatprep.mubr.msk.bf16.mxu0 %vm9598_vm0, %v9596_v0  ;;  %8775 = vmatpush3.bf16.msra.mxu0 %v9318_v25 }
0x2c7b   :  { %8776 = vmatprep.subr.bf16.mxu0 %v9596_v0 }
0x2c7e   :  { %8777 = vmatpush3.bf16.msra.mxu0 %v9319_v9 }
0x2c7f   :  { %8778 = vmatprep.subr.bf16.mxu0 %v9596_v0 }
0x2c82   :  { %8779 = vmatpush3.bf16.msra.mxu0 %v9320_v20 }
0x2c83   :  { %8780 = vmatprep.subr.bf16.mxu0 %v9596_v0 }
0x2c86   :  { %8781 = vmatpush3.bf16.msra.mxu0 %v9321_v10  ;;  %v9328_v10 = vld [vmem:[%s10368_s27 + $0x4] ss:$8 sps:$4 sm:$0xff]  }
0x2c87   :  { %8782 = vmatprep.subr.bf16.mxu0 %v9596_v0  ;;  %4691 = vmatprep.subr.bf16.mxu1 %v9328_v10 }
0x2c8a   :  { %8783 = vmatpush3.bf16.msra.mxu0 %v9322_v18  ;;  %v9326_v18 = vld [vmem:[%s10368_s27] ss:$8 sps:$4 sm:$0xff]  }
0x2c8b   :  { %8784 = vmatprep.subr.bf16.mxu0 %v9596_v0 }
0x2c8e   :  { %8785 = vmatpush3.bf16.msra.mxu0 %v9323_v26  ;;  %v9331_v26 = vld [vmem:[%s10368_s27 + $0x14] ss:$8 sps:$4 sm:$0xff]  }
0x2c8f   :  { %8786 = vmatprep.subr.bf16.mxu0 %v9596_v0 }
0x2c92   :  { %8787 = vmatpush3.bf16.msra.mxu0 %v9324_v2  ;;  %v7940_v2 = vld [vmem:[%s10407_s21] ss:$0 sm:$0xff] }
0x2c93   :  { %8788 = vmatprep.subr.bf16.mxu0 %v9596_v0 }
0x2c96   :  { %8789 = vmatpush3.bf16.msra.mxu0 %v9325_v13 }
0x2c97   :  { %8806 = vmatprep.subr.bf16.mxu0 %v9596_v0 }
0x2d4c   :  { %v4318_v39 = vpop.f32.mrb[120].mxu0 }
0x2d4d   :  { %v4319_v53 = vadd.f32 %v7910_v29, %v4318_v39  ;;  %v8760_v47 = vpop.f32.mrb[121].mxu0 }
0x2d4e   :  { %v4321_v12 = vpop.f32.mrb[122].mxu0 }
0x2d4f   :  { %v10640_v14 = vadd.f32 %v4319_v53, %v10344_v43  ;;  %v4322_v22 = vadd.f32 %v7910_v29, %v4321_v12  ;;  %v8761_v49 = vpop.f32.mrb[123].mxu0 }
0x2d51   :  { %v10643_v46 = vadd.f32 %v4322_v22, %v10347_v16  ;;  %v4329_v19 = vsel %vm273_vm2, %v10640_v14, 0.0 }
0x2d52   :  { %4330 = vadd.xlane.f32.xlu1 %v4329_v19  ;;  %v7924_v19 = vld [vmem:[%s10711_s19] ss:$0 sm:$0xff] }
0x2d53   :  { %v4332_v34 = vsel %vm273_vm2, %v10643_v46, 0.0 }
0x2d54   :  { %4333 = vadd.xlane.f32.xlu0 %v4332_v34 }
0x2ddf   :  { %v4331_v36 = vpop.xlane.xlu1 %4330 }
0x2de0   :  { %v4335_v28 = vmul.f32 0.015625, %v4331_v36 }
0x2de1   :  { %v4334_v7 = vpop.xlane.xlu0 %4333 }
0x2de2   :  { %v4337_v54 = vsub.f32 %v10640_v14, %v4335_v28  ;;  %v4336_v43 = vmul.f32 0.015625, %v4334_v7 }
0x2de4   :  { %v4338_v41 = vsub.f32 %v10643_v46, %v4336_v43  ;;  %v4339_v48 = vmul.f32 %v4337_v54, %v4337_v54 }
0x2de6   :  { %v4341_v16 = vsel %vm273_vm2, %v4339_v48, 0.0  ;;  %v4340_v55 = vmul.f32 %v4338_v41, %v4338_v41 }
0x2de7   :  { %4342 = vadd.xlane.f32.xlu0 %v4341_v16 }
0x2de8   :  { %v4344_v15 = vsel %vm273_vm2, %v4340_v55, 0.0 }
0x2deb   :  { %4345 = vadd.xlane.f32.xlu0 %v4344_v15 }
0x2e74   :  { %v4343_v27 = vpop.xlane.xlu0 %4342 }
0x2e75   :  { %v4347_v30 = vmul.f32 0.015625, %v4343_v27  ;;  %v9329_v27 = vld [vmem:[%s10368_s27 + $0x10] ss:$8 sps:$4 sm:$0xff]  }
0x2e77   :  { %v4349_v31 = vadd.f32 1e-05, %v4347_v30  ;;  %v9334_v30 = vld [vmem:[%s10368_s27 + $0x24] ss:$8 sps:$4 sm:$0xff]  }
0x2e78   :  { %v4346_v33 = vpop.xlane.xlu0 %4345 }
0x2e79   :  { %9510 = vrsqrt.f32 %v4349_v31  ;;  %v4348_v37 = vmul.f32 0.015625, %v4346_v33  ;;  %v9332_v31 = vld [vmem:[%s10368_s27 + $0x20] ss:$8 sps:$4 sm:$0xff]   ;;  %v9335_v33 = vld [vmem:[%s10368_s27 + $0x30] ss:$8 sps:$4 sm:$0xff]  }
0x2e7b   :  { %v4350_v6 = vadd.f32 1e-05, %v4348_v37  ;;  %v9337_v37 = vld [vmem:[%s10368_s27 + $0x34] ss:$8 sps:$4 sm:$0xff]  }
0x2e7d   :  { %9512 = vrsqrt.f32 %v4350_v6 }
0x2e83   :  { %v9511_v44 = vpop.eup %9510 }
0x2e84   :  { %v4353_v38 = vmul.f32 %v9511_v44, %v4337_v54 }
0x2e86   :  { %v4361_v50 = vmul.f32 %v7916_v35, %v4353_v38 }
0x2e87   :  { %v9513_v51 = vpop.eup %9512 }
0x2e88   :  { %v4354_v52 = vmul.f32 %v9513_v51, %v4338_v41  ;;  %v4369_v60 = vadd.f32 %v7917_v57, %v4361_v50 }
0x2e8a   :  { %v4362_v58 = vmul.f32 %v7916_v35, %v4354_v52 }
0x2e8c   :  { %v4370_v63 = vadd.f32 %v7917_v57, %v4362_v58  ;;  %v7939_v57 = vld [vmem:[%s10402_s10] ss:$0 sm:$0xff] }
0x2e8e   :  { %v4371_v1 = vpack.c.bf16 %v4370_v63, %v4369_v60 }
0x2e90   :  { %8771 = vmatmul.mubr.msk.bf16.vlgmr.msra.gmra.mrb[116].mxu1 %vm273_vm2, %v4371_v1 }
0x2e91   :  { %4723 = vmatprep.mubr.bf16.mxu1 %v9602_v32  ;;  %4692 = vmatpush1.bf16.msra.mxu1 %v9326_v18 }
0x2e92   :  { %4693 = vmatprep.subr.bf16.mxu1 %v9331_v26 }
0x2e95   :  { %4694 = vmatpush1.bf16.msra.mxu1 %v9329_v27 }
0x2e96   :  { %4695 = vmatprep.subr.bf16.mxu1 %v9334_v30 }
0x2e99   :  { %4696 = vmatpush1.bf16.msra.mxu1 %v9332_v31 }
0x2e9a   :  { %4697 = vmatprep.subr.bf16.mxu1 %v9337_v37 }
0x2e9d   :  { %4698 = vmatpush1.bf16.msra.mxu1 %v9335_v33 }
0x2e9e   :  { %8794 = vmatprep.subr.bf16.mxu1 %v9596_v0 }
0x2f63   :  { %v4448_v5 = vpop.f32.mrb[116].mxu1 }
0x2f64   :  { %v4449_v8 = vadd.f32 %v7918_v4, %v4448_v5  ;;  %v8772_v29 = vpop.f32.mrb[117].mxu1 }
0x2f65   :  { %v4451_v39 = vpop.f32.mrb[118].mxu1  ;;  %v4636_v29 = vld [vmem:[%s10419_s13] sm:$0x3] }
0x2f66   :  { %v4452_v53 = vadd.f32 %v7918_v4, %v4451_v39  ;;  %v8773_v47 = vpop.f32.mrb[119].mxu1  ;;  %v4455_v12 = vmax.f32 %v4449_v8, 0.0  ;;  %v4641_v39 = vrot.slane %v4636_v29, %v9724_v59 }
0x2f68   :  { %v4456_v22 = vmax.f32 %v4452_v53, 0.0  ;;  %v4645_v53 = vrot.slane %v4636_v29, %v9727_v61 }
0x2f6a   :  { %v4457_v49 = vpack.c.bf16 %v4456_v22, %v4455_v12 }
0x2f6c   :  { %8791 = vmatmul.mubr.bf16.vlgmr.msra.gmra.mrb[124].mxu0 %v4457_v49 }
0x2f6d   :  { %8808 = vmatprep.mubr.msk.bf16.mxu0 %vm9598_vm0, %v9596_v0 }
0x303f   :  { %v4563_v34 = vpop.f32.mrb[124].mxu0 }
0x3040   :  { %v4564_v36 = vadd.f32 %v7924_v19, %v4563_v34  ;;  %v8792_v28 = vpop.f32.mrb[125].mxu0 }
0x3041   :  { %v4566_v7 = vpop.f32.mrb[126].mxu0 }
0x3042   :  { %v10715_v54 = vadd.f32 %v4564_v36, %v10640_v14  ;;  %v4567_v43 = vadd.f32 %v7924_v19, %v4566_v7  ;;  %v8793_v41 = vpop.f32.mrb[127].mxu0 }
0x3044   :  { %v10718_v48 = vadd.f32 %v4567_v43, %v10643_v46  ;;  %v4585_v16 = vsel %vm273_vm2, %v10715_v54, 0.0 }
0x3045   :  { %4586 = vadd.xlane.f32.xlu1 %v4585_v16 }
0x3046   :  { %v4588_v55 = vsel %vm273_vm2, %v10718_v48, 0.0 }
0x3047   :  { %4589 = vadd.xlane.f32.xlu0 %v4588_v55 }
0x30d2   :  { %v4587_v15 = vpop.xlane.xlu1 %4586 }
0x30d3   :  { %v4591_v3 = vmul.f32 0.015625, %v4587_v15 }
0x30d4   :  { %v4590_v14 = vpop.xlane.xlu0 %4589 }
0x30d5   :  { %v4593_v24 = vsub.f32 %v10715_v54, %v4591_v3  ;;  %v4592_v40 = vmul.f32 0.015625, %v4590_v14 }
0x30d7   :  { %v4594_v46 = vsub.f32 %v10718_v48, %v4592_v40  ;;  %v4595_v21 = vmul.f32 %v4593_v24, %v4593_v24 }
0x30d9   :  { %v4597_v25 = vsel %vm273_vm2, %v4595_v21, 0.0  ;;  %v4596_v9 = vmul.f32 %v4594_v46, %v4594_v46 }
0x30da   :  { %4598 = vadd.xlane.f32.xlu1 %v4597_v25 }
0x30db   :  { %v4600_v20 = vsel %vm273_vm2, %v4596_v9, 0.0 }
0x30dc   :  { %4601 = vadd.xlane.f32.xlu0 %v4600_v20 }
0x3167   :  { %v4599_v6 = vpop.xlane.xlu1 %4598 }
0x3168   :  { %v4603_v44 = vmul.f32 0.015625, %v4599_v6 }
0x3169   :  { %v4602_v38 = vpop.xlane.xlu0 %4601 }
0x316a   :  { %v4605_v35 = vadd.f32 1e-05, %v4603_v44  ;;  %v4604_v51 = vmul.f32 0.015625, %v4602_v38 }
0x316c   :  { %9514 = vrsqrt.f32 %v4605_v35  ;;  %v4606_v50 = vadd.f32 1e-05, %v4604_v51 }
0x316e   :  { %9516 = vrsqrt.f32 %v4606_v50 }
0x3176   :  { %v9515_v52 = vpop.eup %9514 }
0x3177   :  { %v4609_v58 = vmul.f32 %v9515_v52, %v4593_v24 }
0x3178   :  { %v9517_v60 = vpop.eup %9516 }
0x3179   :  { %v4610_v63 = vmul.f32 %v9517_v60, %v4594_v46  ;;  %v4617_v1 = vmul.f32 %v7939_v57, %v4609_v58 }
0x317b   :  { %v4618_v13 = vmul.f32 %v7939_v57, %v4610_v63  ;;  %v4625_v4 = vadd.f32 %v7940_v2, %v4617_v1 }
0x317d   :  { %v4626_v5 = vadd.f32 %v7940_v2, %v4618_v13 }
0x317f   :  { %v4627_v8 = vpack.c.bf16 %v4626_v5, %v4625_v4 }
0x3181   :  { %7949 = vmatmul.mubr.msk.bf16.vlgmr.msra.gmra.mrb[120].mxu1 %vm273_vm2, %v4627_v8 }
0x3182   :  { %8796 = vmatprep.mubr.msk.bf16.mxu1 %vm9598_vm0, %v9596_v0 }
0x3254   :  { %v4725_v47 = vpop.f32.mrb[120].mxu1 }
0x3255   :  { %v4726_v12 = vadd.f32 %v4725_v47, %v4641_v39  ;;  %v4727_v22 = vpop.f32.mrb[121].mxu1 }
0x3256   :  { %v4728_v49 = vadd.f32 %v4727_v22, %v4645_v53  ;;  %v4729_v19 = vpop.f32.mrb[122].mxu1 }
0x3257   :  { %v10745_v34 = vpack.c.bf16 %v4726_v12, %v4726_v12  ;;  %v4730_v36 = vadd.f32 %v4729_v19, %v4641_v39  ;;  %v4731_v28 = vpop.f32.mrb[123].mxu1 }
0x3258   :  { %v10747_v7 = vpack.c.bf16 %v4728_v49, %v4728_v49  ;;  %v4732_v43 = vadd.f32 %v4731_v28, %v4645_v53 }
0x3259   :  { %v10749_v41 = vpack.c.bf16 %v4730_v36, %v4730_v36  ;;  %4737 = vrot.lane.b32.xlu1 %v10745_v34, %s9606_s4 }
0x325a   :  { %v4864_v16 = vsel %vm555_vm3, %v10747_v7, 0  ;;  %v10766_v24 = vpack.c.bf16 %v4732_v43, %v4732_v43 }
0x325b   :  { %4786 = vrot.lane.b32.xlu0 %v10749_v41, %s9606_s4  ;;  %8807 = vmatpush3.bf16.msra.mxu0 %v4864_v16 }
0x325c   :  { %8818 = vmatprep.subr.bf16.mxu0 %v9596_v0  ;;  %v4910_v40 = vsel %vm555_vm3, %v10766_v24, 0 }
0x32cb   :  { %v4738_v55 = vpop.permute.xlu1 %4737 }
0x32cc   :  { %v4743_v15 = vsel %vm429_vm4, %v4738_v55, 0 }
0x32cd   :  { %8795 = vmatpush3.bf16.xpose.msra.mxu1 %v4743_v15  ;;  %v4787_v3 = vpop.permute.xlu0 %4786 }
0x32ce   :  { %8800 = vmatprep.subr.bf16.mxu1 %v9596_v0  ;;  %v4792_v14 = vsel %vm429_vm4, %v4787_v3, 0 }
0x32d4   :  { %8797 = vmatmul.mubr.msk.bf16.vlgmr.msra.gmra.mrb[124].mxu1 %vm429_vm4, %v10745_v34 }
0x32d5   :  { %8801 = vmatpush3.bf16.xpose.msra.mxu1 %v4792_v14  ;;  %8802 = vmatprep.mubr.msk.bf16.mxu1 %vm9598_vm0, %v9596_v0 }
0x32d6   :  { %8812 = vmatprep.subr.bf16.mxu1 %v9596_v0 }
0x32dc   :  { %8803 = vmatmul.mubr.msk.bf16.vlgmr.msra.gmra.mrb[128].mxu1 %vm429_vm4, %v10749_v41 }
0x32dd   :  { %8813 = vmatpush3.bf16.msra.mxu1 %v4910_v40  ;;  %8814 = vmatprep.mubr.msk.bf16.mxu1 %vm9598_vm0, %v9596_v0 }
0x32de   :  { %8824 = vmatprep.subr.bf16.mxu1 %v9596_v0 }
0x33a7   :  { %v4779_v46 = vpop.f32.mrb[124].mxu1 }
0x33a8   :  { %v8798_v21 = vpop.f32.mrb[125].mxu1  ;;  %v4834_v25 = vsel %vm525_vm5, %v4779_v46, -inf }
0x33a9   :  { %4835 = vmax.xlane.f32.xlu1 %v4834_v25  ;;  %v4782_v9 = vpop.f32.mrb[126].mxu1 }
0x33aa   :  { %v8799_v20 = vpop.f32.mrb[127].mxu1 }
0x33af   :  { %v4828_v10 = vpop.f32.mrb[128].mxu1 }
0x33b0   :  { %v8804_v18 = vpop.f32.mrb[129].mxu1  ;;  %v4837_v26 = vsel %vm525_vm5, %v4828_v10, -inf }
0x33b1   :  { %4838 = vmax.xlane.f32.xlu0 %v4837_v26  ;;  %v4831_v27 = vpop.f32.mrb[130].mxu1 }
0x33b2   :  { %v8805_v30 = vpop.f32.mrb[131].mxu1 }
0x33ba   :  { %4954 = vrot.lane.b32.xlu1 %v10745_v34, %s9607_s5 }
0x3436   :  { %v4836_v31 = vpop.xlane.xlu1 %4835 }
0x3437   :  { %v4840_v33 = vsub.f32 %v4779_v46, %v4836_v31 }
0x3439   :  { %v4842_v37 = vmul.f32 1.442695, %v4840_v33 }
0x343a   :  { %v4955_v57 = vpop.permute.xlu1 %4954 }
0x343b   :  { %9518 = vpow2.f32 %v4842_v37  ;;  %v4960_v13 = vsel %vm429_vm4, %v4955_v57, 0 }
0x343e   :  { %v4839_v6 = vpop.xlane.xlu0 %4838 }
0x343f   :  { %v4841_v44 = vsub.f32 %v4828_v10, %v4839_v6 }
0x3441   :  { %v4844_v38 = vmul.f32 1.442695, %v4841_v44 }
0x3443   :  { %9520 = vpow2.f32 %v4844_v38 }
0x3445   :  { %v9519_v35 = vpop.eup %9518 }
0x3446   :  { %v4846_v51 = vsel %vm525_vm5, %v9519_v35, 0.0 }
0x3447   :  { %4847 = vadd.xlane.f32.xlu1 %v4846_v51 }
0x344d   :  { %v9521_v50 = vpop.eup %9520 }
0x344e   :  { %v4849_v52 = vsel %vm525_vm5, %v9521_v50, 0.0 }
0x344f   :  { %4850 = vadd.xlane.f32.xlu0 %v4849_v52 }
0x3458   :  { %4952 = vrot.lane.b32.xlu1 %v10745_v34, %s9608_s6 }
0x345c   :  { %5002 = vrot.lane.b32.xlu1 %v10749_v41, %s9608_s6 }
0x3465   :  { %5004 = vrot.lane.b32.xlu0 %v10749_v41, %s9607_s5 }
0x34d4   :  { %v4848_v58 = vpop.xlane.xlu1 %4847 }
0x34d5   :  { %9522 = vrcp.f32 %v4848_v58 }
0x34d8   :  { %v4953_v39 = vpop.permute.xlu1 %4952 }
0x34dc   :  { %v4851_v60 = vpop.xlane.xlu0 %4850  ;;  %v5003_v47 = vpop.permute.xlu1 %5002 }
0x34dd   :  { %9524 = vrcp.f32 %v4851_v60 }
0x34df   :  { %v9523_v63 = vpop.eup %9522 }
0x34e0   :  { %v4853_v1 = vmul.f32 %v9523_v63, %v9519_v35  ;;  %v5005_v8 = vpop.permute.xlu0 %5004 }
0x34e1   :  { %v5010_v53 = vsel %vm429_vm4, %v5005_v8, 0 }
0x34e2   :  { %7989 = vst.msk [vmem:[%s10469_s30 + $0x40] sm:$0xff] %vm525_vm5, %v4853_v1  ;;  %v4856_v2 = vpack.c.bf16 %v4853_v1, %v4853_v1 }
0x34e4   :  { %8809 = vmatmul.mubr.msk.bf16.vlgmr.msra.gmra.mrb[128].mxu0 %vm525_vm5, %v4856_v2 }
0x34e5   :  { %8819 = vmatpush3.bf16.xpose.msra.mxu0 %v4960_v13  ;;  %8820 = vmatprep.mubr.msk.bf16.mxu0 %vm9598_vm0, %v9596_v0 }
0x34e6   :  { %8830 = vmatprep.subr.bf16.mxu0 %v9596_v0 }
0x34e7   :  { %v9525_v4 = vpop.eup %9524 }
0x34e8   :  { %v4855_v5 = vmul.f32 %v9525_v4, %v9521_v50 }
0x34ea   :  { %7990 = vst.msk [vmem:[%s10469_s30 + $0x48] sm:$0xff] %vm525_vm5, %v4855_v5  ;;  %v4857_v29 = vpack.c.bf16 %v4855_v5, %v4855_v5 }
0x34ec   :  { %8815 = vmatmul.mubr.msk.bf16.vlgmr.msra.gmra.mrb[132].mxu1 %vm525_vm5, %v4857_v29  ;;  %8821 = vmatmul.mubr.msk.bf16.vlgmr.msra.gmra.mrb[132].mxu0 %vm429_vm4, %v4953_v39 }
0x34ed   :  { %8825 = vmatpush3.bf16.xpose.msra.mxu1 %v5010_v53  ;;  %8826 = vmatprep.mubr.msk.bf16.mxu1 %vm9598_vm0, %v9596_v0 }
0x34ee   :  { %8836 = vmatprep.subr.bf16.mxu1 %v9596_v0  ;;  %8832 = vmatprep.mubr.msk.bf16.mxu0 %vm9598_vm0, %v9596_v0 }
0x34f4   :  { %8827 = vmatmul.mubr.msk.bf16.vlgmr.msra.gmra.mrb[136].mxu1 %vm429_vm4, %v5003_v47 }
0x34f5   :  { %8838 = vmatprep.mubr.msk.bf16.mxu1 %vm9598_vm0, %v9596_v0 }
0x35b7   :  { %v10807_v12 = vpop.f32.mrb[128].mxu0 }
0x35b8   :  { %v8810_v22 = vpop.f32.mrb[129].mxu0 }
0x35b9   :  { %v4903_v49 = vpop.f32.mrb[130].mxu0 }
0x35ba   :  { %v8811_v19 = vpop.f32.mrb[131].mxu0 }
0x35bf   :  { %v10809_v36 = vpop.f32.mrb[132].mxu1  ;;  %v4996_v28 = vpop.f32.mrb[132].mxu0 }
0x35c0   :  { %v8816_v43 = vpop.f32.mrb[133].mxu1  ;;  %v8822_v16 = vpop.f32.mrb[133].mxu0  ;;  %v5052_v55 = vsel %vm525_vm5, %v4996_v28, -inf }
0x35c1   :  { %v4949_v15 = vpop.f32.mrb[134].mxu1  ;;  %5053 = vmax.xlane.f32.xlu1 %v5052_v55  ;;  %v4999_v3 = vpop.f32.mrb[134].mxu0 }
0x35c2   :  { %v8817_v14 = vpop.f32.mrb[135].mxu1  ;;  %v8823_v40 = vpop.f32.mrb[135].mxu0 }
0x35c7   :  { %v5046_v46 = vpop.f32.mrb[136].mxu1 }
0x35c8   :  { %v8828_v21 = vpop.f32.mrb[137].mxu1  ;;  %v5055_v25 = vsel %vm525_vm5, %v5046_v46, -inf }
0x35c9   :  { %5056 = vmax.xlane.f32.xlu0 %v5055_v25  ;;  %v5049_v9 = vpop.f32.mrb[138].mxu1 }
0x35ca   :  { %v8829_v20 = vpop.f32.mrb[139].mxu1 }
0x35d2   :  { %5077 = vrot.lane.b32.xlu1 %v10747_v7, %s9608_s6 }
0x35d6   :  { %5176 = vrot.lane.b32.xlu1 %v10745_v34, %s9609_s7 }
0x35da   :  { %5226 = vrot.lane.b32.xlu1 %v10749_v41, %s9609_s7 }
0x35de   :  { %5174 = vrot.lane.b32.xlu1 %v10745_v34, %s9610_s8 }
0x364e   :  { %v5054_v10 = vpop.xlane.xlu1 %5053 }
0x364f   :  { %v5058_v18 = vsub.f32 %v4996_v28, %v5054_v10 }
0x3651   :  { %v5060_v26 = vmul.f32 1.442695, %v5058_v18 }
0x3652   :  { %v5078_v27 = vpop.permute.xlu1 %5077 }
0x3653   :  { %9526 = vpow2.f32 %v5060_v26  ;;  %v5083_v30 = vsel %vm555_vm3, %v5078_v27, 0 }
0x3654   :  { %8831 = vmatpush3.bf16.msra.mxu0 %v5083_v30 }
0x3655   :  { %8842 = vmatprep.subr.bf16.mxu0 %v9596_v0 }
0x3656   :  { %v5057_v31 = vpop.xlane.xlu0 %5056  ;;  %v5177_v57 = vpop.permute.xlu1 %5176 }
0x3657   :  { %v5059_v33 = vsub.f32 %v5046_v46, %v5057_v31  ;;  %v5182_v2 = vsel %vm429_vm4, %v5177_v57, 0 }
0x3659   :  { %v5062_v37 = vmul.f32 1.442695, %v5059_v33 }
0x365a   :  { %v5227_v13 = vpop.permute.xlu1 %5226 }
0x365b   :  { %9528 = vpow2.f32 %v5062_v37  ;;  %v5232_v39 = vsel %vm429_vm4, %v5227_v13, 0 }
0x365d   :  { %v9527_v6 = vpop.eup %9526 }
0x365e   :  { %v5064_v44 = vsel %vm525_vm5, %v9527_v6, 0.0  ;;  %v5175_v29 = vpop.permute.xlu1 %5174 }
0x365f   :  { %5065 = vadd.xlane.f32.xlu0 %v5064_v44 }
0x3665   :  { %v9529_v38 = vpop.eup %9528 }
0x3666   :  { %v5067_v35 = vsel %vm525_vm5, %v9529_v38, 0.0 }
0x3667   :  { %5068 = vadd.xlane.f32.xlu0 %v5067_v35 }
0x367d   :  { %5126 = vrot.lane.b32.xlu0 %v10766_v24, %s9608_s6 }
0x3681   :  { %5224 = vrot.lane.b32.xlu0 %v10749_v41, %s9610_s8 }
0x36ec   :  { %v5066_v51 = vpop.xlane.xlu0 %5065 }
0x36ed   :  { %9530 = vrcp.f32 %v5066_v51 }
0x36f4   :  { %v5069_v50 = vpop.xlane.xlu0 %5068 }
0x36f5   :  { %9532 = vrcp.f32 %v5069_v50 }
0x36f7   :  { %v9531_v52 = vpop.eup %9530 }
0x36f8   :  { %v5071_v58 = vmul.f32 %v9531_v52, %v9527_v6  ;;  %v5127_v60 = vpop.permute.xlu0 %5126 }
0x36f9   :  { %v5132_v63 = vsel %vm555_vm3, %v5127_v60, 0 }
0x36fa   :  { %7991 = vst.msk [vmem:[%s10469_s30 + $0x50] sm:$0xff] %vm525_vm5, %v5071_v58  ;;  %8837 = vmatpush3.bf16.msra.mxu1 %v5132_v63  ;;  %v5074_v1 = vpack.c.bf16 %v5071_v58, %v5071_v58 }
0x36fb   :  { %8848 = vmatprep.subr.bf16.mxu1 %v9596_v0 }
0x36fc   :  { %8833 = vmatmul.mubr.msk.bf16.vlgmr.msra.gmra.mrb[136].mxu0 %vm525_vm5, %v5074_v1  ;;  %v5225_v53 = vpop.permute.xlu0 %5224 }
0x36fd   :  { %8843 = vmatpush3.bf16.xpose.msra.mxu0 %v5182_v2  ;;  %8844 = vmatprep.mubr.msk.bf16.mxu0 %vm9598_vm0, %v9596_v0 }
0x36fe   :  { %8854 = vmatprep.subr.bf16.mxu0 %v9596_v0 }
0x36ff   :  { %v9533_v4 = vpop.eup %9532 }
0x3700   :  { %v5073_v5 = vmul.f32 %v9533_v4, %v9529_v38 }
0x3702   :  { %7992 = vst.msk [vmem:[%s10469_s30 + $0x58] sm:$0xff] %vm525_vm5, %v5073_v5  ;;  %v5075_v8 = vpack.c.bf16 %v5073_v5, %v5073_v5 }
0x3704   :  { %8839 = vmatmul.mubr.msk.bf16.vlgmr.msra.gmra.mrb[140].mxu1 %vm525_vm5, %v5075_v8  ;;  %8845 = vmatmul.mubr.msk.bf16.vlgmr.msra.gmra.mrb[140].mxu0 %vm429_vm4, %v5175_v29 }
0x3705   :  { %8849 = vmatpush3.bf16.xpose.msra.mxu1 %v5232_v39  ;;  %8850 = vmatprep.mubr.msk.bf16.mxu1 %vm9598_vm0, %v9596_v0 }
0x3706   :  { %8860 = vmatprep.subr.bf16.mxu1 %v9596_v0  ;;  %8856 = vmatprep.mubr.msk.bf16.mxu0 %vm9598_vm0, %v9596_v0 }
0x370c   :  { %8851 = vmatmul.mubr.msk.bf16.vlgmr.msra.gmra.mrb[144].mxu1 %vm429_vm4, %v5225_v53 }
0x370d   :  { %8862 = vmatprep.mubr.msk.bf16.mxu1 %vm9598_vm0, %v9596_v0 }
0x37cf   :  { %v10851_v47 = vpop.f32.mrb[136].mxu0 }
0x37d0   :  { %v8834_v22 = vpop.f32.mrb[137].mxu0 }
0x37d1   :  { %v5122_v49 = vpop.f32.mrb[138].mxu0 }
0x37d2   :  { %v8835_v19 = vpop.f32.mrb[139].mxu0 }
0x37d7   :  { %v10853_v28 = vpop.f32.mrb[140].mxu1  ;;  %v5218_v43 = vpop.f32.mrb[140].mxu0 }
0x37d8   :  { %v9203_v16 = vpack.i.bf16 %v10853_v28, %v10851_v47  ;;  %v8840_v55 = vpop.f32.mrb[141].mxu1  ;;  %v8846_v15 = vpop.f32.mrb[141].mxu0  ;;  %v5274_v3 = vsel %vm525_vm5, %v5218_v43, -inf }
0x37d9   :  { %v5171_v14 = vpop.f32.mrb[142].mxu1  ;;  %5275 = vmax.xlane.f32.xlu1 %v5274_v3  ;;  %v5221_v40 = vpop.f32.mrb[142].mxu0 }
0x37da   :  { %v8841_v46 = vpop.f32.mrb[143].mxu1  ;;  %v8847_v21 = vpop.f32.mrb[143].mxu0 }
0x37df   :  { %v5268_v25 = vpop.f32.mrb[144].mxu1 }
0x37e0   :  { %v8852_v9 = vpop.f32.mrb[145].mxu1  ;;  %v5277_v20 = vsel %vm525_vm5, %v5268_v25, -inf }
0x37e1   :  { %5278 = vmax.xlane.f32.xlu0 %v5277_v20  ;;  %v5271_v10 = vpop.f32.mrb[146].mxu1 }
0x37e2   :  { %v8853_v18 = vpop.f32.mrb[147].mxu1 }
0x37ea   :  { %5298 = vrot.lane.b32.xlu1 %v10747_v7, %s9610_s8 }
0x37ee   :  { %5396 = vrot.lane.b32.xlu1 %v10745_v34, %s9604_s26 }
0x37f2   :  { %5446 = vrot.lane.b32.xlu1 %v10749_v41, %s9604_s26 }
0x37f6   :  { %5394 = vrot.lane.b32.xlu1 %v10745_v34, %s9611_s9 }
0x3866   :  { %v5276_v26 = vpop.xlane.xlu1 %5275 }
0x3867   :  { %v5280_v27 = vsub.f32 %v5218_v43, %v5276_v26 }
0x3869   :  { %v5282_v30 = vmul.f32 1.442695, %v5280_v27 }
0x386a   :  { %v5299_v31 = vpop.permute.xlu1 %5298 }
0x386b   :  { %9534 = vpow2.f32 %v5282_v30  ;;  %v5304_v33 = vsel %vm555_vm3, %v5299_v31, 0 }
0x386c   :  { %8855 = vmatpush3.bf16.msra.mxu0 %v5304_v33 }
0x386d   :  { %8866 = vmatprep.subr.bf16.mxu0 %v9596_v0 }
0x386e   :  { %v5279_v37 = vpop.xlane.xlu0 %5278  ;;  %v5397_v58 = vpop.permute.xlu1 %5396 }
0x386f   :  { %v5281_v6 = vsub.f32 %v5268_v25, %v5279_v37  ;;  %v5402_v13 = vsel %vm429_vm4, %v5397_v58, 0 }
0x3871   :  { %v5284_v44 = vmul.f32 1.442695, %v5281_v6 }
0x3873   :  { %9536 = vpow2.f32 %v5284_v44 }
0x3875   :  { %v9535_v38 = vpop.eup %9534 }
0x3876   :  { %v5286_v35 = vsel %vm525_vm5, %v9535_v38, 0.0 }
0x3877   :  { %5287 = vadd.xlane.f32.xlu0 %v5286_v35 }
0x387d   :  { %v9537_v34 = vpop.eup %9536 }
0x387e   :  { %v5289_v51 = vsel %vm525_vm5, %v9537_v34, 0.0 }
0x387f   :  { %5290 = vadd.xlane.f32.xlu0 %v5289_v51 }
0x3895   :  { %5346 = vrot.lane.b32.xlu0 %v10766_v24, %s9610_s8 }
0x3899   :  { %5444 = vrot.lane.b32.xlu0 %v10749_v41, %s9611_s9  ;;  %v5447_v41 = vpop.permute.xlu1 %5446 }
0x389a   :  { %v5452_v39 = vsel %vm429_vm4, %v5447_v41, 0  ;;  %v9339_v41 = vld [vmem:[%s10611_s17 + $0x8] sm:$0xff]  }
0x389d   :  { %v5395_v29 = vpop.permute.xlu1 %5394 }
0x3904   :  { %v5288_v50 = vpop.xlane.xlu0 %5287 }
0x3905   :  { %9538 = vrcp.f32 %v5288_v50 }
0x390c   :  { %v5291_v52 = vpop.xlane.xlu0 %5290 }
0x390d   :  { %9540 = vrcp.f32 %v5291_v52 }
0x390f   :  { %v9539_v57 = vpop.eup %9538 }
0x3910   :  { %v5293_v60 = vmul.f32 %v9539_v57, %v9535_v38  ;;  %v5347_v63 = vpop.permute.xlu0 %5346 }
0x3911   :  { %v5352_v1 = vsel %vm555_vm3, %v5347_v63, 0 }
0x3912   :  { %7993 = vst.msk [vmem:[%s10469_s30 + $0x60] sm:$0xff] %vm525_vm5, %v5293_v60  ;;  %8861 = vmatpush3.bf16.msra.mxu1 %v5352_v1  ;;  %v5296_v2 = vpack.c.bf16 %v5293_v60, %v5293_v60 }
0x3913   :  { %8872 = vmatprep.subr.bf16.mxu1 %v9596_v0 }
0x3914   :  { %8857 = vmatmul.mubr.msk.bf16.vlgmr.msra.gmra.mrb[144].mxu0 %vm525_vm5, %v5296_v2  ;;  %v5445_v53 = vpop.permute.xlu0 %5444 }
0x3915   :  { %8867 = vmatpush3.bf16.xpose.msra.mxu0 %v5402_v13  ;;  %8868 = vmatprep.mubr.msk.bf16.mxu0 %vm9598_vm0, %v9596_v0  ;;  %v9338_v13 = vld [vmem:[%s10611_s17] sm:$0xff]  }
0x3916   :  { %8878 = vmatprep.subr.bf16.mxu0 %v9596_v0 }
0x3917   :  { %v9541_v4 = vpop.eup %9540 }
0x3918   :  { %v5295_v5 = vmul.f32 %v9541_v4, %v9537_v34  ;;  %v9340_v4 = vld [vmem:[%s10611_s17 + $0x10] sm:$0xff]  }
0x391a   :  { %7994 = vst.msk [vmem:[%s10469_s30 + $0x68] sm:$0xff] %vm525_vm5, %v5295_v5  ;;  %v5297_v8 = vpack.c.bf16 %v5295_v5, %v5295_v5  ;;  %v9341_v5 = vld [vmem:[%s10611_s17 + $0x18] sm:$0xff]  }
0x391c   :  { %8863 = vmatmul.mubr.msk.bf16.vlgmr.msra.gmra.mrb[148].mxu1 %vm525_vm5, %v5297_v8  ;;  %8869 = vmatmul.mubr.msk.bf16.vlgmr.msra.gmra.mrb[148].mxu0 %vm429_vm4, %v5395_v29 }
0x391d   :  { %8873 = vmatpush3.bf16.xpose.msra.mxu1 %v5452_v39  ;;  %8874 = vmatprep.mubr.msk.bf16.mxu1 %vm9598_vm0, %v9596_v0 }
0x391e   :  { %8884 = vmatprep.subr.bf16.mxu1 %v9596_v0  ;;  %8880 = vmatprep.mubr.msk.bf16.mxu0 %vm9598_vm0, %v9596_v0 }
0x3924   :  { %8875 = vmatmul.mubr.msk.bf16.vlgmr.msra.gmra.mrb[152].mxu1 %vm429_vm4, %v5445_v53 }
0x3925   :  { %8886 = vmatprep.mubr.msk.bf16.mxu1 %vm9598_vm0, %v9596_v0 }
0x39e7   :  { %v5340_v22 = vpop.f32.mrb[144].mxu0 }
0x39e8   :  { %v8858_v49 = vpop.f32.mrb[145].mxu0 }
0x39e9   :  { %v5343_v19 = vpop.f32.mrb[146].mxu0 }
0x39ea   :  { %v8859_v43 = vpop.f32.mrb[147].mxu0 }
0x39ef   :  { %v5388_v55 = vpop.f32.mrb[148].mxu1  ;;  %v5438_v15 = vpop.f32.mrb[148].mxu0 }
0x39f0   :  { %v9208_v3 = vpack.i.bf16 %v5388_v55, %v5340_v22  ;;  %v8864_v14 = vpop.f32.mrb[149].mxu1  ;;  %v8870_v40 = vpop.f32.mrb[149].mxu0  ;;  %v5494_v46 = vsel %vm525_vm5, %v5438_v15, -inf }
0x39f1   :  { %v5391_v21 = vpop.f32.mrb[150].mxu1  ;;  %5495 = vmax.xlane.f32.xlu1 %v5494_v46  ;;  %v5441_v25 = vpop.f32.mrb[150].mxu0 }
0x39f2   :  { %v8865_v9 = vpop.f32.mrb[151].mxu1  ;;  %v8871_v20 = vpop.f32.mrb[151].mxu0 }
0x39f7   :  { %v5488_v10 = vpop.f32.mrb[152].mxu1 }
0x39f8   :  { %v8876_v18 = vpop.f32.mrb[153].mxu1  ;;  %v5497_v26 = vsel %vm525_vm5, %v5488_v10, -inf }
0x39f9   :  { %5498 = vmax.xlane.f32.xlu0 %v5497_v26  ;;  %v5491_v27 = vpop.f32.mrb[154].mxu1 }
0x39fa   :  { %v8877_v30 = vpop.f32.mrb[155].mxu1 }
0x3a02   :  { %5518 = vrot.lane.b32.xlu1 %v10747_v7, %s9611_s9 }
0x3a06   :  { %9204 = vrot.lane.b32.xlu1 %v9203_v16, %s9604_s26 }
0x3a0a   :  { %9209 = vrot.lane.b32.xlu1 %v9208_v3, %s9609_s7 }
0x3a7e   :  { %v5496_v31 = vpop.xlane.xlu1 %5495 }
0x3a7f   :  { %v5500_v33 = vsub.f32 %v5438_v15, %v5496_v31 }
0x3a81   :  { %v5502_v37 = vmul.f32 1.442695, %v5500_v33 }
0x3a82   :  { %v5519_v6 = vpop.permute.xlu1 %5518 }
0x3a83   :  { %9542 = vpow2.f32 %v5502_v37  ;;  %v5524_v44 = vsel %vm555_vm3, %v5519_v6, 0 }
0x3a84   :  { %8879 = vmatpush3.bf16.msra.mxu0 %v5524_v44 }
0x3a85   :  { %8890 = vmatprep.subr.bf16.mxu0 %v9596_v0 }
0x3a86   :  { %v5499_v38 = vpop.xlane.xlu0 %5498  ;;  %v9205_v15 = vpop.permute.xlu1 %9204 }
0x3a87   :  { %v5501_v35 = vsub.f32 %v5488_v10, %v5499_v38  ;;  %v9207_v14 = vunpack.i.h.bf16 %v9205_v15  ;;  %v9206_v40 = vunpack.i.l.bf16 %v9205_v15 }
0x3a89   :  { %v5504_v7 = vmul.f32 1.442695, %v5501_v35  ;;  %v5639_v9 = vsel %vm429_vm4, %v10809_v36, %v9207_v14  ;;  %v5638_v20 = vsel %vm429_vm4, %v10807_v12, %v9206_v40  ;;  %v7966_v36 = vld [vmem:[%s10636_s1] ss:$0 sm:$0xff] }
0x3a8a   :  { %v9210_v3 = vpop.permute.xlu1 %9209 }
0x3a8b   :  { %9544 = vpow2.f32 %v5504_v7  ;;  %v9212_v46 = vunpack.i.h.bf16 %v9210_v3  ;;  %v9211_v21 = vunpack.i.l.bf16 %v9210_v3 }
0x3a8d   :  { %v9543_v34 = vpop.eup %9542  ;;  %v5640_v26 = vsel %vm1333_vm6, %v5638_v20, %v9211_v21  ;;  %v5641_v27 = vsel %vm1333_vm6, %v5639_v9, %v9212_v46  ;;  %v7972_v46 = vld [vmem:[%s10685_s20] ss:$0 sm:$0xff] }
0x3a8e   :  { %v5506_v47 = vsel %vm525_vm5, %v9543_v34, 0.0  ;;  %v7973_v20 = vld [vmem:[%s10690_s28] ss:$0 sm:$0xff] }
0x3a8f   :  { %5507 = vadd.xlane.f32.xlu0 %v5506_v47 }
0x3a95   :  { %v9545_v28 = vpop.eup %9544 }
0x3a96   :  { %v5509_v16 = vsel %vm525_vm5, %v9545_v28, 0.0 }
0x3a97   :  { %5510 = vadd.xlane.f32.xlu0 %v5509_v16 }
0x3aad   :  { %5566 = vrot.lane.b32.xlu0 %v10766_v24, %s9611_s9 }
0x3b1c   :  { %v5508_v51 = vpop.xlane.xlu0 %5507 }
0x3b1d   :  { %9546 = vrcp.f32 %v5508_v51 }
0x3b24   :  { %v5511_v50 = vpop.xlane.xlu0 %5510 }
0x3b25   :  { %9548 = vrcp.f32 %v5511_v50 }
0x3b27   :  { %v9547_v52 = vpop.eup %9546 }
0x3b28   :  { %v5513_v57 = vmul.f32 %v9547_v52, %v9543_v34  ;;  %v5567_v58 = vpop.permute.xlu0 %5566 }
0x3b29   :  { %v5572_v60 = vsel %vm555_vm3, %v5567_v58, 0 }
0x3b2a   :  { %7995 = vst.msk [vmem:[%s10469_s30 + $0x70] sm:$0xff] %vm525_vm5, %v5513_v57  ;;  %8885 = vmatpush3.bf16.msra.mxu1 %v5572_v60  ;;  %v5516_v63 = vpack.c.bf16 %v5513_v57, %v5513_v57 }
0x3b2b   :  { %8902 = vmatprep.subr.bf16.mxu1 %v9596_v0 }
0x3b2c   :  { %8881 = vmatmul.mubr.msk.bf16.vlgmr.msra.gmra.mrb[152].mxu0 %vm525_vm5, %v5516_v63 }
0x3b2d   :  { %8898 = vmatprep.mubr.msk.bf16.mxu0 %vm9598_vm0, %v9596_v0  ;;  %8891 = vmatpush3.bf16.msra.mxu0 %v9338_v13  ;;  %v9343_v13 = vld [vmem:[%s10656_s15 + $0x8] sm:$0xff]  }
0x3b2e   :  { %8892 = vmatprep.subr.bf16.mxu0 %v9596_v0 }
0x3b2f   :  { %v9549_v24 = vpop.eup %9548 }
0x3b30   :  { %v5515_v1 = vmul.f32 %v9549_v24, %v9545_v28 }
0x3b31   :  { %8893 = vmatpush3.bf16.msra.mxu0 %v9339_v41  ;;  %v9344_v41 = vld [vmem:[%s10656_s15 + $0x10] sm:$0xff]  }
0x3b32   :  { %7996 = vst.msk [vmem:[%s10469_s30 + $0x78] sm:$0xff] %vm525_vm5, %v5515_v1  ;;  %v5517_v2 = vpack.c.bf16 %v5515_v1, %v5515_v1  ;;  %8894 = vmatprep.subr.bf16.mxu0 %v9596_v0 }
0x3b34   :  { %8887 = vmatmul.mubr.msk.bf16.vlgmr.msra.gmra.mrb[156].mxu1 %vm525_vm5, %v5517_v2  ;;  %v9342_v2 = vld [vmem:[%s10656_s15] sm:$0xff]  }
0x3b35   :  { %8910 = vmatprep.mubr.msk.bf16.mxu1 %vm9598_vm0, %v9596_v0  ;;  %8895 = vmatpush3.bf16.msra.mxu0 %v9340_v4  ;;  %v9345_v4 = vld [vmem:[%s10656_s15 + $0x18] sm:$0xff]  }
0x3b36   :  { %8896 = vmatprep.subr.bf16.mxu0 %v9596_v0  ;;  %8903 = vmatpush3.bf16.msra.mxu1 %v9342_v2 }
0x3b37   :  { %8904 = vmatprep.subr.bf16.mxu1 %v9596_v0 }
0x3b39   :  { %8897 = vmatpush3.bf16.msra.mxu0 %v9341_v5  ;;  %v9346_v5 = vld [vmem:[%s10668_s18] sm:$0xff]  }
0x3b3a   :  { %8914 = vmatprep.subr.bf16.mxu0 %v9596_v0  ;;  %8905 = vmatpush3.bf16.msra.mxu1 %v9343_v13 }
0x3b3b   :  { %8906 = vmatprep.subr.bf16.mxu1 %v9596_v0 }
0x3b3e   :  { %8907 = vmatpush3.bf16.msra.mxu1 %v9344_v41 }
0x3b3f   :  { %8908 = vmatprep.subr.bf16.mxu1 %v9596_v0 }
0x3b42   :  { %8909 = vmatpush3.bf16.msra.mxu1 %v9345_v4 }
0x3bff   :  { %v5560_v8 = vpop.f32.mrb[152].mxu0 }
0x3c00   :  { %v8882_v29 = vpop.f32.mrb[153].mxu0 }
0x3c01   :  { %v5563_v39 = vpop.f32.mrb[154].mxu0  ;;  %v9348_v29 = vld [vmem:[%s10668_s18 + $0x10] sm:$0xff]  }
0x3c02   :  { %v8883_v53 = vpop.f32.mrb[155].mxu0  ;;  %v9349_v39 = vld [vmem:[%s10668_s18 + $0x18] sm:$0xff]  }
0x3c03   :  { %v9350_v53 = vld [vmem:[%s10668_s18 + $0x20] sm:$0xff]  }
0x3c07   :  { %v5608_v22 = vpop.f32.mrb[156].mxu1 }
0x3c08   :  { %v9213_v49 = vpack.i.bf16 %v5608_v22, %v5560_v8  ;;  %v8888_v19 = vpop.f32.mrb[157].mxu1  ;;  %v9347_v8 = vld [vmem:[%s10668_s18 + $0x8] sm:$0xff]  }
0x3c09   :  { %v5611_v43 = vpop.f32.mrb[158].mxu1  ;;  %v9351_v22 = vld [vmem:[%s10668_s18 + $0x28] sm:$0xff]  }
0x3c0a   :  { %v8889_v55 = vpop.f32.mrb[159].mxu1  ;;  %9214 = vrot.lane.b32.xlu1 %v9213_v49, %s9607_s5 }
0x3c7c   :  { %v9215_v25 = vpop.permute.xlu1 %9214 }
0x3c7d   :  { %v9217_v10 = vunpack.i.h.bf16 %v9215_v25  ;;  %v9216_v18 = vunpack.i.l.bf16 %v9215_v25 }
0x3c7f   :  { %v5643_v30 = vsel %vm1336_vm7, %v5641_v27, %v9217_v10  ;;  %v5642_v31 = vsel %vm1336_vm7, %v5640_v26, %v9216_v18 }
0x3c80   :  { %v5644_v33 = vpack.c.bf16 %v5643_v30, %v5642_v31  ;;  %v9352_v30 = vld [vmem:[%s10668_s18 + $0x30] sm:$0xff]   ;;  %v9353_v31 = vld [vmem:[%s10668_s18 + $0x38] sm:$0xff]  }
0x3c82   :  { %8899 = vmatmul.mubr.msk.bf16.vlgmr.msra.gmra.mrb[156].mxu0 %vm273_vm2, %v5644_v33  ;;  %v7974_v33 = vld [vmem:[%s10703_s25] ss:$0 sm:$0xff] }
0x3c83   :  { %8930 = vmatprep.mubr.msk.bf16.mxu0 %vm9598_vm0, %v9596_v0  ;;  %8915 = vmatpush3.bf16.msra.mxu0 %v9346_v5 }
0x3c84   :  { %8916 = vmatprep.subr.bf16.mxu0 %v9596_v0 }
0x3c87   :  { %8917 = vmatpush3.bf16.msra.mxu0 %v9347_v8 }
0x3c88   :  { %8918 = vmatprep.subr.bf16.mxu0 %v9596_v0 }
0x3c8b   :  { %8919 = vmatpush3.bf16.msra.mxu0 %v9348_v29 }
0x3c8c   :  { %8920 = vmatprep.subr.bf16.mxu0 %v9596_v0 }
0x3c8f   :  { %8921 = vmatpush3.bf16.msra.mxu0 %v9349_v39 }
0x3c90   :  { %8922 = vmatprep.subr.bf16.mxu0 %v9596_v0 }
0x3c93   :  { %8923 = vmatpush3.bf16.msra.mxu0 %v9350_v53  ;;  %v9356_v53 = vld [vmem:[%s10368_s27 + $0x4] ss:$8 sps:$4 sm:$0xff]  }
0x3c94   :  { %8924 = vmatprep.subr.bf16.mxu0 %v9596_v0  ;;  %6095 = vmatprep.subr.bf16.mxu1 %v9356_v53 }
0x3c97   :  { %8925 = vmatpush3.bf16.msra.mxu0 %v9351_v22  ;;  %v9354_v22 = vld [vmem:[%s10368_s27] ss:$8 sps:$4 sm:$0xff]  }
0x3c98   :  { %8926 = vmatprep.subr.bf16.mxu0 %v9596_v0 }
0x3c9b   :  { %8927 = vmatpush3.bf16.msra.mxu0 %v9352_v30 }
0x3c9c   :  { %8928 = vmatprep.subr.bf16.mxu0 %v9596_v0 }
0x3c9f   :  { %8929 = vmatpush3.bf16.msra.mxu0 %v9353_v31  ;;  %v7998_v31 = vld [vmem:[%s10407_s21] ss:$0 sm:$0xff]  ;;  %s9638_s21 = smov 31  }
0x3ca0   :  { %8946 = vmatprep.subr.bf16.mxu0 %v9596_v0 }
0x3d55   :  { %v5721_v37 = vpop.f32.mrb[156].mxu0 }
0x3d56   :  { %v5722_v6 = vadd.f32 %v7966_v36, %v5721_v37  ;;  %v8900_v12 = vpop.f32.mrb[157].mxu0 }
0x3d57   :  { %v5724_v44 = vpop.f32.mrb[158].mxu0 }
0x3d58   :  { %v10946_v38 = vadd.f32 %v5722_v6, %v10715_v54  ;;  %v5725_v35 = vadd.f32 %v7966_v36, %v5724_v44  ;;  %v8901_v7 = vpop.f32.mrb[159].mxu0 }
0x3d5a   :  { %v10949_v34 = vadd.f32 %v5725_v35, %v10718_v48  ;;  %v5732_v47 = vsel %vm273_vm2, %v10946_v38, 0.0 }
0x3d5b   :  { %5733 = vadd.xlane.f32.xlu0 %v5732_v47 }
0x3d5c   :  { %v5735_v28 = vsel %vm273_vm2, %v10949_v34, 0.0 }
0x3d5d   :  { %5736 = vadd.xlane.f32.xlu1 %v5735_v28 }
0x3de8   :  { %v5734_v16 = vpop.xlane.xlu0 %5733 }
0x3de9   :  { %v5738_v51 = vmul.f32 0.015625, %v5734_v16 }
0x3dea   :  { %v5737_v50 = vpop.xlane.xlu1 %5736 }
0x3deb   :  { %v5740_v52 = vsub.f32 %v10946_v38, %v5738_v51  ;;  %v5739_v57 = vmul.f32 0.015625, %v5737_v50 }
0x3ded   :  { %v5741_v58 = vsub.f32 %v10949_v34, %v5739_v57  ;;  %v5742_v60 = vmul.f32 %v5740_v52, %v5740_v52 }
0x3def   :  { %v5744_v63 = vsel %vm273_vm2, %v5742_v60, 0.0  ;;  %v5743_v24 = vmul.f32 %v5741_v58, %v5741_v58 }
0x3df0   :  { %5745 = vadd.xlane.f32.xlu0 %v5744_v63 }
0x3df1   :  { %v5747_v1 = vsel %vm273_vm2, %v5743_v24, 0.0 }
0x3df4   :  { %5748 = vadd.xlane.f32.xlu0 %v5747_v1 }
0x3e7d   :  { %v5746_v49 = vpop.xlane.xlu0 %5745 }
0x3e7e   :  { %v5750_v19 = vmul.f32 0.015625, %v5746_v49  ;;  %v9359_v49 = vld [vmem:[%s10368_s27 + $0x14] ss:$8 sps:$4 sm:$0xff]  }
0x3e80   :  { %v5752_v43 = vadd.f32 1e-05, %v5750_v19  ;;  %v9357_v19 = vld [vmem:[%s10368_s27 + $0x10] ss:$8 sps:$4 sm:$0xff]  }
0x3e81   :  { %v5749_v55 = vpop.xlane.xlu0 %5748 }
0x3e82   :  { %9550 = vrsqrt.f32 %v5752_v43  ;;  %v5751_v15 = vmul.f32 0.015625, %v5749_v55  ;;  %v9362_v43 = vld [vmem:[%s10368_s27 + $0x24] ss:$8 sps:$4 sm:$0xff]   ;;  %v9360_v55 = vld [vmem:[%s10368_s27 + $0x20] ss:$8 sps:$4 sm:$0xff]  }
0x3e84   :  { %v5753_v3 = vadd.f32 1e-05, %v5751_v15  ;;  %v9363_v15 = vld [vmem:[%s10368_s27 + $0x30] ss:$8 sps:$4 sm:$0xff]  }
0x3e86   :  { %9552 = vrsqrt.f32 %v5753_v3  ;;  %v9365_v3 = vld [vmem:[%s10368_s27 + $0x34] ss:$8 sps:$4 sm:$0xff]  }
0x3e8c   :  { %v9551_v14 = vpop.eup %9550 }
0x3e8d   :  { %v5756_v40 = vmul.f32 %v9551_v14, %v5740_v52 }
0x3e8f   :  { %v5764_v25 = vmul.f32 %v7972_v46, %v5756_v40 }
0x3e90   :  { %v9553_v21 = vpop.eup %9552 }
0x3e91   :  { %v5757_v9 = vmul.f32 %v9553_v21, %v5741_v58  ;;  %v5772_v18 = vadd.f32 %v7973_v20, %v5764_v25 }
0x3e93   :  { %v5765_v10 = vmul.f32 %v7972_v46, %v5757_v9 }
0x3e95   :  { %v5773_v26 = vadd.f32 %v7973_v20, %v5765_v10  ;;  %v7997_v10 = vld [vmem:[%s10402_s10] ss:$0 sm:$0xff]  ;;  %s7759_s10 = sld [smem:[%s11354_s0 + %s9609_s7]]  }
0x3e97   :  { %v5774_v27 = vpack.c.bf16 %v5773_v26, %v5772_v18 }
0x3e99   :  { %8911 = vmatmul.mubr.msk.bf16.vlgmr.msra.gmra.mrb[160].mxu1 %vm273_vm2, %v5774_v27 }
0x3e9a   :  { %6127 = vmatprep.mubr.bf16.mxu1 %v9602_v32  ;;  %v7980_v32 = vld [vmem:[%s10711_s19] ss:$0 sm:$0xff]  ;;  %6096 = vmatpush1.bf16.msra.mxu1 %v9354_v22 }
0x3e9b   :  { %6097 = vmatprep.subr.bf16.mxu1 %v9359_v49 }
0x3e9e   :  { %6098 = vmatpush1.bf16.msra.mxu1 %v9357_v19 }
0x3e9f   :  { %6099 = vmatprep.subr.bf16.mxu1 %v9362_v43 }
0x3ea2   :  { %6100 = vmatpush1.bf16.msra.mxu1 %v9360_v55 }
0x3ea3   :  { %6101 = vmatprep.subr.bf16.mxu1 %v9365_v3 }
0x3ea6   :  { %6102 = vmatpush1.bf16.msra.mxu1 %v9363_v15 }
0x3ea7   :  { %8934 = vmatprep.subr.bf16.mxu1 %v9596_v0 }
0x3f6c   :  { %v5851_v36 = vpop.f32.mrb[160].mxu1 }
0x3f6d   :  { %v5852_v37 = vadd.f32 %v7974_v33, %v5851_v36  ;;  %v8912_v6 = vpop.f32.mrb[161].mxu1 }
0x3f6e   :  { %v5854_v12 = vpop.f32.mrb[162].mxu1 }
0x3f6f   :  { %v5855_v44 = vadd.f32 %v7974_v33, %v5854_v12  ;;  %v8913_v35 = vpop.f32.mrb[163].mxu1  ;;  %v5858_v7 = vmax.f32 %v5852_v37, 0.0  ;;  %v6040_v12 = vld [vmem:[%s10419_s13] sm:$0x3] }
0x3f70   :  { %v6049_v35 = vrot.slane %v6040_v12, %v9727_v61 }
0x3f71   :  { %v5859_v47 = vmax.f32 %v5855_v44, 0.0  ;;  %v6045_v44 = vrot.slane %v6040_v12, %v9724_v59 }
0x3f73   :  { %v5860_v28 = vpack.c.bf16 %v5859_v47, %v5858_v7 }
0x3f75   :  { %8931 = vmatmul.mubr.bf16.vlgmr.msra.gmra.mrb[160].mxu0 %v5860_v28 }
0x3f76   :  { %8948 = vmatprep.mubr.msk.bf16.mxu0 %vm9598_vm0, %v9596_v0 }
0x4048   :  { %v5966_v16 = vpop.f32.mrb[160].mxu0 }
0x4049   :  { %v5967_v51 = vadd.f32 %v7980_v32, %v5966_v16  ;;  %v8932_v50 = vpop.f32.mrb[161].mxu0 }
0x404a   :  { %v5969_v52 = vpop.f32.mrb[162].mxu0 }
0x404b   :  { %v10991_v57 = vadd.f32 %v5967_v51, %v10946_v38  ;;  %v5970_v58 = vadd.f32 %v7980_v32, %v5969_v52  ;;  %v8933_v60 = vpop.f32.mrb[163].mxu0 }
0x404d   :  { %v10994_v63 = vadd.f32 %v5970_v58, %v10949_v34  ;;  %v5989_v24 = vsel %vm273_vm2, %v10991_v57, 0.0 }
0x404e   :  { %5990 = vadd.xlane.f32.xlu0 %v5989_v24 }
0x404f   :  { %v5992_v1 = vsel %vm273_vm2, %v10994_v63, 0.0 }
0x4050   :  { %5993 = vadd.xlane.f32.xlu1 %v5992_v1 }
0x40db   :  { %v5991_v2 = vpop.xlane.xlu0 %5990 }
0x40dc   :  { %v5995_v13 = vmul.f32 0.015625, %v5991_v2 }
0x40dd   :  { %v5994_v38 = vpop.xlane.xlu1 %5993 }
0x40de   :  { %v5997_v41 = vsub.f32 %v10991_v57, %v5995_v13  ;;  %v5996_v4 = vmul.f32 0.015625, %v5994_v38 }
0x40e0   :  { %v5998_v34 = vsub.f32 %v10994_v63, %v5996_v4  ;;  %v5999_v5 = vmul.f32 %v5997_v41, %v5997_v41 }
0x40e2   :  { %v6001_v8 = vsel %vm273_vm2, %v5999_v5, 0.0  ;;  %v6000_v29 = vmul.f32 %v5998_v34, %v5998_v34 }
0x40e3   :  { %6002 = vadd.xlane.f32.xlu0 %v6001_v8 }
0x40e4   :  { %v6004_v39 = vsel %vm273_vm2, %v6000_v29, 0.0 }
0x40e5   :  { %6005 = vadd.xlane.f32.xlu1 %v6004_v39 }
0x4170   :  { %v6003_v14 = vpop.xlane.xlu0 %6002 }
0x4171   :  { %v6007_v40 = vmul.f32 0.015625, %v6003_v14 }
0x4172   :  { %v6006_v46 = vpop.xlane.xlu1 %6005 }
0x4173   :  { %v6009_v21 = vadd.f32 1e-05, %v6007_v40  ;;  %v6008_v25 = vmul.f32 0.015625, %v6006_v46 }
0x4175   :  { %9554 = vrsqrt.f32 %v6009_v21  ;;  %v6010_v9 = vadd.f32 1e-05, %v6008_v25 }
0x4177   :  { %9556 = vrsqrt.f32 %v6010_v9 }
0x417f   :  { %v9555_v20 = vpop.eup %9554 }
0x4180   :  { %v6013_v18 = vmul.f32 %v9555_v20, %v5997_v41 }
0x4181   :  { %v9557_v26 = vpop.eup %9556 }
0x4182   :  { %v6021_v27 = vmul.f32 %v7997_v10, %v6013_v18  ;;  %v6014_v30 = vmul.f32 %v9557_v26, %v5998_v34 }
0x4184   :  { %v6022_v33 = vmul.f32 %v7997_v10, %v6014_v30  ;;  %v6029_v36 = vadd.f32 %v7998_v31, %v6021_v27 }
0x4186   :  { %v6030_v37 = vadd.f32 %v7998_v31, %v6022_v33 }
0x4188   :  { %v6031_v6 = vpack.c.bf16 %v6030_v37, %v6029_v36 }
0x418a   :  { %8007 = vmatmul.mubr.msk.bf16.vlgmr.msra.gmra.mrb[164].mxu1 %vm273_vm2, %v6031_v6 }
0x418b   :  { %8936 = vmatprep.mubr.msk.bf16.mxu1 %vm9598_vm0, %v9596_v0 }
0x425d   :  { %v6129_v7 = vpop.f32.mrb[164].mxu1 }
0x425e   :  { %v6130_v47 = vadd.f32 %v6129_v7, %v6045_v44  ;;  %v6131_v28 = vpop.f32.mrb[165].mxu1 }
0x425f   :  { %v6132_v32 = vadd.f32 %v6131_v28, %v6049_v35  ;;  %v6133_v16 = vpop.f32.mrb[166].mxu1 }
0x4260   :  { %v11021_v51 = vpack.c.bf16 %v6130_v47, %v6130_v47  ;;  %v6134_v50 = vadd.f32 %v6133_v16, %v6045_v44  ;;  %v6135_v52 = vpop.f32.mrb[167].mxu1 }
0x4261   :  { %v11023_v58 = vpack.c.bf16 %v6132_v32, %v6132_v32  ;;  %v6136_v60 = vadd.f32 %v6135_v52, %v6049_v35 }
0x4262   :  { %v11025_v24 = vpack.c.bf16 %v6134_v50, %v6134_v50  ;;  %6141 = vrot.lane.b32.xlu0 %v11021_v51, %s9606_s4 }
0x4263   :  { %v6268_v59 = vsel %vm555_vm3, %v11023_v58, 0  ;;  %v11042_v38 = vpack.c.bf16 %v6136_v60, %v6136_v60 }
0x4264   :  { %6190 = vrot.lane.b32.xlu1 %v11025_v24, %s9606_s4  ;;  %8947 = vmatpush3.bf16.msra.mxu0 %v6268_v59 }
0x4265   :  { %8958 = vmatprep.subr.bf16.mxu0 %v9596_v0  ;;  %v6314_v41 = vsel %vm555_vm3, %v11042_v38, 0 }
0x42d4   :  { %v6142_v61 = vpop.permute.xlu0 %6141 }
0x42d5   :  { %v6147_v1 = vsel %vm429_vm4, %v6142_v61, 0 }
0x42d6   :  { %8935 = vmatpush3.bf16.xpose.msra.mxu1 %v6147_v1  ;;  %v6191_v2 = vpop.permute.xlu1 %6190 }
0x42d7   :  { %8940 = vmatprep.subr.bf16.mxu1 %v9596_v0  ;;  %v6196_v13 = vsel %vm429_vm4, %v6191_v2, 0 }
0x42dd   :  { %8937 = vmatmul.mubr.msk.bf16.vlgmr.msra.gmra.mrb[168].mxu1 %vm429_vm4, %v11021_v51 }
0x42de   :  { %8941 = vmatpush3.bf16.xpose.msra.mxu1 %v6196_v13  ;;  %8942 = vmatprep.mubr.msk.bf16.mxu1 %vm9598_vm0, %v9596_v0 }
0x42df   :  { %8952 = vmatprep.subr.bf16.mxu1 %v9596_v0 }
0x42e5   :  { %8943 = vmatmul.mubr.msk.bf16.vlgmr.msra.gmra.mrb[172].mxu1 %vm429_vm4, %v11025_v24 }
0x42e6   :  { %8953 = vmatpush3.bf16.msra.mxu1 %v6314_v41  ;;  %8954 = vmatprep.mubr.msk.bf16.mxu1 %vm9598_vm0, %v9596_v0 }
0x42e7   :  { %8964 = vmatprep.subr.bf16.mxu1 %v9596_v0 }
0x43b0   :  { %v6183_v4 = vpop.f32.mrb[168].mxu1 }
0x43b1   :  { %v8938_v34 = vpop.f32.mrb[169].mxu1  ;;  %v6238_v5 = vsel %vm525_vm5, %v6183_v4, -inf }
0x43b2   :  { %6239 = vmax.xlane.f32.xlu1 %v6238_v5  ;;  %v6186_v8 = vpop.f32.mrb[170].mxu1 }
0x43b3   :  { %v8939_v29 = vpop.f32.mrb[171].mxu1 }
0x43b8   :  { %v6232_v39 = vpop.f32.mrb[172].mxu1 }
0x43b9   :  { %v8944_v53 = vpop.f32.mrb[173].mxu1  ;;  %v6241_v22 = vsel %vm525_vm5, %v6232_v39, -inf }
0x43ba   :  { %6242 = vmax.xlane.f32.xlu0 %v6241_v22  ;;  %v6235_v49 = vpop.f32.mrb[174].mxu1 }
0x43bb   :  { %v8945_v19 = vpop.f32.mrb[175].mxu1 }
0x43c3   :  { %6408 = vrot.lane.b32.xlu1 %v11025_v24, %s9607_s5 }
0x443f   :  { %v6240_v43 = vpop.xlane.xlu1 %6239 }
0x4440   :  { %v6244_v55 = vsub.f32 %v6183_v4, %v6240_v43 }
0x4442   :  { %v6246_v15 = vmul.f32 1.442695, %v6244_v55 }
0x4443   :  { %v6409_v10 = vpop.permute.xlu1 %6408 }
0x4444   :  { %9558 = vpow2.f32 %v6246_v15  ;;  %v6414_v44 = vsel %vm429_vm4, %v6409_v10, 0 }
0x4447   :  { %v6243_v3 = vpop.xlane.xlu0 %6242 }
0x4448   :  { %v6245_v14 = vsub.f32 %v6232_v39, %v6243_v3 }
0x444a   :  { %v6248_v40 = vmul.f32 1.442695, %v6245_v14 }
0x444c   :  { %9560 = vpow2.f32 %v6248_v40 }
0x444e   :  { %v9559_v46 = vpop.eup %9558 }
0x444f   :  { %v6250_v21 = vsel %vm525_vm5, %v9559_v46, 0.0 }
0x4450   :  { %6251 = vadd.xlane.f32.xlu0 %v6250_v21 }
0x4456   :  { %v9561_v25 = vpop.eup %9560 }
0x4457   :  { %v6253_v9 = vsel %vm525_vm5, %v9561_v25, 0.0 }
0x4458   :  { %6254 = vadd.xlane.f32.xlu1 %v6253_v9 }
0x4466   :  { %6358 = vrot.lane.b32.xlu0 %v11021_v51, %s9607_s5 }
0x4469   :  { %6356 = vrot.lane.b32.xlu1 %v11021_v51, %s9608_s6 }
0x446d   :  { %6406 = vrot.lane.b32.xlu1 %v11025_v24, %s9608_s6 }
0x44dd   :  { %v6252_v20 = vpop.xlane.xlu0 %6251 }
0x44de   :  { %9562 = vrcp.f32 %v6252_v20 }
0x44e1   :  { %v6359_v30 = vpop.permute.xlu0 %6358 }
0x44e2   :  { %v6364_v33 = vsel %vm429_vm4, %v6359_v30, 0 }
0x44e5   :  { %v6255_v18 = vpop.xlane.xlu1 %6254 }
0x44e6   :  { %9564 = vrcp.f32 %v6255_v18 }
0x44e8   :  { %v9563_v26 = vpop.eup %9562 }
0x44e9   :  { %v6257_v27 = vmul.f32 %v9563_v26, %v9559_v46  ;;  %v6357_v12 = vpop.permute.xlu1 %6356 }
0x44eb   :  { %8047 = vst.msk [vmem:[%s10469_s30 + $0x80] sm:$0xff] %vm525_vm5, %v6257_v27  ;;  %v6260_v31 = vpack.c.bf16 %v6257_v27, %v6257_v27 }
0x44ed   :  { %8949 = vmatmul.mubr.msk.bf16.vlgmr.msra.gmra.mrb[164].mxu0 %vm525_vm5, %v6260_v31  ;;  %v6407_v35 = vpop.permute.xlu1 %6406 }
0x44ee   :  { %8959 = vmatpush3.bf16.xpose.msra.mxu0 %v6364_v33  ;;  %8960 = vmatprep.mubr.msk.bf16.mxu0 %vm9598_vm0, %v9596_v0 }
0x44ef   :  { %8970 = vmatprep.subr.bf16.mxu0 %v9596_v0 }
0x44f0   :  { %v9565_v36 = vpop.eup %9564 }
0x44f1   :  { %v6259_v37 = vmul.f32 %v9565_v36, %v9561_v25 }
0x44f3   :  { %8048 = vst.msk [vmem:[%s10469_s30 + $0x88] sm:$0xff] %vm525_vm5, %v6259_v37  ;;  %v6261_v6 = vpack.c.bf16 %v6259_v37, %v6259_v37 }
0x44f5   :  { %8955 = vmatmul.mubr.msk.bf16.vlgmr.msra.gmra.mrb[176].mxu1 %vm525_vm5, %v6261_v6  ;;  %8961 = vmatmul.mubr.msk.bf16.vlgmr.msra.gmra.mrb[168].mxu0 %vm429_vm4, %v6357_v12 }
0x44f6   :  { %8965 = vmatpush3.bf16.xpose.msra.mxu1 %v6414_v44  ;;  %8966 = vmatprep.mubr.msk.bf16.mxu1 %vm9598_vm0, %v9596_v0 }
0x44f7   :  { %8976 = vmatprep.subr.bf16.mxu1 %v9596_v0  ;;  %8972 = vmatprep.mubr.msk.bf16.mxu0 %vm9598_vm0, %v9596_v0 }
0x44fd   :  { %8967 = vmatmul.mubr.msk.bf16.vlgmr.msra.gmra.mrb[180].mxu1 %vm429_vm4, %v6407_v35 }
0x44fe   :  { %8978 = vmatprep.mubr.msk.bf16.mxu1 %vm9598_vm0, %v9596_v0 }
0x45c0   :  { %v11083_v7 = vpop.f32.mrb[164].mxu0 }
0x45c1   :  { %v8950_v47 = vpop.f32.mrb[165].mxu0 }
0x45c2   :  { %v6307_v28 = vpop.f32.mrb[166].mxu0 }
0x45c3   :  { %v8951_v32 = vpop.f32.mrb[167].mxu0 }
0x45c8   :  { %v11085_v16 = vpop.f32.mrb[176].mxu1  ;;  %v6400_v50 = vpop.f32.mrb[168].mxu0 }
0x45c9   :  { %v8956_v52 = vpop.f32.mrb[177].mxu1  ;;  %v8962_v60 = vpop.f32.mrb[169].mxu0  ;;  %v6456_v59 = vsel %vm525_vm5, %v6400_v50, -inf }
0x45ca   :  { %v6353_v61 = vpop.f32.mrb[178].mxu1  ;;  %6457 = vmax.xlane.f32.xlu0 %v6456_v59  ;;  %v6403_v1 = vpop.f32.mrb[170].mxu0 }
0x45cb   :  { %v8957_v2 = vpop.f32.mrb[179].mxu1  ;;  %v8963_v13 = vpop.f32.mrb[171].mxu0 }
0x45d0   :  { %v6450_v41 = vpop.f32.mrb[180].mxu1 }
0x45d1   :  { %v8968_v4 = vpop.f32.mrb[181].mxu1  ;;  %v6459_v34 = vsel %vm525_vm5, %v6450_v41, -inf }
0x45d2   :  { %6460 = vmax.xlane.f32.xlu1 %v6459_v34  ;;  %v6453_v5 = vpop.f32.mrb[182].mxu1 }
0x45d3   :  { %v8969_v8 = vpop.f32.mrb[183].mxu1 }
0x45e3   :  { %6530 = vrot.lane.b32.xlu1 %v11042_v38, %s9608_s6 }
0x45e7   :  { %6580 = vrot.lane.b32.xlu1 %v11021_v51, %s9609_s7 }
0x45eb   :  { %6630 = vrot.lane.b32.xlu1 %v11025_v24, %s9609_s7 }
0x45ef   :  { %6628 = vrot.lane.b32.xlu1 %v11025_v24, %s9610_s8 }
0x4657   :  { %v6458_v29 = vpop.xlane.xlu0 %6457 }
0x4658   :  { %v6462_v39 = vsub.f32 %v6400_v50, %v6458_v29 }
0x465a   :  { %v6464_v53 = vmul.f32 1.442695, %v6462_v39 }
0x465c   :  { %9566 = vpow2.f32 %v6464_v53 }
0x465f   :  { %v6461_v22 = vpop.xlane.xlu1 %6460 }
0x4660   :  { %v6463_v49 = vsub.f32 %v6450_v41, %v6461_v22 }
0x4662   :  { %v6466_v19 = vmul.f32 1.442695, %v6463_v49 }
0x4663   :  { %v6531_v43 = vpop.permute.xlu1 %6530 }
0x4664   :  { %9568 = vpow2.f32 %v6466_v19  ;;  %v6536_v55 = vsel %vm555_vm3, %v6531_v43, 0 }
0x4665   :  { %8977 = vmatpush3.bf16.msra.mxu1 %v6536_v55 }
0x4666   :  { %v9567_v15 = vpop.eup %9566  ;;  %8988 = vmatprep.subr.bf16.mxu1 %v9596_v0 }
0x4667   :  { %v6468_v3 = vsel %vm525_vm5, %v9567_v15, 0.0  ;;  %v6581_v26 = vpop.permute.xlu1 %6580 }
0x4668   :  { %6469 = vadd.xlane.f32.xlu0 %v6468_v3  ;;  %v6586_v33 = vsel %vm429_vm4, %v6581_v26, 0 }
0x466b   :  { %v6631_v31 = vpop.permute.xlu1 %6630 }
0x466c   :  { %v6636_v37 = vsel %vm429_vm4, %v6631_v31, 0 }
0x466e   :  { %v9569_v14 = vpop.eup %9568 }
0x466f   :  { %v6471_v40 = vsel %vm525_vm5, %v9569_v14, 0.0  ;;  %v6629_v12 = vpop.permute.xlu1 %6628 }
0x4670   :  { %6472 = vadd.xlane.f32.xlu0 %v6471_v40 }
0x4686   :  { %6481 = vrot.lane.b32.xlu0 %v11023_v58, %s9608_s6 }
0x468a   :  { %6578 = vrot.lane.b32.xlu0 %v11021_v51, %s9610_s8 }
0x46f5   :  { %v6470_v46 = vpop.xlane.xlu0 %6469 }
0x46f6   :  { %9570 = vrcp.f32 %v6470_v46 }
0x46fd   :  { %v6473_v21 = vpop.xlane.xlu0 %6472 }
0x46fe   :  { %9572 = vrcp.f32 %v6473_v21 }
0x4700   :  { %v9571_v25 = vpop.eup %9570 }
0x4701   :  { %v6475_v9 = vmul.f32 %v9571_v25, %v9567_v15  ;;  %v6482_v20 = vpop.permute.xlu0 %6481 }
0x4702   :  { %v6487_v10 = vsel %vm555_vm3, %v6482_v20, 0 }
0x4703   :  { %8049 = vst.msk [vmem:[%s10469_s30 + $0x90] sm:$0xff] %vm525_vm5, %v6475_v9  ;;  %8971 = vmatpush3.bf16.msra.mxu0 %v6487_v10  ;;  %v6478_v18 = vpack.c.bf16 %v6475_v9, %v6475_v9 }
0x4704   :  { %8982 = vmatprep.subr.bf16.mxu0 %v9596_v0 }
0x4705   :  { %v6579_v6 = vpop.permute.xlu0 %6578 }
0x4706   :  { %8973 = vmatmul.mubr.msk.bf16.vlgmr.msra.gmra.mrb[172].mxu0 %vm525_vm5, %v6478_v18 }
0x4707   :  { %8984 = vmatprep.mubr.msk.bf16.mxu0 %vm9598_vm0, %v9596_v0 }
0x4708   :  { %v9573_v27 = vpop.eup %9572 }
0x4709   :  { %v6477_v30 = vmul.f32 %v9573_v27, %v9569_v14 }
0x470b   :  { %8050 = vst.msk [vmem:[%s10469_s30 + $0x98] sm:$0xff] %vm525_vm5, %v6477_v30  ;;  %v6479_v36 = vpack.c.bf16 %v6477_v30, %v6477_v30 }
0x470c   :  { %8983 = vmatpush3.bf16.xpose.msra.mxu0 %v6586_v33 }
0x470d   :  { %8979 = vmatmul.mubr.msk.bf16.vlgmr.msra.gmra.mrb[184].mxu1 %vm525_vm5, %v6479_v36  ;;  %8994 = vmatprep.subr.bf16.mxu0 %v9596_v0 }
0x470e   :  { %8989 = vmatpush3.bf16.xpose.msra.mxu1 %v6636_v37  ;;  %8990 = vmatprep.mubr.msk.bf16.mxu1 %vm9598_vm0, %v9596_v0 }
0x470f   :  { %9000 = vmatprep.subr.bf16.mxu1 %v9596_v0 }
0x4713   :  { %8985 = vmatmul.mubr.msk.bf16.vlgmr.msra.gmra.mrb[176].mxu0 %vm429_vm4, %v6579_v6 }
0x4714   :  { %8996 = vmatprep.mubr.msk.bf16.mxu0 %vm9598_vm0, %v9596_v0 }
0x4715   :  { %8991 = vmatmul.mubr.msk.bf16.vlgmr.msra.gmra.mrb[188].mxu1 %vm429_vm4, %v6629_v12 }
0x4716   :  { %9002 = vmatprep.mubr.msk.bf16.mxu1 %vm9598_vm0, %v9596_v0 }
0x47d9   :  { %v11127_v44 = vpop.f32.mrb[172].mxu0 }
0x47da   :  { %v8974_v35 = vpop.f32.mrb[173].mxu0 }
0x47db   :  { %v6526_v47 = vpop.f32.mrb[174].mxu0 }
0x47dc   :  { %v8975_v28 = vpop.f32.mrb[175].mxu0 }
0x47e0   :  { %v11129_v32 = vpop.f32.mrb[184].mxu1 }
0x47e1   :  { %v9218_v50 = vpack.i.bf16 %v11129_v32, %v11127_v44  ;;  %v8980_v52 = vpop.f32.mrb[185].mxu1 }
0x47e2   :  { %v6575_v60 = vpop.f32.mrb[186].mxu1 }
0x47e3   :  { %v8981_v59 = vpop.f32.mrb[187].mxu1 }
0x47e6   :  { %v6622_v61 = vpop.f32.mrb[176].mxu0 }
0x47e7   :  { %v8986_v1 = vpop.f32.mrb[177].mxu0  ;;  %v6678_v2 = vsel %vm525_vm5, %v6622_v61, -inf }
0x47e8   :  { %v6672_v13 = vpop.f32.mrb[188].mxu1  ;;  %6679 = vmax.xlane.f32.xlu0 %v6678_v2  ;;  %v6625_v41 = vpop.f32.mrb[178].mxu0 }
0x47e9   :  { %v8987_v4 = vpop.f32.mrb[179].mxu0  ;;  %v8992_v34 = vpop.f32.mrb[189].mxu1  ;;  %v6681_v5 = vsel %vm525_vm5, %v6672_v13, -inf }
0x47ea   :  { %6682 = vmax.xlane.f32.xlu1 %v6681_v5  ;;  %v6675_v8 = vpop.f32.mrb[190].mxu1 }
0x47eb   :  { %v8993_v29 = vpop.f32.mrb[191].mxu1 }
0x47fb   :  { %6750 = vrot.lane.b32.xlu1 %v11042_v38, %s9610_s8 }
0x47ff   :  { %6800 = vrot.lane.b32.xlu1 %v11021_v51, %s9604_s26 }
0x4803   :  { %6850 = vrot.lane.b32.xlu1 %v11025_v24, %s9604_s26 }
0x4807   :  { %6848 = vrot.lane.b32.xlu1 %v11025_v24, %s9611_s9 }
0x4875   :  { %v6680_v39 = vpop.xlane.xlu0 %6679 }
0x4876   :  { %v6684_v53 = vsub.f32 %v6622_v61, %v6680_v39 }
0x4877   :  { %v6683_v22 = vpop.xlane.xlu1 %6682 }
0x4878   :  { %v6686_v49 = vmul.f32 1.442695, %v6684_v53  ;;  %v6685_v19 = vsub.f32 %v6672_v13, %v6683_v22 }
0x487a   :  { %9574 = vpow2.f32 %v6686_v49  ;;  %v6688_v43 = vmul.f32 1.442695, %v6685_v19 }
0x487b   :  { %v6751_v55 = vpop.permute.xlu1 %6750 }
0x487c   :  { %9576 = vpow2.f32 %v6688_v43  ;;  %v6756_v15 = vsel %vm555_vm3, %v6751_v55, 0 }
0x487d   :  { %9001 = vmatpush3.bf16.msra.mxu1 %v6756_v15 }
0x487e   :  { %9012 = vmatprep.subr.bf16.mxu1 %v9596_v0 }
0x487f   :  { %v6801_v10 = vpop.permute.xlu1 %6800 }
0x4880   :  { %v6806_v31 = vsel %vm429_vm4, %v6801_v10, 0 }
0x4884   :  { %v9575_v3 = vpop.eup %9574 }
0x4885   :  { %v6690_v14 = vsel %vm525_vm5, %v9575_v3, 0.0 }
0x4886   :  { %v9577_v40 = vpop.eup %9576  ;;  %6691 = vadd.xlane.f32.xlu0 %v6690_v14 }
0x4887   :  { %v6693_v24 = vsel %vm525_vm5, %v9577_v40, 0.0 }
0x488a   :  { %6694 = vadd.xlane.f32.xlu0 %v6693_v24 }
0x48a0   :  { %6702 = vrot.lane.b32.xlu0 %v11023_v58, %s9610_s8 }
0x48a4   :  { %6798 = vrot.lane.b32.xlu0 %v11021_v51, %s9611_s9  ;;  %v6851_v51 = vpop.permute.xlu1 %6850 }
0x48a5   :  { %v6856_v36 = vsel %vm429_vm4, %v6851_v51, 0  ;;  %v9369_v51 = vld [vmem:[%s10611_s17 + $0x18] sm:$0xff]  }
0x48a8   :  { %v6849_v6 = vpop.permute.xlu1 %6848 }
0x4913   :  { %v6692_v46 = vpop.xlane.xlu0 %6691 }
0x4914   :  { %9578 = vrcp.f32 %v6692_v46 }
0x4917   :  { %v6695_v21 = vpop.xlane.xlu0 %6694 }
0x4918   :  { %9580 = vrcp.f32 %v6695_v21 }
0x491b   :  { %v6703_v25 = vpop.permute.xlu0 %6702 }
0x491c   :  { %v6708_v9 = vsel %vm555_vm3, %v6703_v25, 0 }
0x491d   :  { %8995 = vmatpush3.bf16.msra.mxu0 %v6708_v9 }
0x491e   :  { %v9579_v20 = vpop.eup %9578  ;;  %9006 = vmatprep.subr.bf16.mxu0 %v9596_v0 }
0x491f   :  { %v6697_v18 = vmul.f32 %v9579_v20, %v9575_v3  ;;  %v6799_v37 = vpop.permute.xlu0 %6798 }
0x4921   :  { %8051 = vst.msk [vmem:[%s10469_s30 + $0xa0] sm:$0xff] %vm525_vm5, %v6697_v18  ;;  %v6700_v26 = vpack.c.bf16 %v6697_v18, %v6697_v18 }
0x4922   :  { %v9581_v27 = vpop.eup %9580 }
0x4923   :  { %v6699_v30 = vmul.f32 %v9581_v27, %v9577_v40  ;;  %8997 = vmatmul.mubr.msk.bf16.vlgmr.msra.gmra.mrb[180].mxu0 %vm525_vm5, %v6700_v26  ;;  %v9366_v26 = vld [vmem:[%s10611_s17] sm:$0xff]   ;;  %v9367_v27 = vld [vmem:[%s10611_s17 + $0x8] sm:$0xff]  }
0x4924   :  { %9008 = vmatprep.mubr.msk.bf16.mxu0 %vm9598_vm0, %v9596_v0 }
0x4925   :  { %8052 = vst.msk [vmem:[%s10469_s30 + $0xa8] sm:$0xff] %vm525_vm5, %v6699_v30  ;;  %v6701_v33 = vpack.c.bf16 %v6699_v30, %v6699_v30  ;;  %v9368_v30 = vld [vmem:[%s10611_s17 + $0x10] sm:$0xff]   ;;  %s11287_s17 = sld [smem:[%s11354_s0 + %s9638_s21]]  }
0x4926   :  { %9007 = vmatpush3.bf16.xpose.msra.mxu0 %v6806_v31 }
0x4927   :  { %9003 = vmatmul.mubr.msk.bf16.vlgmr.msra.gmra.mrb[192].mxu1 %vm525_vm5, %v6701_v33  ;;  %9018 = vmatprep.subr.bf16.mxu0 %v9596_v0 }
0x4928   :  { %9013 = vmatpush3.bf16.xpose.msra.mxu1 %v6856_v36  ;;  %9014 = vmatprep.mubr.msk.bf16.mxu1 %vm9598_vm0, %v9596_v0 }
0x4929   :  { %9024 = vmatprep.subr.bf16.mxu1 %v9596_v0 }
0x492d   :  { %9009 = vmatmul.mubr.msk.bf16.vlgmr.msra.gmra.mrb[184].mxu0 %vm429_vm4, %v6799_v37 }
0x492e   :  { %9020 = vmatprep.mubr.msk.bf16.mxu0 %vm9598_vm0, %v9596_v0 }
0x492f   :  { %9015 = vmatmul.mubr.msk.bf16.vlgmr.msra.gmra.mrb[196].mxu1 %vm429_vm4, %v6849_v6 }
0x4930   :  { %9026 = vmatprep.mubr.msk.bf16.mxu1 %vm9598_vm0, %v9596_v0 }
0x49f6   :  { %v6744_v12 = vpop.f32.mrb[180].mxu0 }
0x49f7   :  { %v8998_v35 = vpop.f32.mrb[181].mxu0 }
0x49f8   :  { %v6747_v47 = vpop.f32.mrb[182].mxu0 }
0x49f9   :  { %v8999_v28 = vpop.f32.mrb[183].mxu0 }
0x49fa   :  { %v6792_v52 = vpop.f32.mrb[192].mxu1 }
0x49fb   :  { %v9223_v60 = vpack.i.bf16 %v6792_v52, %v6744_v12  ;;  %v9004_v59 = vpop.f32.mrb[193].mxu1 }
0x49fc   :  { %v6795_v61 = vpop.f32.mrb[194].mxu1 }
0x49fd   :  { %v9005_v1 = vpop.f32.mrb[195].mxu1 }
0x4a00   :  { %v6842_v2 = vpop.f32.mrb[184].mxu0 }
0x4a01   :  { %v9010_v13 = vpop.f32.mrb[185].mxu0  ;;  %v6898_v41 = vsel %vm525_vm5, %v6842_v2, -inf }
0x4a02   :  { %v6892_v4 = vpop.f32.mrb[196].mxu1  ;;  %6899 = vmax.xlane.f32.xlu0 %v6898_v41  ;;  %v6845_v34 = vpop.f32.mrb[186].mxu0 }
0x4a03   :  { %v9011_v5 = vpop.f32.mrb[187].mxu0  ;;  %v9016_v8 = vpop.f32.mrb[197].mxu1  ;;  %v6901_v29 = vsel %vm525_vm5, %v6892_v4, -inf }
0x4a04   :  { %6902 = vmax.xlane.f32.xlu1 %v6901_v29  ;;  %v6895_v39 = vpop.f32.mrb[198].mxu1 }
0x4a05   :  { %v9017_v53 = vpop.f32.mrb[199].mxu1 }
0x4a15   :  { %6970 = vrot.lane.b32.xlu1 %v11042_v38, %s9611_s9 }
0x4a19   :  { %9219 = vrot.lane.b32.xlu1 %v9218_v50, %s9604_s26  ;;  %s9637_s26 = smov 37  }
0x4a1a   :  { %s7764_s8 = sld [smem:[%s11354_s0 + %s9637_s26]]  }
0x4a1d   :  { %9224 = vrot.lane.b32.xlu1 %v9223_v60, %s9609_s7  ;;  %s9639_s7 = smov 38  }
0x4a8f   :  { %v6900_v22 = vpop.xlane.xlu0 %6899 }
0x4a90   :  { %v6904_v49 = vsub.f32 %v6842_v2, %v6900_v22 }
0x4a91   :  { %v6903_v19 = vpop.xlane.xlu1 %6902 }
0x4a92   :  { %v6906_v43 = vmul.f32 1.442695, %v6904_v49  ;;  %v6905_v55 = vsub.f32 %v6892_v4, %v6903_v19 }
0x4a94   :  { %9582 = vpow2.f32 %v6906_v43  ;;  %v6908_v15 = vmul.f32 1.442695, %v6905_v55 }
0x4a95   :  { %v6971_v3 = vpop.permute.xlu1 %6970 }
0x4a96   :  { %9584 = vpow2.f32 %v6908_v15  ;;  %v6976_v14 = vsel %vm555_vm3, %v6971_v3, 0 }
0x4a97   :  { %9025 = vmatpush3.bf16.msra.mxu1 %v6976_v14 }
0x4a98   :  { %9042 = vmatprep.subr.bf16.mxu1 %v9596_v0 }
0x4a99   :  { %v9220_v52 = vpop.permute.xlu1 %9219 }
0x4a9a   :  { %v9222_v59 = vunpack.i.h.bf16 %v9220_v52  ;;  %v9221_v61 = vunpack.i.l.bf16 %v9220_v52 }
0x4a9c   :  { %v7043_v41 = vsel %vm429_vm4, %v11085_v16, %v9222_v59  ;;  %v7042_v4 = vsel %vm429_vm4, %v11083_v7, %v9221_v61  ;;  %v8024_v16 = vld [vmem:[%s10636_s1] ss:$0 sm:$0xff] }
0x4a9d   :  { %v9225_v60 = vpop.permute.xlu1 %9224  ;;  %v8030_v61 = vld [vmem:[%s10685_s20] ss:$0 sm:$0xff] }
0x4a9e   :  { %v9583_v38 = vpop.eup %9582  ;;  %v9227_v1 = vunpack.i.h.bf16 %v9225_v60  ;;  %v9226_v2 = vunpack.i.l.bf16 %v9225_v60 }
0x4a9f   :  { %v6910_v44 = vsel %vm525_vm5, %v9583_v38, 0.0 }
0x4aa0   :  { %v9585_v32 = vpop.eup %9584  ;;  %6911 = vadd.xlane.f32.xlu0 %v6910_v44  ;;  %v7045_v8 = vsel %vm1333_vm6, %v7043_v41, %v9227_v1  ;;  %v7044_v29 = vsel %vm1333_vm6, %v7042_v4, %v9226_v2  ;;  %v8031_v41 = vld [vmem:[%s10690_s28] ss:$0 sm:$0xff] }
0x4aa1   :  { %v6913_v50 = vsel %vm525_vm5, %v9585_v32, 0.0 }
0x4aa4   :  { %6914 = vadd.xlane.f32.xlu0 %v6913_v50 }
0x4aba   :  { %6922 = vrot.lane.b32.xlu0 %v11023_v58, %s9611_s9 }
0x4b2d   :  { %v6912_v40 = vpop.xlane.xlu0 %6911 }
0x4b2e   :  { %9586 = vrcp.f32 %v6912_v40 }
0x4b31   :  { %v6915_v24 = vpop.xlane.xlu0 %6914 }
0x4b32   :  { %9588 = vrcp.f32 %v6915_v24 }
0x4b35   :  { %v6923_v46 = vpop.permute.xlu0 %6922 }
0x4b36   :  { %v6928_v21 = vsel %vm555_vm3, %v6923_v46, 0 }
0x4b37   :  { %9019 = vmatpush3.bf16.msra.mxu0 %v6928_v21 }
0x4b38   :  { %v9587_v25 = vpop.eup %9586  ;;  %9030 = vmatprep.subr.bf16.mxu0 %v9596_v0 }
0x4b39   :  { %v6917_v9 = vmul.f32 %v9587_v25, %v9583_v38 }
0x4b3b   :  { %8053 = vst.msk [vmem:[%s10469_s30 + $0xb0] sm:$0xff] %vm525_vm5, %v6917_v9  ;;  %v6920_v20 = vpack.c.bf16 %v6917_v9, %v6917_v9 }
0x4b3c   :  { %v9589_v58 = vpop.eup %9588 }
0x4b3d   :  { %v6919_v10 = vmul.f32 %v9589_v58, %v9585_v32  ;;  %9021 = vmatmul.mubr.msk.bf16.vlgmr.msra.gmra.mrb[188].mxu0 %vm525_vm5, %v6920_v20 }
0x4b3e   :  { %9038 = vmatprep.mubr.msk.bf16.mxu0 %vm9598_vm0, %v9596_v0  ;;  %9031 = vmatpush3.bf16.msra.mxu0 %v9366_v26  ;;  %v9370_v26 = vld [vmem:[%s10656_s15] sm:$0xff]  }
0x4b3f   :  { %8054 = vst.msk [vmem:[%s10469_s30 + $0xb8] sm:$0xff] %vm525_vm5, %v6919_v10  ;;  %v6921_v18 = vpack.c.bf16 %v6919_v10, %v6919_v10  ;;  %9032 = vmatprep.subr.bf16.mxu0 %v9596_v0 }
0x4b41   :  { %9027 = vmatmul.mubr.msk.bf16.vlgmr.msra.gmra.mrb[200].mxu1 %vm525_vm5, %v6921_v18 }
0x4b42   :  { %9050 = vmatprep.mubr.msk.bf16.mxu1 %vm9598_vm0, %v9596_v0  ;;  %9033 = vmatpush3.bf16.msra.mxu0 %v9367_v27  ;;  %v9372_v27 = vld [vmem:[%s10656_s15 + $0x10] sm:$0xff]  }
0x4b43   :  { %9034 = vmatprep.subr.bf16.mxu0 %v9596_v0  ;;  %9043 = vmatpush3.bf16.msra.mxu1 %v9370_v26 }
0x4b44   :  { %9044 = vmatprep.subr.bf16.mxu1 %v9596_v0 }
0x4b46   :  { %9035 = vmatpush3.bf16.msra.mxu0 %v9368_v30  ;;  %v9374_v30 = vld [vmem:[%s10668_s18] sm:$0xff]  }
0x4b47   :  { %9036 = vmatprep.subr.bf16.mxu0 %v9596_v0 }
0x4b4a   :  { %9037 = vmatpush3.bf16.msra.mxu0 %v9369_v51  ;;  %v9375_v51 = vld [vmem:[%s10668_s18 + $0x8] sm:$0xff]  }
0x4b4b   :  { %9054 = vmatprep.subr.bf16.mxu0 %v9596_v0 }
0x4c10   :  { %v6964_v31 = vpop.f32.mrb[188].mxu0 }
0x4c11   :  { %v9022_v33 = vpop.f32.mrb[189].mxu0 }
0x4c12   :  { %v6967_v36 = vpop.f32.mrb[190].mxu0  ;;  %v9377_v33 = vld [vmem:[%s10668_s18 + $0x18] sm:$0xff]  }
0x4c13   :  { %v9023_v37 = vpop.f32.mrb[191].mxu0  ;;  %v9378_v36 = vld [vmem:[%s10668_s18 + $0x20] sm:$0xff]  }
0x4c14   :  { %v7012_v6 = vpop.f32.mrb[200].mxu1  ;;  %v9379_v37 = vld [vmem:[%s10668_s18 + $0x28] sm:$0xff]  }
0x4c15   :  { %v9228_v12 = vpack.i.bf16 %v7012_v6, %v6964_v31  ;;  %v9028_v35 = vpop.f32.mrb[201].mxu1  ;;  %v9376_v31 = vld [vmem:[%s10668_s18 + $0x10] sm:$0xff]  }
0x4c16   :  { %v7015_v47 = vpop.f32.mrb[202].mxu1 }
0x4c17   :  { %v9029_v28 = vpop.f32.mrb[203].mxu1  ;;  %9229 = vrot.lane.b32.xlu0 %v9228_v12, %s9607_s5  ;;  %s7763_s5 = sld [smem:[%s11354_s0 + %s9643_s23]]  }
0x4c89   :  { %v9230_v13 = vpop.permute.xlu0 %9229 }
0x4c8a   :  { %v9232_v34 = vunpack.i.h.bf16 %v9230_v13  ;;  %v9231_v5 = vunpack.i.l.bf16 %v9230_v13 }
0x4c8c   :  { %v7047_v39 = vsel %vm1336_vm7, %v7045_v8, %v9232_v34  ;;  %v7046_v53 = vsel %vm1336_vm7, %v7044_v29, %v9231_v5  ;;  %v9380_v29 = vld [vmem:[%s10668_s18 + $0x30] sm:$0xff]  }
0x4c8d   :  { %v7048_v22 = vpack.c.bf16 %v7047_v39, %v7046_v53  ;;  %v9381_v39 = vld [vmem:[%s10668_s18 + $0x38] sm:$0xff]   ;;  %v8032_v53 = vld [vmem:[%s10703_s25] ss:$0 sm:$0xff]  ;;  %s11294_s18 = sld [smem:[%s11354_s0 + %s9639_s7]]  }
0x4c8f   :  { %9039 = vmatmul.mubr.msk.bf16.vlgmr.msra.gmra.mrb[192].mxu0 %vm273_vm2, %v7048_v22 }
0x4c90   :  { %9070 = vmatprep.mubr.msk.bf16.mxu0 %vm9598_vm0, %v9596_v0  ;;  %9055 = vmatpush3.bf16.msra.mxu0 %v9374_v30 }
0x4c91   :  { %9056 = vmatprep.subr.bf16.mxu0 %v9596_v0 }
0x4c94   :  { %9057 = vmatpush3.bf16.msra.mxu0 %v9375_v51 }
0x4c95   :  { %9058 = vmatprep.subr.bf16.mxu0 %v9596_v0 }
0x4c98   :  { %9059 = vmatpush3.bf16.msra.mxu0 %v9376_v31 }
0x4c99   :  { %9060 = vmatprep.subr.bf16.mxu0 %v9596_v0 }
0x4c9c   :  { %9061 = vmatpush3.bf16.msra.mxu0 %v9377_v33 }
0x4c9d   :  { %9062 = vmatprep.subr.bf16.mxu0 %v9596_v0 }
0x4ca0   :  { %9063 = vmatpush3.bf16.msra.mxu0 %v9378_v36 }
0x4ca1   :  { %9064 = vmatprep.subr.bf16.mxu0 %v9596_v0 }
0x4ca4   :  { %9065 = vmatpush3.bf16.msra.mxu0 %v9379_v37 }
0x4ca5   :  { %9066 = vmatprep.subr.bf16.mxu0 %v9596_v0 }
0x4ca8   :  { %9067 = vmatpush3.bf16.msra.mxu0 %v9380_v29 }
0x4ca9   :  { %9068 = vmatprep.subr.bf16.mxu0 %v9596_v0 }
0x4cac   :  { %9069 = vmatpush3.bf16.msra.mxu0 %v9381_v39  ;;  %v9392_v39 = vld [vmem:[%s7761_s11 + $0x10] sm:$0xff]  }
0x4cad   :  { %9098 = vmatprep.subr.bf16.mxu0 %v9596_v0 }
0x4d62   :  { %v7125_v49 = vpop.f32.mrb[192].mxu0 }
0x4d63   :  { %v7126_v19 = vadd.f32 %v8024_v16, %v7125_v49  ;;  %v9040_v7 = vpop.f32.mrb[193].mxu0 }
0x4d64   :  { %v7128_v43 = vpop.f32.mrb[194].mxu0 }
0x4d65   :  { %v11222_v55 = vadd.f32 %v7126_v19, %v10991_v57  ;;  %v7129_v15 = vadd.f32 %v8024_v16, %v7128_v43  ;;  %v9041_v3 = vpop.f32.mrb[195].mxu0 }
0x4d67   :  { %v11225_v14 = vadd.f32 %v7129_v15, %v10994_v63  ;;  %v7136_v38 = vsel %vm273_vm2, %v11222_v55, 0.0 }
0x4d68   :  { %7137 = vadd.xlane.f32.xlu1 %v7136_v38 }
0x4d69   :  { %v7139_v44 = vsel %vm273_vm2, %v11225_v14, 0.0 }
0x4d6a   :  { %7140 = vadd.xlane.f32.xlu0 %v7139_v44  ;;  %v9382_v44 = vld [vmem:[%s7759_s10] sm:$0xff]  }
0x4d79   :  { %3085 = vrot.lane.b32.xlu1 %v10381_v42, %s9606_s4 }
0x4d7d   :  { %3087 = vrot.lane.b32.xlu1 %v10386_v45, %s9606_s4 }
0x4df5   :  { %v7138_v32 = vpop.xlane.xlu1 %7137 }
0x4df6   :  { %v7142_v50 = vmul.f32 0.015625, %v7138_v32  ;;  %v9383_v32 = vld [vmem:[%s7759_s10 + $0x8] sm:$0xff]  }
0x4df7   :  { %v7141_v40 = vpop.xlane.xlu0 %7140 }
0x4df8   :  { %v7144_v24 = vsub.f32 %v11222_v55, %v7142_v50  ;;  %v7143_v46 = vmul.f32 0.015625, %v7141_v40  ;;  %v9384_v50 = vld [vmem:[%s7759_s10 + $0x10] sm:$0xff]   ;;  %v9385_v40 = vld [vmem:[%s7759_s10 + $0x18] sm:$0xff]  }
0x4df9   :  { %v3086_v21 = vpop.permute.xlu1 %3085 }
0x4dfa   :  { %v7145_v25 = vsub.f32 %v11225_v14, %v7143_v46  ;;  %v3091_v42 = vsel %vm273_vm2, %v10036_v17, %v3086_v21  ;;  %v7146_v45 = vmul.f32 %v7144_v24, %v7144_v24  ;;  %v9371_v17 = vld [vmem:[%s10656_s15 + $0x8] sm:$0xff]  }
0x4dfb   :  { %3093 = vst [vmem:[%s7764_s8] sm:$0xff] %v3091_v42  ;;  %9045 = vmatpush3.bf16.msra.mxu1 %v9371_v17 }
0x4dfc   :  { %v7148_v9 = vsel %vm273_vm2, %v7146_v45, 0.0  ;;  %v7147_v20 = vmul.f32 %v7145_v25, %v7145_v25  ;;  %9046 = vmatprep.subr.bf16.mxu1 %v9596_v0 }
0x4dfd   :  { %v3088_v58 = vpop.permute.xlu1 %3087  ;;  %7149 = vadd.xlane.f32.xlu0 %v7148_v9 }
0x4dfe   :  { %v3092_v10 = vsel %vm273_vm2, %v10039_v23, %v3088_v58  ;;  %v7151_v18 = vsel %vm273_vm2, %v7147_v20, 0.0  ;;  %v9373_v23 = vld [vmem:[%s10656_s15 + $0x18] sm:$0xff]  }
0x4dff   :  { %3094 = vst [vmem:[%s7764_s8 + $0x8] sm:$0xff] %v3092_v10  ;;  %9047 = vmatpush3.bf16.msra.mxu1 %v9372_v27 }
0x4e00   :  { %9048 = vmatprep.subr.bf16.mxu1 %v9596_v0 }
0x4e01   :  { %7152 = vadd.xlane.f32.xlu0 %v7151_v18 }
0x4e03   :  { %9049 = vmatpush3.bf16.msra.mxu1 %v9373_v23 }
0x4e04   :  { %9074 = vmatprep.subr.bf16.mxu1 %v9596_v0 }
0x4e8a   :  { %v7150_v6 = vpop.xlane.xlu0 %7149 }
0x4e8b   :  { %v7154_v12 = vmul.f32 0.015625, %v7150_v6 }
0x4e8d   :  { %v7156_v35 = vadd.f32 1e-05, %v7154_v12 }
0x4e8e   :  { %v7153_v47 = vpop.xlane.xlu0 %7152 }
0x4e8f   :  { %9590 = vrsqrt.f32 %v7156_v35  ;;  %v7155_v28 = vmul.f32 0.015625, %v7153_v47 }
0x4e91   :  { %v7157_v52 = vadd.f32 1e-05, %v7155_v28 }
0x4e93   :  { %9592 = vrsqrt.f32 %v7157_v52 }
0x4e99   :  { %v9591_v60 = vpop.eup %9590 }
0x4e9a   :  { %v7160_v59 = vmul.f32 %v9591_v60, %v7144_v24  ;;  %v8038_v24 = vld [vmem:[%s10711_s19] ss:$0 sm:$0xff] }
0x4e9c   :  { %v7168_v2 = vmul.f32 %v8030_v61, %v7160_v59 }
0x4e9d   :  { %v9593_v1 = vpop.eup %9592 }
0x4e9e   :  { %v7161_v13 = vmul.f32 %v9593_v1, %v7145_v25  ;;  %v7176_v34 = vadd.f32 %v8031_v41, %v7168_v2  ;;  %v9387_v2 = vld [vmem:[%s11287_s17 + $0x8] sm:$0xff]  }
0x4ea0   :  { %v7169_v4 = vmul.f32 %v8030_v61, %v7161_v13  ;;  %v9386_v61 = vld [vmem:[%s11287_s17] sm:$0xff]   ;;  %v7422_v13 = vpack.c.bf16 %v10392_v11, %v10392_v11  ;;  %v9391_v11 = vld [vmem:[%s7761_s11 + $0x8] sm:$0xff]  }
0x4ea2   :  { %v7177_v5 = vadd.f32 %v8031_v41, %v7169_v4  ;;  %v7421_v41 = vpack.c.bf16 %v10390_v56, %v10390_v56  ;;  %v9388_v4 = vld [vmem:[%s11287_s17 + $0x10] sm:$0xff]   ;;  %v9390_v56 = vld [vmem:[%s7761_s11] sm:$0xff]  }
0x4ea4   :  { %v7178_v8 = vpack.c.bf16 %v7177_v5, %v7176_v34  ;;  %v7517_v34 = vunpack.c.l.b16 %v7421_v41  ;;  %v9389_v5 = vld [vmem:[%s11287_s17 + $0x18] sm:$0xff]  }
0x4ea6   :  { %9051 = vmatmul.mubr.msk.bf16.vlgmr.msra.gmra.mrb[204].mxu1 %vm273_vm2, %v7178_v8 }
0x4ea7   :  { %9082 = vmatprep.mubr.msk.bf16.mxu1 %vm9598_vm0, %v9596_v0  ;;  %9075 = vmatpush3.bf16.msra.mxu1 %v9382_v44 }
0x4ea8   :  { %9076 = vmatprep.subr.bf16.mxu1 %v9596_v0 }
0x4eab   :  { %9077 = vmatpush3.bf16.msra.mxu1 %v9383_v32 }
0x4eac   :  { %9078 = vmatprep.subr.bf16.mxu1 %v9596_v0 }
0x4eaf   :  { %9079 = vmatpush3.bf16.msra.mxu1 %v9384_v50 }
0x4eb0   :  { %9080 = vmatprep.subr.bf16.mxu1 %v9596_v0 }
0x4eb3   :  { %9081 = vmatpush3.bf16.msra.mxu1 %v9385_v40 }
0x4eb4   :  { %9086 = vmatprep.subr.bf16.mxu1 %v9596_v0 }
0x4f79   :  { %v7255_v22 = vpop.f32.mrb[204].mxu1 }
0x4f7a   :  { %v7256_v16 = vadd.f32 %v8032_v53, %v7255_v22  ;;  %v9052_v49 = vpop.f32.mrb[205].mxu1 }
0x4f7b   :  { %v7258_v19 = vpop.f32.mrb[206].mxu1 }
0x4f7c   :  { %v7259_v7 = vadd.f32 %v8032_v53, %v7258_v19  ;;  %v9053_v43 = vpop.f32.mrb[207].mxu1  ;;  %v7262_v15 = vmax.f32 %v7256_v16, 0.0  ;;  %v9393_v53 = vld [vmem:[%s7761_s11 + $0x18] sm:$0xff]  }
0x4f7e   :  { %v7263_v3 = vmax.f32 %v7259_v7, 0.0 }
0x4f80   :  { %v7264_v38 = vpack.c.bf16 %v7263_v3, %v7262_v15 }
0x4f82   :  { %9071 = vmatmul.mubr.bf16.vlgmr.msra.gmra.mrb[196].mxu0 %v7264_v38  ;;  %v8065_v38 = vld [vmem:[%s7760_s12] ss:$0 sm:$0xff] }
0x4f83   :  { %9106 = vmatprep.mubr.msk.bf16.mxu0 %vm9598_vm0, %v9596_v0  ;;  %9099 = vmatpush3.bf16.msra.mxu0 %v9390_v56 }
0x4f84   :  { %9100 = vmatprep.subr.bf16.mxu0 %v9596_v0 }
0x4f87   :  { %9101 = vmatpush3.bf16.msra.mxu0 %v9391_v11 }
0x4f88   :  { %9102 = vmatprep.subr.bf16.mxu0 %v9596_v0 }
0x4f8b   :  { %9103 = vmatpush3.bf16.msra.mxu0 %v9392_v39 }
0x4f8c   :  { %9104 = vmatprep.subr.bf16.mxu0 %v9596_v0 }
0x4f8f   :  { %9105 = vmatpush3.bf16.msra.mxu0 %v9393_v53 }
0x5055   :  { %v7370_v46 = vpop.f32.mrb[196].mxu0 }
0x5056   :  { %v7371_v21 = vadd.f32 %v8038_v24, %v7370_v46  ;;  %v9072_v25 = vpop.f32.mrb[197].mxu0 }
0x5057   :  { %v7373_v42 = vpop.f32.mrb[198].mxu0 }
0x5058   :  { %v7377_v45 = vadd.f32 %v7371_v21, %v11222_v55  ;;  %v7374_v9 = vadd.f32 %v8038_v24, %v7373_v42  ;;  %v9073_v20 = vpop.f32.mrb[199].mxu0 }
0x505a   :  { %7402 = vst.msk [vmem:[%s11294_s18 + $0x8] sm:$0xff] %vm273_vm2, %v7377_v45  ;;  %v7405_v58 = vsel %vm273_vm2, %v7377_v45, 0.0  ;;  %v7378_v10 = vadd.f32 %v7374_v9, %v11225_v14 }
0x505b   :  { %v7406_v18 = vrot.slane %v7405_v58, 4 }
0x505c   :  { %7404 = vst.msk [vmem:[%s11294_s18 + $0x18] sm:$0xff] %vm273_vm2, %v7378_v10  ;;  %v7412_v26 = vsel %vm273_vm2, %v7378_v10, 0.0 }
0x505d   :  { %v7407_v17 = vadd.f32 %v7406_v18, %v7405_v58  ;;  %v7413_v27 = vrot.slane %v7412_v26, 4 }
0x505f   :  { %v7408_v23 = vrot.slane %v7407_v17, 2  ;;  %v7414_v30 = vadd.f32 %v7413_v27, %v7412_v26 }
0x5061   :  { %v7409_v51 = vadd.f32 %v7408_v23, %v7407_v17  ;;  %v7415_v55 = vrot.slane %v7414_v30, 2 }
0x5063   :  { %v7410_v31 = vrot.slane %v7409_v51, 1  ;;  %v7416_v33 = vadd.f32 %v7415_v55, %v7414_v30 }
0x5065   :  { %v7417_v36 = vrot.slane %v7416_v33, 1  ;;  %v7411_v37 = vadd.f32 %v7410_v31, %v7409_v51 }
0x5067   :  { %v7418_v6 = vadd.f32 %v7417_v36, %v7416_v33  ;;  %v7419_v12 = vmul.f32 0.125, %v7411_v37 }
0x5069   :  { %v7420_v14 = vmul.f32 0.125, %v7418_v6  ;;  %v7431_v35 = vpack.c.bf16 %v7419_v12, %v7419_v12 }
0x506b   :  { %v7686_v47 = vsel %vm7445_vm8, %v7420_v14, %v7419_v12  ;;  %v7432_v28 = vpack.c.bf16 %v7420_v14, %v7420_v14  ;;  %v7443_v52 = vunpack.c.l.b16 %v7431_v35 }
0x506c   :  { %7687 = vrot.lane.b32.xlu1 %v7686_v47, %s9606_s4 }
0x506d   :  { %v7444_v60 = vunpack.c.l.b16 %v7432_v28 }
0x506f   :  { %v7446_v59 = vsel %vm7445_vm8, %v7444_v60, %v7443_v52 }
0x5070   :  { %v7447_v1 = vpack.c.b16 %v7446_v59, %v7446_v59  ;;  %7393 = vrot.lane.b32.xlu1 %v10991_v57, %s9606_s4  ;;  %v7518_v57 = vunpack.c.l.b16 %v7422_v13 }
0x5072   :  { %9083 = vmatmul.mubr.msk.bf16.vlgmr.msra.gmra.mrb[208].mxu1 %vm273_vm2, %v7447_v1  ;;  %v7519_v8 = vsel %vm7445_vm8, %v7518_v57, %v7517_v34 }
0x5073   :  { %9087 = vmatpush3.bf16.msra.mxu1 %v9386_v61  ;;  %9094 = vmatprep.mubr.msk.bf16.mxu1 %vm9598_vm0, %v9596_v0  ;;  %v7520_v29 = vpack.c.b16 %v7519_v8, %v7519_v8 }
0x5074   :  { %9088 = vmatprep.subr.bf16.mxu1 %v9596_v0 }
0x5077   :  { %9089 = vmatpush3.bf16.msra.mxu1 %v9387_v2 }
0x5078   :  { %9090 = vmatprep.subr.bf16.mxu1 %v9596_v0 }
0x507b   :  { %9091 = vmatpush3.bf16.msra.mxu1 %v9388_v4 }
0x507c   :  { %9092 = vmatprep.subr.bf16.mxu1 %v9596_v0 }
0x507f   :  { %9093 = vmatpush3.bf16.msra.mxu1 %v9389_v5 }
0x5082   :  { %9095 = vmatmul.mubr.msk.bf16.vlgmr.msra.gmra.mrb[212].mxu1 %vm273_vm2, %v7520_v29 }
0x50de   :  { %v7688_v22 = vpop.permute.xlu1 %7687 }
0x50df   :  { %v7694_v16 = vsel %vm273_vm2, %v10397_v62, %v7688_v22 }
0x50e2   :  { %v7394_v49 = vpop.permute.xlu1 %7393 }
0x50e3   :  { %v7399_v19 = vsel %vm273_vm2, %v10715_v54, %v7394_v49  ;;  %v8066_v54 = vld [vmem:[%s7762_s3] ss:$0 sm:$0xff] }
0x50e4   :  { %7401 = vst [vmem:[%s11294_s18] sm:$0xff] %v7399_v19 }
0x5145   :  { %v7509_v7 = vpop.f32.mrb[208].mxu1 }
0x5146   :  { %v9084_v43 = vpop.f32.mrb[209].mxu1 }
0x5147   :  { %v7512_v15 = vpop.f32.mrb[210].mxu1 }
0x5148   :  { %v9085_v3 = vpop.f32.mrb[211].mxu1 }
0x5155   :  { %v7582_v0 = vpop.f32.mrb[212].mxu1 }
0x5156   :  { %v7583_v44 = vadd.f32 %v7582_v0, %v7509_v7  ;;  %v9096_v32 = vpop.f32.mrb[213].mxu1 }
0x5157   :  { %v7585_v50 = vpop.f32.mrb[214].mxu1 }
0x5158   :  { %v7595_v62 = vadd.f32 %v8065_v38, %v7583_v44  ;;  %v9097_v40 = vpop.f32.mrb[215].mxu1 }
0x515a   :  { %v7596_v24 = vmax.f32 %v7595_v62, 0.0 }
0x515c   :  { %v7597_v46 = vpack.c.bf16 %v7596_v24, %v7596_v24 }
0x515e   :  { %9107 = vmatmul.mubr.msk.bf16.vlgmr.msra.gmra.mrb[200].mxu0 %vm273_vm2, %v7597_v46 }
0x5231   :  { %v7674_v21 = vpop.f32.mrb[200].mxu0 }
0x5232   :  { %v7675_v25 = vadd.f32 %v8066_v54, %v7674_v21  ;;  %v9108_v42 = vpop.f32.mrb[201].mxu0 }
0x5233   :  { %v7677_v45 = vpop.f32.mrb[202].mxu0 }
0x5234   :  { %7691 = vrot.lane.b32.xlu0 %v7675_v25, %s9606_s4  ;;  %v9109_v9 = vpop.f32.mrb[203].mxu0 }
0x5238   :  { %7395 = vrot.lane.b32.xlu0 %v10994_v63, %s9606_s4 }
0x52a6   :  { %v7692_v20 = vpop.permute.xlu0 %7691 }
0x52a7   :  { %v7695_v58 = vsel %vm273_vm2, %v7596_v24, %v7692_v20 }
0x52a8   :  { %v7698_v10 = vcombine.low %v7694_v16, %v7695_v58 }
0x52aa   :  { %8072 = vst.sshfl [vmem:[%s7763_s5] sm:$0x33 pattern:$0x76325410] %v7698_v10  ;;  %v7396_v18 = vpop.permute.xlu0 %7395 }
0x52ab   :  { %v7400_v26 = vsel %vm273_vm2, %v10718_v48, %v7396_v18 }
0x52ac   :  { %7403 = vst [vmem:[%s11294_s18 + $0x10] sm:$0xff] %v7400_v26 }

</bundles_post_ra>
